<compile_context>
chip_gen: v5e
topology: v5e:2x2
jax: 0.10.0
libtpu: 0.0.40
codegen_flags: <defaults>
</compile_context>

<pallas_src>
import jax
import jax.numpy as jnp
from jax import lax
from jax.experimental import pallas as pl
from jax.experimental.pallas import tpu as pltpu

LANES = 128
ROW_ALIGN = 16          # bf16 sublane pack (16, 128)


def _round_up(x, m):
    return (x + m - 1) // m * m


def _vmem_capacity_bytes():
    try:
        info = pltpu.get_tpu_info()
        cap = getattr(info, "vmem_capacity_bytes", None)
        if cap:
            return int(cap)
    except Exception:
        pass
    return 64 * 1024 * 1024          # safe default (v7x-sized VMEM)


def _pick_depth_tile(N, D, fits, min_steps=4):
    """Largest divisor of D whose per-step working set fits the VMEM budget while
    keeping enough grid steps (>= min_steps) to feed both TensorCores."""
    best = 1
    for t in range(1, D + 1):
        if D % t:
            continue
        if not fits(t):
            continue
        if t == 1 or N * (D // t) >= min_steps:
            best = max(best, t)
    return best


def _make_bottleneck_kernel(*, TD, WPp, ROWS_OUT, HALO, R2, Pp):
    """Fused conv1+bn1+relu -> conv2(3x3x3) as 27 shifted GEMM taps +bn2+relu
    -> conv3+bn3 + identity residual + relu, for one (batch, depth-slab) step."""
    NTAP = TD + 2

    def kernel(x_lo_ref, x_c_ref, x_hi_ref, mask_ref,
               w1_ref, s1_ref, b1_ref, w2_ref, s2_ref, b2_ref,
               w3_ref, s3_ref, b3_ref, o_ref, out1_ref):
        db = pl.program_id(1)
        n_db = pl.num_programs(1)

        # hoisted once per step (JAX does not CSE broadcast_in_dim)
        maskb = jnp.broadcast_to(mask_ref[...], (R2, Pp))

        def conv1_bn_relu(xs, valid=None):
            y = jnp.dot(xs, w1_ref[...], preferred_element_type=jnp.float32)
            y = jnp.maximum(y * s1_ref[...] + b1_ref[...], 0.0) * maskb
            if valid is not None:
                y = y * valid
            return y.astype(jnp.bfloat16)

        # conv1 on the two depth-halo slices (zeroed when they fall outside [0, D))
        out1_ref[0] = conv1_bn_relu(x_lo_ref[0, 0], (db > 0).astype(jnp.float32))
        out1_ref[NTAP - 1] = conv1_bn_relu(x_hi_ref[0, 0],
                                           (db + 1 < n_db).astype(jnp.float32))

        # conv1 on the TD interior slices of the slab -> bf16 VMEM scratch
        def c1_body(i, carry):
            out1_ref[i + 1] = conv1_bn_relu(x_c_ref[0, i])
            return carry
        lax.fori_loop(0, TD, c1_body, 0)

        # per output depth slice: conv2 as 27 shifted GEMM taps (f32 acc in vregs),
        # then bn2/relu, conv3, bn3, residual add, relu.
        def t_body(t, carry):
            acc = jnp.zeros((ROWS_OUT, Pp), jnp.float32)
            for kd in range(3):
                for kh in range(3):
                    for kw in range(3):
                        start = HALO + (kh - 1) * WPp + (kw - 1)        # static, >= 0
                        tap = out1_ref[t + kd, pl.ds(start, ROWS_OUT), :]
                        acc = acc + jnp.dot(tap, w2_ref[kd * 9 + kh * 3 + kw],
                                            preferred_element_type=jnp.float32)
            out2 = jnp.maximum(acc * s2_ref[...] + b2_ref[...], 0.0).astype(jnp.bfloat16)
            y3 = jnp.dot(out2, w3_ref[...], preferred_element_type=jnp.float32)
            res = x_c_ref[0, t, pl.ds(HALO, ROWS_OUT), :].astype(jnp.float32)
            o_ref[0, t] = jnp.maximum(y3 * s3_ref[...] + b3_ref[...] + res,
                                      0.0).astype(o_ref.dtype)
            return carry
        lax.fori_loop(0, TD, t_body, 0)

    return kernel


def bottleneck_pallas(x_ncdhw, params, stride=1):
    """Forward pass of the 3D ResNet Bottleneck block (inference BN, identity residual)."""
    if stride != 1:
        # TODO(synk): stride>1 and a caller-supplied `downsample` module are not implemented.
        raise NotImplementedError("bottleneck_pallas: only stride=1 / identity residual")

    w1, w2, w3 = params["w1"], params["w2"], params["w3"]
    Cin, planes = w1.shape
    C4 = w3.shape[1]

    x = jnp.transpose(x_ncdhw, (0, 2, 3, 4, 1)).astype(jnp.float32)     # NCDHW -> NDHWC
    N, D, H, W, Cx = x.shape
    assert Cx == Cin == C4, "identity residual requires in_planes == planes * expansion"

    # channel padding to lane multiples (lane-dense GEMM operands / stores)
    # TODO(synk): for planes < 128 the conv2 contraction is zero-padded; packing two taps
    # per 128-lane K block would avoid the wasted MACs on small-channel layers.
    Cp, Pp, C4p = _round_up(Cin, LANES), _round_up(planes, LANES), _round_up(C4, LANES)

    # spatial layout: pad W+2 to a bf16-sublane-pack multiple so kh/centre tap shifts
    # and the residual slice start on pack boundaries
    HP = H + 2
    WPp = _round_up(W + 2, ROW_ALIGN)
    HALO = _round_up(WPp + 1, ROW_ALIGN)           # >= worst-case row shift of a 3x3 tap
    ROWS_OUT = _round_up(HP * WPp, ROW_ALIGN)      # rows computed per depth slice
    R2 = ROWS_OUT + 2 * HALO                       # rows loaded per depth slice

    # --- VMEM budget -> depth-slab size TD (generation-aware) ---
    def step_bytes(td):
        b = 2 * td * R2 * Cp * 2                     # centre input slab (bf16, double-buffered)
        b += 2 * 2 * R2 * Cp * 2                     # two depth-halo slices
        b += 2 * td * ROWS_OUT * C4p * 2             # output block (bf16, double-buffered)
        b += (Cp * Pp + 27 * Pp * Pp + Pp * C4p) * 2  # single-buffered bf16 weights
        b += R2 * 4 + 6 * max(Pp, C4p) * 4           # mask + folded-BN vectors
        b += (td + 2) * R2 * Pp * 2                  # bf16 conv1 scratch
        return b

    vmem_cap = _vmem_capacity_bytes()
    budget = min(int(vmem_cap * 0.5), 100 * 1024 * 1024)
    TD = _pick_depth_tile(N, D, lambda td: step_bytes(td) <= budget)
    NTAP = TD + 2
    vmem_limit = int(min(vmem_cap * 0.9,
                         max(32 * 1024 * 1024, step_bytes(TD) * 1.3 + 4 * 1024 * 1024)))

    # --- activations: channel pad -> spatial halo pad (W padded to WPp) -> flatten -> bf16 ---
    xc = jnp.pad(x, ((0, 0),) * 4 + ((0, Cp - Cin),))
    xp = jnp.pad(xc, ((0, 0), (0, 0), (1, 1), (1, 1 + WPp - (W + 2)), (0, 0)))
    xf = xp.reshape(N, D, HP * WPp, Cp)
    xf = jnp.pad(xf, ((0, 0), (0, 0), (HALO, R2 - HP * WPp - HALO), (0, 0)))
    xf = xf.astype(jnp.bfloat16)                                         # (N, D, R2, Cp)
    # TODO(synk): the residual is taken from this bf16 stream (skip connection is bf16-
    # quantized); carry a separate f32 centre-slice stream if tighter fidelity is needed.

    # rows that correspond to real (h, w) positions (implements conv2's zero padding)
    q = jnp.arange(R2) - HALO
    h_idx, w_idx = q // WPp, q % WPp
    interior = ((q >= 0) & (q < HP * WPp) &
                (h_idx >= 1) & (h_idx <= H) & (w_idx >= 1) & (w_idx <= W))
    mask = interior.astype(jnp.float32)[:, None]                         # (R2, 1)

    # weights / folded-BN params: zero-pad channels (padded output channels stay exactly 0)
    w1p = jnp.pad(w1, ((0, Cp - Cin), (0, Pp - planes))).astype(jnp.bfloat16)
    w2p = jnp.pad(w2, ((0, 0),) * 3 + ((0, Pp - planes), (0, Pp - planes)))
    w2p = w2p.reshape(27, Pp, Pp).astype(jnp.bfloat16)                   # (kd,kh,kw)-major taps
    w3p = jnp.pad(w3, ((0, Pp - planes), (0, C4p - C4))).astype(jnp.bfloat16)

    def pad_vec(v, c):
        return jnp.pad(v, ((0, 0), (0, c - v.shape[1]))).astype(jnp.float32)

    s1, b1 = pad_vec(params["scale1"], Pp), pad_vec(params["shift1"], Pp)
    s2, b2 = pad_vec(params["scale2"], Pp), pad_vec(params["shift2"], Pp)
    s3, b3 = pad_vec(params["scale3"], C4p), pad_vec(params["shift3"], C4p)

    kernel = _make_bottleneck_kernel(TD=TD, WPp=WPp, ROWS_OUT=ROWS_OUT,
                                     HALO=HALO, R2=R2, Pp=Pp)

    mid = lambda n, db: (n, db, 0, 0)
    lo = lambda n, db: (n, jnp.maximum(db * TD - 1, 0), 0, 0)            # clamped; kernel zeroes
    hi = lambda n, db: (n, jnp.minimum(db * TD + TD, D - 1), 0, 0)       # clamped; kernel zeroes
    c2 = lambda n, db: (0, 0)
    c3 = lambda n, db: (0, 0, 0)

    def const_spec(shape, imap):
        # grid-invariant operands: fetched once, keep a single VMEM buffer
        return pl.BlockSpec(shape, imap, pipeline_mode=pl.Buffered(1))

    in_specs = [
        pl.BlockSpec((1, 1, R2, Cp), lo),       # depth-halo slice below the slab
        pl.BlockSpec((1, TD, R2, Cp), mid),     # TD interior slices (one big DMA per step)
        pl.BlockSpec((1, 1, R2, Cp), hi),       # depth-halo slice above the slab
        const_spec((R2, 1), c2),
        const_spec((Cp, Pp), c2), const_spec((1, Pp), c2), const_spec((1, Pp), c2),
        const_spec((27, Pp, Pp), c3), const_spec((1, Pp), c2), const_spec((1, Pp), c2),
        const_spec((Pp, C4p), c2), const_spec((1, C4p), c2), const_spec((1, C4p), c2),
    ]
    out_spec = pl.BlockSpec((1, TD, ROWS_OUT, C4p), mid)

    out_padded = pl.pallas_call(
        kernel,
        out_shape=jax.ShapeDtypeStruct((N, D, ROWS_OUT, C4p), jnp.bfloat16),
        grid_spec=pltpu.PrefetchScalarGridSpec(
            num_scalar_prefetch=0,
            grid=(N, D // TD),
            in_specs=in_specs,
            out_specs=out_spec,
            scratch_shapes=[pltpu.VMEM((NTAP, R2, Pp), jnp.bfloat16)],   # conv1 result, bf16
        ),
        compiler_params=pltpu.CompilerParams(
            dimension_semantics=("parallel", "parallel"),
            vmem_limit_bytes=vmem_limit,
        ),
    )(xf, xf, xf, mask, w1p, s1, b1, w2p, s2, b2, w3p, s3, b3)

    # crop padded rows/channels; chained blocks would keep bf16/NDHWC instead of this pass
    out = out_padded[:, :, :HP * WPp, :C4].astype(jnp.float32)
    out = out.reshape(N, D, HP, WPp, C4)[:, :, 1:H + 1, 1:W + 1, :]
    return jnp.transpose(out, (0, 4, 1, 2, 3))                           # back to NCDHW


# ---------------------------------------------------------------------------
# Deterministic synthetic parameters (BN folded to inference-mode scale/shift)
# ---------------------------------------------------------------------------
def init_params(key, in_planes, planes, expansion=4, eps=1e-5):
    C4 = planes * expansion
    ks = jax.random.split(key, 15)

    def folded_bn(kg, kb, km, kv, c):
        gamma = 1.0 + 0.1 * jax.random.normal(kg, (c,), jnp.float32)
        beta = 0.1 * jax.random.normal(kb, (c,), jnp.float32)
        mean = 0.1 * jax.random.normal(km, (c,), jnp.float32)
        var = jax.nn.softplus(jax.random.normal(kv, (c,), jnp.float32)) + 0.5
        scale = gamma * jax.lax.rsqrt(var + eps)
        shift = beta - mean * scale
        return scale.reshape(1, c), shift.reshape(1, c)

    w1 = 0.1 * jax.random.normal(ks[0], (in_planes, planes), jnp.float32)
    w2 = 0.1 * jax.random.normal(ks[1], (3, 3, 3, planes, planes), jnp.float32)   # DHWIO
    w3 = 0.1 * jax.random.normal(ks[2], (planes, C4), jnp.float32)
    s1, b1 = folded_bn(ks[3], ks[4], ks[5], ks[6], planes)
    s2, b2 = folded_bn(ks[7], ks[8], ks[9], ks[10], planes)
    s3, b3 = folded_bn(ks[11], ks[12], ks[13], ks[14], C4)

    return dict(w1=w1, w2=w2, w3=w3,
                scale1=s1, shift1=b1, scale2=s2, shift2=b2, scale3=s3, shift3=b3)


# ---------------------------------------------------------------------------
# Pure-JAX reference (independent conv path; matmul inputs cast to compute_dtype)
# ---------------------------------------------------------------------------
def bottleneck_ref(x_ncdhw, params, compute_dtype=jnp.float32):
    cd = compute_dtype
    x = jnp.transpose(x_ncdhw, (0, 2, 3, 4, 1)).astype(jnp.float32)
    out = jnp.einsum("ndhwc,cf->ndhwf", x.astype(cd), params["w1"].astype(cd),
                     preferred_element_type=jnp.float32)
    out = jnp.maximum(out * params["scale1"][0] + params["shift1"][0], 0.0)
    out = jax.lax.conv_general_dilated(
        out.astype(cd), params["w2"].astype(cd),
        window_strides=(1, 1, 1), padding=((1, 1), (1, 1), (1, 1)),
        dimension_numbers=("NDHWC", "DHWIO", "NDHWC"),
        preferred_element_type=jnp.float32)
    out = jnp.maximum(out * params["scale2"][0] + params["shift2"][0], 0.0)
    out = jnp.einsum("ndhwc,cf->ndhwf", out.astype(cd), params["w3"].astype(cd),
                     preferred_element_type=jnp.float32)
    out = out * params["scale3"][0] + params["shift3"][0]
    out = jnp.maximum(out + x.astype(cd).astype(jnp.float32), 0.0)
    return jnp.transpose(out, (0, 4, 1, 2, 3))


if __name__ == "__main__":
    key = jax.random.PRNGKey(0)
    k_x, k_p = jax.random.split(key)

    in_planes, planes = 16, 4                 # expansion=4 -> out channels = 16 (identity residual)
    N, D, H, W = 2, 8, 8, 8
    x = jax.random.normal(k_x, (N, in_planes, D, H, W), jnp.float32)    # NCDHW
    params = init_params(k_p, in_planes, planes)

    out = jax.block_until_ready(jax.jit(bottleneck_pallas)(x, params))
    assert out.shape == (N, planes * 4, D, H, W), out.shape

    # check vs. a reference that quantizes matmul inputs to bf16 like the kernel does
    # (kernel additionally rounds its output to bf16 -> ~half-ulp slack)
    ref_bf16 = bottleneck_ref(x, params, compute_dtype=jnp.bfloat16)
    err_bf16 = float(jnp.max(jnp.abs(out - ref_bf16)))
    assert err_bf16 < 4e-2, f"mismatch vs bf16-input reference: max_err={err_bf16}"

    # loose sanity check vs. the full-f32 reference (difference = bf16 quantization only)
    ref_f32 = bottleneck_ref(x, params, compute_dtype=jnp.float32)
    err_f32 = float(jnp.max(jnp.abs(out - ref_f32)))
    assert err_f32 < 1.5e-1, f"mismatch vs f32 reference: max_err={err_f32}"

    print("KERNEL_OK")
</pallas_src>

<mosaic_0001>
module attributes {stable_mosaic.version = 11 : i64} {
  func.func @kernel(%arg0: i32, %arg1: i32, %arg2: memref<1x1x224x128xbf16, #tpu.memory_space<vmem>>, %arg3: memref<1x4x224x128xbf16, #tpu.memory_space<vmem>>, %arg4: memref<1x1x224x128xbf16, #tpu.memory_space<vmem>>, %arg5: memref<224x1xf32, #tpu.memory_space<vmem>>, %arg6: memref<128x128xbf16, #tpu.memory_space<vmem>>, %arg7: memref<1x128xf32, #tpu.memory_space<vmem>>, %arg8: memref<1x128xf32, #tpu.memory_space<vmem>>, %arg9: memref<27x128x128xbf16, #tpu.memory_space<vmem>>, %arg10: memref<1x128xf32, #tpu.memory_space<vmem>>, %arg11: memref<1x128xf32, #tpu.memory_space<vmem>>, %arg12: memref<128x128xbf16, #tpu.memory_space<vmem>>, %arg13: memref<1x128xf32, #tpu.memory_space<vmem>>, %arg14: memref<1x128xf32, #tpu.memory_space<vmem>>, %arg15: memref<1x4x160x128xbf16, #tpu.memory_space<vmem>>, %arg16: memref<6x224x128xbf16, #tpu.memory_space<vmem>>) attributes {dimension_semantics = [#tpu.dimension_semantics<parallel>, #tpu.dimension_semantics<parallel>], iteration_bounds = array<i64: 2, 2>, scalar_prefetch = 0 : i64, scratch_operands = 1 : i64, tpu.core_type = #tpu.core_type<tc>, window_params = [{transform_indices = @transform_0, window_bounds = array<i64: 1, 1, 224, 128>}, {transform_indices = @transform_1, window_bounds = array<i64: 1, 4, 224, 128>}, {transform_indices = @transform_2, window_bounds = array<i64: 1, 1, 224, 128>}, {pipeline_mode = #tpu.pipeline_mode<synchronous>, transform_indices = @transform_3, window_bounds = array<i64: 224, 1>}, {pipeline_mode = #tpu.pipeline_mode<synchronous>, transform_indices = @transform_4, window_bounds = array<i64: 128, 128>}, {pipeline_mode = #tpu.pipeline_mode<synchronous>, transform_indices = @transform_5, window_bounds = array<i64: 1, 128>}, {pipeline_mode = #tpu.pipeline_mode<synchronous>, transform_indices = @transform_6, window_bounds = array<i64: 1, 128>}, {pipeline_mode = #tpu.pipeline_mode<synchronous>, transform_indices = @transform_7, window_bounds = array<i64: 27, 128, 128>}, {pipeline_mode = #tpu.pipeline_mode<synchronous>, transform_indices = @transform_8, window_bounds = array<i64: 1, 128>}, {pipeline_mode = #tpu.pipeline_mode<synchronous>, transform_indices = @transform_9, window_bounds = array<i64: 1, 128>}, {pipeline_mode = #tpu.pipeline_mode<synchronous>, transform_indices = @transform_10, window_bounds = array<i64: 128, 128>}, {pipeline_mode = #tpu.pipeline_mode<synchronous>, transform_indices = @transform_11, window_bounds = array<i64: 1, 128>}, {pipeline_mode = #tpu.pipeline_mode<synchronous>, transform_indices = @transform_12, window_bounds = array<i64: 1, 128>}, {transform_indices = @transform_13, window_bounds = array<i64: 1, 4, 160, 128>}]} {
    %c0 = arith.constant 0 : index
    %c0_0 = arith.constant 0 : index
    %0 = vector.load %arg5[%c0, %c0_0] : memref<224x1xf32, #tpu.memory_space<vmem>>, vector<224x1xf32>
    %1 = vector.shape_cast %0 : vector<224x1xf32> to vector<224x1xf32>
    %2 = vector.broadcast %1 : vector<224x1xf32> to vector<224x128xf32>
    %c0_1 = arith.constant 0 : index
    %c0_2 = arith.constant 0 : index
    %c0_3 = arith.constant 0 : index
    %c0_4 = arith.constant 0 : index
    %3 = vector.load %arg2[%c0_1, %c0_2, %c0_3, %c0_4] : memref<1x1x224x128xbf16, #tpu.memory_space<vmem>>, vector<1x1x224x128xbf16>
    %4 = vector.shape_cast %3 : vector<1x1x224x128xbf16> to vector<224x128xbf16>
    %c0_i32 = arith.constant 0 : i32
    %5 = arith.cmpi sgt, %arg1, %c0_i32 : i32
    %6 = arith.extui %5 : i1 to i32
    %7 = arith.sitofp %6 : i32 to f32
    %c0_5 = arith.constant 0 : index
    %c0_6 = arith.constant 0 : index
    %8 = vector.load %arg6[%c0_5, %c0_6] : memref<128x128xbf16, #tpu.memory_space<vmem>>, vector<128x128xbf16>
    %cst = arith.constant dense<0.000000e+00> : vector<224x128xf32>
    %9 = tpu.matmul %4, %8, %cst {dimension_numbers = #tpu.dot_dimension_numbers<[1], [0], [0], [1], [0, 0, 1, 1], [], []>} : vector<224x128xbf16>, vector<128x128xbf16>, vector<224x128xf32> -> vector<224x128xf32>
    %c0_7 = arith.constant 0 : index
    %c0_8 = arith.constant 0 : index
    %10 = vector.load %arg7[%c0_7, %c0_8] : memref<1x128xf32, #tpu.memory_space<vmem>>, vector<1x128xf32>
    %11 = vector.broadcast %10 : vector<1x128xf32> to vector<224x128xf32>
    %12 = arith.mulf %9, %11 : vector<224x128xf32>
    %c0_9 = arith.constant 0 : index
    %c0_10 = arith.constant 0 : index
    %13 = vector.load %arg8[%c0_9, %c0_10] : memref<1x128xf32, #tpu.memory_space<vmem>>, vector<1x128xf32>
    %14 = vector.broadcast %13 : vector<1x128xf32> to vector<224x128xf32>
    %15 = arith.addf %12, %14 : vector<224x128xf32>
    %cst_11 = arith.constant 0.000000e+00 : f32
    %16 = vector.broadcast %cst_11 : f32 to vector<224x128xf32>
    %17 = arith.maximumf %15, %16 : vector<224x128xf32>
    %18 = arith.mulf %17, %2 : vector<224x128xf32>
    %19 = vector.broadcast %7 : f32 to vector<224x128xf32>
    %20 = arith.mulf %18, %19 : vector<224x128xf32>
    %21 = arith.truncf %20 : vector<224x128xf32> to vector<224x128xbf16>
    %c0_12 = arith.constant 0 : index
    %c0_13 = arith.constant 0 : index
    %c0_14 = arith.constant 0 : index
    %22 = vector.load %arg16[%c0_12, %c0_13, %c0_14] : memref<6x224x128xbf16, #tpu.memory_space<vmem>>, vector<1x224x128xbf16>
    %23 = vector.shape_cast %22 : vector<1x224x128xbf16> to vector<224x128xbf16>
    %24 = vector.shape_cast %21 : vector<224x128xbf16> to vector<1x224x128xbf16>
    tpu.vector_store %arg16[%c0_12, %c0_13, %c0_14], %24 {strides = array<i32>} : memref<6x224x128xbf16, #tpu.memory_space<vmem>>, vector<1x224x128xbf16>,
    %c0_15 = arith.constant 0 : index
    %c0_16 = arith.constant 0 : index
    %c0_17 = arith.constant 0 : index
    %c0_18 = arith.constant 0 : index
    %25 = vector.load %arg4[%c0_15, %c0_16, %c0_17, %c0_18] : memref<1x1x224x128xbf16, #tpu.memory_space<vmem>>, vector<1x1x224x128xbf16>
    %26 = vector.shape_cast %25 : vector<1x1x224x128xbf16> to vector<224x128xbf16>
    %c1_i32 = arith.constant 1 : i32
    %27 = arith.addi %arg1, %c1_i32 : i32
    %c2_i32 = arith.constant 2 : i32
    %28 = arith.cmpi slt, %27, %c2_i32 : i32
    %29 = arith.extui %28 : i1 to i32
    %30 = arith.sitofp %29 : i32 to f32
    %c0_19 = arith.constant 0 : index
    %c0_20 = arith.constant 0 : index
    %31 = vector.load %arg6[%c0_19, %c0_20] : memref<128x128xbf16, #tpu.memory_space<vmem>>, vector<128x128xbf16>
    %cst_21 = arith.constant dense<0.000000e+00> : vector<224x128xf32>
    %32 = tpu.matmul %26, %31, %cst_21 {dimension_numbers = #tpu.dot_dimension_numbers<[1], [0], [0], [1], [0, 0, 1, 1], [], []>} : vector<224x128xbf16>, vector<128x128xbf16>, vector<224x128xf32> -> vector<224x128xf32>
    %c0_22 = arith.constant 0 : index
    %c0_23 = arith.constant 0 : index
    %33 = vector.load %arg7[%c0_22, %c0_23] : memref<1x128xf32, #tpu.memory_space<vmem>>, vector<1x128xf32>
    %34 = vector.broadcast %33 : vector<1x128xf32> to vector<224x128xf32>
    %35 = arith.mulf %32, %34 : vector<224x128xf32>
    %c0_24 = arith.constant 0 : index
    %c0_25 = arith.constant 0 : index
    %36 = vector.load %arg8[%c0_24, %c0_25] : memref<1x128xf32, #tpu.memory_space<vmem>>, vector<1x128xf32>
    %37 = vector.broadcast %36 : vector<1x128xf32> to vector<224x128xf32>
    %38 = arith.addf %35, %37 : vector<224x128xf32>
    %cst_26 = arith.constant 0.000000e+00 : f32
    %39 = vector.broadcast %cst_26 : f32 to vector<224x128xf32>
    %40 = arith.maximumf %38, %39 : vector<224x128xf32>
    %41 = arith.mulf %40, %2 : vector<224x128xf32>
    %42 = vector.broadcast %30 : f32 to vector<224x128xf32>
    %43 = arith.mulf %41, %42 : vector<224x128xf32>
    %44 = arith.truncf %43 : vector<224x128xf32> to vector<224x128xbf16>
    %c5 = arith.constant 5 : index
    %c0_27 = arith.constant 0 : index
    %c0_28 = arith.constant 0 : index
    %45 = vector.load %arg16[%c5, %c0_27, %c0_28] : memref<6x224x128xbf16, #tpu.memory_space<vmem>>, vector<1x224x128xbf16>
    %46 = vector.shape_cast %45 : vector<1x224x128xbf16> to vector<224x128xbf16>
    %47 = vector.shape_cast %44 : vector<224x128xbf16> to vector<1x224x128xbf16>
    tpu.vector_store %arg16[%c5, %c0_27, %c0_28], %47 {strides = array<i32>} : memref<6x224x128xbf16, #tpu.memory_space<vmem>>, vector<1x224x128xbf16>,
    %c0_i32_29 = arith.constant 0 : i32
    %c4_i32 = arith.constant 4 : i32
    %48 = arith.addi %c0_i32_29, %c4_i32 : i32
    %c1_i32_30 = arith.constant 1 : i32
    scf.for %arg17 = %c0_i32_29 to %48 step %c1_i32_30  : i32 {
      %c0_36 = arith.constant 0 : index
      %50 = arith.index_cast %arg17 : i32 to index
      %c0_37 = arith.constant 0 : index
      %c0_38 = arith.constant 0 : index
      %51 = vector.load %arg3[%c0_36, %50, %c0_37, %c0_38] : memref<1x4x224x128xbf16, #tpu.memory_space<vmem>>, vector<1x1x224x128xbf16>
      %52 = vector.shape_cast %51 : vector<1x1x224x128xbf16> to vector<224x128xbf16>
      %c0_39 = arith.constant 0 : index
      %c0_40 = arith.constant 0 : index
      %53 = vector.load %arg6[%c0_39, %c0_40] : memref<128x128xbf16, #tpu.memory_space<vmem>>, vector<128x128xbf16>
      %cst_41 = arith.constant dense<0.000000e+00> : vector<224x128xf32>
      %54 = tpu.matmul %52, %53, %cst_41 {dimension_numbers = #tpu.dot_dimension_numbers<[1], [0], [0], [1], [0, 0, 1, 1], [], []>} : vector<224x128xbf16>, vector<128x128xbf16>, vector<224x128xf32> -> vector<224x128xf32>
      %c0_42 = arith.constant 0 : index
      %c0_43 = arith.constant 0 : index
      %55 = vector.load %arg7[%c0_42, %c0_43] : memref<1x128xf32, #tpu.memory_space<vmem>>, vector<1x128xf32>
      %56 = vector.broadcast %55 : vector<1x128xf32> to vector<224x128xf32>
      %57 = arith.mulf %54, %56 : vector<224x128xf32>
      %c0_44 = arith.constant 0 : index
      %c0_45 = arith.constant 0 : index
      %58 = vector.load %arg8[%c0_44, %c0_45] : memref<1x128xf32, #tpu.memory_space<vmem>>, vector<1x128xf32>
      %59 = vector.broadcast %58 : vector<1x128xf32> to vector<224x128xf32>
      %60 = arith.addf %57, %59 : vector<224x128xf32>
      %cst_46 = arith.constant 0.000000e+00 : f32
      %61 = vector.broadcast %cst_46 : f32 to vector<224x128xf32>
      %62 = arith.maximumf %60, %61 : vector<224x128xf32>
      %63 = arith.mulf %62, %2 : vector<224x128xf32>
      %64 = arith.truncf %63 : vector<224x128xf32> to vector<224x128xbf16>
      %c1_i32_47 = arith.constant 1 : i32
      %65 = arith.addi %arg17, %c1_i32_47 : i32
      %66 = arith.index_cast %65 : i32 to index
      %c0_48 = arith.constant 0 : index
      %c0_49 = arith.constant 0 : index
      %67 = vector.load %arg16[%66, %c0_48, %c0_49] : memref<6x224x128xbf16, #tpu.memory_space<vmem>>, vector<1x224x128xbf16>
      %68 = vector.shape_cast %67 : vector<1x224x128xbf16> to vector<224x128xbf16>
      %69 = vector.shape_cast %64 : vector<224x128xbf16> to vector<1x224x128xbf16>
      tpu.vector_store %arg16[%66, %c0_48, %c0_49], %69 {strides = array<i32>} : memref<6x224x128xbf16, #tpu.memory_space<vmem>>, vector<1x224x128xbf16>,
    }
    %c4_i32_31 = arith.constant 4 : i32
    %c0_i32_32 = arith.constant 0 : i32
    %c4_i32_33 = arith.constant 4 : i32
    %49 = arith.addi %c0_i32_32, %c4_i32_33 : i32
    %c1_i32_34 = arith.constant 1 : i32
    scf.for %arg17 = %c0_i32_32 to %49 step %c1_i32_34  : i32 {
      %cst_36 = arith.constant 0.000000e+00 : f32
      %50 = vector.broadcast %cst_36 : f32 to vector<160x128xf32>
      %c0_i32_37 = arith.constant 0 : i32
      %51 = arith.addi %arg17, %c0_i32_37 : i32
      %52 = arith.index_cast %51 : i32 to index
      %c15 = arith.constant 15 : index
      %c0_38 = arith.constant 0 : index
      %53 = vector.load %arg16[%52, %c15, %c0_38] : memref<6x224x128xbf16, #tpu.memory_space<vmem>>, vector<1x160x128xbf16>
      %54 = vector.shape_cast %53 : vector<1x160x128xbf16> to vector<160x128xbf16>
      %c0_39 = arith.constant 0 : index
      %c0_40 = arith.constant 0 : index
      %c0_41 = arith.constant 0 : index
      %55 = vector.load %arg9[%c0_39, %c0_40, %c0_41] : memref<27x128x128xbf16, #tpu.memory_space<vmem>>, vector<1x128x128xbf16>
      %56 = vector.shape_cast %55 : vector<1x128x128xbf16> to vector<128x128xbf16>
      %cst_42 = arith.constant dense<0.000000e+00> : vector<160x128xf32>
      %57 = tpu.matmul %54, %56, %cst_42 {dimension_numbers = #tpu.dot_dimension_numbers<[1], [0], [0], [1], [0, 0, 1, 1], [], []>} : vector<160x128xbf16>, vector<128x128xbf16>, vector<160x128xf32> -> vector<160x128xf32>
      %58 = arith.addf %50, %57 : vector<160x128xf32>
      %c0_i32_43 = arith.constant 0 : i32
      %59 = arith.addi %arg17, %c0_i32_43 : i32
      %60 = arith.index_cast %59 : i32 to index
      %c16 = arith.constant 16 : index
      %c0_44 = arith.constant 0 : index
      %61 = vector.load %arg16[%60, %c16, %c0_44] : memref<6x224x128xbf16, #tpu.memory_space<vmem>>, vector<1x160x128xbf16>
      %62 = vector.shape_cast %61 : vector<1x160x128xbf16> to vector<160x128xbf16>
      %c1 = arith.constant 1 : index
      %c0_45 = arith.constant 0 : index
      %c0_46 = arith.constant 0 : index
      %63 = vector.load %arg9[%c1, %c0_45, %c0_46] : memref<27x128x128xbf16, #tpu.memory_space<vmem>>, vector<1x128x128xbf16>
      %64 = vector.shape_cast %63 : vector<1x128x128xbf16> to vector<128x128xbf16>
      %cst_47 = arith.constant dense<0.000000e+00> : vector<160x128xf32>
      %65 = tpu.matmul %62, %64, %cst_47 {dimension_numbers = #tpu.dot_dimension_numbers<[1], [0], [0], [1], [0, 0, 1, 1], [], []>} : vector<160x128xbf16>, vector<128x128xbf16>, vector<160x128xf32> -> vector<160x128xf32>
      %66 = arith.addf %58, %65 : vector<160x128xf32>
      %c0_i32_48 = arith.constant 0 : i32
      %67 = arith.addi %arg17, %c0_i32_48 : i32
      %68 = arith.index_cast %67 : i32 to index
      %c17 = arith.constant 17 : index
      %c0_49 = arith.constant 0 : index
      %69 = vector.load %arg16[%68, %c17, %c0_49] : memref<6x224x128xbf16, #tpu.memory_space<vmem>>, vector<1x160x128xbf16>
      %70 = vector.shape_cast %69 : vector<1x160x128xbf16> to vector<160x128xbf16>
      %c2 = arith.constant 2 : index
      %c0_50 = arith.constant 0 : index
      %c0_51 = arith.constant 0 : index
      %71 = vector.load %arg9[%c2, %c0_50, %c0_51] : memref<27x128x128xbf16, #tpu.memory_space<vmem>>, vector<1x128x128xbf16>
      %72 = vector.shape_cast %71 : vector<1x128x128xbf16> to vector<128x128xbf16>
      %cst_52 = arith.constant dense<0.000000e+00> : vector<160x128xf32>
      %73 = tpu.matmul %70, %72, %cst_52 {dimension_numbers = #tpu.dot_dimension_numbers<[1], [0], [0], [1], [0, 0, 1, 1], [], []>} : vector<160x128xbf16>, vector<128x128xbf16>, vector<160x128xf32> -> vector<160x128xf32>
      %74 = arith.addf %66, %73 : vector<160x128xf32>
      %c0_i32_53 = arith.constant 0 : i32
      %75 = arith.addi %arg17, %c0_i32_53 : i32
      %76 = arith.index_cast %75 : i32 to index
      %c31 = arith.constant 31 : index
      %c0_54 = arith.constant 0 : index
      %77 = vector.load %arg16[%76, %c31, %c0_54] : memref<6x224x128xbf16, #tpu.memory_space<vmem>>, vector<1x160x128xbf16>
      %78 = vector.shape_cast %77 : vector<1x160x128xbf16> to vector<160x128xbf16>
      %c3 = arith.constant 3 : index
      %c0_55 = arith.constant 0 : index
      %c0_56 = arith.constant 0 : index
      %79 = vector.load %arg9[%c3, %c0_55, %c0_56] : memref<27x128x128xbf16, #tpu.memory_space<vmem>>, vector<1x128x128xbf16>
      %80 = vector.shape_cast %79 : vector<1x128x128xbf16> to vector<128x128xbf16>
      %cst_57 = arith.constant dense<0.000000e+00> : vector<160x128xf32>
      %81 = tpu.matmul %78, %80, %cst_57 {dimension_numbers = #tpu.dot_dimension_numbers<[1], [0], [0], [1], [0, 0, 1, 1], [], []>} : vector<160x128xbf16>, vector<128x128xbf16>, vector<160x128xf32> -> vector<160x128xf32>
      %82 = arith.addf %74, %81 : vector<160x128xf32>
      %c0_i32_58 = arith.constant 0 : i32
      %83 = arith.addi %arg17, %c0_i32_58 : i32
      %84 = arith.index_cast %83 : i32 to index
      %c32 = arith.constant 32 : index
      %c0_59 = arith.constant 0 : index
      %85 = vector.load %arg16[%84, %c32, %c0_59] : memref<6x224x128xbf16, #tpu.memory_space<vmem>>, vector<1x160x128xbf16>
      %86 = vector.shape_cast %85 : vector<1x160x128xbf16> to vector<160x128xbf16>
      %c4 = arith.constant 4 : index
      %c0_60 = arith.constant 0 : index
      %c0_61 = arith.constant 0 : index
      %87 = vector.load %arg9[%c4, %c0_60, %c0_61] : memref<27x128x128xbf16, #tpu.memory_space<vmem>>, vector<1x128x128xbf16>
      %88 = vector.shape_cast %87 : vector<1x128x128xbf16> to vector<128x128xbf16>
      %cst_62 = arith.constant dense<0.000000e+00> : vector<160x128xf32>
      %89 = tpu.matmul %86, %88, %cst_62 {dimension_numbers = #tpu.dot_dimension_numbers<[1], [0], [0], [1], [0, 0, 1, 1], [], []>} : vector<160x128xbf16>, vector<128x128xbf16>, vector<160x128xf32> -> vector<160x128xf32>
      %90 = arith.addf %82, %89 : vector<160x128xf32>
      %c0_i32_63 = arith.constant 0 : i32
      %91 = arith.addi %arg17, %c0_i32_63 : i32
      %92 = arith.index_cast %91 : i32 to index
      %c33 = arith.constant 33 : index
      %c0_64 = arith.constant 0 : index
      %93 = vector.load %arg16[%92, %c33, %c0_64] : memref<6x224x128xbf16, #tpu.memory_space<vmem>>, vector<1x160x128xbf16>
      %94 = vector.shape_cast %93 : vector<1x160x128xbf16> to vector<160x128xbf16>
      %c5_65 = arith.constant 5 : index
      %c0_66 = arith.constant 0 : index
      %c0_67 = arith.constant 0 : index
      %95 = vector.load %arg9[%c5_65, %c0_66, %c0_67] : memref<27x128x128xbf16, #tpu.memory_space<vmem>>, vector<1x128x128xbf16>
      %96 = vector.shape_cast %95 : vector<1x128x128xbf16> to vector<128x128xbf16>
      %cst_68 = arith.constant dense<0.000000e+00> : vector<160x128xf32>
      %97 = tpu.matmul %94, %96, %cst_68 {dimension_numbers = #tpu.dot_dimension_numbers<[1], [0], [0], [1], [0, 0, 1, 1], [], []>} : vector<160x128xbf16>, vector<128x128xbf16>, vector<160x128xf32> -> vector<160x128xf32>
      %98 = arith.addf %90, %97 : vector<160x128xf32>
      %c0_i32_69 = arith.constant 0 : i32
      %99 = arith.addi %arg17, %c0_i32_69 : i32
      %100 = arith.index_cast %99 : i32 to index
      %c47 = arith.constant 47 : index
      %c0_70 = arith.constant 0 : index
      %101 = vector.load %arg16[%100, %c47, %c0_70] : memref<6x224x128xbf16, #tpu.memory_space<vmem>>, vector<1x160x128xbf16>
      %102 = vector.shape_cast %101 : vector<1x160x128xbf16> to vector<160x128xbf16>
      %c6 = arith.constant 6 : index
      %c0_71 = arith.constant 0 : index
      %c0_72 = arith.constant 0 : index
      %103 = vector.load %arg9[%c6, %c0_71, %c0_72] : memref<27x128x128xbf16, #tpu.memory_space<vmem>>, vector<1x128x128xbf16>
      %104 = vector.shape_cast %103 : vector<1x128x128xbf16> to vector<128x128xbf16>
      %cst_73 = arith.constant dense<0.000000e+00> : vector<160x128xf32>
      %105 = tpu.matmul %102, %104, %cst_73 {dimension_numbers = #tpu.dot_dimension_numbers<[1], [0], [0], [1], [0, 0, 1, 1], [], []>} : vector<160x128xbf16>, vector<128x128xbf16>, vector<160x128xf32> -> vector<160x128xf32>
      %106 = arith.addf %98, %105 : vector<160x128xf32>
      %c0_i32_74 = arith.constant 0 : i32
      %107 = arith.addi %arg17, %c0_i32_74 : i32
      %108 = arith.index_cast %107 : i32 to index
      %c48 = arith.constant 48 : index
      %c0_75 = arith.constant 0 : index
      %109 = vector.load %arg16[%108, %c48, %c0_75] : memref<6x224x128xbf16, #tpu.memory_space<vmem>>, vector<1x160x128xbf16>
      %110 = vector.shape_cast %109 : vector<1x160x128xbf16> to vector<160x128xbf16>
      %c7 = arith.constant 7 : index
      %c0_76 = arith.constant 0 : index
      %c0_77 = arith.constant 0 : index
      %111 = vector.load %arg9[%c7, %c0_76, %c0_77] : memref<27x128x128xbf16, #tpu.memory_space<vmem>>, vector<1x128x128xbf16>
      %112 = vector.shape_cast %111 : vector<1x128x128xbf16> to vector<128x128xbf16>
      %cst_78 = arith.constant dense<0.000000e+00> : vector<160x128xf32>
      %113 = tpu.matmul %110, %112, %cst_78 {dimension_numbers = #tpu.dot_dimension_numbers<[1], [0], [0], [1], [0, 0, 1, 1], [], []>} : vector<160x128xbf16>, vector<128x128xbf16>, vector<160x128xf32> -> vector<160x128xf32>
      %114 = arith.addf %106, %113 : vector<160x128xf32>
      %c0_i32_79 = arith.constant 0 : i32
      %115 = arith.addi %arg17, %c0_i32_79 : i32
      %116 = arith.index_cast %115 : i32 to index
      %c49 = arith.constant 49 : index
      %c0_80 = arith.constant 0 : index
      %117 = vector.load %arg16[%116, %c49, %c0_80] : memref<6x224x128xbf16, #tpu.memory_space<vmem>>, vector<1x160x128xbf16>
      %118 = vector.shape_cast %117 : vector<1x160x128xbf16> to vector<160x128xbf16>
      %c8 = arith.constant 8 : index
      %c0_81 = arith.constant 0 : index
      %c0_82 = arith.constant 0 : index
      %119 = vector.load %arg9[%c8, %c0_81, %c0_82] : memref<27x128x128xbf16, #tpu.memory_space<vmem>>, vector<1x128x128xbf16>
      %120 = vector.shape_cast %119 : vector<1x128x128xbf16> to vector<128x128xbf16>
      %cst_83 = arith.constant dense<0.000000e+00> : vector<160x128xf32>
      %121 = tpu.matmul %118, %120, %cst_83 {dimension_numbers = #tpu.dot_dimension_numbers<[1], [0], [0], [1], [0, 0, 1, 1], [], []>} : vector<160x128xbf16>, vector<128x128xbf16>, vector<160x128xf32> -> vector<160x128xf32>
      %122 = arith.addf %114, %121 : vector<160x128xf32>
      %c1_i32_84 = arith.constant 1 : i32
      %123 = arith.addi %arg17, %c1_i32_84 : i32
      %124 = arith.index_cast %123 : i32 to index
      %c15_85 = arith.constant 15 : index
      %c0_86 = arith.constant 0 : index
      %125 = vector.load %arg16[%124, %c15_85, %c0_86] : memref<6x224x128xbf16, #tpu.memory_space<vmem>>, vector<1x160x128xbf16>
      %126 = vector.shape_cast %125 : vector<1x160x128xbf16> to vector<160x128xbf16>
      %c9 = arith.constant 9 : index
      %c0_87 = arith.constant 0 : index
      %c0_88 = arith.constant 0 : index
      %127 = vector.load %arg9[%c9, %c0_87, %c0_88] : memref<27x128x128xbf16, #tpu.memory_space<vmem>>, vector<1x128x128xbf16>
      %128 = vector.shape_cast %127 : vector<1x128x128xbf16> to vector<128x128xbf16>
      %cst_89 = arith.constant dense<0.000000e+00> : vector<160x128xf32>
      %129 = tpu.matmul %126, %128, %cst_89 {dimension_numbers = #tpu.dot_dimension_numbers<[1], [0], [0], [1], [0, 0, 1, 1], [], []>} : vector<160x128xbf16>, vector<128x128xbf16>, vector<160x128xf32> -> vector<160x128xf32>
      %130 = arith.addf %122, %129 : vector<160x128xf32>
      %c1_i32_90 = arith.constant 1 : i32
      %131 = arith.addi %arg17, %c1_i32_90 : i32
      %132 = arith.index_cast %131 : i32 to index
      %c16_91 = arith.constant 16 : index
      %c0_92 = arith.constant 0 : index
      %133 = vector.load %arg16[%132, %c16_91, %c0_92] : memref<6x224x128xbf16, #tpu.memory_space<vmem>>, vector<1x160x128xbf16>
      %134 = vector.shape_cast %133 : vector<1x160x128xbf16> to vector<160x128xbf16>
      %c10 = arith.constant 10 : index
      %c0_93 = arith.constant 0 : index
      %c0_94 = arith.constant 0 : index
      %135 = vector.load %arg9[%c10, %c0_93, %c0_94] : memref<27x128x128xbf16, #tpu.memory_space<vmem>>, vector<1x128x128xbf16>
      %136 = vector.shape_cast %135 : vector<1x128x128xbf16> to vector<128x128xbf16>
      %cst_95 = arith.constant dense<0.000000e+00> : vector<160x128xf32>
      %137 = tpu.matmul %134, %136, %cst_95 {dimension_numbers = #tpu.dot_dimension_numbers<[1], [0], [0], [1], [0, 0, 1, 1], [], []>} : vector<160x128xbf16>, vector<128x128xbf16>, vector<160x128xf32> -> vector<160x128xf32>
      %138 = arith.addf %130, %137 : vector<160x128xf32>
      %c1_i32_96 = arith.constant 1 : i32
      %139 = arith.addi %arg17, %c1_i32_96 : i32
      %140 = arith.index_cast %139 : i32 to index
      %c17_97 = arith.constant 17 : index
      %c0_98 = arith.constant 0 : index
      %141 = vector.load %arg16[%140, %c17_97, %c0_98] : memref<6x224x128xbf16, #tpu.memory_space<vmem>>, vector<1x160x128xbf16>
      %142 = vector.shape_cast %141 : vector<1x160x128xbf16> to vector<160x128xbf16>
      %c11 = arith.constant 11 : index
      %c0_99 = arith.constant 0 : index
      %c0_100 = arith.constant 0 : index
      %143 = vector.load %arg9[%c11, %c0_99, %c0_100] : memref<27x128x128xbf16, #tpu.memory_space<vmem>>, vector<1x128x128xbf16>
      %144 = vector.shape_cast %143 : vector<1x128x128xbf16> to vector<128x128xbf16>
      %cst_101 = arith.constant dense<0.000000e+00> : vector<160x128xf32>
      %145 = tpu.matmul %142, %144, %cst_101 {dimension_numbers = #tpu.dot_dimension_numbers<[1], [0], [0], [1], [0, 0, 1, 1], [], []>} : vector<160x128xbf16>, vector<128x128xbf16>, vector<160x128xf32> -> vector<160x128xf32>
      %146 = arith.addf %138, %145 : vector<160x128xf32>
      %c1_i32_102 = arith.constant 1 : i32
      %147 = arith.addi %arg17, %c1_i32_102 : i32
      %148 = arith.index_cast %147 : i32 to index
      %c31_103 = arith.constant 31 : index
      %c0_104 = arith.constant 0 : index
      %149 = vector.load %arg16[%148, %c31_103, %c0_104] : memref<6x224x128xbf16, #tpu.memory_space<vmem>>, vector<1x160x128xbf16>
      %150 = vector.shape_cast %149 : vector<1x160x128xbf16> to vector<160x128xbf16>
      %c12 = arith.constant 12 : index
      %c0_105 = arith.constant 0 : index
      %c0_106 = arith.constant 0 : index
      %151 = vector.load %arg9[%c12, %c0_105, %c0_106] : memref<27x128x128xbf16, #tpu.memory_space<vmem>>, vector<1x128x128xbf16>
      %152 = vector.shape_cast %151 : vector<1x128x128xbf16> to vector<128x128xbf16>
      %cst_107 = arith.constant dense<0.000000e+00> : vector<160x128xf32>
      %153 = tpu.matmul %150, %152, %cst_107 {dimension_numbers = #tpu.dot_dimension_numbers<[1], [0], [0], [1], [0, 0, 1, 1], [], []>} : vector<160x128xbf16>, vector<128x128xbf16>, vector<160x128xf32> -> vector<160x128xf32>
      %154 = arith.addf %146, %153 : vector<160x128xf32>
      %c1_i32_108 = arith.constant 1 : i32
      %155 = arith.addi %arg17, %c1_i32_108 : i32
      %156 = arith.index_cast %155 : i32 to index
      %c32_109 = arith.constant 32 : index
      %c0_110 = arith.constant 0 : index
      %157 = vector.load %arg16[%156, %c32_109, %c0_110] : memref<6x224x128xbf16, #tpu.memory_space<vmem>>, vector<1x160x128xbf16>
      %158 = vector.shape_cast %157 : vector<1x160x128xbf16> to vector<160x128xbf16>
      %c13 = arith.constant 13 : index
      %c0_111 = arith.constant 0 : index
      %c0_112 = arith.constant 0 : index
      %159 = vector.load %arg9[%c13, %c0_111, %c0_112] : memref<27x128x128xbf16, #tpu.memory_space<vmem>>, vector<1x128x128xbf16>
      %160 = vector.shape_cast %159 : vector<1x128x128xbf16> to vector<128x128xbf16>
      %cst_113 = arith.constant dense<0.000000e+00> : vector<160x128xf32>
      %161 = tpu.matmul %158, %160, %cst_113 {dimension_numbers = #tpu.dot_dimension_numbers<[1], [0], [0], [1], [0, 0, 1, 1], [], []>} : vector<160x128xbf16>, vector<128x128xbf16>, vector<160x128xf32> -> vector<160x128xf32>
      %162 = arith.addf %154, %161 : vector<160x128xf32>
      %c1_i32_114 = arith.constant 1 : i32
      %163 = arith.addi %arg17, %c1_i32_114 : i32
      %164 = arith.index_cast %163 : i32 to index
      %c33_115 = arith.constant 33 : index
      %c0_116 = arith.constant 0 : index
      %165 = vector.load %arg16[%164, %c33_115, %c0_116] : memref<6x224x128xbf16, #tpu.memory_space<vmem>>, vector<1x160x128xbf16>
      %166 = vector.shape_cast %165 : vector<1x160x128xbf16> to vector<160x128xbf16>
      %c14 = arith.constant 14 : index
      %c0_117 = arith.constant 0 : index
      %c0_118 = arith.constant 0 : index
      %167 = vector.load %arg9[%c14, %c0_117, %c0_118] : memref<27x128x128xbf16, #tpu.memory_space<vmem>>, vector<1x128x128xbf16>
      %168 = vector.shape_cast %167 : vector<1x128x128xbf16> to vector<128x128xbf16>
      %cst_119 = arith.constant dense<0.000000e+00> : vector<160x128xf32>
      %169 = tpu.matmul %166, %168, %cst_119 {dimension_numbers = #tpu.dot_dimension_numbers<[1], [0], [0], [1], [0, 0, 1, 1], [], []>} : vector<160x128xbf16>, vector<128x128xbf16>, vector<160x128xf32> -> vector<160x128xf32>
      %170 = arith.addf %162, %169 : vector<160x128xf32>
      %c1_i32_120 = arith.constant 1 : i32
      %171 = arith.addi %arg17, %c1_i32_120 : i32
      %172 = arith.index_cast %171 : i32 to index
      %c47_121 = arith.constant 47 : index
      %c0_122 = arith.constant 0 : index
      %173 = vector.load %arg16[%172, %c47_121, %c0_122] : memref<6x224x128xbf16, #tpu.memory_space<vmem>>, vector<1x160x128xbf16>
      %174 = vector.shape_cast %173 : vector<1x160x128xbf16> to vector<160x128xbf16>
      %c15_123 = arith.constant 15 : index
      %c0_124 = arith.constant 0 : index
      %c0_125 = arith.constant 0 : index
      %175 = vector.load %arg9[%c15_123, %c0_124, %c0_125] : memref<27x128x128xbf16, #tpu.memory_space<vmem>>, vector<1x128x128xbf16>
      %176 = vector.shape_cast %175 : vector<1x128x128xbf16> to vector<128x128xbf16>
      %cst_126 = arith.constant dense<0.000000e+00> : vector<160x128xf32>
      %177 = tpu.matmul %174, %176, %cst_126 {dimension_numbers = #tpu.dot_dimension_numbers<[1], [0], [0], [1], [0, 0, 1, 1], [], []>} : vector<160x128xbf16>, vector<128x128xbf16>, vector<160x128xf32> -> vector<160x128xf32>
      %178 = arith.addf %170, %177 : vector<160x128xf32>
      %c1_i32_127 = arith.constant 1 : i32
      %179 = arith.addi %arg17, %c1_i32_127 : i32
      %180 = arith.index_cast %179 : i32 to index
      %c48_128 = arith.constant 48 : index
      %c0_129 = arith.constant 0 : index
      %181 = vector.load %arg16[%180, %c48_128, %c0_129] : memref<6x224x128xbf16, #tpu.memory_space<vmem>>, vector<1x160x128xbf16>
      %182 = vector.shape_cast %181 : vector<1x160x128xbf16> to vector<160x128xbf16>
      %c16_130 = arith.constant 16 : index
      %c0_131 = arith.constant 0 : index
      %c0_132 = arith.constant 0 : index
      %183 = vector.load %arg9[%c16_130, %c0_131, %c0_132] : memref<27x128x128xbf16, #tpu.memory_space<vmem>>, vector<1x128x128xbf16>
      %184 = vector.shape_cast %183 : vector<1x128x128xbf16> to vector<128x128xbf16>
      %cst_133 = arith.constant dense<0.000000e+00> : vector<160x128xf32>
      %185 = tpu.matmul %182, %184, %cst_133 {dimension_numbers = #tpu.dot_dimension_numbers<[1], [0], [0], [1], [0, 0, 1, 1], [], []>} : vector<160x128xbf16>, vector<128x128xbf16>, vector<160x128xf32> -> vector<160x128xf32>
      %186 = arith.addf %178, %185 : vector<160x128xf32>
      %c1_i32_134 = arith.constant 1 : i32
      %187 = arith.addi %arg17, %c1_i32_134 : i32
      %188 = arith.index_cast %187 : i32 to index
      %c49_135 = arith.constant 49 : index
      %c0_136 = arith.constant 0 : index
      %189 = vector.load %arg16[%188, %c49_135, %c0_136] : memref<6x224x128xbf16, #tpu.memory_space<vmem>>, vector<1x160x128xbf16>
      %190 = vector.shape_cast %189 : vector<1x160x128xbf16> to vector<160x128xbf16>
      %c17_137 = arith.constant 17 : index
      %c0_138 = arith.constant 0 : index
      %c0_139 = arith.constant 0 : index
      %191 = vector.load %arg9[%c17_137, %c0_138, %c0_139] : memref<27x128x128xbf16, #tpu.memory_space<vmem>>, vector<1x128x128xbf16>
      %192 = vector.shape_cast %191 : vector<1x128x128xbf16> to vector<128x128xbf16>
      %cst_140 = arith.constant dense<0.000000e+00> : vector<160x128xf32>
      %193 = tpu.matmul %190, %192, %cst_140 {dimension_numbers = #tpu.dot_dimension_numbers<[1], [0], [0], [1], [0, 0, 1, 1], [], []>} : vector<160x128xbf16>, vector<128x128xbf16>, vector<160x128xf32> -> vector<160x128xf32>
      %194 = arith.addf %186, %193 : vector<160x128xf32>
      %c2_i32_141 = arith.constant 2 : i32
      %195 = arith.addi %arg17, %c2_i32_141 : i32
      %196 = arith.index_cast %195 : i32 to index
      %c15_142 = arith.constant 15 : index
      %c0_143 = arith.constant 0 : index
      %197 = vector.load %arg16[%196, %c15_142, %c0_143] : memref<6x224x128xbf16, #tpu.memory_space<vmem>>, vector<1x160x128xbf16>
      %198 = vector.shape_cast %197 : vector<1x160x128xbf16> to vector<160x128xbf16>
      %c18 = arith.constant 18 : index
      %c0_144 = arith.constant 0 : index
      %c0_145 = arith.constant 0 : index
      %199 = vector.load %arg9[%c18, %c0_144, %c0_145] : memref<27x128x128xbf16, #tpu.memory_space<vmem>>, vector<1x128x128xbf16>
      %200 = vector.shape_cast %199 : vector<1x128x128xbf16> to vector<128x128xbf16>
      %cst_146 = arith.constant dense<0.000000e+00> : vector<160x128xf32>
      %201 = tpu.matmul %198, %200, %cst_146 {dimension_numbers = #tpu.dot_dimension_numbers<[1], [0], [0], [1], [0, 0, 1, 1], [], []>} : vector<160x128xbf16>, vector<128x128xbf16>, vector<160x128xf32> -> vector<160x128xf32>
      %202 = arith.addf %194, %201 : vector<160x128xf32>
      %c2_i32_147 = arith.constant 2 : i32
      %203 = arith.addi %arg17, %c2_i32_147 : i32
      %204 = arith.index_cast %203 : i32 to index
      %c16_148 = arith.constant 16 : index
      %c0_149 = arith.constant 0 : index
      %205 = vector.load %arg16[%204, %c16_148, %c0_149] : memref<6x224x128xbf16, #tpu.memory_space<vmem>>, vector<1x160x128xbf16>
      %206 = vector.shape_cast %205 : vector<1x160x128xbf16> to vector<160x128xbf16>
      %c19 = arith.constant 19 : index
      %c0_150 = arith.constant 0 : index
      %c0_151 = arith.constant 0 : index
      %207 = vector.load %arg9[%c19, %c0_150, %c0_151] : memref<27x128x128xbf16, #tpu.memory_space<vmem>>, vector<1x128x128xbf16>
      %208 = vector.shape_cast %207 : vector<1x128x128xbf16> to vector<128x128xbf16>
      %cst_152 = arith.constant dense<0.000000e+00> : vector<160x128xf32>
      %209 = tpu.matmul %206, %208, %cst_152 {dimension_numbers = #tpu.dot_dimension_numbers<[1], [0], [0], [1], [0, 0, 1, 1], [], []>} : vector<160x128xbf16>, vector<128x128xbf16>, vector<160x128xf32> -> vector<160x128xf32>
      %210 = arith.addf %202, %209 : vector<160x128xf32>
      %c2_i32_153 = arith.constant 2 : i32
      %211 = arith.addi %arg17, %c2_i32_153 : i32
      %212 = arith.index_cast %211 : i32 to index
      %c17_154 = arith.constant 17 : index
      %c0_155 = arith.constant 0 : index
      %213 = vector.load %arg16[%212, %c17_154, %c0_155] : memref<6x224x128xbf16, #tpu.memory_space<vmem>>, vector<1x160x128xbf16>
      %214 = vector.shape_cast %213 : vector<1x160x128xbf16> to vector<160x128xbf16>
      %c20 = arith.constant 20 : index
      %c0_156 = arith.constant 0 : index
      %c0_157 = arith.constant 0 : index
      %215 = vector.load %arg9[%c20, %c0_156, %c0_157] : memref<27x128x128xbf16, #tpu.memory_space<vmem>>, vector<1x128x128xbf16>
      %216 = vector.shape_cast %215 : vector<1x128x128xbf16> to vector<128x128xbf16>
      %cst_158 = arith.constant dense<0.000000e+00> : vector<160x128xf32>
      %217 = tpu.matmul %214, %216, %cst_158 {dimension_numbers = #tpu.dot_dimension_numbers<[1], [0], [0], [1], [0, 0, 1, 1], [], []>} : vector<160x128xbf16>, vector<128x128xbf16>, vector<160x128xf32> -> vector<160x128xf32>
      %218 = arith.addf %210, %217 : vector<160x128xf32>
      %c2_i32_159 = arith.constant 2 : i32
      %219 = arith.addi %arg17, %c2_i32_159 : i32
      %220 = arith.index_cast %219 : i32 to index
      %c31_160 = arith.constant 31 : index
      %c0_161 = arith.constant 0 : index
      %221 = vector.load %arg16[%220, %c31_160, %c0_161] : memref<6x224x128xbf16, #tpu.memory_space<vmem>>, vector<1x160x128xbf16>
      %222 = vector.shape_cast %221 : vector<1x160x128xbf16> to vector<160x128xbf16>
      %c21 = arith.constant 21 : index
      %c0_162 = arith.constant 0 : index
      %c0_163 = arith.constant 0 : index
      %223 = vector.load %arg9[%c21, %c0_162, %c0_163] : memref<27x128x128xbf16, #tpu.memory_space<vmem>>, vector<1x128x128xbf16>
      %224 = vector.shape_cast %223 : vector<1x128x128xbf16> to vector<128x128xbf16>
      %cst_164 = arith.constant dense<0.000000e+00> : vector<160x128xf32>
      %225 = tpu.matmul %222, %224, %cst_164 {dimension_numbers = #tpu.dot_dimension_numbers<[1], [0], [0], [1], [0, 0, 1, 1], [], []>} : vector<160x128xbf16>, vector<128x128xbf16>, vector<160x128xf32> -> vector<160x128xf32>
      %226 = arith.addf %218, %225 : vector<160x128xf32>
      %c2_i32_165 = arith.constant 2 : i32
      %227 = arith.addi %arg17, %c2_i32_165 : i32
      %228 = arith.index_cast %227 : i32 to index
      %c32_166 = arith.constant 32 : index
      %c0_167 = arith.constant 0 : index
      %229 = vector.load %arg16[%228, %c32_166, %c0_167] : memref<6x224x128xbf16, #tpu.memory_space<vmem>>, vector<1x160x128xbf16>
      %230 = vector.shape_cast %229 : vector<1x160x128xbf16> to vector<160x128xbf16>
      %c22 = arith.constant 22 : index
      %c0_168 = arith.constant 0 : index
      %c0_169 = arith.constant 0 : index
      %231 = vector.load %arg9[%c22, %c0_168, %c0_169] : memref<27x128x128xbf16, #tpu.memory_space<vmem>>, vector<1x128x128xbf16>
      %232 = vector.shape_cast %231 : vector<1x128x128xbf16> to vector<128x128xbf16>
      %cst_170 = arith.constant dense<0.000000e+00> : vector<160x128xf32>
      %233 = tpu.matmul %230, %232, %cst_170 {dimension_numbers = #tpu.dot_dimension_numbers<[1], [0], [0], [1], [0, 0, 1, 1], [], []>} : vector<160x128xbf16>, vector<128x128xbf16>, vector<160x128xf32> -> vector<160x128xf32>
      %234 = arith.addf %226, %233 : vector<160x128xf32>
      %c2_i32_171 = arith.constant 2 : i32
      %235 = arith.addi %arg17, %c2_i32_171 : i32
      %236 = arith.index_cast %235 : i32 to index
      %c33_172 = arith.constant 33 : index
      %c0_173 = arith.constant 0 : index
      %237 = vector.load %arg16[%236, %c33_172, %c0_173] : memref<6x224x128xbf16, #tpu.memory_space<vmem>>, vector<1x160x128xbf16>
      %238 = vector.shape_cast %237 : vector<1x160x128xbf16> to vector<160x128xbf16>
      %c23 = arith.constant 23 : index
      %c0_174 = arith.constant 0 : index
      %c0_175 = arith.constant 0 : index
      %239 = vector.load %arg9[%c23, %c0_174, %c0_175] : memref<27x128x128xbf16, #tpu.memory_space<vmem>>, vector<1x128x128xbf16>
      %240 = vector.shape_cast %239 : vector<1x128x128xbf16> to vector<128x128xbf16>
      %cst_176 = arith.constant dense<0.000000e+00> : vector<160x128xf32>
      %241 = tpu.matmul %238, %240, %cst_176 {dimension_numbers = #tpu.dot_dimension_numbers<[1], [0], [0], [1], [0, 0, 1, 1], [], []>} : vector<160x128xbf16>, vector<128x128xbf16>, vector<160x128xf32> -> vector<160x128xf32>
      %242 = arith.addf %234, %241 : vector<160x128xf32>
      %c2_i32_177 = arith.constant 2 : i32
      %243 = arith.addi %arg17, %c2_i32_177 : i32
      %244 = arith.index_cast %243 : i32 to index
      %c47_178 = arith.constant 47 : index
      %c0_179 = arith.constant 0 : index
      %245 = vector.load %arg16[%244, %c47_178, %c0_179] : memref<6x224x128xbf16, #tpu.memory_space<vmem>>, vector<1x160x128xbf16>
      %246 = vector.shape_cast %245 : vector<1x160x128xbf16> to vector<160x128xbf16>
      %c24 = arith.constant 24 : index
      %c0_180 = arith.constant 0 : index
      %c0_181 = arith.constant 0 : index
      %247 = vector.load %arg9[%c24, %c0_180, %c0_181] : memref<27x128x128xbf16, #tpu.memory_space<vmem>>, vector<1x128x128xbf16>
      %248 = vector.shape_cast %247 : vector<1x128x128xbf16> to vector<128x128xbf16>
      %cst_182 = arith.constant dense<0.000000e+00> : vector<160x128xf32>
      %249 = tpu.matmul %246, %248, %cst_182 {dimension_numbers = #tpu.dot_dimension_numbers<[1], [0], [0], [1], [0, 0, 1, 1], [], []>} : vector<160x128xbf16>, vector<128x128xbf16>, vector<160x128xf32> -> vector<160x128xf32>
      %250 = arith.addf %242, %249 : vector<160x128xf32>
      %c2_i32_183 = arith.constant 2 : i32
      %251 = arith.addi %arg17, %c2_i32_183 : i32
      %252 = arith.index_cast %251 : i32 to index
      %c48_184 = arith.constant 48 : index
      %c0_185 = arith.constant 0 : index
      %253 = vector.load %arg16[%252, %c48_184, %c0_185] : memref<6x224x128xbf16, #tpu.memory_space<vmem>>, vector<1x160x128xbf16>
      %254 = vector.shape_cast %253 : vector<1x160x128xbf16> to vector<160x128xbf16>
      %c25 = arith.constant 25 : index
      %c0_186 = arith.constant 0 : index
      %c0_187 = arith.constant 0 : index
      %255 = vector.load %arg9[%c25, %c0_186, %c0_187] : memref<27x128x128xbf16, #tpu.memory_space<vmem>>, vector<1x128x128xbf16>
      %256 = vector.shape_cast %255 : vector<1x128x128xbf16> to vector<128x128xbf16>
      %cst_188 = arith.constant dense<0.000000e+00> : vector<160x128xf32>
      %257 = tpu.matmul %254, %256, %cst_188 {dimension_numbers = #tpu.dot_dimension_numbers<[1], [0], [0], [1], [0, 0, 1, 1], [], []>} : vector<160x128xbf16>, vector<128x128xbf16>, vector<160x128xf32> -> vector<160x128xf32>
      %258 = arith.addf %250, %257 : vector<160x128xf32>
      %c2_i32_189 = arith.constant 2 : i32
      %259 = arith.addi %arg17, %c2_i32_189 : i32
      %260 = arith.index_cast %259 : i32 to index
      %c49_190 = arith.constant 49 : index
      %c0_191 = arith.constant 0 : index
      %261 = vector.load %arg16[%260, %c49_190, %c0_191] : memref<6x224x128xbf16, #tpu.memory_space<vmem>>, vector<1x160x128xbf16>
      %262 = vector.shape_cast %261 : vector<1x160x128xbf16> to vector<160x128xbf16>
      %c26 = arith.constant 26 : index
      %c0_192 = arith.constant 0 : index
      %c0_193 = arith.constant 0 : index
      %263 = vector.load %arg9[%c26, %c0_192, %c0_193] : memref<27x128x128xbf16, #tpu.memory_space<vmem>>, vector<1x128x128xbf16>
      %264 = vector.shape_cast %263 : vector<1x128x128xbf16> to vector<128x128xbf16>
      %cst_194 = arith.constant dense<0.000000e+00> : vector<160x128xf32>
      %265 = tpu.matmul %262, %264, %cst_194 {dimension_numbers = #tpu.dot_dimension_numbers<[1], [0], [0], [1], [0, 0, 1, 1], [], []>} : vector<160x128xbf16>, vector<128x128xbf16>, vector<160x128xf32> -> vector<160x128xf32>
      %266 = arith.addf %258, %265 : vector<160x128xf32>
      %c0_195 = arith.constant 0 : index
      %c0_196 = arith.constant 0 : index
      %267 = vector.load %arg10[%c0_195, %c0_196] : memref<1x128xf32, #tpu.memory_space<vmem>>, vector<1x128xf32>
      %268 = vector.broadcast %267 : vector<1x128xf32> to vector<160x128xf32>
      %269 = arith.mulf %266, %268 : vector<160x128xf32>
      %c0_197 = arith.constant 0 : index
      %c0_198 = arith.constant 0 : index
      %270 = vector.load %arg11[%c0_197, %c0_198] : memref<1x128xf32, #tpu.memory_space<vmem>>, vector<1x128xf32>
      %271 = vector.broadcast %270 : vector<1x128xf32> to vector<160x128xf32>
      %272 = arith.addf %269, %271 : vector<160x128xf32>
      %cst_199 = arith.constant 0.000000e+00 : f32
      %273 = vector.broadcast %cst_199 : f32 to vector<160x128xf32>
      %274 = arith.maximumf %272, %273 : vector<160x128xf32>
      %275 = arith.truncf %274 : vector<160x128xf32> to vector<160x128xbf16>
      %c0_200 = arith.constant 0 : index
      %c0_201 = arith.constant 0 : index
      %276 = vector.load %arg12[%c0_200, %c0_201] : memref<128x128xbf16, #tpu.memory_space<vmem>>, vector<128x128xbf16>
      %cst_202 = arith.constant dense<0.000000e+00> : vector<160x128xf32>
      %277 = tpu.matmul %275, %276, %cst_202 {dimension_numbers = #tpu.dot_dimension_numbers<[1], [0], [0], [1], [0, 0, 1, 1], [], []>} : vector<160x128xbf16>, vector<128x128xbf16>, vector<160x128xf32> -> vector<160x128xf32>
      %c0_203 = arith.constant 0 : index
      %278 = arith.index_cast %arg17 : i32 to index
      %c32_204 = arith.constant 32 : index
      %c0_205 = arith.constant 0 : index
      %279 = vector.load %arg3[%c0_203, %278, %c32_204, %c0_205] : memref<1x4x224x128xbf16, #tpu.memory_space<vmem>>, vector<1x1x160x128xbf16>
      %280 = vector.shape_cast %279 : vector<1x1x160x128xbf16> to vector<160x128xbf16>
      %281 = arith.extf %280 : vector<160x128xbf16> to vector<160x128xf32>
      %c0_206 = arith.constant 0 : index
      %c0_207 = arith.constant 0 : index
      %282 = vector.load %arg13[%c0_206, %c0_207] : memref<1x128xf32, #tpu.memory_space<vmem>>, vector<1x128xf32>
      %283 = vector.broadcast %282 : vector<1x128xf32> to vector<160x128xf32>
      %284 = arith.mulf %277, %283 : vector<160x128xf32>
      %c0_208 = arith.constant 0 : index
      %c0_209 = arith.constant 0 : index
      %285 = vector.load %arg14[%c0_208, %c0_209] : memref<1x128xf32, #tpu.memory_space<vmem>>, vector<1x128xf32>
      %286 = vector.broadcast %285 : vector<1x128xf32> to vector<160x128xf32>
      %287 = arith.addf %284, %286 : vector<160x128xf32>
      %288 = arith.addf %287, %281 : vector<160x128xf32>
      %cst_210 = arith.constant 0.000000e+00 : f32
      %289 = vector.broadcast %cst_210 : f32 to vector<160x128xf32>
      %290 = arith.maximumf %288, %289 : vector<160x128xf32>
      %291 = arith.truncf %290 : vector<160x128xf32> to vector<160x128xbf16>
      %c0_211 = arith.constant 0 : index
      %292 = arith.index_cast %arg17 : i32 to index
      %c0_212 = arith.constant 0 : index
      %c0_213 = arith.constant 0 : index
      %293 = vector.load %arg15[%c0_211, %292, %c0_212, %c0_213] : memref<1x4x160x128xbf16, #tpu.memory_space<vmem>>, vector<1x1x160x128xbf16>
      %294 = vector.shape_cast %293 : vector<1x1x160x128xbf16> to vector<160x128xbf16>
      %295 = vector.shape_cast %291 : vector<160x128xbf16> to vector<1x1x160x128xbf16>
      tpu.vector_store %arg15[%c0_211, %292, %c0_212, %c0_213], %295 {strides = array<i32>} : memref<1x4x160x128xbf16, #tpu.memory_space<vmem>>, vector<1x1x160x128xbf16>,
    }
    %c4_i32_35 = arith.constant 4 : i32
    return
  }
  func.func @transform_0(%arg0: i32, %arg1: i32) -> (i32, i32, i32, i32) {
    %c4_i32 = arith.constant 4 : i32
    %0 = arith.muli %arg1, %c4_i32 : i32
    %c1_i32 = arith.constant 1 : i32
    %1 = arith.subi %0, %c1_i32 : i32
    %c0_i32 = arith.constant 0 : i32
    %2 = arith.maxsi %1, %c0_i32 : i32
    %c0_i32_0 = arith.constant 0 : i32
    %c0_i32_1 = arith.constant 0 : i32
    %c0_i32_2 = arith.constant 0 : i32
    return %arg0, %2, %c0_i32_0, %c0_i32_1 : i32, i32, i32, i32
  }
  func.func @transform_1(%arg0: i32, %arg1: i32) -> (i32, i32, i32, i32) {
    %c0_i32 = arith.constant 0 : i32
    %c0_i32_0 = arith.constant 0 : i32
    %c0_i32_1 = arith.constant 0 : i32
    return %arg0, %arg1, %c0_i32, %c0_i32_0 : i32, i32, i32, i32
  }
  func.func @transform_2(%arg0: i32, %arg1: i32) -> (i32, i32, i32, i32) {
    %c4_i32 = arith.constant 4 : i32
    %0 = arith.muli %arg1, %c4_i32 : i32
    %c4_i32_0 = arith.constant 4 : i32
    %1 = arith.addi %0, %c4_i32_0 : i32
    %c7_i32 = arith.constant 7 : i32
    %2 = arith.minsi %1, %c7_i32 : i32
    %c0_i32 = arith.constant 0 : i32
    %c0_i32_1 = arith.constant 0 : i32
    %c0_i32_2 = arith.constant 0 : i32
    return %arg0, %2, %c0_i32, %c0_i32_1 : i32, i32, i32, i32
  }
  func.func @transform_3(%arg0: i32, %arg1: i32) -> (i32, i32) {
    %c0_i32 = arith.constant 0 : i32
    %c0_i32_0 = arith.constant 0 : i32
    %c0_i32_1 = arith.constant 0 : i32
    return %c0_i32, %c0_i32_0 : i32, i32
  }
  func.func @transform_4(%arg0: i32, %arg1: i32) -> (i32, i32) {
    %c0_i32 = arith.constant 0 : i32
    %c0_i32_0 = arith.constant 0 : i32
    %c0_i32_1 = arith.constant 0 : i32
    return %c0_i32, %c0_i32_0 : i32, i32
  }
  func.func @transform_5(%arg0: i32, %arg1: i32) -> (i32, i32) {
    %c0_i32 = arith.constant 0 : i32
    %c0_i32_0 = arith.constant 0 : i32
    %c0_i32_1 = arith.constant 0 : i32
    return %c0_i32, %c0_i32_0 : i32, i32
  }
  func.func @transform_6(%arg0: i32, %arg1: i32) -> (i32, i32) {
    %c0_i32 = arith.constant 0 : i32
    %c0_i32_0 = arith.constant 0 : i32
    %c0_i32_1 = arith.constant 0 : i32
    return %c0_i32, %c0_i32_0 : i32, i32
  }
  func.func @transform_7(%arg0: i32, %arg1: i32) -> (i32, i32, i32) {
    %c0_i32 = arith.constant 0 : i32
    %c0_i32_0 = arith.constant 0 : i32
    %c0_i32_1 = arith.constant 0 : i32
    %c0_i32_2 = arith.constant 0 : i32
    return %c0_i32, %c0_i32_0, %c0_i32_1 : i32, i32, i32
  }
  func.func @transform_8(%arg0: i32, %arg1: i32) -> (i32, i32) {
    %c0_i32 = arith.constant 0 : i32
    %c0_i32_0 = arith.constant 0 : i32
    %c0_i32_1 = arith.constant 0 : i32
    return %c0_i32, %c0_i32_0 : i32, i32
  }
  func.func @transform_9(%arg0: i32, %arg1: i32) -> (i32, i32) {
    %c0_i32 = arith.constant 0 : i32
    %c0_i32_0 = arith.constant 0 : i32
    %c0_i32_1 = arith.constant 0 : i32
    return %c0_i32, %c0_i32_0 : i32, i32
  }
  func.func @transform_10(%arg0: i32, %arg1: i32) -> (i32, i32) {
    %c0_i32 = arith.constant 0 : i32
    %c0_i32_0 = arith.constant 0 : i32
    %c0_i32_1 = arith.constant 0 : i32
    return %c0_i32, %c0_i32_0 : i32, i32
  }
  func.func @transform_11(%arg0: i32, %arg1: i32) -> (i32, i32) {
    %c0_i32 = arith.constant 0 : i32
    %c0_i32_0 = arith.constant 0 : i32
    %c0_i32_1 = arith.constant 0 : i32
    return %c0_i32, %c0_i32_0 : i32, i32
  }
  func.func @transform_12(%arg0: i32, %arg1: i32) -> (i32, i32) {
    %c0_i32 = arith.constant 0 : i32
    %c0_i32_0 = arith.constant 0 : i32
    %c0_i32_1 = arith.constant 0 : i32
    return %c0_i32, %c0_i32_0 : i32, i32
  }
  func.func @transform_13(%arg0: i32, %arg1: i32) -> (i32, i32, i32, i32) {
    %c0_i32 = arith.constant 0 : i32
    %c0_i32_0 = arith.constant 0 : i32
    %c0_i32_1 = arith.constant 0 : i32
    return %arg0, %arg1, %c0_i32, %c0_i32_0 : i32, i32, i32, i32
  }
}

</mosaic_0001>

<bundles_post_ra>
// kernel: bottleneck_pallas.1
= control target key start
LH: loop header
LB: loop body
LE: loop exit
PB: predicated region body
PF: predicated region fallthrough
CT: control target
= control target key end

     0   :  { %s14187_s25 = smov 0   ;;  %s14189_s26 = smov 0   ;;  %s16925_s0 = inlined_call_operand.vmem [shape: bf16[2,8,224,128], index: 0, kind: input, shape index: {}, may-alias: {0,1,2}]   ;;  %s16926_s1 = inlined_call_operand.vmem [shape: bf16[2,8,224,128], index: 1, kind: input, shape index: {}, may-alias: {0,1,2}]   ;;  %s16927_s2 = inlined_call_operand.vmem [shape: bf16[2,8,224,128], index: 2, kind: input, shape index: {}, may-alias: {0,1,2}]   ;;  %s16928_s3 = inlined_call_operand.vmem [shape: f32[224,1], index: 3, kind: input, shape index: {}]   ;;  %s16929_s4 = inlined_call_operand.vmem [shape: bf16[128,128], index: 4, kind: input, shape index: {}]   ;;  %s16930_s5 = inlined_call_operand.vmem [shape: f32[1,128], index: 5, kind: input, shape index: {}]   ;;  %s16931_s6 = inlined_call_operand.vmem [shape: f32[1,128], index: 6, kind: input, shape index: {}]   ;;  %s16932_s7 = inlined_call_operand.vmem [shape: bf16[27,128,128], index: 7, kind: input, shape index: {}]   ;;  %s16933_s8 = inlined_call_operand.vmem [shape: f32[1,128], index: 8, kind: input, shape index: {}]   ;;  %s16934_s9 = inlined_call_operand.vmem [shape: f32[1,128], index: 9, kind: input, shape index: {}]   ;;  %s16935_s10 = inlined_call_operand.vmem [shape: bf16[128,128], index: 10, kind: input, shape index: {}]   ;;  %s16936_s11 = inlined_call_operand.vmem [shape: f32[1,128], index: 11, kind: input, shape index: {}]   ;;  %s16937_s12 = inlined_call_operand.vmem [shape: f32[1,128], index: 12, kind: input, shape index: {}]   ;;  %s16938_s13 = inlined_call_operand.vmem [shape: bf16[2,8,160,128], index: 13, kind: output, shape index: {}]  }
   0x1   :  { %16942 = sst [smem:[#allocation8_spill]] %s16936_s11  ;;  %s14191_s27 = smov 0  }
   0x2   :  { %16943 = sst [smem:[#allocation9_spill]] %s16937_s12  ;;  %s14193_s28 = smov 0  }
   0x3   :  { %s14195_s29 = smov 0  }
   0x4 LB: > { %16944 = sst [smem:[#allocation3_spill]] %s14098_s27  ;;  %s32_s30 = sadd.s32 1, %s14098_s27  ;;  %s14106_s29 = sphi %s14195_s29, %s23_s29   ;;  %s14102_s28 = sphi %s14193_s28, %s16957_s28   ;;  %s14098_s27 = sphi %s14191_s27, %s16956_s27   ;;  %s14094_s26 = sphi %s14189_s26, %s16955_s26   ;;  %s14090_s25 = sphi %s14187_s25, %s16954_s25  }
   0x5   : > { %16945 = sst [smem:[#allocation4_spill]] %s14102_s28  ;;  %s35_s14 = sadd.s32 1, %s14102_s28 }
   0x6   : > { %16946 = sst [smem:[#allocation5_spill]] %s14106_s29  ;;  %p33_p0 = scmp.ge.s32.totalorder %s32_s30, 2 }
   0x7   : > { %p9897_p1 = scmp.ge.s32.totalorder %s14106_s29, 1  ;;  %p473_p2 = scmp.lt.s32.totalorder %s14106_s29, 5 }
   0x8   : > { %s16959_s30 = smov (%p33_p0, %s32_s30), 0  ;;  %s16961_s14 = smov (!%p33_p0, %s35_s14), %s14102_s28 }
   0x9   : > { %16947 = sst [smem:[#allocation6_spill]] %s16959_s30  ;;  %p474_p3 = pnand %p9897_p1, %p473_p2 }
   0xa   : > { %p37_p4 = scmp.ge.s32.totalorder %s16961_s14, 2  ;;  %s14228_s19 = sshll.u32 (!%p474_p3), %s14090_s25, 2 }
   0xb   : > { %477 = sbr.rel (%p474_p3) target bundleno = 1970 (0x7b2), region = 72  ;;  %p557_p5 = scmp.lt.s32.totalorder (!%p474_p3), %s14094_s26, 1 }
   0xc   : > { %s16963_s14 = smov (%p37_p4, %s16961_s14), 0  ;;  %s9899_s20 = sadd.s32 (!%p474_p3), 4294967295, %s14228_s19 }
   0xd   : > { %16948 = sst [smem:[#allocation7_spill]] %s16963_s14  ;;  %p573_p6 = scmp.lt.s32.totalorder (!%p474_p3), %s14228_s19, 7 }
   0xe   : > { %p555_p7 = scmp.gt.s32.totalorder (!%p474_p3), %s9899_s20, 0  ;;  %p9900_p8 = scmp.lt.s32.totalorder (!%p474_p3), %s9899_s20, 7 }
   0xf   : > { %s582_s15 = sadd.s32 (!%p474_p3), 4, %s14228_s19  ;;  %s1268_s30 = sadd.s32 (!%p474_p3), 1, %s14090_s25 }
  0x10   : > { %v12160_v0 = vld [vmem:[%s16929_s4 + $0x38] sm:$0xff]  ;;  %v14116_v2 = vmov 0   ;;  %v12159_v3 = vld [vmem:[%s16929_s4 + $0x30] sm:$0xff]  ;;  %v609_v4 = vld [vmem:[%s16928_s3] sm:$0xff]  ;;  %s16965_s26 = smov (!%p557_p5, %s14094_s26), 1  ;;  %s16967_s19 = smov (!%p573_p6, %s14228_s19), 7 }
  0x11   : > { %v12182_v1 = vld [vmem:[%s16929_s4 + $0x38] sm:$0xff]  ;;  %14047 = vset.pattern.permute.xlu0 %v14116_v2  ;;  %14048 = vset.pattern.permute.xlu1 %v14116_v2  ;;  %v12181_v5 = vld [vmem:[%s16929_s4 + $0x30] sm:$0xff]  ;;  %s556_s17 = scalar_select %p555_p7, %s9899_s20, 0  ;;  %v12158_v6 = vld [vmem:[%s16929_s4 + $0x28] sm:$0xff] }
  0x12   : > { %956 = vmatpush.bf16.msra.mxu0 %v12160_v0  ;;  %13792 = vmatpush.bf16.msra.mxu2 %v12160_v0  ;;  %v611_v7 = vld [vmem:[%s16928_s3 + $0x10] sm:$0xff]  ;;  %s14254_s24 = smul.u32 224, %s16965_s26  ;;  %v12180_v8 = vld [vmem:[%s16929_s4 + $0x28] sm:$0xff]  ;;  %v613_v9 = vld [vmem:[%s16928_s3 + $0x20] sm:$0xff]  ;;  %p14278_p9 = scmp.lt.s32.totalorder %s582_s15, 7 }
  0x13   : > { %1420 = vmatpush.bf16.msra.mxu1 %v12182_v1  ;;  %13800 = vmatpush.bf16.msra.mxu3 %v12182_v1  ;;  %s16969_s17 = smov (!%p9900_p8, %s556_s17), 7  ;;  %v610_v10 = vld [vmem:[%s16928_s3 + $0x8] sm:$0xff]  ;;  %s13986_s14 = smul.u32 28, %s16967_s19  ;;  %v12157_v11 = vld [vmem:[%s16929_s4 + $0x20] sm:$0xff]  ;;  %v612_v13 = vld [vmem:[%s16928_s3 + $0x18] sm:$0xff] }
  0x14   : > { %639 = vperm.xlu0 %14047, %v609_v4   ;;  %14049 = vset.pattern.permute.xlu2 %v14116_v2  ;;  %v12179_v12 = vld [vmem:[%s16929_s4 + $0x20] sm:$0xff]  ;;  %s13988_s22 = smul.u32 20, %s16967_s19  ;;  %v12156_v14 = vld [vmem:[%s16929_s4 + $0x18] sm:$0xff]  ;;  %s16971_s15 = smov (!%p14278_p9, %s582_s15), 7  ;;  %v615_v16 = vld [vmem:[%s16928_s3 + $0x30] sm:$0xff] }
  0x15   : > { %649 = vperm.xlu1 %14048, %v611_v7   ;;  %659 = vperm.xlu2 %14049, %v613_v9   ;;  %s577_s21 = sadd.s32 %s13986_s14, %s14254_s24  ;;  %s13989_s16 = smul.u32 160, %s16965_s26  ;;  %v12178_v15 = vld [vmem:[%s16929_s4 + $0x18] sm:$0xff]  ;;  %v12155_v17 = vld [vmem:[%s16929_s4 + $0x10] sm:$0xff]  ;;  %v614_v18 = vld [vmem:[%s16928_s3 + $0x28] sm:$0xff] }
  0x16   : > { %957 = vmatpush.bf16.msra.mxu0 %v12159_v3  ;;  %13793 = vmatpush.bf16.msra.mxu2 %v12159_v3  ;;  %s9907_s28 = sshll.u32 %s577_s21, 2  ;;  %s16973_s15 = smov (!%p14278_p9, %s16971_s15), 7  ;;  %v12177_v19 = vld [vmem:[%s16929_s4 + $0x10] sm:$0xff]  ;;  %v616_v20 = vld [vmem:[%s16928_s3 + $0x38] sm:$0xff]  ;;  %v12154_v21 = vld [vmem:[%s16929_s4 + $0x8] sm:$0xff] }
  0x17   : > { %1421 = vmatpush.bf16.msra.mxu1 %v12181_v5  ;;  %13801 = vmatpush.bf16.msra.mxu3 %v12181_v5  ;;  %s14290_s23 = scalar_lea.vmem %s16926_s1, %s9907_s28  ;;  %s605_s26 = sadd.s32 %s13989_s16, %s13988_s22  ;;  %v12176_v22 = vld [vmem:[%s16929_s4 + $0x8] sm:$0xff]  ;;  %v617_v24 = vld [vmem:[%s16928_s3 + $0x40] sm:$0xff]  ;;  %v619_v29 = vld [vmem:[%s16928_s3 + $0x50] sm:$0xff] }
  0x18   : > { %s13984_s28 = smul.u32 28, %s16969_s17  ;;  %s9914_s11 = sshll.u32 %s605_s26, 2  ;;  %v618_v23 = vld [vmem:[%s16928_s3 + $0x48] sm:$0xff]  ;;  %v12153_v25 = vld [vmem:[%s16929_s4] sm:$0xff]  ;;  %v620_v33 = vld [vmem:[%s16928_s3 + $0x58] sm:$0xff] }
  0x19   : > { %s14311_s20 = scalar_lea.vmem %s16938_s13, %s9914_s11  ;;  %s13987_s11 = smul.u32 28, %s16973_s15  ;;  %v12175_v26 = vld [vmem:[%s16929_s4] sm:$0xff]  ;;  %v622_v34 = vld [vmem:[%s16928_s3 + $0x68] sm:$0xff]  ;;  %v624_v35 = vld [vmem:[%s16928_s3 + $0x78] sm:$0xff] }
  0x1a   : > { %958 = vmatpush.bf16.msra.mxu0 %v12158_v6  ;;  %13794 = vmatpush.bf16.msra.mxu2 %v12158_v6  ;;  %s563_s26 = sadd.s32 %s14254_s24, %s13984_s28  ;;  %v621_v32 = vld [vmem:[%s16928_s3 + $0x60] sm:$0xff]  ;;  %v623_v36 = vld [vmem:[%s16928_s3 + $0x70] sm:$0xff]  ;;  %v626_v43 = vld [vmem:[%s16928_s3 + $0x88] sm:$0xff]  ;;  %p805_p10 = scmp.gt.s32.totalorder %s14090_s25, 0 }
  0x1b   : > { %1422 = vmatpush.bf16.msra.mxu1 %v12180_v8  ;;  %13802 = vmatpush.bf16.msra.mxu3 %v12180_v8  ;;  %s591_s21 = sadd.s32 %s13987_s11, %s14254_s24  ;;  %s9905_s28 = sshll.u32 %s563_s26, 2  ;;  %v625_v39 = vld [vmem:[%s16928_s3 + $0x80] sm:$0xff]  ;;  %v627_v42 = vld [vmem:[%s16928_s3 + $0x90] sm:$0xff]  ;;  %v628_v44 = vld [vmem:[%s16928_s3 + $0x98] sm:$0xff] }
  0x1c   : > { %644 = vperm.xlu0 %14047, %v610_v10   ;;  %s9912_s15 = sshll.u32 %s591_s21, 2  ;;  %s14347_s26 = scalar_lea.vmem %s16925_s0, %s9905_s28  ;;  %v630_v45 = vld [vmem:[%s16928_s3 + $0xa8] sm:$0xff]  ;;  %v631_v48 = vld [vmem:[%s16928_s3 + $0xb0] sm:$0xff]  ;;  %v633_v51 = vld [vmem:[%s16928_s3 + $0xc0] sm:$0xff] }
  0x1d   : > { %654 = vperm.xlu1 %14048, %v612_v13   ;;  %664 = vperm.xlu2 %14049, %v614_v18   ;;  %s14355_s19 = scalar_lea.vmem %s16927_s2, %s9912_s15  ;;  %v12139_v27 = vld [vmem:[%s14347_s26] sm:$0xff]  ;;  %v12146_v28 = vld [vmem:[%s14347_s26 + $0x38] sm:$0xff]  ;;  %v12140_v37 = vld [vmem:[%s14347_s26 + $0x8] sm:$0xff]  ;;  %p14483_p11 = scmp.lt.s32.totalorder %s1268_s30, 2 }
  0x1e   : > { %959 = vmatpush.bf16.msra.mxu0 %v12157_v11  ;;  %13795 = vmatpush.bf16.msra.mxu2 %v12157_v11  ;;  %v12161_v30 = vld [vmem:[%s14355_s19] sm:$0xff]  ;;  %v12168_v31 = vld [vmem:[%s14355_s19 + $0x38] sm:$0xff]  ;;  %v12162_v40 = vld [vmem:[%s14355_s19 + $0x8] sm:$0xff]  ;;  %s806_s15 = scalar_select %p805_p10, 1, 0 }
  0x1f   : > { %1423 = vmatpush.bf16.msra.mxu1 %v12179_v12  ;;  %13803 = vmatpush.bf16.msra.mxu3 %v12179_v12  ;;  %v12147_v38 = vld [vmem:[%s14347_s26 + $0x40] sm:$0xff]  ;;  %v12141_v46 = vld [vmem:[%s14347_s26 + $0x10] sm:$0xff]  ;;  %v12148_v47 = vld [vmem:[%s14347_s26 + $0x48] sm:$0xff]  ;;  %s1270_s25 = scalar_select %p14483_p11, 1, 0 }
  0x20   : > { %v12169_v41 = vld [vmem:[%s14355_s19 + $0x40] sm:$0xff]  ;;  %v12163_v49 = vld [vmem:[%s14355_s19 + $0x10] sm:$0xff]  ;;  %v12170_v50 = vld [vmem:[%s14355_s19 + $0x48] sm:$0xff]  ;;  %s807_s22 = scvt.s32.f32 %s806_s15  ;;  %s14751_s27 = smov 0  }
  0x21   : > { %v629_v52 = vld [vmem:[%s16928_s3 + $0xa0] sm:$0xff]  ;;  %v634_v53 = vld [vmem:[%s16928_s3 + $0xc8] sm:$0xff]  ;;  %v632_v54 = vld [vmem:[%s16928_s3 + $0xb8] sm:$0xff]  ;;  %s1271_s16 = scvt.s32.f32 %s1270_s25 }
  0x22   : > { %960 = vmatpush.bf16.msra.mxu0 %v12156_v14  ;;  %13796 = vmatpush.bf16.msra.mxu2 %v12156_v14  ;;  %v636_v55 = vld [vmem:[%s16928_s3 + $0xd8] sm:$0xff]  ;;  %v12149_v57 = vld [vmem:[%s14347_s26 + $0x50] sm:$0xff]  ;;  %v12143_v61 = vld [vmem:[%s14347_s26 + $0x20] sm:$0xff] }
  0x23   : > { %1424 = vmatpush.bf16.msra.mxu1 %v12178_v15  ;;  %13804 = vmatpush.bf16.msra.mxu3 %v12178_v15  ;;  %v12142_v56 = vld [vmem:[%s14347_s26 + $0x18] sm:$0xff]  ;;  %v12171_v59 = vld [vmem:[%s14355_s19 + $0x50] sm:$0xff]  ;;  %v12165_v63 = vld [vmem:[%s14355_s19 + $0x20] sm:$0xff] }
  0x24   : > { %669 = vperm.xlu0 %14047, %v615_v16   ;;  %v12164_v58 = vld [vmem:[%s14355_s19 + $0x18] sm:$0xff]  ;;  %v635_v60 = vld [vmem:[%s16928_s3 + $0xd0] sm:$0xff]  ;;  %v12144_v1 = vld [vmem:[%s14347_s26 + $0x28] sm:$0xff] }
  0x25   : > { %674 = vperm.xlu1 %14048, %v616_v20   ;;  %679 = vperm.xlu2 %14049, %v617_v24   ;;  %v12150_v62 = vld [vmem:[%s14347_s26 + $0x58] sm:$0xff]  ;;  %v12151_v2 = vld [vmem:[%s14347_s26 + $0x60] sm:$0xff]  ;;  %v12166_v3 = vld [vmem:[%s14355_s19 + $0x28] sm:$0xff] }
  0x26   : > { %961 = vmatpush.bf16.msra.mxu0 %v12155_v17  ;;  %13797 = vmatpush.bf16.msra.mxu2 %v12155_v17  ;;  %v12172_v0 = vld [vmem:[%s14355_s19 + $0x58] sm:$0xff]  ;;  %v12173_v4 = vld [vmem:[%s14355_s19 + $0x60] sm:$0xff]  ;;  %v12145_v5 = vld [vmem:[%s14347_s26 + $0x30] sm:$0xff] }
  0x27   : > { %1425 = vmatpush.bf16.msra.mxu1 %v12177_v19  ;;  %13805 = vmatpush.bf16.msra.mxu3 %v12177_v19  ;;  %v12152_v6 = vld [vmem:[%s14347_s26 + $0x68] sm:$0xff]  ;;  %v12167_v7 = vld [vmem:[%s14355_s19 + $0x30] sm:$0xff]  ;;  %v14458_v17 = vld [vmem:[%s16930_s5] ss:$0 sm:$0xff] }
  0x28   : > { %v12174_v8 = vld [vmem:[%s14355_s19 + $0x68] sm:$0xff]  ;;  %v14463_v18 = vld [vmem:[%s16930_s5] ss:$0 sm:$0xff] }
  0x2a   : > { %962 = vmatpush.bf16.msra.mxu0 %v12154_v21  ;;  %13798 = vmatpush.bf16.msra.mxu2 %v12154_v21 }
  0x2b   : > { %1426 = vmatpush.bf16.msra.mxu1 %v12176_v22  ;;  %13806 = vmatpush.bf16.msra.mxu3 %v12176_v22  ;;  %v14472_v22 = vld [vmem:[%s16931_s6] ss:$0 sm:$0xff] }
  0x2c   : > { %684 = vperm.xlu0 %14047, %v618_v23  }
  0x2d   : > { %689 = vperm.xlu1 %14048, %v619_v29   ;;  %694 = vperm.xlu2 %14049, %v620_v33  }
  0x2e   : > { %963 = vmatpush.bf16.msra.mxu0 %v12153_v25  ;;  %13799 = vmatpush.bf16.msra.mxu2 %v12153_v25  ;;  %v14479_v25 = vld [vmem:[%s16931_s6] ss:$0 sm:$0xff] }
  0x2f   : > { %1427 = vmatpush.bf16.msra.mxu1 %v12175_v26  ;;  %13807 = vmatpush.bf16.msra.mxu3 %v12175_v26 }
  0x31   : > { %964 = vmatmul.bf16.vlgmr.msra.gmra.mxu0 %v12139_v27  ;;  %999 = vmatmul.bf16.vlgmr.msra.gmra.mxu2 %v12146_v28 }
  0x32   : > { %1428 = vmatmul.bf16.vlgmr.msra.gmra.mxu1 %v12161_v30  ;;  %1463 = vmatmul.bf16.vlgmr.msra.gmra.mxu3 %v12168_v31 }
  0x34   : > { %699 = vperm.xlu0 %14047, %v621_v32  }
  0x35   : > { %704 = vperm.xlu1 %14048, %v622_v34   ;;  %709 = vperm.xlu2 %14049, %v623_v36  }
  0x3c   : > { %714 = vperm.xlu0 %14047, %v624_v35  }
  0x3d   : > { %719 = vperm.xlu1 %14048, %v625_v39   ;;  %724 = vperm.xlu2 %14049, %v626_v43  }
  0x41   : > { %969 = vmatmul.bf16.gmra.mxu0 %v12140_v37  ;;  %1004 = vmatmul.bf16.gmra.mxu2 %v12147_v38 }
  0x42   : > { %1433 = vmatmul.bf16.gmra.mxu1 %v12162_v40  ;;  %1468 = vmatmul.bf16.gmra.mxu3 %v12169_v41 }
  0x44   : > { %729 = vperm.xlu0 %14047, %v627_v42  }
  0x45   : > { %734 = vperm.xlu1 %14048, %v628_v44   ;;  %739 = vperm.xlu2 %14049, %v629_v52   ;;  %v14509_v52 = vstv %s1271_s16 }
  0x4c   : > { %744 = vperm.xlu0 %14047, %v630_v45  }
  0x4d   : > { %749 = vperm.xlu1 %14048, %v631_v48   ;;  %754 = vperm.xlu2 %14049, %v632_v54   ;;  %v14506_v48 = vstv %s807_s22 }
  0x51   : > { %974 = vmatmul.bf16.gmra.mxu0 %v12141_v46  ;;  %1009 = vmatmul.bf16.gmra.mxu2 %v12148_v47 }
  0x52   : > { %1438 = vmatmul.bf16.gmra.mxu1 %v12163_v49  ;;  %1473 = vmatmul.bf16.gmra.mxu3 %v12170_v50 }
  0x54   : > { %759 = vperm.xlu0 %14047, %v633_v51  }
  0x55   : > { %764 = vperm.xlu1 %14048, %v634_v53   ;;  %769 = vperm.xlu2 %14049, %v635_v60  }
  0x5c   : > { %774 = vperm.xlu0 %14047, %v636_v55  }
  0x61   : > { %979 = vmatmul.bf16.gmra.mxu0 %v12142_v56  ;;  %1014 = vmatmul.bf16.gmra.mxu2 %v12149_v57 }
  0x62   : > { %1443 = vmatmul.bf16.gmra.mxu1 %v12164_v58  ;;  %1478 = vmatmul.bf16.gmra.mxu3 %v12171_v59 }
  0x6f   : > { %v14441_v10 = vpop.permute.xlu2 %659 }
  0x71   : > { %984 = vmatmul.bf16.gmra.mxu0 %v12143_v61  ;;  %1019 = vmatmul.bf16.gmra.mxu2 %v12150_v62 }
  0x72   : > { %1448 = vmatmul.bf16.gmra.mxu1 %v12165_v63  ;;  %1483 = vmatmul.bf16.gmra.mxu3 %v12172_v0 }
  0x77   : > { %v14447_v13 = vpop.permute.xlu2 %664 }
  0x7f   : > { %v14453_v16 = vpop.permute.xlu2 %679 }
  0x81   : > { %989 = vmatmul.bf16.gmra.mxu0 %v12144_v1  ;;  %1024 = vmatmul.bf16.gmra.mxu2 %v12151_v2 }
  0x82   : > { %1453 = vmatmul.bf16.gmra.mxu1 %v12166_v3  ;;  %1488 = vmatmul.bf16.gmra.mxu3 %v12173_v4 }
  0x86   : > { %v14439_v9 = vpop.permute.xlu0 %639 }
  0x87   : > { %v14445_v12 = vpop.permute.xlu1 %649  ;;  %v14489_v29 = vpop.permute.xlu2 %694 }
  0x8e   : > { %v14443_v11 = vpop.permute.xlu0 %644 }
  0x8f   : > { %v14451_v15 = vpop.permute.xlu1 %654  ;;  %v14514_v59 = vpop.permute.xlu2 %709 }
  0x91   : > { %994 = vmatmul.bf16.gmra.mxu0 %v12145_v5  ;;  %1029 = vmatmul.bf16.gmra.mxu2 %v12152_v6 }
  0x92   : > { %1458 = vmatmul.bf16.gmra.mxu1 %v12167_v7  ;;  %1493 = vmatmul.bf16.gmra.mxu3 %v12174_v8 }
  0x96   : > { %v14449_v14 = vpop.permute.xlu0 %669 }
  0x97   : > { %v14481_v26 = vpop.permute.xlu1 %674 }
  0x9e   : > { %v14465_v19 = vpop.permute.xlu0 %684 }
  0x9f   : > { %v14503_v45 = vpop.permute.xlu1 %689 }
  0xa6   : > { %v14496_v39 = vpop.permute.xlu0 %699 }
  0xae   : > { %v965_v20 = vpop.f32.mrf.mxu0 }
  0xaf   : > { %v1039_v21 = vmul.f32 %v14458_v17, %v965_v20  ;;  %v1429_v23 = vpop.f32.mrf.mxu1 }
  0xb0   : > { %v1503_v24 = vmul.f32 %v14463_v18, %v1429_v23 }
  0xb1   : > { %v1071_v27 = vadd.f32 %v14472_v22, %v1039_v21 }
  0xb2   : > { %v1535_v28 = vadd.f32 %v14479_v25, %v1503_v24  ;;  %v14527_v24 = vpop.permute.xlu0 %714 }
  0xb3   : > { %v1099_v35 = vmax.f32 %v1071_v27, 0.0 }
  0xb4   : > { %v1000_v30 = vpop.f32.mrf.mxu2  ;;  %v1563_v38 = vmax.f32 %v1535_v28, 0.0 }
  0xb5   : > { %v1053_v31 = vmul.f32 %v14458_v17, %v1000_v30  ;;  %v1464_v32 = vpop.f32.mrf.mxu3  ;;  %v1127_v46 = vmul.f32 %v1099_v35, %v14439_v9 }
  0xb6   : > { %v1517_v33 = vmul.f32 %v14463_v18, %v1464_v32  ;;  %v967_v34 = vpop.f32.mrf.mxu0  ;;  %v1591_v49 = vmul.f32 %v1563_v38, %v14439_v9 }
  0xb7   : > { %v1040_v36 = vmul.f32 %v14458_v17, %v967_v34  ;;  %v1431_v37 = vpop.f32.mrf.mxu1  ;;  %v1085_v41 = vadd.f32 %v14472_v22, %v1053_v31  ;;  %v1156_v62 = vmul.f32 %v14506_v48, %v1127_v46 }
  0xb8   : > { %v1504_v40 = vmul.f32 %v14463_v18, %v1431_v37  ;;  %v1549_v43 = vadd.f32 %v14479_v25, %v1517_v33  ;;  %v1620_v3 = vmul.f32 %v14509_v52, %v1591_v49  ;;  %v14533_v33 = vpop.permute.xlu1 %704 }
  0xb9   : > { %v1072_v42 = vadd.f32 %v14472_v22, %v1040_v36  ;;  %v1113_v53 = vmax.f32 %v1085_v41, 0.0 }
  0xba   : > { %v1536_v44 = vadd.f32 %v14479_v25, %v1504_v40  ;;  %v1577_v57 = vmax.f32 %v1549_v43, 0.0 }
  0xbb   : > { %v1100_v47 = vmax.f32 %v1072_v42, 0.0  ;;  %v1141_v8 = vmul.f32 %v1113_v53, %v14514_v59 }
  0xbc   : > { %v1564_v50 = vmax.f32 %v1536_v44, 0.0  ;;  %v1002_v51 = vpop.f32.mrf.mxu2  ;;  %v1605_v23 = vmul.f32 %v1577_v57, %v14514_v59 }
  0xbd   : > { %v1128_v54 = vmul.f32 %v1100_v47, %v14443_v11  ;;  %v1054_v55 = vmul.f32 %v14458_v17, %v1002_v51  ;;  %v1466_v56 = vpop.f32.mrf.mxu3  ;;  %v1170_v35 = vmul.f32 %v14506_v48, %v1141_v8 }
  0xbe   : > { %v1592_v58 = vmul.f32 %v1564_v50, %v14443_v11  ;;  %v1518_v60 = vmul.f32 %v14463_v18, %v1466_v56  ;;  %v970_v61 = vpop.f32.mrf.mxu0  ;;  %v1634_v40 = vmul.f32 %v14509_v52, %v1605_v23 }
  0xbf   : > { %v1157_v63 = vmul.f32 %v14506_v48, %v1128_v54  ;;  %v1086_v0 = vadd.f32 %v14472_v22, %v1054_v55  ;;  %v1041_v1 = vmul.f32 %v14458_v17, %v970_v61  ;;  %v1434_v2 = vpop.f32.mrf.mxu1 }
  0xc0   : > { %v1621_v4 = vmul.f32 %v14509_v52, %v1592_v58  ;;  %v1550_v5 = vadd.f32 %v14479_v25, %v1518_v60  ;;  %v1505_v6 = vmul.f32 %v14463_v18, %v1434_v2 }
  0xc1   : > { %v12526_v7 = vpack.c.bf16 %v1157_v63, %v1156_v62  ;;  %v1114_v20 = vmax.f32 %v1086_v0, 0.0  ;;  %v1073_v30 = vadd.f32 %v14472_v22, %v1041_v1 }
  0xc2   : > { %v12596_v21 = vpack.c.bf16 %v1621_v4, %v1620_v3  ;;  %v1578_v27 = vmax.f32 %v1550_v5, 0.0  ;;  %v1537_v32 = vadd.f32 %v14479_v25, %v1505_v6  ;;  %v14552_v6 = vpop.permute.xlu1 %719 }
  0xc3   : > { %12527 = vst [vmem:[#allocation2] sm:$0xff] %v12526_v7   ;;  %v1142_v28 = vmul.f32 %v1114_v20, %v14527_v24  ;;  %v1101_v46 = vmax.f32 %v1073_v30, 0.0 }
  0xc4   : > { %12597 = vst [vmem:[#allocation2 + $0x230] sm:$0xff] %v12596_v21   ;;  %v1606_v31 = vmul.f32 %v1578_v27, %v14527_v24  ;;  %v1005_v34 = vpop.f32.mrf.mxu2  ;;  %v1565_v51 = vmax.f32 %v1537_v32, 0.0 }
  0xc5   : > { %v1171_v36 = vmul.f32 %v14506_v48, %v1142_v28  ;;  %v1055_v37 = vmul.f32 %v14458_v17, %v1005_v34  ;;  %v1469_v38 = vpop.f32.mrf.mxu3  ;;  %v1129_v58 = vmul.f32 %v1101_v46, %v14445_v12 }
  0xc6   : > { %v1635_v41 = vmul.f32 %v14509_v52, %v1606_v31  ;;  %v1519_v42 = vmul.f32 %v14463_v18, %v1469_v38  ;;  %v972_v43 = vpop.f32.mrf.mxu0  ;;  %v1593_v61 = vmul.f32 %v1565_v51, %v14445_v12 }
  0xc7   : > { %v12561_v44 = vpack.c.bf16 %v1171_v36, %v1170_v35  ;;  %v1042_v47 = vmul.f32 %v14458_v17, %v972_v43  ;;  %v1436_v49 = vpop.f32.mrf.mxu1  ;;  %v1087_v54 = vadd.f32 %v14472_v22, %v1055_v37  ;;  %v1158_v20 = vmul.f32 %v14506_v48, %v1129_v58 }
  0xc8   : > { %v12631_v50 = vpack.c.bf16 %v1635_v41, %v1634_v40  ;;  %v1506_v53 = vmul.f32 %v14463_v18, %v1436_v49  ;;  %v1551_v56 = vadd.f32 %v14479_v25, %v1519_v42  ;;  %v1622_v30 = vmul.f32 %v14509_v52, %v1593_v61  ;;  %v14564_v40 = vpop.permute.xlu2 %724 }
  0xc9   : > { %13189 = vst [vmem:[#allocation2 + $0x38] sm:$0xff] %v12561_v44   ;;  %v1074_v55 = vadd.f32 %v14472_v22, %v1042_v47  ;;  %v1115_v0 = vmax.f32 %v1087_v54, 0.0 }
  0xca   : > { %13202 = vst [vmem:[#allocation2 + $0x268] sm:$0xff] %v12631_v50   ;;  %v1538_v57 = vadd.f32 %v14479_v25, %v1506_v53  ;;  %v1579_v4 = vmax.f32 %v1551_v56, 0.0 }
  0xcb   : > { %v1102_v60 = vmax.f32 %v1074_v55, 0.0  ;;  %v1143_v36 = vmul.f32 %v1115_v0, %v14552_v6 }
  0xcc   : > { %v1566_v62 = vmax.f32 %v1538_v57, 0.0  ;;  %v1007_v63 = vpop.f32.mrf.mxu2  ;;  %v1607_v41 = vmul.f32 %v1579_v4, %v14552_v6 }
  0xcd   : > { %v1130_v1 = vmul.f32 %v1102_v60, %v14451_v15  ;;  %v1056_v2 = vmul.f32 %v14458_v17, %v1007_v63  ;;  %v1471_v3 = vpop.f32.mrf.mxu3  ;;  %v1172_v50 = vmul.f32 %v14506_v48, %v1143_v36 }
  0xce   : > { %v1594_v5 = vmul.f32 %v1566_v62, %v14451_v15  ;;  %v1520_v7 = vmul.f32 %v14463_v18, %v1471_v3  ;;  %v975_v8 = vpop.f32.mrf.mxu0  ;;  %v1636_v55 = vmul.f32 %v14509_v52, %v1607_v41 }
  0xcf   : > { %v1159_v21 = vmul.f32 %v14506_v48, %v1130_v1  ;;  %v1088_v23 = vadd.f32 %v14472_v22, %v1056_v2  ;;  %v1043_v27 = vmul.f32 %v14458_v17, %v975_v8  ;;  %v1439_v28 = vpop.f32.mrf.mxu1 }
  0xd0   : > { %v1623_v31 = vmul.f32 %v14509_v52, %v1594_v5  ;;  %v1552_v32 = vadd.f32 %v14479_v25, %v1520_v7  ;;  %v1507_v34 = vmul.f32 %v14463_v18, %v1439_v28 }
  0xd1   : > { %v12531_v35 = vpack.c.bf16 %v1159_v21, %v1158_v20  ;;  %v1116_v37 = vmax.f32 %v1088_v23, 0.0  ;;  %v1075_v44 = vadd.f32 %v14472_v22, %v1043_v27 }
  0xd2   : > { %v12601_v38 = vpack.c.bf16 %v1623_v31, %v1622_v30  ;;  %v1580_v42 = vmax.f32 %v1552_v32, 0.0  ;;  %v1539_v47 = vadd.f32 %v14479_v25, %v1507_v34 }
  0xd3   : > { %13183 = vst [vmem:[#allocation2 + $0x8] sm:$0xff] %v12531_v35   ;;  %v1144_v43 = vmul.f32 %v1116_v37, %v14564_v40  ;;  %v1103_v61 = vmax.f32 %v1075_v44, 0.0 }
  0xd4   : > { %13196 = vst [vmem:[#allocation2 + $0x238] sm:$0xff] %v12601_v38   ;;  %v1608_v46 = vmul.f32 %v1580_v42, %v14564_v40  ;;  %v1010_v49 = vpop.f32.mrf.mxu2  ;;  %v1567_v1 = vmax.f32 %v1539_v47, 0.0 }
  0xd5   : > { %v1173_v51 = vmul.f32 %v14506_v48, %v1144_v43  ;;  %v1057_v53 = vmul.f32 %v14458_v17, %v1010_v49  ;;  %v1474_v54 = vpop.f32.mrf.mxu3  ;;  %v1131_v8 = vmul.f32 %v1103_v61, %v14441_v10 }
  0xd6   : > { %v1637_v56 = vmul.f32 %v14509_v52, %v1608_v46  ;;  %v1521_v57 = vmul.f32 %v14463_v18, %v1474_v54  ;;  %v977_v58 = vpop.f32.mrf.mxu0  ;;  %v1595_v21 = vmul.f32 %v1567_v1, %v14441_v10  ;;  %v14593_v46 = vpop.permute.xlu0 %729 }
  0xd7   : > { %v12566_v60 = vpack.c.bf16 %v1173_v51, %v1172_v50  ;;  %v1044_v62 = vmul.f32 %v14458_v17, %v977_v58  ;;  %v1441_v63 = vpop.f32.mrf.mxu1  ;;  %v1089_v3 = vadd.f32 %v14472_v22, %v1057_v53  ;;  %v1160_v38 = vmul.f32 %v14506_v48, %v1131_v8 }
  0xd8   : > { %v12636_v0 = vpack.c.bf16 %v1637_v56, %v1636_v55  ;;  %v1508_v2 = vmul.f32 %v14463_v18, %v1441_v63  ;;  %v1553_v5 = vadd.f32 %v14479_v25, %v1521_v57  ;;  %v1624_v47 = vmul.f32 %v14509_v52, %v1595_v21  ;;  %v14600_v56 = vpop.permute.xlu1 %734 }
  0xd9   : > { %13190 = vst [vmem:[#allocation2 + $0x40] sm:$0xff] %v12566_v60   ;;  %v1076_v4 = vadd.f32 %v14472_v22, %v1044_v62  ;;  %v1117_v28 = vmax.f32 %v1089_v3, 0.0 }
  0xda   : > { %13203 = vst [vmem:[#allocation2 + $0x270] sm:$0xff] %v12636_v0   ;;  %v1540_v7 = vadd.f32 %v14479_v25, %v1508_v2  ;;  %v1581_v34 = vmax.f32 %v1553_v5, 0.0 }
  0xdb   : > { %v1104_v20 = vmax.f32 %v1076_v4, 0.0  ;;  %v1145_v53 = vmul.f32 %v1117_v28, %v14593_v46 }
  0xdc   : > { %v1568_v23 = vmax.f32 %v1540_v7, 0.0  ;;  %v1012_v27 = vpop.f32.mrf.mxu2  ;;  %v1609_v57 = vmul.f32 %v1581_v34, %v14593_v46 }
  0xdd   : > { %v1132_v30 = vmul.f32 %v1104_v20, %v14447_v13  ;;  %v1058_v31 = vmul.f32 %v14458_v17, %v1012_v27  ;;  %v1476_v32 = vpop.f32.mrf.mxu3  ;;  %v1174_v2 = vmul.f32 %v14506_v48, %v1145_v53 }
  0xde   : > { %v1596_v35 = vmul.f32 %v1568_v23, %v14447_v13  ;;  %v1522_v36 = vmul.f32 %v14463_v18, %v1476_v32  ;;  %v980_v37 = vpop.f32.mrf.mxu0  ;;  %v1638_v7 = vmul.f32 %v14509_v52, %v1609_v57 }
  0xdf   : > { %v1161_v41 = vmul.f32 %v14506_v48, %v1132_v30  ;;  %v1090_v42 = vadd.f32 %v14472_v22, %v1058_v31  ;;  %v1045_v43 = vmul.f32 %v14458_v17, %v980_v37  ;;  %v1444_v44 = vpop.f32.mrf.mxu1 }
  0xe0   : > { %v1625_v49 = vmul.f32 %v14509_v52, %v1596_v35  ;;  %v1554_v50 = vadd.f32 %v14479_v25, %v1522_v36  ;;  %v1509_v51 = vmul.f32 %v14463_v18, %v1444_v44 }
  0xe1   : > { %v12536_v54 = vpack.c.bf16 %v1161_v41, %v1160_v38  ;;  %v1118_v55 = vmax.f32 %v1090_v42, 0.0  ;;  %v1077_v62 = vadd.f32 %v14472_v22, %v1045_v43 }
  0xe2   : > { %v12606_v58 = vpack.c.bf16 %v1625_v49, %v1624_v47  ;;  %v1582_v60 = vmax.f32 %v1554_v50, 0.0  ;;  %v1541_v0 = vadd.f32 %v14479_v25, %v1509_v51 }
  0xe3   : > { %13184 = vst [vmem:[#allocation2 + $0x10] sm:$0xff] %v12536_v54   ;;  %v1146_v61 = vmul.f32 %v1118_v55, %v14600_v56  ;;  %v1105_v27 = vmax.f32 %v1077_v62, 0.0 }
  0xe4   : > { %13197 = vst [vmem:[#allocation2 + $0x240] sm:$0xff] %v12606_v58   ;;  %v1610_v63 = vmul.f32 %v1582_v60, %v14600_v56  ;;  %v1015_v1 = vpop.f32.mrf.mxu2  ;;  %v1569_v32 = vmax.f32 %v1541_v0, 0.0 }
  0xe5   : > { %v1175_v3 = vmul.f32 %v14506_v48, %v1146_v61  ;;  %v1059_v4 = vmul.f32 %v14458_v17, %v1015_v1  ;;  %v1479_v5 = vpop.f32.mrf.mxu3  ;;  %v1133_v41 = vmul.f32 %v1105_v27, %v14449_v14  ;;  %v14629_v1 = vpop.permute.xlu2 %739 }
  0xe6   : > { %v1639_v8 = vmul.f32 %v14509_v52, %v1610_v63  ;;  %v1523_v20 = vmul.f32 %v14463_v18, %v1479_v5  ;;  %v982_v21 = vpop.f32.mrf.mxu0  ;;  %v1597_v43 = vmul.f32 %v1569_v32, %v14449_v14 }
  0xe7   : > { %v12571_v23 = vpack.c.bf16 %v1175_v3, %v1174_v2  ;;  %v1046_v28 = vmul.f32 %v14458_v17, %v982_v21  ;;  %v1446_v30 = vpop.f32.mrf.mxu1  ;;  %v1091_v35 = vadd.f32 %v14472_v22, %v1059_v4  ;;  %v1162_v60 = vmul.f32 %v14506_v48, %v1133_v41  ;;  %v14636_v21 = vpop.permute.xlu0 %744 }
  0xe8   : > { %v12641_v31 = vpack.c.bf16 %v1639_v8, %v1638_v7  ;;  %v1510_v34 = vmul.f32 %v14463_v18, %v1446_v30  ;;  %v1555_v37 = vadd.f32 %v14479_v25, %v1523_v20  ;;  %v1626_v2 = vmul.f32 %v14509_v52, %v1597_v43 }
  0xe9   : > { %13191 = vst [vmem:[#allocation2 + $0x48] sm:$0xff] %v12571_v23   ;;  %v1078_v36 = vadd.f32 %v14472_v22, %v1046_v28  ;;  %v1119_v49 = vmax.f32 %v1091_v35, 0.0 }
  0xea   : > { %13204 = vst [vmem:[#allocation2 + $0x278] sm:$0xff] %v12641_v31   ;;  %v1542_v38 = vadd.f32 %v14479_v25, %v1510_v34  ;;  %v1583_v54 = vmax.f32 %v1555_v37, 0.0 }
  0xeb   : > { %v1106_v42 = vmax.f32 %v1078_v36, 0.0  ;;  %v1147_v7 = vmul.f32 %v1119_v49, %v14629_v1 }
  0xec   : > { %v1570_v44 = vmax.f32 %v1542_v38, 0.0  ;;  %v1017_v47 = vpop.f32.mrf.mxu2  ;;  %v1611_v23 = vmul.f32 %v1583_v54, %v14629_v1 }
  0xed   : > { %v1134_v50 = vmul.f32 %v1106_v42, %v14481_v26  ;;  %v1060_v51 = vmul.f32 %v14458_v17, %v1017_v47  ;;  %v1481_v53 = vpop.f32.mrf.mxu3  ;;  %v1176_v36 = vmul.f32 %v14506_v48, %v1147_v7 }
  0xee   : > { %v1598_v55 = vmul.f32 %v1570_v44, %v14481_v26  ;;  %v1524_v57 = vmul.f32 %v14463_v18, %v1481_v53  ;;  %v985_v58 = vpop.f32.mrf.mxu0  ;;  %v1640_v42 = vmul.f32 %v14509_v52, %v1611_v23 }
  0xef   : > { %v1163_v61 = vmul.f32 %v14506_v48, %v1134_v50  ;;  %v1092_v62 = vadd.f32 %v14472_v22, %v1060_v51  ;;  %v1047_v63 = vmul.f32 %v14458_v17, %v985_v58  ;;  %v1449_v0 = vpop.f32.mrf.mxu1 }
  0xf0   : > { %v1627_v3 = vmul.f32 %v14509_v52, %v1598_v55  ;;  %v1556_v4 = vadd.f32 %v14479_v25, %v1524_v57  ;;  %v1511_v5 = vmul.f32 %v14463_v18, %v1449_v0 }
  0xf1   : > { %v12541_v8 = vpack.c.bf16 %v1163_v61, %v1162_v60  ;;  %v1120_v20 = vmax.f32 %v1092_v62, 0.0  ;;  %v1079_v31 = vadd.f32 %v14472_v22, %v1047_v63 }
  0xf2   : > { %v12611_v27 = vpack.c.bf16 %v1627_v3, %v1626_v2  ;;  %v1584_v28 = vmax.f32 %v1556_v4, 0.0  ;;  %v1543_v34 = vadd.f32 %v14479_v25, %v1511_v5 }
  0xf3   : > { %13185 = vst [vmem:[#allocation2 + $0x18] sm:$0xff] %v12541_v8   ;;  %v1148_v30 = vmul.f32 %v1120_v20, %v14636_v21  ;;  %v1107_v50 = vmax.f32 %v1079_v31, 0.0 }
  0xf4   : > { %13198 = vst [vmem:[#allocation2 + $0x248] sm:$0xff] %v12611_v27   ;;  %v1612_v32 = vmul.f32 %v1584_v28, %v14636_v21  ;;  %v1020_v35 = vpop.f32.mrf.mxu2  ;;  %v1571_v55 = vmax.f32 %v1543_v34, 0.0 }
  0xf5   : > { %v1177_v37 = vmul.f32 %v14506_v48, %v1148_v30  ;;  %v1061_v38 = vmul.f32 %v14458_v17, %v1020_v35  ;;  %v1484_v41 = vpop.f32.mrf.mxu3  ;;  %v1135_v63 = vmul.f32 %v1107_v50, %v14453_v16  ;;  %v14672_v50 = vpop.permute.xlu2 %754 }
  0xf6   : > { %v1641_v43 = vmul.f32 %v14509_v52, %v1612_v32  ;;  %v1525_v44 = vmul.f32 %v14463_v18, %v1484_v41  ;;  %v987_v47 = vpop.f32.mrf.mxu0  ;;  %v1599_v2 = vmul.f32 %v1571_v55, %v14453_v16 }
  0xf7   : > { %v12576_v49 = vpack.c.bf16 %v1177_v37, %v1176_v36  ;;  %v1048_v51 = vmul.f32 %v14458_v17, %v987_v47  ;;  %v1451_v53 = vpop.f32.mrf.mxu1  ;;  %v1093_v58 = vadd.f32 %v14472_v22, %v1061_v38  ;;  %v1164_v31 = vmul.f32 %v14506_v48, %v1135_v63  ;;  %v14665_v37 = vpop.permute.xlu1 %749 }
  0xf8   : > { %v12646_v54 = vpack.c.bf16 %v1641_v43, %v1640_v42  ;;  %v1512_v57 = vmul.f32 %v14463_v18, %v1451_v53  ;;  %v1557_v61 = vadd.f32 %v14479_v25, %v1525_v44  ;;  %v1628_v38 = vmul.f32 %v14509_v52, %v1599_v2 }
  0xf9   : > { %13192 = vst [vmem:[#allocation2 + $0x50] sm:$0xff] %v12576_v49   ;;  %v1080_v60 = vadd.f32 %v14472_v22, %v1048_v51  ;;  %v1121_v5 = vmax.f32 %v1093_v58, 0.0 }
  0xfa   : > { %13205 = vst [vmem:[#allocation2 + $0x280] sm:$0xff] %v12646_v54   ;;  %v1544_v62 = vadd.f32 %v14479_v25, %v1512_v57  ;;  %v1585_v23 = vmax.f32 %v1557_v61, 0.0 }
  0xfb   : > { %v1108_v0 = vmax.f32 %v1080_v60, 0.0  ;;  %v1149_v44 = vmul.f32 %v1121_v5, %v14665_v37 }
  0xfc   : > { %v1572_v3 = vmax.f32 %v1544_v62, 0.0  ;;  %v1022_v4 = vpop.f32.mrf.mxu2  ;;  %v1613_v51 = vmul.f32 %v1585_v23, %v14665_v37 }
  0xfd   : > { %v1136_v7 = vmul.f32 %v1108_v0, %v14465_v19  ;;  %v1062_v8 = vmul.f32 %v14458_v17, %v1022_v4  ;;  %v1486_v20 = vpop.f32.mrf.mxu3  ;;  %v1178_v62 = vmul.f32 %v14506_v48, %v1149_v44 }
  0xfe   : > { %v1600_v27 = vmul.f32 %v1572_v3, %v14465_v19  ;;  %v1526_v28 = vmul.f32 %v14463_v18, %v1486_v20  ;;  %v990_v30 = vpop.f32.mrf.mxu0  ;;  %v1642_v3 = vmul.f32 %v14509_v52, %v1613_v51 }
  0xff   : > { %v1165_v32 = vmul.f32 %v14506_v48, %v1136_v7  ;;  %v1094_v34 = vadd.f32 %v14472_v22, %v1062_v8  ;;  %v1049_v35 = vmul.f32 %v14458_v17, %v990_v30  ;;  %v1454_v36 = vpop.f32.mrf.mxu1 }
 0x100   : > { %v1629_v41 = vmul.f32 %v14509_v52, %v1600_v27  ;;  %v1558_v42 = vadd.f32 %v14479_v25, %v1526_v28  ;;  %v1513_v43 = vmul.f32 %v14463_v18, %v1454_v36 }
 0x101   : > { %v12546_v47 = vpack.c.bf16 %v1165_v32, %v1164_v31  ;;  %v1122_v49 = vmax.f32 %v1094_v34, 0.0  ;;  %v1081_v57 = vadd.f32 %v14472_v22, %v1049_v35 }
 0x102   : > { %v12616_v53 = vpack.c.bf16 %v1629_v41, %v1628_v38  ;;  %v1586_v54 = vmax.f32 %v1558_v42, 0.0  ;;  %v1545_v60 = vadd.f32 %v14479_v25, %v1513_v43 }
 0x103   : > { %13186 = vst [vmem:[#allocation2 + $0x20] sm:$0xff] %v12546_v47   ;;  %v1150_v55 = vmul.f32 %v1122_v49, %v14672_v50  ;;  %v1109_v20 = vmax.f32 %v1081_v57, 0.0 }
 0x104   : > { %13199 = vst [vmem:[#allocation2 + $0x250] sm:$0xff] %v12616_v53   ;;  %v1614_v58 = vmul.f32 %v1586_v54, %v14672_v50  ;;  %v1025_v61 = vpop.f32.mrf.mxu2  ;;  %v1573_v30 = vmax.f32 %v1545_v60, 0.0 }
 0x105   : > { %v1179_v63 = vmul.f32 %v14506_v48, %v1150_v55  ;;  %v1063_v0 = vmul.f32 %v14458_v17, %v1025_v61  ;;  %v1489_v2 = vpop.f32.mrf.mxu3  ;;  %v1137_v38 = vmul.f32 %v1109_v20, %v14503_v45 }
 0x106   : > { %v1643_v4 = vmul.f32 %v14509_v52, %v1614_v58  ;;  %v1527_v5 = vmul.f32 %v14463_v18, %v1489_v2  ;;  %v992_v7 = vpop.f32.mrf.mxu0  ;;  %v1601_v42 = vmul.f32 %v1573_v30, %v14503_v45  ;;  %v14701_v2 = vpop.permute.xlu0 %759 }
 0x107   : > { %v12581_v8 = vpack.c.bf16 %v1179_v63, %v1178_v62  ;;  %v1050_v23 = vmul.f32 %v14458_v17, %v992_v7  ;;  %v1456_v27 = vpop.f32.mrf.mxu1  ;;  %v1095_v32 = vadd.f32 %v14472_v22, %v1063_v0  ;;  %v1166_v60 = vmul.f32 %v14506_v48, %v1137_v38 }
 0x108   : > { %v12651_v28 = vpack.c.bf16 %v1643_v4, %v1642_v3  ;;  %v1514_v31 = vmul.f32 %v14463_v18, %v1456_v27  ;;  %v1559_v35 = vadd.f32 %v14479_v25, %v1527_v5  ;;  %v1630_v3 = vmul.f32 %v14509_v52, %v1601_v42  ;;  %v14708_v27 = vpop.permute.xlu1 %764 }
 0x109   : > { %13193 = vst [vmem:[#allocation2 + $0x58] sm:$0xff] %v12581_v8   ;;  %v1082_v34 = vadd.f32 %v14472_v22, %v1050_v23  ;;  %v1123_v47 = vmax.f32 %v1095_v32, 0.0 }
 0x10a   : > { %13206 = vst [vmem:[#allocation2 + $0x288] sm:$0xff] %v12651_v28   ;;  %v1546_v36 = vadd.f32 %v14479_v25, %v1514_v31  ;;  %v1587_v54 = vmax.f32 %v1559_v35, 0.0 }
 0x10b   : > { %v1110_v41 = vmax.f32 %v1082_v34, 0.0  ;;  %v1151_v8 = vmul.f32 %v1123_v47, %v14701_v2 }
 0x10c   : > { %v1574_v43 = vmax.f32 %v1546_v36, 0.0  ;;  %v1027_v44 = vpop.f32.mrf.mxu2  ;;  %v1615_v28 = vmul.f32 %v1587_v54, %v14701_v2 }
 0x10d   : > { %v1138_v49 = vmul.f32 %v1110_v41, %v14489_v29  ;;  %v1064_v51 = vmul.f32 %v14458_v17, %v1027_v44  ;;  %v1491_v53 = vpop.f32.mrf.mxu3  ;;  %v1180_v41 = vmul.f32 %v14506_v48, %v1151_v8 }
 0x10e   : > { %v1602_v55 = vmul.f32 %v1574_v43, %v14489_v29  ;;  %v1528_v57 = vmul.f32 %v14463_v18, %v1491_v53  ;;  %v995_v58 = vpop.f32.mrf.mxu0  ;;  %v1644_v47 = vmul.f32 %v14509_v52, %v1615_v28 }
 0x10f   : > { %v1167_v61 = vmul.f32 %v14506_v48, %v1138_v49  ;;  %v1096_v62 = vadd.f32 %v14472_v22, %v1064_v51  ;;  %v1051_v63 = vmul.f32 %v14458_v17, %v995_v58  ;;  %v1459_v0 = vpop.f32.mrf.mxu1 }
 0x110   : > { %v1631_v4 = vmul.f32 %v14509_v52, %v1602_v55  ;;  %v1560_v5 = vadd.f32 %v14479_v25, %v1528_v57  ;;  %v1515_v7 = vmul.f32 %v14463_v18, %v1459_v0 }
 0x111   : > { %v12551_v20 = vpack.c.bf16 %v1167_v61, %v1166_v60  ;;  %v1124_v23 = vmax.f32 %v1096_v62, 0.0  ;;  %v1083_v34 = vadd.f32 %v14472_v22, %v1051_v63 }
 0x112   : > { %v12621_v30 = vpack.c.bf16 %v1631_v4, %v1630_v3  ;;  %v1588_v31 = vmax.f32 %v1560_v5, 0.0  ;;  %v1547_v36 = vadd.f32 %v14479_v25, %v1515_v7 }
 0x113   : > { %13187 = vst [vmem:[#allocation2 + $0x28] sm:$0xff] %v12551_v20   ;;  %v1152_v32 = vmul.f32 %v1124_v23, %v14708_v27  ;;  %v1111_v55 = vmax.f32 %v1083_v34, 0.0 }
 0x114   : > { %13200 = vst [vmem:[#allocation2 + $0x258] sm:$0xff] %v12621_v30   ;;  %v1616_v35 = vmul.f32 %v1588_v31, %v14708_v27  ;;  %v1030_v38 = vpop.f32.mrf.mxu2  ;;  %v1575_v61 = vmax.f32 %v1547_v36, 0.0 }
 0x115   : > { %v1181_v42 = vmul.f32 %v14506_v48, %v1152_v32  ;;  %v1065_v43 = vmul.f32 %v14458_v17, %v1030_v38  ;;  %v1494_v44 = vpop.f32.mrf.mxu3  ;;  %v1139_v5 = vmul.f32 %v1111_v55, %v14496_v39 }
 0x116   : > { %v1645_v49 = vmul.f32 %v14509_v52, %v1616_v35  ;;  %v1529_v51 = vmul.f32 %v14463_v18, %v1494_v44  ;;  %v997_v53 = vpop.f32.mrf.mxu0  ;;  %v1603_v8 = vmul.f32 %v1575_v61, %v14496_v39 }
 0x117   : > { %v12586_v54 = vpack.c.bf16 %v1181_v42, %v1180_v41  ;;  %v1052_v57 = vmul.f32 %v14458_v17, %v997_v53  ;;  %v1461_v58 = vpop.f32.mrf.mxu1  ;;  %v1097_v63 = vadd.f32 %v14472_v22, %v1065_v43  ;;  %v1168_v38 = vmul.f32 %v14506_v48, %v1139_v5  ;;  %v14736_v43 = vpop.permute.xlu2 %769 }
 0x118   : > { %v12656_v60 = vpack.c.bf16 %v1645_v49, %v1644_v47  ;;  %v1516_v62 = vmul.f32 %v14463_v18, %v1461_v58  ;;  %v1561_v3 = vadd.f32 %v14479_v25, %v1529_v51  ;;  %v1632_v44 = vmul.f32 %v14509_v52, %v1603_v8 }
 0x119   : > { %13194 = vst [vmem:[#allocation2 + $0x60] sm:$0xff] %v12586_v54   ;;  %v1084_v0 = vadd.f32 %v14472_v22, %v1052_v57  ;;  %v1125_v28 = vmax.f32 %v1097_v63, 0.0  ;;  %v14742_v54 = vpop.permute.xlu0 %774 }
 0x11a   : > { %13207 = vst [vmem:[#allocation2 + $0x290] sm:$0xff] %v12656_v60   ;;  %v1548_v4 = vadd.f32 %v14479_v25, %v1516_v62  ;;  %v1589_v34 = vmax.f32 %v1561_v3, 0.0 }
 0x11b   : > { %v1112_v7 = vmax.f32 %v1084_v0, 0.0  ;;  %v1153_v49 = vmul.f32 %v1125_v28, %v14736_v43 }
 0x11c   : > { %v1576_v20 = vmax.f32 %v1548_v4, 0.0  ;;  %v1032_v23 = vpop.f32.mrf.mxu2 }
 0x11d   : > { %v1140_v30 = vmul.f32 %v1112_v7, %v14533_v33  ;;  %v1066_v31 = vmul.f32 %v14458_v17, %v1032_v23  ;;  %v1496_v32 = vpop.f32.mrf.mxu3  ;;  %v1182_v60 = vmul.f32 %v14506_v48, %v1153_v49 }
 0x11e   : > { %v1604_v35 = vmul.f32 %v1576_v20, %v14533_v33  ;;  %v1530_v36 = vmul.f32 %v14463_v18, %v1496_v32  ;;  %v1617_v18 = vmul.f32 %v1589_v34, %v14736_v43 }
 0x11f   : > { %v1169_v41 = vmul.f32 %v14506_v48, %v1140_v30  ;;  %v1098_v42 = vadd.f32 %v14472_v22, %v1066_v31 }
 0x120   : > { %v1633_v47 = vmul.f32 %v14509_v52, %v1604_v35  ;;  %v1562_v17 = vadd.f32 %v14479_v25, %v1530_v36  ;;  %v1646_v61 = vmul.f32 %v14509_v52, %v1617_v18 }
 0x121   : > { %v12556_v51 = vpack.c.bf16 %v1169_v41, %v1168_v38  ;;  %v1126_v53 = vmax.f32 %v1098_v42, 0.0 }
 0x122   : > { %v12626_v55 = vpack.c.bf16 %v1633_v47, %v1632_v44  ;;  %v1590_v57 = vmax.f32 %v1562_v17, 0.0 }
 0x123   : > { %13188 = vst [vmem:[#allocation2 + $0x30] sm:$0xff] %v12556_v51   ;;  %v1154_v22 = vmul.f32 %v1126_v53, %v14742_v54 }
 0x124   : > { %13201 = vst [vmem:[#allocation2 + $0x260] sm:$0xff] %v12626_v55   ;;  %v1618_v58 = vmul.f32 %v1590_v57, %v14742_v54 }
 0x125   : > { %v1183_v25 = vmul.f32 %v14506_v48, %v1154_v22 }
 0x126   : > { %v1647_v62 = vmul.f32 %v14509_v52, %v1618_v58 }
 0x127   : > { %v12591_v63 = vpack.c.bf16 %v1183_v25, %v1182_v60 }
 0x128   : > { %v12661_v0 = vpack.c.bf16 %v1647_v62, %v1646_v61 }
 0x129   : > { %13195 = vst [vmem:[#allocation2 + $0x68] sm:$0xff] %v12591_v63  }
 0x12a   : > { %13208 = vst [vmem:[#allocation2 + $0x298] sm:$0xff] %v12661_v0  }
 0x12b LB: >> { %v12205_v3 = vld [vmem:[%s16929_s4 + $0x38] sm:$0xff]  ;;  %v12204_v48 = vld [vmem:[%s16929_s4 + $0x30] sm:$0xff]  ;;  %v12203_v52 = vld [vmem:[%s16929_s4 + $0x28] sm:$0xff]  ;;  %s12183_s22 = smul.u32 112, %s14110_s27  ;;  %s1710_s27 = sadd.s32 1, %s14110_s27   ;;  %s14110_s27 = sphi %s14751_s27, %s1710_s27  }
 0x12c   : >> { %13809 = vmatpush.bf16.msra.mxu2 %v12205_v3  ;;  %13810 = vmatpush.bf16.msra.mxu3 %v12205_v3  ;;  %v12202_v4 = vld [vmem:[%s16929_s4 + $0x20] sm:$0xff]  ;;  %v12201_v5 = vld [vmem:[%s16929_s4 + $0x18] sm:$0xff]  ;;  %v12200_v7 = vld [vmem:[%s16929_s4 + $0x10] sm:$0xff]  ;;  %p1707_p12 = scmp.ge.s32.totalorder %s1710_s27, 4  }
 0x12d   : >> { %1890 = vmatpush.bf16.msra.mxu0 %v12205_v3  ;;  %13808 = vmatpush.bf16.msra.mxu1 %v12205_v3  ;;  %v12199_v8 = vld [vmem:[%s16929_s4 + $0x8] sm:$0xff]  ;;  %v12198_v20 = vld [vmem:[%s16929_s4] sm:$0xff]  ;;  %s14784_s11 = scalar_lea.vmem %s14290_s23, %s12183_s22  ;;  %s14834_s30 = scalar_lea.vmem [#allocation2], %s12183_s22 }
 0x12e   : >> { %v12190_v23 = vld [vmem:[%s14784_s11 + $0x30] sm:$0xff]  ;;  %v12184_v30 = vld [vmem:[%s14784_s11] sm:$0xff]  ;;  %v12187_v31 = vld [vmem:[%s14784_s11 + $0x18] sm:$0xff]  ;;  %s14915_s14 = smov (%p1707_p12), 0  }
 0x12f   : >> { %v12194_v28 = vld [vmem:[%s14784_s11 + $0x50] sm:$0xff]  ;;  %v12191_v32 = vld [vmem:[%s14784_s11 + $0x38] sm:$0xff]  ;;  %v12185_v35 = vld [vmem:[%s14784_s11 + $0x8] sm:$0xff] }
 0x130   : >> { %13812 = vmatpush.bf16.msra.mxu2 %v12204_v48  ;;  %13813 = vmatpush.bf16.msra.mxu3 %v12204_v48  ;;  %v12195_v34 = vld [vmem:[%s14784_s11 + $0x58] sm:$0xff]  ;;  %v12188_v36 = vld [vmem:[%s14784_s11 + $0x20] sm:$0xff]  ;;  %v12186_v42 = vld [vmem:[%s14784_s11 + $0x10] sm:$0xff] }
 0x131   : >> { %1891 = vmatpush.bf16.msra.mxu0 %v12204_v48  ;;  %13811 = vmatpush.bf16.msra.mxu1 %v12204_v48  ;;  %v12192_v38 = vld [vmem:[%s14784_s11 + $0x40] sm:$0xff]  ;;  %v12189_v44 = vld [vmem:[%s14784_s11 + $0x28] sm:$0xff] }
 0x132   : >> { %v12196_v41 = vld [vmem:[%s14784_s11 + $0x60] sm:$0xff]  ;;  %v12193_v47 = vld [vmem:[%s14784_s11 + $0x48] sm:$0xff] }
 0x133   : >> { %v12197_v17 = vld [vmem:[%s14784_s11 + $0x68] sm:$0xff]  ;;  %v14803_v49 = vld [vmem:[%s16930_s5] ss:$0 sm:$0xff] }
 0x134   : >> { %13815 = vmatpush.bf16.msra.mxu2 %v12203_v52  ;;  %13816 = vmatpush.bf16.msra.mxu3 %v12203_v52  ;;  %v14810_v57 = vld [vmem:[%s16931_s6] ss:$0 sm:$0xff] }
 0x135   : >> { %1892 = vmatpush.bf16.msra.mxu0 %v12203_v52  ;;  %13814 = vmatpush.bf16.msra.mxu1 %v12203_v52 }
 0x138   : >> { %13818 = vmatpush.bf16.msra.mxu2 %v12202_v4  ;;  %13819 = vmatpush.bf16.msra.mxu3 %v12202_v4 }
 0x139   : >> { %1893 = vmatpush.bf16.msra.mxu0 %v12202_v4  ;;  %13817 = vmatpush.bf16.msra.mxu1 %v12202_v4 }
 0x13c   : >> { %13821 = vmatpush.bf16.msra.mxu2 %v12201_v5  ;;  %13822 = vmatpush.bf16.msra.mxu3 %v12201_v5 }
 0x13d   : >> { %1894 = vmatpush.bf16.msra.mxu0 %v12201_v5  ;;  %13820 = vmatpush.bf16.msra.mxu1 %v12201_v5 }
 0x140   : >> { %13824 = vmatpush.bf16.msra.mxu2 %v12200_v7  ;;  %13825 = vmatpush.bf16.msra.mxu3 %v12200_v7 }
 0x141   : >> { %1895 = vmatpush.bf16.msra.mxu0 %v12200_v7  ;;  %13823 = vmatpush.bf16.msra.mxu1 %v12200_v7 }
 0x144   : >> { %13827 = vmatpush.bf16.msra.mxu2 %v12199_v8  ;;  %13828 = vmatpush.bf16.msra.mxu3 %v12199_v8 }
 0x145   : >> { %1896 = vmatpush.bf16.msra.mxu0 %v12199_v8  ;;  %13826 = vmatpush.bf16.msra.mxu1 %v12199_v8 }
 0x148   : >> { %13830 = vmatpush.bf16.msra.mxu2 %v12198_v20  ;;  %13831 = vmatpush.bf16.msra.mxu3 %v12198_v20 }
 0x149   : >> { %1897 = vmatpush.bf16.msra.mxu0 %v12198_v20  ;;  %13829 = vmatpush.bf16.msra.mxu1 %v12198_v20 }
 0x14b   : >> { %1928 = vmatmul.bf16.vlgmr.msra.gmra.mxu2 %v12190_v23  ;;  %1948 = vmatmul.bf16.vlgmr.msra.gmra.mxu3 %v12194_v28 }
 0x14c   : >> { %1898 = vmatmul.bf16.vlgmr.msra.gmra.mxu0 %v12184_v30  ;;  %1913 = vmatmul.bf16.vlgmr.msra.gmra.mxu1 %v12187_v31 }
 0x15b   : >> { %1933 = vmatmul.bf16.gmra.mxu2 %v12191_v32  ;;  %1953 = vmatmul.bf16.gmra.mxu3 %v12195_v34 }
 0x15c   : >> { %1903 = vmatmul.bf16.gmra.mxu0 %v12185_v35  ;;  %1918 = vmatmul.bf16.gmra.mxu1 %v12188_v36 }
 0x16b   : >> { %1938 = vmatmul.bf16.gmra.mxu2 %v12192_v38  ;;  %1958 = vmatmul.bf16.gmra.mxu3 %v12196_v41 }
 0x16c   : >> { %1908 = vmatmul.bf16.gmra.mxu0 %v12186_v42  ;;  %1923 = vmatmul.bf16.gmra.mxu1 %v12189_v44 }
 0x17b   : >> { %1943 = vmatmul.bf16.gmra.mxu2 %v12193_v47  ;;  %1963 = vmatmul.bf16.gmra.mxu3 %v12197_v17 }
 0x1c9   : >> { %v1899_v51 = vpop.f32.mrf.mxu0  ;;  %v1914_v53 = vpop.f32.mrf.mxu1 }
 0x1ca   : >> { %v1973_v18 = vmul.f32 %v14803_v49, %v1899_v51  ;;  %v1979_v55 = vmul.f32 %v14803_v49, %v1914_v53 }
 0x1cc   : >> { %v2005_v60 = vadd.f32 %v14810_v57, %v1973_v18  ;;  %v2011_v25 = vadd.f32 %v14810_v57, %v1979_v55 }
 0x1ce   : >> { %v1929_v22 = vpop.f32.mrf.mxu2  ;;  %v1949_v58 = vpop.f32.mrf.mxu3  ;;  %v2033_v3 = vmax.f32 %v2005_v60, 0.0  ;;  %v2039_v48 = vmax.f32 %v2011_v25, 0.0 }
 0x1cf   : >> { %v1985_v61 = vmul.f32 %v14803_v49, %v1929_v22  ;;  %v1993_v62 = vmul.f32 %v14803_v49, %v1949_v58 }
 0x1d0   : >> { %v2061_v23 = vmul.f32 %v2033_v3, %v14439_v9  ;;  %v2067_v28 = vmul.f32 %v2039_v48, %v14449_v14 }
 0x1d1   : >> { %v1901_v63 = vpop.f32.mrf.mxu0  ;;  %v1916_v0 = vpop.f32.mrf.mxu1  ;;  %v2017_v8 = vadd.f32 %v14810_v57, %v1985_v61  ;;  %v2025_v20 = vadd.f32 %v14810_v57, %v1993_v62 }
 0x1d2   : >> { %v1974_v52 = vmul.f32 %v14803_v49, %v1901_v63  ;;  %v1980_v4 = vmul.f32 %v14803_v49, %v1916_v0 }
 0x1d3   : >> { %v2045_v42 = vmax.f32 %v2017_v8, 0.0  ;;  %v2053_v44 = vmax.f32 %v2025_v20, 0.0 }
 0x1d4   : >> { %v2006_v5 = vadd.f32 %v14810_v57, %v1974_v52  ;;  %v2012_v7 = vadd.f32 %v14810_v57, %v1980_v4 }
 0x1d5   : >> { %v2073_v61 = vmul.f32 %v2045_v42, %v14496_v39  ;;  %v2081_v62 = vmul.f32 %v2053_v44, %v14629_v1 }
 0x1d6   : >> { %v1931_v30 = vpop.f32.mrf.mxu2  ;;  %v1951_v31 = vpop.f32.mrf.mxu3  ;;  %v2034_v32 = vmax.f32 %v2006_v5, 0.0  ;;  %v2040_v34 = vmax.f32 %v2012_v7, 0.0 }
 0x1d7   : >> { %v1986_v35 = vmul.f32 %v14803_v49, %v1931_v30  ;;  %v1994_v36 = vmul.f32 %v14803_v49, %v1951_v31 }
 0x1d8   : >> { %v2062_v38 = vmul.f32 %v2034_v32, %v14443_v11  ;;  %v2068_v41 = vmul.f32 %v2040_v34, %v14481_v26 }
 0x1d9   : >> { %v2018_v47 = vadd.f32 %v14810_v57, %v1986_v35  ;;  %v2026_v17 = vadd.f32 %v14810_v57, %v1994_v36  ;;  %v1904_v51 = vpop.f32.mrf.mxu0  ;;  %v1919_v53 = vpop.f32.mrf.mxu1 }
 0x1da   : >> { %v12666_v18 = vpack.c.bf16 %v2062_v38, %v2061_v23  ;;  %v12681_v55 = vpack.c.bf16 %v2068_v41, %v2067_v28  ;;  %v1975_v22 = vmul.f32 %v14803_v49, %v1904_v51  ;;  %v1981_v58 = vmul.f32 %v14803_v49, %v1919_v53 }
 0x1db   : >> { %v2046_v60 = vmax.f32 %v2018_v47, 0.0  ;;  %v2054_v25 = vmax.f32 %v2026_v17, 0.0 }
 0x1dc   : >> { %13209 = vst [vmem:[%s14834_s30 + $0x70] sm:$0xff] %v12666_v18   ;;  %v2007_v52 = vadd.f32 %v14810_v57, %v1975_v22  ;;  %v2013_v4 = vadd.f32 %v14810_v57, %v1981_v58 }
 0x1dd   : >> { %v2074_v63 = vmul.f32 %v2046_v60, %v14533_v33  ;;  %v2082_v0 = vmul.f32 %v2054_v25, %v14636_v21  ;;  %13212 = vst [vmem:[%s14834_s30 + $0x88] sm:$0xff] %v12681_v55  }
 0x1de   : >> { %v1934_v3 = vpop.f32.mrf.mxu2  ;;  %v1954_v48 = vpop.f32.mrf.mxu3  ;;  %v2035_v30 = vmax.f32 %v2007_v52, 0.0  ;;  %v2041_v31 = vmax.f32 %v2013_v4, 0.0 }
 0x1df   : >> { %v12696_v5 = vpack.c.bf16 %v2074_v63, %v2073_v61  ;;  %v12716_v7 = vpack.c.bf16 %v2082_v0, %v2081_v62  ;;  %v1987_v8 = vmul.f32 %v14803_v49, %v1934_v3  ;;  %v1995_v20 = vmul.f32 %v14803_v49, %v1954_v48 }
 0x1e0   : >> { %v2063_v42 = vmul.f32 %v2035_v30, %v14445_v12  ;;  %v2069_v44 = vmul.f32 %v2041_v31, %v14453_v16 }
 0x1e1   : >> { %13215 = vst [vmem:[%s14834_s30 + $0xa0] sm:$0xff] %v12696_v5   ;;  %v1906_v23 = vpop.f32.mrf.mxu0  ;;  %v1921_v28 = vpop.f32.mrf.mxu1  ;;  %v2019_v38 = vadd.f32 %v14810_v57, %v1987_v8  ;;  %v2027_v41 = vadd.f32 %v14810_v57, %v1995_v20 }
 0x1e2   : >> { %13219 = vst [vmem:[%s14834_s30 + $0xc0] sm:$0xff] %v12716_v7   ;;  %v1976_v32 = vmul.f32 %v14803_v49, %v1906_v23  ;;  %v1982_v34 = vmul.f32 %v14803_v49, %v1921_v28 }
 0x1e3   : >> { %v2047_v60 = vmax.f32 %v2019_v38, 0.0  ;;  %v2055_v25 = vmax.f32 %v2027_v41, 0.0 }
 0x1e4   : >> { %v2008_v35 = vadd.f32 %v14810_v57, %v1976_v32  ;;  %v2014_v36 = vadd.f32 %v14810_v57, %v1982_v34 }
 0x1e5   : >> { %v2075_v8 = vmul.f32 %v2047_v60, %v14514_v59  ;;  %v2083_v20 = vmul.f32 %v2055_v25, %v14665_v37 }
 0x1e6   : >> { %v1936_v47 = vpop.f32.mrf.mxu2  ;;  %v1956_v17 = vpop.f32.mrf.mxu3  ;;  %v2036_v51 = vmax.f32 %v2008_v35, 0.0  ;;  %v2042_v53 = vmax.f32 %v2014_v36, 0.0 }
 0x1e7   : >> { %v1988_v18 = vmul.f32 %v14803_v49, %v1936_v47  ;;  %v1996_v55 = vmul.f32 %v14803_v49, %v1956_v17 }
 0x1e8   : >> { %v2064_v22 = vmul.f32 %v2036_v51, %v14451_v15  ;;  %v2070_v58 = vmul.f32 %v2042_v53, %v14465_v19 }
 0x1e9   : >> { %v2020_v61 = vadd.f32 %v14810_v57, %v1988_v18  ;;  %v2028_v62 = vadd.f32 %v14810_v57, %v1996_v55  ;;  %v1909_v63 = vpop.f32.mrf.mxu0  ;;  %v1924_v0 = vpop.f32.mrf.mxu1 }
 0x1ea   : >> { %v12671_v3 = vpack.c.bf16 %v2064_v22, %v2063_v42  ;;  %v12686_v48 = vpack.c.bf16 %v2070_v58, %v2069_v44  ;;  %v1977_v52 = vmul.f32 %v14803_v49, %v1909_v63  ;;  %v1983_v4 = vmul.f32 %v14803_v49, %v1924_v0 }
 0x1eb   : >> { %v2048_v5 = vmax.f32 %v2020_v61, 0.0  ;;  %v2056_v7 = vmax.f32 %v2028_v62, 0.0 }
 0x1ec   : >> { %13210 = vst [vmem:[%s14834_s30 + $0x78] sm:$0xff] %v12671_v3   ;;  %v2009_v32 = vadd.f32 %v14810_v57, %v1977_v52  ;;  %v2015_v34 = vadd.f32 %v14810_v57, %v1983_v4 }
 0x1ed   : >> { %v2076_v23 = vmul.f32 %v2048_v5, %v14527_v24  ;;  %v2084_v28 = vmul.f32 %v2056_v7, %v14672_v50  ;;  %13213 = vst [vmem:[%s14834_s30 + $0x90] sm:$0xff] %v12686_v48  }
 0x1ee   : >> { %v1939_v30 = vpop.f32.mrf.mxu2  ;;  %v1959_v31 = vpop.f32.mrf.mxu3  ;;  %v2037_v47 = vmax.f32 %v2009_v32, 0.0  ;;  %v2043_v17 = vmax.f32 %v2015_v34, 0.0 }
 0x1ef   : >> { %v12701_v35 = vpack.c.bf16 %v2076_v23, %v2075_v8  ;;  %v12721_v36 = vpack.c.bf16 %v2084_v28, %v2083_v20  ;;  %v1989_v38 = vmul.f32 %v14803_v49, %v1939_v30  ;;  %v1997_v41 = vmul.f32 %v14803_v49, %v1959_v31 }
 0x1f0   : >> { %v2065_v60 = vmul.f32 %v2037_v47, %v14441_v10  ;;  %v2071_v25 = vmul.f32 %v2043_v17, %v14503_v45 }
 0x1f1   : >> { %13216 = vst [vmem:[%s14834_s30 + $0xa8] sm:$0xff] %v12701_v35   ;;  %v1911_v42 = vpop.f32.mrf.mxu0  ;;  %v1926_v44 = vpop.f32.mrf.mxu1  ;;  %v2021_v22 = vadd.f32 %v14810_v57, %v1989_v38  ;;  %v2029_v58 = vadd.f32 %v14810_v57, %v1997_v41 }
 0x1f2   : >> { %13220 = vst [vmem:[%s14834_s30 + $0xc8] sm:$0xff] %v12721_v36   ;;  %v1978_v51 = vmul.f32 %v14803_v49, %v1911_v42  ;;  %v1984_v53 = vmul.f32 %v14803_v49, %v1926_v44 }
 0x1f3   : >> { %v2049_v5 = vmax.f32 %v2021_v22, 0.0  ;;  %v2057_v7 = vmax.f32 %v2029_v58, 0.0 }
 0x1f4   : >> { %v2010_v18 = vadd.f32 %v14810_v57, %v1978_v51  ;;  %v2016_v55 = vadd.f32 %v14810_v57, %v1984_v53 }
 0x1f5   : >> { %v2077_v32 = vmul.f32 %v2049_v5, %v14552_v6  ;;  %v2085_v34 = vmul.f32 %v2057_v7, %v14701_v2 }
 0x1f6   : >> { %v1941_v61 = vpop.f32.mrf.mxu2  ;;  %v1961_v62 = vpop.f32.mrf.mxu3  ;;  %v2038_v63 = vmax.f32 %v2010_v18, 0.0  ;;  %v2044_v0 = vmax.f32 %v2016_v55, 0.0 }
 0x1f7   : >> { %v1990_v3 = vmul.f32 %v14803_v49, %v1941_v61  ;;  %v1998_v48 = vmul.f32 %v14803_v49, %v1961_v62 }
 0x1f8   : >> { %v2066_v52 = vmul.f32 %v2038_v63, %v14447_v13  ;;  %v2072_v4 = vmul.f32 %v2044_v0, %v14489_v29 }
 0x1f9   : >> { %v2022_v8 = vadd.f32 %v14810_v57, %v1990_v3  ;;  %v2030_v20 = vadd.f32 %v14810_v57, %v1998_v48 }
 0x1fa   : >> { %v12676_v23 = vpack.c.bf16 %v2066_v52, %v2065_v60  ;;  %v12691_v28 = vpack.c.bf16 %v2072_v4, %v2071_v25 }
 0x1fb   : >> { %v2050_v30 = vmax.f32 %v2022_v8, 0.0  ;;  %v2058_v31 = vmax.f32 %v2030_v20, 0.0 }
 0x1fc   : >> { %13211 = vst [vmem:[%s14834_s30 + $0x80] sm:$0xff] %v12676_v23  }
 0x1fd   : >> { %v2078_v35 = vmul.f32 %v2050_v30, %v14564_v40  ;;  %v2086_v36 = vmul.f32 %v2058_v31, %v14708_v27  ;;  %13214 = vst [vmem:[%s14834_s30 + $0x98] sm:$0xff] %v12691_v28  }
 0x1fe   : >> { %v1944_v38 = vpop.f32.mrf.mxu2  ;;  %v1964_v41 = vpop.f32.mrf.mxu3 }
 0x1ff   : >> { %v12706_v42 = vpack.c.bf16 %v2078_v35, %v2077_v32  ;;  %v12726_v44 = vpack.c.bf16 %v2086_v36, %v2085_v34  ;;  %v1991_v47 = vmul.f32 %v14803_v49, %v1944_v38  ;;  %v1999_v17 = vmul.f32 %v14803_v49, %v1964_v41 }
 0x201   : >> { %13217 = vst [vmem:[%s14834_s30 + $0xb0] sm:$0xff] %v12706_v42   ;;  %v2023_v51 = vadd.f32 %v14810_v57, %v1991_v47  ;;  %v2031_v53 = vadd.f32 %v14810_v57, %v1999_v17 }
 0x202   : >> { %13221 = vst [vmem:[%s14834_s30 + $0xd0] sm:$0xff] %v12726_v44  }
 0x203   : >> { %v2051_v60 = vmax.f32 %v2023_v51, 0.0  ;;  %v2059_v25 = vmax.f32 %v2031_v53, 0.0 }
 0x205   : >> { %v2079_v3 = vmul.f32 %v2051_v60, %v14593_v46  ;;  %v2087_v48 = vmul.f32 %v2059_v25, %v14736_v43 }
 0x206   : >> { %v1946_v18 = vpop.f32.mrf.mxu2  ;;  %v1966_v55 = vpop.f32.mrf.mxu3 }
 0x207   : >> { %v1992_v22 = vmul.f32 %v14803_v49, %v1946_v18  ;;  %v2000_v58 = vmul.f32 %v14803_v49, %v1966_v55 }
 0x209   : >> { %v2024_v61 = vadd.f32 %v14810_v57, %v1992_v22  ;;  %v2032_v62 = vadd.f32 %v14810_v57, %v2000_v58 }
 0x20b   : >> { %v2052_v63 = vmax.f32 %v2024_v61, 0.0  ;;  %v2060_v0 = vmax.f32 %v2032_v62, 0.0 }
 0x20d   : >> { %v2080_v52 = vmul.f32 %v2052_v63, %v14600_v56  ;;  %v2088_v4 = vmul.f32 %v2060_v0, %v14742_v54 }
 0x20e   : > { %1709 = sbr.rel (!%p1707_p12) target bundleno = 299 (0x12b), region = 156 }
 0x20f   : >> { %v12711_v5 = vpack.c.bf16 %v2080_v52, %v2079_v3  ;;  %v12731_v7 = vpack.c.bf16 %v2088_v4, %v2087_v48 }
 0x211   : >> { %13218 = vst [vmem:[%s14834_s30 + $0xb8] sm:$0xff] %v12711_v5  }
 0x212   : >> { %13222 = vst [vmem:[%s14834_s30 + $0xd8] sm:$0xff] %v12731_v7  }
 0x213 LB: >> { %v12222_v49 = vld [vmem:[%s16932_s7 + $0x78] sm:$0xff]  ;;  %v12221_v10 = vld [vmem:[%s16932_s7 + $0x70] sm:$0xff]  ;;  %s12206_s21 = smul.u32 112, %s14114_s14  ;;  %v12220_v14 = vld [vmem:[%s16932_s7 + $0x68] sm:$0xff]  ;;  %vm2392_vm0 = vsmask.f32 4352  ;;  %s14114_s14 = sphi %s14915_s14, %s2154_s14  }
 0x214   : >> { %v12214_v57 = vld [vmem:[%s16932_s7 + $0x38] sm:$0xff]  ;;  %2320 = vmatpush.bf16.msra.mxu0 %v12222_v49  ;;  %v12213_v11 = vld [vmem:[%s16932_s7 + $0x30] sm:$0xff]  ;;  %v12212_v15 = vld [vmem:[%s16932_s7 + $0x28] sm:$0xff]  ;;  %vm2699_vm1 = vsmask.f32 7424  ;;  %s16951_s15 = sld [smem:[#allocation8_spill]] }
 0x215   : >> { %v12240_v8 = vld [vmem:[%s16932_s7 + $0xb8] sm:$0xff]  ;;  %2549 = vmatpush.bf16.msra.mxu1 %v12214_v57  ;;  %v12239_v12 = vld [vmem:[%s16932_s7 + $0xb0] sm:$0xff]  ;;  %v12238_v16 = vld [vmem:[%s16932_s7 + $0xa8] sm:$0xff]  ;;  %s14971_s28 = scalar_lea.vmem [#allocation2], %s12206_s21  ;;  %s16833_s25 = scalar_lea.vmem %s14290_s23, %s12206_s21 }
 0x216   : >> { %v12248_v9 = vld [vmem:[%s16932_s7 + $0xf8] sm:$0xff]  ;;  %2842 = vmatpush.bf16.msra.mxu2 %v12240_v8  ;;  %v12247_v13 = vld [vmem:[%s16932_s7 + $0xf0] sm:$0xff]  ;;  %v12246_v19 = vld [vmem:[%s16932_s7 + $0xe8] sm:$0xff]  ;;  %s16952_s16 = sld [smem:[#allocation9_spill]]  ;;  %s12522_s21 = smul.u32 80, %s14114_s14 }
 0x217   : >> { %3168 = vmatpush.bf16.msra.mxu3 %v12248_v9  ;;  %v12219_v26 = vld [vmem:[%s16932_s7 + $0x60] sm:$0xff]  ;;  %v12218_v46 = vld [vmem:[%s16932_s7 + $0x58] sm:$0xff]  ;;  %v12217_v20 = vld [vmem:[%s16932_s7 + $0x50] sm:$0xff]  ;;  %s2154_s14 = sadd.s32 1, %s14114_s14  }
 0x218   : >> { %2321 = vmatpush.bf16.msra.mxu0 %v12221_v10  ;;  %v12211_v29 = vld [vmem:[%s16932_s7 + $0x20] sm:$0xff]  ;;  %v12210_v56 = vld [vmem:[%s16932_s7 + $0x18] sm:$0xff]  ;;  %v12209_v23 = vld [vmem:[%s16932_s7 + $0x10] sm:$0xff]  ;;  %s16850_s24 = scalar_lea.vmem %s14311_s20, %s12522_s21  ;;  %p2151_p13 = scmp.ge.s32.totalorder %s2154_s14, 4  }
 0x219   : >> { %2550 = vmatpush.bf16.msra.mxu1 %v12213_v11  ;;  %v12237_v39 = vld [vmem:[%s16932_s7 + $0xa0] sm:$0xff]  ;;  %v13382_v24 = vld [vmem:[%s14971_s28 + $0x4] sm:$0xf0]   ;;  %v13384_v33 = vld [vmem:[%s14971_s28 + $0xc] sm:$0xff]  }
 0x21a   : >> { %2843 = vmatpush.bf16.msra.mxu2 %v12239_v12  ;;  %v12245_v45 = vld [vmem:[%s16932_s7 + $0xe0] sm:$0xff]  ;;  %v13402_v6 = vld [vmem:[%s14971_s28 + $0xc] sm:$0x8]  ;;  %v13833_v40 = vld [vmem:[%s14971_s28 + $0xc] sm:$0xf0]   ;;  %v2402_v43 = vshrl.u32 %v13384_v33, 16 }
 0x21b   : >> { %3169 = vmatpush.bf16.msra.mxu3 %v12247_v13  ;;  %v13235_v59 = vld [vmem:[%s14971_s28 + $0x4] sm:$0x8]  ;;  %v12223_v21 = vld [vmem:[%s14971_s28 + $0x8] sm:$0xff]  ;;  %v12236_v37 = vld [vmem:[%s16932_s7 + $0x98] sm:$0xff]  ;;  %v13403_v27 = vor.u32 %v13833_v40, %v13402_v6  ;;  %v2405_v54 = vshll.u32 %v13384_v33, 16 }
 0x21c   : >> { %2322 = vmatpush.bf16.msra.mxu0 %v12220_v14  ;;  %v13236_v1 = vor.u32 %v13382_v24, %v13235_v59  ;;  %v12244_v50 = vld [vmem:[%s16932_s7 + $0xd8] sm:$0xff]  ;;  %v14999_v31 = vld [vmem:[%s14971_s28 + $0x10] sm:$0xff]  ;;  %v2703_v32 = vshll.u32 %v12223_v21, 16  ;;  %v2404_v44 = vrot.slane %v2402_v43, 3  ;;  %v2701_v17 = vshrl.u32 %v12223_v21, 16  ;;  %v12216_v51 = vld [vmem:[%s16932_s7 + $0x48] sm:$0xff] }
 0x21d   : >> { %2551 = vmatpush.bf16.msra.mxu1 %v12212_v15  ;;  %v13835_v2 = vld [vmem:[%s14971_s28 + $0x14] sm:$0xff]   ;;  %v3013_v36 = vshrl.u32 %v13403_v27, 16  ;;  %v3016_v38 = vshll.u32 %v13403_v27, 16  ;;  %v2407_v47 = vrot.slane %v2405_v54, 4  ;;  %v12208_v53 = vld [vmem:[%s16932_s7 + $0x8] sm:$0xff]  ;;  %v2708_v58 = vshll.u32 %v14999_v31, 16 }
 0x21e   : >> { %2844 = vmatpush.bf16.msra.mxu2 %v12238_v16  ;;  %v2394_v28 = vshrl.u32 %v13236_v1, 16  ;;  %v2397_v30 = vshll.u32 %v13236_v1, 16  ;;  %v12235_v34 = vld [vmem:[%s16932_s7 + $0x90] sm:$0xff]  ;;  %v3021_v41 = vshrl.u32 %v13835_v2, 16  ;;  %v3024_v42 = vshll.u32 %v13835_v2, 16  ;;  %v12234_v60 = vld [vmem:[%s16932_s7 + $0x88] sm:$0xff] }
 0x21f   : >> { %3170 = vmatpush.bf16.msra.mxu3 %v12246_v19  ;;  %v12243_v35 = vld [vmem:[%s16932_s7 + $0xd0] sm:$0xff]  ;;  %v2705_v22 = vrot.slane %v2703_v32, 1  ;;  %v12242_v25 = vld [vmem:[%s16932_s7 + $0xc8] sm:$0xff]  ;;  %v3015_v61 = vrot.slane %v3013_v36, 3  ;;  %v3018_v62 = vrot.slane %v3016_v38, 4  ;;  %v12215_v3 = vld [vmem:[%s16932_s7 + $0x40] sm:$0xff]  ;;  %v2408_v4 = vor.u32 %v2407_v47, %v2404_v44 }
 0x220   : >> { %2323 = vmatpush.bf16.msra.mxu0 %v12219_v26  ;;  %v2396_v18 = vrot.slane %v2394_v28, 3  ;;  %v2399_v55 = vrot.slane %v2397_v30, 4  ;;  %v3023_v63 = vrot.slane %v3021_v41, 3  ;;  %v3026_v0 = vrot.slane %v3024_v42, 4  ;;  %v12207_v48 = vld [vmem:[%s16932_s7] sm:$0xff]  ;;  %v12282_v10 = vld [vmem:[%s16932_s7 + $0x1b8] sm:$0xff] }
 0x221   : >> { %2552 = vmatpush.bf16.msra.mxu1 %v12211_v29  ;;  %v12233_v5 = vld [vmem:[%s16932_s7 + $0x80] sm:$0xff]  ;;  %v2706_v49 = vor.u32 %v2705_v22, %v2701_v17  ;;  %v2710_v57 = vrot.slane %v2708_v58, 1  ;;  %v3019_v8 = vor.u32 %v3018_v62, %v3015_v61  ;;  %v12256_v11 = vld [vmem:[%s16932_s7 + $0x138] sm:$0xff]  ;;  %v13223_v12 = vld [vmem:[%s14971_s28 + $0x8] sm:$0xff]  }
 0x222   : >> { %2845 = vmatpush.bf16.msra.mxu2 %v12237_v39  ;;  %v2400_v52 = vor.u32 %v2399_v55, %v2396_v18  ;;  %v12241_v7 = vld [vmem:[%s16932_s7 + $0xc0] sm:$0xff]  ;;  %v3027_v9 = vor.u32 %v3026_v0, %v3023_v63  ;;  %v13386_v14 = vld [vmem:[%s14971_s28 + $0x14] sm:$0xff]   ;;  %v12272_v43 = vld [vmem:[%s16932_s7 + $0x168] sm:$0xff] }
 0x223   : >> { %3171 = vmatpush.bf16.msra.mxu3 %v12245_v45  ;;  %v2711_v15 = vsel %vm2699_vm1, %v2706_v49, %v2710_v57  ;;  %v12274_v19 = vld [vmem:[%s16932_s7 + $0x178] sm:$0xff]  ;;  %v12281_v29 = vld [vmem:[%s16932_s7 + $0x1b0] sm:$0xff]  ;;  %v2411_v45 = vshrl.u32 %v13386_v14, 16  ;;  %v2414_v59 = vshll.u32 %v13386_v14, 16  ;;  %v13839_v36 = vld [vmem:[%s14971_s28 + $0x24] sm:$0xff]  }
 0x224   : >> { %2324 = vmatpush.bf16.msra.mxu0 %v12218_v46  ;;  %v2409_v13 = vsel %vm2392_vm0, %v2400_v52, %v2408_v4  ;;  %v3028_v16 = vsel %vm2392_vm0, %v3019_v8, %v3027_v9  ;;  %v13837_v26 = vld [vmem:[%s14971_s28 + $0x1c] sm:$0xff]   ;;  %v12255_v39 = vld [vmem:[%s16932_s7 + $0x130] sm:$0xff]  ;;  %v12280_v46 = vld [vmem:[%s16932_s7 + $0x1a8] sm:$0xff]  ;;  %v3039_v17 = vshrl.u32 %v13839_v36, 16 }
 0x225   : >> { %2553 = vmatpush.bf16.msra.mxu1 %v12210_v56  ;;  %v12225_v24 = vld [vmem:[%s14971_s28 + $0x18] sm:$0xff]  ;;  %v3030_v33 = vshrl.u32 %v13837_v26, 16  ;;  %v3033_v6 = vshll.u32 %v13837_v26, 16  ;;  %v12273_v40 = vld [vmem:[%s16932_s7 + $0x170] sm:$0xff]  ;;  %v12254_v56 = vld [vmem:[%s16932_s7 + $0x128] sm:$0xff]  ;;  %v2413_v1 = vrot.slane %v2411_v45, 3 }
 0x226   : >> { %2846 = vmatpush.bf16.msra.mxu2 %v12236_v37  ;;  %v2416_v21 = vrot.slane %v2414_v59, 4  ;;  %v2712_v37 = vshrl.u32 %v14999_v31, 16  ;;  %v15068_v30 = vld [vmem:[%s14971_s28 + $0x10] sm:$0xff]   ;;  %v13388_v32 = vld [vmem:[%s14971_s28 + $0x1c] sm:$0xff]   ;;  %v2720_v55 = vshrl.u32 %v12225_v24, 16  ;;  %v3041_v58 = vrot.slane %v3039_v17, 3 }
 0x227   : >> { %3172 = vmatpush.bf16.msra.mxu3 %v12244_v50  ;;  %v2716_v50 = vshll.u32 %v12225_v24, 16  ;;  %v3032_v2 = vrot.slane %v3030_v33, 3  ;;  %v3035_v27 = vrot.slane %v3033_v6, 4  ;;  %v2420_v38 = vshrl.u32 %v13388_v32, 16  ;;  %v12279_v42 = vld [vmem:[%s16932_s7 + $0x1a0] sm:$0xff]  ;;  %v15084_v0 = vld [vmem:[%s14971_s28 + $0x18] sm:$0xff]  }
 0x228   : >> { %2325 = vmatpush.bf16.msra.mxu0 %v12217_v20  ;;  %v2417_v54 = vor.u32 %v2416_v21, %v2413_v1  ;;  %v2714_v20 = vor.u32 %v2712_v37, %v2710_v57  ;;  %v2423_v41 = vshll.u32 %v13388_v32, 16  ;;  %v12253_v44 = vld [vmem:[%s16932_s7 + $0x120] sm:$0xff]  ;;  %v12227_v8 = vld [vmem:[%s14971_s28 + $0x28] sm:$0xff]  ;;  %v12278_v1 = vld [vmem:[%s16932_s7 + $0x198] sm:$0xff] }
 0x229   : >> { %2554 = vmatpush.bf16.msra.mxu1 %v12209_v23  ;;  %v2718_v23 = vrot.slane %v2716_v50, 1  ;;  %v3036_v28 = vor.u32 %v3035_v27, %v3032_v2  ;;  %v12226_v47 = vld [vmem:[%s14971_s28 + $0x20] sm:$0xff]  ;;  %v2732_v14 = vshll.u32 %v12227_v8, 16  ;;  %v13392_v24 = vld [vmem:[%s14971_s28 + $0x2c] sm:$0xff]   ;;  %v12252_v21 = vld [vmem:[%s16932_s7 + $0x118] sm:$0xff] }
 0x22a   : >> { %2847 = vmatpush.bf16.msra.mxu2 %v12235_v34  ;;  %v2418_v31 = vsel %vm2392_vm0, %v2408_v4, %v2417_v54  ;;  %v2425_v18 = vrot.slane %v2423_v41, 4  ;;  %v2724_v22 = vshll.u32 %v12226_v47, 16  ;;  %v12271_v57 = vld [vmem:[%s16932_s7 + $0x160] sm:$0xff]  ;;  %v12270_v37 = vld [vmem:[%s16932_s7 + $0x158] sm:$0xff]  ;;  %v12228_v50 = vld [vmem:[%s14971_s28 + $0x30] sm:$0xff] }
 0x22b   : >> { %3173 = vmatpush.bf16.msra.mxu3 %v12243_v35  ;;  %v2719_v34 = vsel %vm2699_vm1, %v2714_v20, %v2718_v23  ;;  %v3037_v35 = vsel %vm2392_vm0, %v3027_v9, %v3036_v28  ;;  %v2722_v61 = vor.u32 %v2720_v55, %v2718_v23  ;;  %v15097_v45 = vld [vmem:[%s14971_s28 + $0x20] sm:$0xff]   ;;  %v2736_v20 = vshrl.u32 %v12227_v8, 16  ;;  %v12251_v55 = vld [vmem:[%s16932_s7 + $0x110] sm:$0xff] }
 0x22c   : >> { %2326 = vmatpush.bf16.msra.mxu0 %v12216_v51  ;;  %v3042_v51 = vshll.u32 %v13839_v36, 16  ;;  %v2726_v62 = vrot.slane %v2724_v22, 1  ;;  %v2740_v23 = vshll.u32 %v12228_v50, 16  ;;  %v13845_v17 = vld [vmem:[%s14971_s28 + $0x3c] sm:$0xff]   ;;  %v12269_v22 = vld [vmem:[%s16932_s7 + $0x150] sm:$0xff] }
 0x22d   : >> { %2555 = vmatpush.bf16.msra.mxu1 %v12208_v53  ;;  %v2422_v53 = vrot.slane %v2420_v38, 3  ;;  %v15116_v38 = vld [vmem:[%s14971_s28 + $0x28] sm:$0xff]  }
 0x22e   : >> { %2848 = vmatpush.bf16.msra.mxu2 %v12234_v60  ;;  %v3044_v60 = vrot.slane %v3042_v51, 4  ;;  %v2727_v52 = vsel %vm2699_vm1, %v2722_v61, %v2726_v62 }
 0x22f   : >> { %3174 = vmatpush.bf16.msra.mxu3 %v12242_v25  ;;  %v2426_v25 = vor.u32 %v2425_v18, %v2422_v53  ;;  %v12277_v18 = vld [vmem:[%s16932_s7 + $0x190] sm:$0xff] }
 0x230   : >> { %2327 = vmatpush.bf16.msra.mxu0 %v12215_v3  ;;  %v3045_v63 = vor.u32 %v3044_v60, %v3041_v58  ;;  %v12229_v58 = vld [vmem:[%s14971_s28 + $0x38] sm:$0xff]  ;;  %v3066_v60 = vshrl.u32 %v13845_v17, 16 }
 0x231   : >> { %2556 = vmatpush.bf16.msra.mxu1 %v12207_v48  ;;  %v2427_v3 = vsel %vm2392_vm0, %v2417_v54, %v2426_v25  ;;  %v13390_v48 = vld [vmem:[%s14971_s28 + $0x24] sm:$0xff]  }
 0x232   : >> { %2849 = vmatpush.bf16.msra.mxu2 %v12233_v5  ;;  %v3046_v4 = vsel %vm2392_vm0, %v3036_v28, %v3045_v63  ;;  %v13841_v5 = vld [vmem:[%s14971_s28 + $0x2c] sm:$0xff]   ;;  %v2432_v49 = vshll.u32 %v13390_v48, 16 }
 0x233   : >> { %3175 = vmatpush.bf16.msra.mxu3 %v12241_v7  ;;  %2328 = vmatmul.bf16.vlgmr.msra.gmra.mxu0 %v13223_v12  ;;  %v2429_v7 = vshrl.u32 %v13390_v48, 16  ;;  %v3048_v9 = vshrl.u32 %v13841_v5, 16  ;;  %v3068_v48 = vrot.slane %v3066_v60, 3  ;;  %v15173_v60 = vld [vmem:[%s14971_s28 + $0x40] sm:$0xff]  }
 0x234   : >> { %3332 = vmatpush.bf16.msrb.mxu0 %v12256_v11  ;;  %2557 = vmatmul.bf16.vlgmr.msra.gmra.mxu1 %v2409_v13  ;;  %v2434_v12 = vrot.slane %v2432_v49, 4  ;;  %v2728_v13 = vshrl.u32 %v12226_v47, 16 }
 0x235   : >> { %2850 = vmatmul.bf16.vlgmr.msra.gmra.mxu2 %v2711_v15  ;;  %3644 = vmatpush.bf16.msrb.mxu1 %v12274_v19  ;;  %v2431_v11 = vrot.slane %v2429_v7, 3  ;;  %v3050_v15 = vrot.slane %v3048_v9, 3  ;;  %v13396_v9 = vld [vmem:[%s14971_s28 + $0x3c] sm:$0xff]  }
 0x236   : >> { %3970 = vmatpush.bf16.msrb.mxu2 %v12282_v10  ;;  %3176 = vmatmul.bf16.vlgmr.msra.gmra.mxu3 %v3028_v16  ;;  %v3051_v10 = vshll.u32 %v13841_v5, 16  ;;  %v2730_v26 = vor.u32 %v2728_v13, %v2726_v62  ;;  %v2456_v13 = vshrl.u32 %v13396_v9, 16 }
 0x237   : >> { %v2435_v19 = vor.u32 %v2434_v12, %v2431_v11  ;;  %v13847_v12 = vld [vmem:[%s14971_s28 + $0x44] sm:$0xff]  }
 0x238   : >> { %3333 = vmatpush.bf16.msrb.mxu0 %v12255_v39  ;;  %v3053_v16 = vrot.slane %v3051_v10, 4 }
 0x239   : >> { %3645 = vmatpush.bf16.msrb.mxu1 %v12273_v40  ;;  %v2436_v59 = vsel %vm2392_vm0, %v2426_v25, %v2435_v19  ;;  %v13843_v40 = vld [vmem:[%s14971_s28 + $0x34] sm:$0xff]   ;;  %v3069_v25 = vshll.u32 %v13845_v17, 16 }
 0x23a   : >> { %3971 = vmatpush.bf16.msrb.mxu2 %v12281_v29  ;;  %v2734_v29 = vrot.slane %v2732_v14, 1  ;;  %v3054_v39 = vor.u32 %v3053_v16, %v3050_v15  ;;  %v3057_v2 = vshrl.u32 %v13843_v40, 16  ;;  %v3060_v27 = vshll.u32 %v13843_v40, 16  ;;  %v12276_v15 = vld [vmem:[%s16932_s7 + $0x188] sm:$0xff] }
 0x23b   : >> { %v2459_v14 = vshll.u32 %v13396_v9, 16  ;;  %v12250_v16 = vld [vmem:[%s16932_s7 + $0x108] sm:$0xff] }
 0x23c   : >> { %3334 = vmatpush.bf16.msrb.mxu0 %v12254_v56  ;;  %v2735_v33 = vsel %vm2699_vm1, %v2730_v26, %v2734_v29  ;;  %v3055_v6 = vsel %vm2392_vm0, %v3045_v63, %v3054_v39  ;;  %v2441_v56 = vshll.u32 %v13392_v24, 16  ;;  %v3059_v28 = vrot.slane %v3057_v2, 3  ;;  %v12230_v26 = vld [vmem:[%s14971_s28 + $0x40] sm:$0xff] }
 0x23d   : >> { %3646 = vmatpush.bf16.msrb.mxu1 %v12272_v43  ;;  %v2744_v63 = vshrl.u32 %v12228_v50, 16  ;;  %v15154_v50 = vld [vmem:[%s14971_s28 + $0x38] sm:$0xff]  }
 0x23e   : >> { %3972 = vmatpush.bf16.msrb.mxu2 %v12280_v46  ;;  %v2438_v46 = vshrl.u32 %v13392_v24, 16  ;;  %v2443_v54 = vrot.slane %v2441_v56, 4  ;;  %v2461_v24 = vrot.slane %v2459_v14, 4 }
 0x240   : >> { %3335 = vmatpush.bf16.msrb.mxu0 %v12253_v44  ;;  %v2440_v43 = vrot.slane %v2438_v46, 3 }
 0x241   : >> { %3647 = vmatpush.bf16.msrb.mxu1 %v12271_v57  ;;  %v15135_v57 = vld [vmem:[%s14971_s28 + $0x30] sm:$0xff]  }
 0x242   : >> { %3973 = vmatpush.bf16.msrb.mxu2 %v12279_v42  ;;  %v2444_v32 = vor.u32 %v2443_v54, %v2440_v43  ;;  %v13394_v42 = vld [vmem:[%s14971_s28 + $0x34] sm:$0xff]  }
 0x243   : >> { %2333 = vmatmul.bf16.gmra.mxu0 %v15068_v30  ;;  %v2447_v51 = vshrl.u32 %v13394_v42, 16  ;;  %v2450_v53 = vshll.u32 %v13394_v42, 16  ;;  %v2760_v42 = vshrl.u32 %v12230_v26, 16 }
 0x244   : >> { %2562 = vmatmul.bf16.gmra.mxu1 %v2418_v31  ;;  %3336 = vmatpush.bf16.msrb.mxu0 %v12252_v21  ;;  %v3062_v31 = vrot.slane %v3060_v27, 4  ;;  %v2445_v41 = vsel %vm2392_vm0, %v2435_v19, %v2444_v32  ;;  %v12268_v19 = vld [vmem:[%s16932_s7 + $0x148] sm:$0xff] }
 0x245   : >> { %2855 = vmatmul.bf16.gmra.mxu2 %v2719_v34  ;;  %3648 = vmatpush.bf16.msrb.mxu1 %v12270_v37  ;;  %v2738_v34 = vor.u32 %v2736_v20, %v2734_v29  ;;  %v2449_v61 = vrot.slane %v2447_v51, 3  ;;  %v2452_v62 = vrot.slane %v2450_v53, 4  ;;  %v3075_v29 = vshrl.u32 %v13847_v12, 16  ;;  %v13398_v27 = vld [vmem:[%s14971_s28 + $0x44] sm:$0xff]   ;;  %v13849_v20 = vld [vmem:[%s14971_s28 + $0x4c] sm:$0xff]  }
 0x246   : >> { %3181 = vmatmul.bf16.gmra.mxu3 %v3037_v35  ;;  %3974 = vmatpush.bf16.msrb.mxu2 %v12278_v1  ;;  %v2742_v35 = vrot.slane %v2740_v23, 1  ;;  %v3063_v36 = vor.u32 %v3062_v31, %v3059_v28  ;;  %v2465_v23 = vshrl.u32 %v13398_v27, 16  ;;  %v2468_v28 = vshll.u32 %v13398_v27, 16  ;;  %v12231_v31 = vld [vmem:[%s14971_s28 + $0x48] sm:$0xff]  ;;  %v12289_v51 = vld [vmem:[%s16932_s7 + $0x1f0] sm:$0xff] }
 0x247   : >> { %v3077_v40 = vrot.slane %v3075_v29, 3  ;;  %v2768_v14 = vshrl.u32 %v12231_v31, 16  ;;  %v12285_v29 = vld [vmem:[%s16932_s7 + $0x1d0] sm:$0xff] }
 0x248   : >> { %v2743_v44 = vsel %vm2699_vm1, %v2738_v34, %v2742_v35  ;;  %v3064_v47 = vsel %vm2392_vm0, %v3054_v39, %v3063_v36  ;;  %3337 = vmatpush.bf16.msrb.mxu0 %v12251_v55  ;;  %v2746_v5 = vor.u32 %v2744_v63, %v2742_v35  ;;  %v3078_v39 = vshll.u32 %v13847_v12, 16  ;;  %v12290_v35 = vld [vmem:[%s16932_s7 + $0x1f8] sm:$0xff] }
 0x249   : >> { %3649 = vmatpush.bf16.msrb.mxu1 %v12269_v22  ;;  %v3087_v34 = vshll.u32 %v13849_v20, 16  ;;  %4134 = vmatpush.bf16.msrb.mxu3 %v12290_v35 }
 0x24a   : >> { %3975 = vmatpush.bf16.msrb.mxu2 %v12277_v18  ;;  %v3080_v46 = vrot.slane %v3078_v39, 4  ;;  %v15207_v39 = vld [vmem:[%s14971_s28 + $0x58] sm:$0xff]  }
 0x24b   : >> { %v3089_v17 = vrot.slane %v3087_v34, 4 }
 0x24c   : >> { %3338 = vmatpush.bf16.msrb.mxu0 %v12250_v16  ;;  %v3081_v37 = vor.u32 %v3080_v46, %v3077_v40  ;;  %v12812_v46 = vunpack.c.h.b16 %v15207_v39 }
 0x24d   : >> { %3650 = vmatpush.bf16.msrb.mxu1 %v12268_v19  ;;  %4135 = vmatpush.bf16.msrb.mxu3 %v12289_v51 }
 0x24e   : >> { %3976 = vmatpush.bf16.msrb.mxu2 %v12276_v15 }
 0x253   : >> { %2338 = vmatmul.bf16.gmra.mxu0 %v15084_v0 }
 0x254   : >> { %2567 = vmatmul.bf16.gmra.mxu1 %v2427_v3  ;;  %v2748_v3 = vshll.u32 %v12229_v58, 16 }
 0x255   : >> { %2860 = vmatmul.bf16.gmra.mxu2 %v2727_v52  ;;  %v3071_v52 = vrot.slane %v3069_v25, 4 }
 0x256   : >> { %3186 = vmatmul.bf16.gmra.mxu3 %v3046_v4  ;;  %v2453_v4 = vor.u32 %v2452_v62, %v2449_v61  ;;  %v2750_v7 = vrot.slane %v2748_v3, 1  ;;  %v13399_v61 = vld [vmem:[%s14971_s28 + $0x4c] sm:$0xff]   ;;  %v12275_v62 = vld [vmem:[%s16932_s7 + $0x180] sm:$0xff] }
 0x257   : >> { %v3072_v49 = vor.u32 %v3071_v52, %v3068_v48  ;;  %v13850_v48 = vld [vmem:[%s14971_s28 + $0x54] sm:$0xff]   ;;  %v12287_v52 = vld [vmem:[%s16932_s7 + $0x1e0] sm:$0xff]  ;;  %3977 = vmatpush.bf16.msrb.mxu2 %v12275_v62 }
 0x258   : >> { %v2454_v8 = vsel %vm2392_vm0, %v2444_v32, %v2453_v4  ;;  %v2751_v10 = vsel %vm2699_vm1, %v2746_v5, %v2750_v7  ;;  %v3084_v32 = vshrl.u32 %v13849_v20, 16  ;;  %v2474_v5 = vshrl.u32 %v13399_v61, 16 }
 0x259   : >> { %v3073_v11 = vsel %vm2392_vm0, %v3063_v36, %v3072_v49  ;;  %v3082_v54 = vsel %vm2392_vm0, %v3072_v49, %v3081_v37  ;;  %v2467_v36 = vrot.slane %v2465_v23, 3  ;;  %v15191_v49 = vld [vmem:[%s14971_s28 + $0x50] sm:$0xff]  ;;  %v3093_v9 = vshrl.u32 %v13850_v48, 16 }
 0x25a   : >> { %v2476_v12 = vrot.slane %v2474_v5, 3  ;;  %v2772_v15 = vshll.u32 %v15191_v49, 16 }
 0x25b   : >> { %v3095_v16 = vrot.slane %v3093_v9, 3  ;;  %v13451_v9 = vld [vmem:[%s14971_s28 + $0x14] sm:$0x8] }
 0x263   : >> { %2343 = vmatmul.bf16.gmra.mxu0 %v15097_v45 }
 0x264   : >> { %2572 = vmatmul.bf16.gmra.mxu1 %v2436_v59  ;;  %v2458_v59 = vrot.slane %v2456_v13, 3 }
 0x265   : >> { %2865 = vmatmul.bf16.gmra.mxu2 %v2735_v33  ;;  %v2752_v33 = vshrl.u32 %v12229_v58, 16  ;;  %v12288_v58 = vld [vmem:[%s16932_s7 + $0x1e8] sm:$0xff] }
 0x266   : >> { %3191 = vmatmul.bf16.gmra.mxu3 %v3055_v6  ;;  %v2756_v6 = vshll.u32 %v12230_v26, 16  ;;  %v2462_v56 = vor.u32 %v2461_v24, %v2458_v59  ;;  %v15201_v26 = vld [vmem:[%s14971_s28 + $0x50] sm:$0xff]  }
 0x267   : >> { %v2754_v1 = vor.u32 %v2752_v33, %v2750_v7  ;;  %4136 = vmatpush.bf16.msrb.mxu3 %v12288_v58  ;;  %v2477_v7 = vshll.u32 %v13399_v61, 16  ;;  %v2774_v33 = vrot.slane %v2772_v15, 1  ;;  %v12316_v61 = vld [vmem:[%s16932_s7 + $0x278] sm:$0xff] }
 0x268   : >> { %v2758_v21 = vrot.slane %v2756_v6, 1  ;;  %v2463_v2 = vsel %vm2392_vm0, %v2453_v4, %v2462_v56  ;;  %v12249_v4 = vld [vmem:[%s16932_s7 + $0x100] sm:$0xff]  ;;  %v12772_v6 = vunpack.c.h.b16 %v15201_v26 }
 0x269   : >> { %3339 = vmatpush.bf16.msrb.mxu0 %v12249_v4  ;;  %v2479_v13 = vrot.slane %v2477_v7, 4 }
 0x26a   : >> { %v2759_v43 = vsel %vm2699_vm1, %v2754_v1, %v2758_v21  ;;  %v2762_v18 = vor.u32 %v2760_v42, %v2758_v21  ;;  %v2628_v1 = vld [vmem:[%s14971_s28 + $0x58] sm:$0x1] }
 0x26b   : >> { %4137 = vmatpush.bf16.msrb.mxu3 %v12287_v52  ;;  %v2480_v59 = vor.u32 %v2479_v13, %v2476_v12 }
 0x273   : >> { %2348 = vmatmul.bf16.gmra.mxu0 %v15116_v38 }
 0x274   : >> { %2577 = vmatmul.bf16.gmra.mxu1 %v2445_v41  ;;  %v2470_v41 = vrot.slane %v2468_v28, 4  ;;  %v2687_v28 = vunpack.c.l.b16 %v2628_v1 }
 0x275   : >> { %2870 = vmatmul.bf16.gmra.mxu2 %v2743_v44  ;;  %v2764_v44 = vshll.u32 %v12231_v31, 16  ;;  %v3011_v31 = vpack.c.b16 %v12812_v46, %v12812_v46 }
 0x276   : >> { %3196 = vmatmul.bf16.gmra.mxu3 %v3064_v47  ;;  %v3086_v47 = vrot.slane %v3084_v32, 3  ;;  %v2471_v53 = vor.u32 %v2470_v41, %v2467_v36  ;;  %v12283_v32 = vld [vmem:[%s16932_s7 + $0x1c0] sm:$0xff]  ;;  %v12324_v36 = vld [vmem:[%s16932_s7 + $0x2b8] sm:$0xff]  ;;  %v2698_v42 = vpack.c.b16 %v2687_v28, %v2687_v28 }
 0x277   : >> { %v2766_v55 = vrot.slane %v2764_v44, 1  ;;  %v12308_v41 = vld [vmem:[%s16932_s7 + $0x238] sm:$0xff]  ;;  %v3102_v44 = vshrl.u32 %v3011_v31, 16  ;;  %4940 = vmatpush.bf16.msra.mxu2 %v12324_v36 }
 0x278   : >> { %v3090_v22 = vor.u32 %v3089_v17, %v3086_v47  ;;  %v2472_v25 = vsel %vm2392_vm0, %v2462_v56, %v2471_v53  ;;  %v12284_v56 = vld [vmem:[%s16932_s7 + $0x1c8] sm:$0xff]  ;;  %v2481_v27 = vsel %vm2392_vm0, %v2471_v53, %v2480_v59  ;;  %v3105_v47 = vshll.u32 %v3011_v31, 16  ;;  %4446 = vmatpush.bf16.msra.mxu0 %v12308_v41 }
 0x279   : >> { %v2767_v63 = vsel %vm2699_vm1, %v2762_v18, %v2766_v55  ;;  %v2770_v24 = vor.u32 %v2768_v14, %v2766_v55 }
 0x27a   : >> { %v3091_v3 = vsel %vm2392_vm0, %v3081_v37, %v3090_v22 }
 0x283   : >> { %2353 = vmatmul.bf16.gmra.mxu0 %v15135_v57 }
 0x284   : >> { %2582 = vmatmul.bf16.gmra.mxu1 %v2454_v8  ;;  %v12267_v8 = vld [vmem:[%s16932_s7 + $0x140] sm:$0xff] }
 0x285   : >> { %2875 = vmatmul.bf16.gmra.mxu2 %v2751_v10  ;;  %v3096_v10 = vshll.u32 %v13850_v48, 16  ;;  %3651 = vmatpush.bf16.msrb.mxu1 %v12267_v8  ;;  %v3107_v48 = vrot.slane %v3105_v47, 4 }
 0x286   : >> { %3201 = vmatmul.bf16.gmra.mxu3 %v3073_v11  ;;  %v12286_v11 = vld [vmem:[%s16932_s7 + $0x1d8] sm:$0xff] }
 0x287   : >> { %v3098_v19 = vrot.slane %v3096_v10, 4  ;;  %4138 = vmatpush.bf16.msrb.mxu3 %v12286_v11  ;;  %v13852_v10 = vld [vmem:[%s14971_s28 + $0x14] sm:$0xf0]  }
 0x289   : >> { %v15210_v40 = vor.u32 %v3098_v19, %v3095_v16  ;;  %4776 = vmatpush.bf16.msra.mxu1 %v12316_v61  ;;  %v12257_v16 = vld [vmem:[%s14971_s28 + $0x10] sm:$0xff]  ;;  %v13452_v19 = vor.u32 %v13852_v10, %v13451_v9 }
 0x28a   : >> { %v3505_v1 = vshll.u32 %v12257_v16, 16 }
 0x28b   : >> { %4139 = vmatpush.bf16.msrb.mxu3 %v12285_v29  ;;  %v3100_v23 = vsel %vm2392_vm0, %v3090_v22, %v15210_v40 }
 0x28c   : >> { %v3507_v31 = vrot.slane %v3505_v1, 1 }
 0x28f   : >> { %4140 = vmatpush.bf16.msrb.mxu3 %v12284_v56  ;;  %v12258_v56 = vld [vmem:[%s14971_s28 + $0x18] sm:$0xff] }
 0x293   : >> { %2358 = vmatmul.bf16.gmra.mxu0 %v15154_v50  ;;  %4141 = vmatpush.bf16.msrb.mxu3 %v12283_v32  ;;  %v3510_v32 = vshll.u32 %v12258_v56, 16 }
 0x294   : >> { %2587 = vmatmul.bf16.gmra.mxu1 %v2463_v2  ;;  %v15218_v2 = vld [vmem:[%s14971_s28 + $0x48] sm:$0xff]  }
 0x295   : >> { %2880 = vmatmul.bf16.gmra.mxu2 %v2759_v43  ;;  %v2775_v43 = vsel %vm2699_vm1, %v2770_v24, %v2774_v33 }
 0x296   : >> { %3206 = vmatmul.bf16.gmra.mxu3 %v3082_v54  ;;  %v2391_v54 = vpack.c.b16 %v12772_v6, %v12772_v6  ;;  %v13854_v6 = vld [vmem:[%s14971_s28 + $0x1c] sm:$0xff]  }
 0x298   : >> { %v2483_v34 = vshrl.u32 %v2391_v54, 16  ;;  %v2486_v35 = vshll.u32 %v2391_v54, 16 }
 0x29a   : >> { %v2485_v22 = vrot.slane %v2483_v34, 3  ;;  %v2488_v58 = vrot.slane %v2486_v35, 4  ;;  %v12323_v35 = vld [vmem:[%s16932_s7 + $0x2b0] sm:$0xff] }
 0x29b   : >> { %4941 = vmatpush.bf16.msra.mxu2 %v12323_v35 }
 0x29c   : >> { %v2489_v4 = vor.u32 %v2488_v58, %v2485_v22 }
 0x29e   : >> { %v2490_v15 = vsel %vm2392_vm0, %v2480_v59, %v2489_v4  ;;  %v3818_v59 = vshll.u32 %v13452_v19, 16 }
 0x2a0   : >> { %v3820_v41 = vrot.slane %v3818_v59, 4 }
 0x2a3   : >> { %2363 = vmatmul.bf16.gmra.mxu0 %v15173_v60 }
 0x2a4   : >> { %2592 = vmatmul.bf16.gmra.mxu1 %v2472_v25  ;;  %v2776_v25 = vshrl.u32 %v15191_v49, 16 }
 0x2a5   : >> { %2885 = vmatmul.bf16.gmra.mxu2 %v2767_v63  ;;  %v2780_v63 = vshll.u32 %v2698_v42, 16 }
 0x2a6   : >> { %3211 = vmatmul.bf16.gmra.mxu3 %v3091_v3  ;;  %v3104_v3 = vrot.slane %v3102_v44, 3  ;;  %v2778_v5 = vor.u32 %v2776_v25, %v2774_v33 }
 0x2a7   : >> { %v2782_v7 = vrot.slane %v2780_v63, 1 }
 0x2a8   : >> { %v3108_v8 = vor.u32 %v3107_v48, %v3104_v3 }
 0x2a9   : >> { %v2783_v24 = vsel %vm2699_vm1, %v2778_v5, %v2782_v7  ;;  %v13856_v5 = vld [vmem:[%s14971_s28 + $0x24] sm:$0xff]  }
 0x2aa   : >> { %v3109_v33 = vsel %vm2392_vm0, %v15210_v40, %v3108_v8  ;;  %v12259_v8 = vld [vmem:[%s14971_s28 + $0x20] sm:$0xff]  ;;  %v3832_v9 = vshrl.u32 %v13856_v5, 16  ;;  %v3835_v10 = vshll.u32 %v13856_v5, 16 }
 0x2b0   : >> { %v2329_v21 = vpop.f32.mrf.mxu0 }
 0x2b1   : >> { %v2558_v37 = vpop.f32.mrf.mxu1 }
 0x2b2   : >> { %v2559_v20 = vadd.f32 %v2558_v37, %v2329_v21  ;;  %v3815_v21 = vshrl.u32 %v13452_v19, 16  ;;  %v3823_v37 = vshrl.u32 %v13854_v6, 16 }
 0x2b3   : >> { %2368 = vmatmul.bf16.gmra.mxu0 %v15218_v2 }
 0x2b4   : >> { %2597 = vmatmul.bf16.gmra.mxu1 %v2481_v27  ;;  %v3826_v27 = vshll.u32 %v13854_v6, 16  ;;  %v3817_v34 = vrot.slane %v3815_v21, 3  ;;  %v3825_v42 = vrot.slane %v3823_v37, 3  ;;  %v12306_v6 = vld [vmem:[%s16932_s7 + $0x228] sm:$0xff] }
 0x2b5   : >> { %2890 = vmatmul.bf16.gmra.mxu2 %v2775_v43 }
 0x2b6   : >> { %3216 = vmatmul.bf16.gmra.mxu3 %v3100_v23  ;;  %v3828_v44 = vrot.slane %v3826_v27, 4 }
 0x2b8   : >> { %v2851_v17 = vpop.f32.mrf.mxu2  ;;  %v2331_v18 = vpop.f32.mrf.mxu0  ;;  %v3829_v22 = vor.u32 %v3828_v44, %v3825_v42 }
 0x2b9   : >> { %v3177_v51 = vpop.f32.mrf.mxu3  ;;  %v2901_v53 = vadd.f32 %v2851_v17, %v2559_v20  ;;  %v2560_v55 = vpop.f32.mrf.mxu1  ;;  %v3503_v20 = vshrl.u32 %v12257_v16, 16  ;;  %v12307_v17 = vld [vmem:[%s16932_s7 + $0x230] sm:$0xff]  ;;  %v3518_v16 = vshll.u32 %v12259_v8, 16 }
 0x2ba   : >> { %v2561_v62 = vadd.f32 %v2560_v55, %v2331_v18  ;;  %v3512_v18 = vrot.slane %v3510_v32, 1  ;;  %4447 = vmatpush.bf16.msra.mxu0 %v12307_v17  ;;  %v3821_v55 = vor.u32 %v3820_v41, %v3817_v34  ;;  %v12260_v34 = vld [vmem:[%s14971_s28 + $0x28] sm:$0xff] }
 0x2bb   : >> { %v15238_v52 = vadd.f32 %v3177_v51, %v2901_v53  ;;  %v12315_v51 = vld [vmem:[%s16932_s7 + $0x270] sm:$0xff]  ;;  %v3508_v53 = vor.u32 %v3507_v31, %v3503_v20  ;;  %v3520_v21 = vrot.slane %v3518_v16, 1 }
 0x2bc   : >> { %4777 = vmatpush.bf16.msra.mxu1 %v12315_v51  ;;  %v3830_v4 = vsel %vm2392_vm0, %v3821_v55, %v3829_v22  ;;  %v13858_v31 = vld [vmem:[%s14971_s28 + $0x2c] sm:$0xff]  }
 0x2bd   : >> { %v3513_v3 = vsel %vm2699_vm1, %v3508_v53, %v3512_v18  ;;  %v3841_v35 = vshrl.u32 %v13858_v31, 16  ;;  %v3522_v53 = vshrl.u32 %v12259_v8, 16  ;;  %v12321_v8 = vld [vmem:[%s16932_s7 + $0x2a0] sm:$0xff] }
 0x2be   : >> { %4448 = vmatpush.bf16.msra.mxu0 %v12306_v6 }
 0x2c0   : >> { %v2853_v49 = vpop.f32.mrf.mxu2  ;;  %v2334_v13 = vpop.f32.mrf.mxu0 }
 0x2c1   : >> { %v3179_v11 = vpop.f32.mrf.mxu3  ;;  %v2902_v12 = vadd.f32 %v2853_v49, %v2561_v62  ;;  %v2563_v14 = vpop.f32.mrf.mxu1 }
 0x2c2   : >> { %v2564_v29 = vadd.f32 %v2563_v14, %v2334_v13 }
 0x2c3   : >> { %v15248_v46 = vadd.f32 %v3179_v11, %v2902_v12  ;;  %2373 = vmatmul.bf16.gmra.mxu0 %v15201_v26 }
 0x2c4   : >> { %2602 = vmatmul.bf16.gmra.mxu1 %v2490_v15  ;;  %v3514_v15 = vshrl.u32 %v12258_v56, 16 }
 0x2c5   : >> { %2895 = vmatmul.bf16.gmra.mxu2 %v2783_v24  ;;  %v3837_v24 = vrot.slane %v3835_v10, 4 }
 0x2c6   : >> { %3221 = vmatmul.bf16.gmra.mxu3 %v3109_v33  ;;  %v3516_v1 = vor.u32 %v3514_v15, %v3512_v18  ;;  %v3526_v18 = vshll.u32 %v12260_v34, 16  ;;  %v12313_v15 = vld [vmem:[%s16932_s7 + $0x260] sm:$0xff] }
 0x2c8   : >> { %v2856_v43 = vpop.f32.mrf.mxu2  ;;  %v2336_v28 = vpop.f32.mrf.mxu0  ;;  %v3521_v20 = vsel %vm2699_vm1, %v3516_v1, %v3520_v21 }
 0x2c9   : >> { %v3182_v54 = vpop.f32.mrf.mxu3  ;;  %v2903_v23 = vadd.f32 %v2856_v43, %v2564_v29  ;;  %v2565_v40 = vpop.f32.mrf.mxu1  ;;  %v3834_v29 = vrot.slane %v3832_v9, 3 }
 0x2ca   : >> { %v2566_v36 = vadd.f32 %v2565_v40, %v2336_v28 }
 0x2cb   : >> { %v15255_v47 = vadd.f32 %v3182_v54, %v2903_v23  ;;  %v3838_v56 = vor.u32 %v3837_v24, %v3834_v29  ;;  %v12314_v23 = vld [vmem:[%s16932_s7 + $0x268] sm:$0xff] }
 0x2cc   : >> { %4778 = vmatpush.bf16.msra.mxu1 %v12314_v23 }
 0x2cd   : >> { %v3839_v40 = vsel %vm2392_vm0, %v3829_v22, %v3838_v56  ;;  %v3843_v22 = vrot.slane %v3841_v35, 3 }
 0x2d0   : >> { %v2858_v58 = vpop.f32.mrf.mxu2  ;;  %v2339_v62 = vpop.f32.mrf.mxu0  ;;  %4779 = vmatpush.bf16.msra.mxu1 %v12313_v15 }
 0x2d1   : >> { %v3184_v25 = vpop.f32.mrf.mxu3  ;;  %v2904_v61 = vadd.f32 %v2858_v58, %v2566_v36  ;;  %v2568_v63 = vpop.f32.mrf.mxu1  ;;  %v3844_v36 = vshll.u32 %v13858_v31, 16 }
 0x2d2   : >> { %v2569_v48 = vadd.f32 %v2568_v63, %v2339_v62 }
 0x2d3   : >> { %v15266_v7 = vadd.f32 %v3184_v25, %v2904_v61  ;;  %3340 = vmatmul.bf16.vlgmr.msrb.gmra.mxu0 %v15068_v30  ;;  %v12322_v30 = vld [vmem:[%s16932_s7 + $0x2a8] sm:$0xff]  ;;  %v3846_v58 = vrot.slane %v3844_v36, 4  ;;  %v3528_v61 = vrot.slane %v3526_v18, 1 }
 0x2d4   : >> { %3652 = vmatmul.bf16.vlgmr.msrb.gmra.mxu1 %v3513_v3  ;;  %4942 = vmatpush.bf16.msra.mxu2 %v12322_v30 }
 0x2d5   : >> { %3978 = vmatmul.bf16.vlgmr.msrb.gmra.mxu2 %v3830_v4  ;;  %v3847_v62 = vor.u32 %v3846_v58, %v3843_v22 }
 0x2d6   : >> { %4142 = vmatmul.bf16.vlgmr.msrb.gmra.mxu3 %v15084_v0 }
 0x2d8   : >> { %v2861_v49 = vpop.f32.mrf.mxu2  ;;  %v2341_v13 = vpop.f32.mrf.mxu0  ;;  %4943 = vmatpush.bf16.msra.mxu2 %v12321_v8 }
 0x2d9   : >> { %v3187_v11 = vpop.f32.mrf.mxu3  ;;  %v2905_v12 = vadd.f32 %v2861_v49, %v2569_v48  ;;  %v2570_v14 = vpop.f32.mrf.mxu1  ;;  %v3848_v49 = vsel %vm2392_vm0, %v3838_v56, %v3847_v62 }
 0x2da   : >> { %v2571_v19 = vadd.f32 %v2570_v14, %v2341_v13  ;;  %v12305_v13 = vld [vmem:[%s16932_s7 + $0x220] sm:$0xff]  ;;  %v12261_v14 = vld [vmem:[%s14971_s28 + $0x30] sm:$0xff] }
 0x2db   : >> { %v15271_v33 = vadd.f32 %v3187_v11, %v2905_v12  ;;  %v13860_v11 = vld [vmem:[%s14971_s28 + $0x34] sm:$0xff]   ;;  %4449 = vmatpush.bf16.msra.mxu0 %v12305_v13 }
 0x2dc   : >> { %v3850_v16 = vshrl.u32 %v13860_v11, 16 }
 0x2e0   : >> { %v2863_v59 = vpop.f32.mrf.mxu2  ;;  %v2344_v43 = vpop.f32.mrf.mxu0 }
 0x2e1   : >> { %v3189_v37 = vpop.f32.mrf.mxu3  ;;  %v2906_v27 = vadd.f32 %v2863_v59, %v2571_v19  ;;  %v2573_v54 = vpop.f32.mrf.mxu1  ;;  %v3853_v19 = vshll.u32 %v13860_v11, 16  ;;  %v3852_v59 = vrot.slane %v3850_v16, 3 }
 0x2e2   : >> { %v2574_v28 = vadd.f32 %v2573_v54, %v2344_v43 }
 0x2e3   : >> { %v15285_v32 = vadd.f32 %v3189_v37, %v2906_v27  ;;  %3345 = vmatmul.bf16.gmra.mxu0 %v15084_v0  ;;  %v3524_v0 = vor.u32 %v3522_v53, %v3520_v21  ;;  %v3530_v21 = vshrl.u32 %v12260_v34, 16  ;;  %v3855_v37 = vrot.slane %v3853_v19, 4  ;;  %v12304_v53 = vld [vmem:[%s16932_s7 + $0x218] sm:$0xff] }
 0x2e4   : >> { %3657 = vmatmul.bf16.gmra.mxu1 %v3521_v20  ;;  %4450 = vmatpush.bf16.msra.mxu0 %v12304_v53 }
 0x2e5   : >> { %3983 = vmatmul.bf16.gmra.mxu2 %v3839_v40  ;;  %v3529_v9 = vsel %vm2699_vm1, %v3524_v0, %v3528_v61  ;;  %v3532_v43 = vor.u32 %v3530_v21, %v3528_v61  ;;  %v3856_v20 = vor.u32 %v3855_v37, %v3852_v59 }
 0x2e6   : >> { %4147 = vmatmul.bf16.gmra.mxu3 %v15097_v45 }
 0x2e7   : >> { %v3857_v34 = vsel %vm2392_vm0, %v3847_v62, %v3856_v20  ;;  %v3538_v62 = vshrl.u32 %v12261_v14, 16 }
 0x2e8   : >> { %v2866_v41 = vpop.f32.mrf.mxu2  ;;  %v2346_v17 = vpop.f32.mrf.mxu0 }
 0x2e9   : >> { %v3192_v42 = vpop.f32.mrf.mxu3  ;;  %v2907_v44 = vadd.f32 %v2866_v41, %v2574_v28  ;;  %v2575_v51 = vpop.f32.mrf.mxu1 }
 0x2ea   : >> { %v2576_v55 = vadd.f32 %v2575_v51, %v2346_v17  ;;  %v12262_v17 = vld [vmem:[%s14971_s28 + $0x38] sm:$0xff] }
 0x2eb   : >> { %v15290_v25 = vadd.f32 %v3192_v42, %v2907_v44  ;;  %v13862_v42 = vld [vmem:[%s14971_s28 + $0x3c] sm:$0xff]  }
 0x2ec   : >> { %v12320_v51 = vld [vmem:[%s16932_s7 + $0x298] sm:$0xff]  ;;  %v3859_v18 = vshrl.u32 %v13862_v42, 16 }
 0x2ed   : >> { %4944 = vmatpush.bf16.msra.mxu2 %v12320_v51 }
 0x2f0   : >> { %v2868_v63 = vpop.f32.mrf.mxu2  ;;  %v2349_v4 = vpop.f32.mrf.mxu0 }
 0x2f1   : >> { %v3194_v3 = vpop.f32.mrf.mxu3  ;;  %v2908_v48 = vadd.f32 %v2868_v63, %v2576_v55  ;;  %v2578_v5 = vpop.f32.mrf.mxu1  ;;  %v3862_v55 = vshll.u32 %v13862_v42, 16  ;;  %v3542_v63 = vshll.u32 %v12262_v17, 16 }
 0x2f2   : >> { %v2579_v10 = vadd.f32 %v2578_v5, %v2349_v4  ;;  %v3861_v4 = vrot.slane %v3859_v18, 3 }
 0x2f3   : >> { %v15298_v12 = vadd.f32 %v3194_v3, %v2908_v48  ;;  %3350 = vmatmul.bf16.gmra.mxu0 %v15097_v45  ;;  %v3534_v45 = vshll.u32 %v12261_v14, 16  ;;  %v12312_v3 = vld [vmem:[%s16932_s7 + $0x258] sm:$0xff]  ;;  %v3864_v5 = vrot.slane %v3862_v55, 4 }
 0x2f4   : >> { %3662 = vmatmul.bf16.gmra.mxu1 %v3529_v9 }
 0x2f5   : >> { %3988 = vmatmul.bf16.gmra.mxu2 %v3848_v49  ;;  %v3536_v54 = vrot.slane %v3534_v45, 1  ;;  %4780 = vmatpush.bf16.msra.mxu1 %v12312_v3  ;;  %v3865_v49 = vor.u32 %v3864_v5, %v3861_v4 }
 0x2f6   : >> { %4152 = vmatmul.bf16.gmra.mxu3 %v15116_v38 }
 0x2f7   : >> { %v3537_v36 = vsel %vm2699_vm1, %v3532_v43, %v3536_v54  ;;  %v3540_v8 = vor.u32 %v3538_v62, %v3536_v54 }
 0x2f8   : >> { %v2871_v29 = vpop.f32.mrf.mxu2  ;;  %v2351_v6 = vpop.f32.mrf.mxu0 }
 0x2f9   : >> { %v3197_v24 = vpop.f32.mrf.mxu3  ;;  %v2909_v30 = vadd.f32 %v2871_v29, %v2579_v10  ;;  %v2580_v1 = vpop.f32.mrf.mxu1  ;;  %v3544_v10 = vrot.slane %v3542_v63, 1  ;;  %v12264_v63 = vld [vmem:[%s14971_s28 + $0x48] sm:$0xff] }
 0x2fa   : >> { %v2581_v56 = vadd.f32 %v2580_v1, %v2351_v6  ;;  %v12263_v1 = vld [vmem:[%s14971_s28 + $0x40] sm:$0xff] }
 0x2fb   : >> { %v15309_v27 = vadd.f32 %v3197_v24, %v2909_v30  ;;  %v3545_v19 = vsel %vm2699_vm1, %v3540_v8, %v3544_v10  ;;  %v3866_v24 = vsel %vm2392_vm0, %v3856_v20, %v3865_v49  ;;  %v13864_v30 = vld [vmem:[%s14971_s28 + $0x44] sm:$0xff]   ;;  %v12319_v20 = vld [vmem:[%s16932_s7 + $0x290] sm:$0xff] }
 0x2fc   : >> { %v3868_v21 = vshrl.u32 %v13864_v30, 16  ;;  %v3871_v45 = vshll.u32 %v13864_v30, 16  ;;  %4945 = vmatpush.bf16.msra.mxu2 %v12319_v20  ;;  %v13868_v20 = vld [vmem:[%s14971_s28 + $0x54] sm:$0xff]  }
 0x300   : >> { %v2873_v23 = vpop.f32.mrf.mxu2  ;;  %v2354_v31 = vpop.f32.mrf.mxu0 }
 0x301   : >> { %v3199_v28 = vpop.f32.mrf.mxu3  ;;  %v2910_v40 = vadd.f32 %v2873_v23, %v2581_v56  ;;  %v2583_v35 = vpop.f32.mrf.mxu1  ;;  %v3546_v23 = vshrl.u32 %v12262_v17, 16 }
 0x302   : >> { %v2584_v41 = vadd.f32 %v2583_v35, %v2354_v31  ;;  %v3873_v31 = vrot.slane %v3871_v45, 4 }
 0x303   : >> { %v15314_v44 = vadd.f32 %v3199_v28, %v2910_v40  ;;  %3355 = vmatmul.bf16.gmra.mxu0 %v15116_v38  ;;  %v3550_v28 = vshll.u32 %v12263_v1, 16 }
 0x304   : >> { %3667 = vmatmul.bf16.gmra.mxu1 %v3537_v36  ;;  %v12303_v36 = vld [vmem:[%s16932_s7 + $0x210] sm:$0xff] }
 0x305   : >> { %3993 = vmatmul.bf16.gmra.mxu2 %v3857_v34  ;;  %v3548_v34 = vor.u32 %v3546_v23, %v3544_v10  ;;  %v3552_v42 = vrot.slane %v3550_v28, 1  ;;  %4451 = vmatpush.bf16.msra.mxu0 %v12303_v36  ;;  %v3889_v36 = vshll.u32 %v13868_v20, 16 }
 0x306   : >> { %4157 = vmatmul.bf16.gmra.mxu3 %v15135_v57 }
 0x308   : >> { %v2876_v22 = vpop.f32.mrf.mxu2  ;;  %v2356_v0 = vpop.f32.mrf.mxu0 }
 0x309   : >> { %v3202_v58 = vpop.f32.mrf.mxu3  ;;  %v2911_v38 = vadd.f32 %v2876_v22, %v2584_v41  ;;  %v2585_v61 = vpop.f32.mrf.mxu1  ;;  %v12311_v41 = vld [vmem:[%s16932_s7 + $0x250] sm:$0xff] }
 0x30a   : >> { %v2586_v48 = vadd.f32 %v2585_v61, %v2356_v0  ;;  %4781 = vmatpush.bf16.msra.mxu1 %v12311_v41  ;;  %v13866_v61 = vld [vmem:[%s14971_s28 + $0x4c] sm:$0xff]   ;;  %v12342_v41 = vld [vmem:[%s16932_s7 + $0x2f8] sm:$0xff] }
 0x30b   : >> { %v15328_v9 = vadd.f32 %v3202_v58, %v2911_v38  ;;  %v3553_v58 = vsel %vm2699_vm1, %v3548_v34, %v3552_v42  ;;  %v3877_v3 = vshrl.u32 %v13866_v61, 16  ;;  %5252 = vmatpush.bf16.msra.mxu3 %v12342_v41  ;;  %v12337_v41 = vld [vmem:[%s16932_s7 + $0x2d0] sm:$0xff] }
 0x310   : >> { %v2878_v11 = vpop.f32.mrf.mxu2  ;;  %v2359_v14 = vpop.f32.mrf.mxu0 }
 0x311   : >> { %v3204_v13 = vpop.f32.mrf.mxu3  ;;  %v2912_v15 = vadd.f32 %v2878_v11, %v2586_v48  ;;  %v2588_v16 = vpop.f32.mrf.mxu1  ;;  %v3880_v48 = vshll.u32 %v13866_v61, 16 }
 0x312   : >> { %v2589_v29 = vadd.f32 %v2588_v16, %v2359_v14  ;;  %v3879_v14 = vrot.slane %v3877_v3, 3 }
 0x313   : >> { %v15333_v6 = vadd.f32 %v3204_v13, %v2912_v15  ;;  %3360 = vmatmul.bf16.gmra.mxu0 %v15135_v57  ;;  %v3870_v57 = vrot.slane %v3868_v21, 3  ;;  %v3554_v13 = vshrl.u32 %v12263_v1, 16  ;;  %v3558_v15 = vshll.u32 %v12264_v63, 16 }
 0x314   : >> { %3672 = vmatmul.bf16.gmra.mxu1 %v3545_v19  ;;  %v3882_v16 = vrot.slane %v3880_v48, 4 }
 0x315   : >> { %3998 = vmatmul.bf16.gmra.mxu2 %v3866_v24  ;;  %v3874_v17 = vor.u32 %v3873_v31, %v3870_v57  ;;  %v3556_v24 = vor.u32 %v3554_v13, %v3552_v42  ;;  %v3560_v30 = vrot.slane %v3558_v15, 1  ;;  %v15376_v57 = vld [vmem:[%s14971_s28 + $0x50] sm:$0xff]  ;;  %v3886_v31 = vshrl.u32 %v13868_v20, 16  ;;  %v12317_v15 = vld [vmem:[%s16932_s7 + $0x280] sm:$0xff] }
 0x316   : >> { %4162 = vmatmul.bf16.gmra.mxu3 %v15154_v50  ;;  %v3883_v1 = vor.u32 %v3882_v16, %v3879_v14  ;;  %v13869_v16 = vld [vmem:[%s14971_s28 + $0x5c] sm:$0xff]  }
 0x317   : >> { %v3875_v0 = vsel %vm2392_vm0, %v3865_v49, %v3874_v17 }
 0x318   : >> { %v2881_v56 = vpop.f32.mrf.mxu2  ;;  %v2361_v43 = vpop.f32.mrf.mxu0  ;;  %v3884_v28 = vsel %vm2392_vm0, %v3874_v17, %v3883_v1 }
 0x319   : >> { %v3207_v59 = vpop.f32.mrf.mxu3  ;;  %v2913_v37 = vadd.f32 %v2881_v56, %v2589_v29  ;;  %v2590_v54 = vpop.f32.mrf.mxu1  ;;  %v12302_v29 = vld [vmem:[%s16932_s7 + $0x208] sm:$0xff] }
 0x31a   : >> { %v2591_v40 = vadd.f32 %v2590_v54, %v2361_v43  ;;  %4452 = vmatpush.bf16.msra.mxu0 %v12302_v29  ;;  %v3561_v43 = vsel %vm2699_vm1, %v3556_v24, %v3560_v30  ;;  %v12310_v54 = vld [vmem:[%s16932_s7 + $0x248] sm:$0xff]  ;;  %v12301_v24 = vld [vmem:[%s16932_s7 + $0x200] sm:$0xff] }
 0x31b   : >> { %v15341_v35 = vadd.f32 %v3207_v59, %v2913_v37  ;;  %4782 = vmatpush.bf16.msra.mxu1 %v12310_v54 }
 0x31e   : >> { %4453 = vmatpush.bf16.msra.mxu0 %v12301_v24 }
 0x320   : >> { %v2883_v51 = vpop.f32.mrf.mxu2  ;;  %v2364_v55 = vpop.f32.mrf.mxu0 }
 0x321   : >> { %v3209_v53 = vpop.f32.mrf.mxu3  ;;  %v2914_v18 = vadd.f32 %v2883_v51, %v2591_v40  ;;  %v2593_v22 = vpop.f32.mrf.mxu1 }
 0x322   : >> { %v2594_v38 = vadd.f32 %v2593_v22, %v2364_v55  ;;  %v3888_v22 = vrot.slane %v3886_v31, 3 }
 0x323   : >> { %v15352_v62 = vadd.f32 %v3209_v53, %v2914_v18  ;;  %3365 = vmatmul.bf16.gmra.mxu0 %v15154_v50  ;;  %v12318_v50 = vld [vmem:[%s16932_s7 + $0x288] sm:$0xff]  ;;  %v3562_v18 = vshrl.u32 %v12264_v63, 16 }
 0x324   : >> { %3677 = vmatmul.bf16.gmra.mxu1 %v3553_v58  ;;  %4946 = vmatpush.bf16.msra.mxu2 %v12318_v50  ;;  %v3891_v58 = vrot.slane %v3889_v36, 4  ;;  %v12340_v63 = vld [vmem:[%s16932_s7 + $0x2e8] sm:$0xff]  ;;  %v12339_v50 = vld [vmem:[%s16932_s7 + $0x2e0] sm:$0xff] }
 0x325   : >> { %4003 = vmatmul.bf16.gmra.mxu2 %v3875_v0  ;;  %v3564_v61 = vor.u32 %v3562_v18, %v3560_v30  ;;  %v15407_v30 = vld [vmem:[%s14971_s28 + $0x58] sm:$0xff]  ;;  %v3431_v18 = vld [vmem:[%s14971_s28 + $0x60] sm:$0x1] }
 0x326   : >> { %4167 = vmatmul.bf16.gmra.mxu3 %v15173_v60  ;;  %v3892_v48 = vor.u32 %v3891_v58, %v3888_v22 }
 0x328   : >> { %v2886_v4 = vpop.f32.mrf.mxu2  ;;  %v2366_v10 = vpop.f32.mrf.mxu0  ;;  %v3893_v14 = vsel %vm2392_vm0, %v3883_v1, %v3892_v48  ;;  %4947 = vmatpush.bf16.msra.mxu2 %v12317_v15  ;;  %v12309_v1 = vld [vmem:[%s16932_s7 + $0x240] sm:$0xff] }
 0x329   : >> { %v3212_v5 = vpop.f32.mrf.mxu3  ;;  %v2915_v8 = vadd.f32 %v2886_v4, %v2594_v38  ;;  %v2595_v11 = vpop.f32.mrf.mxu1  ;;  %v12341_v38 = vld [vmem:[%s16932_s7 + $0x2f0] sm:$0xff]  ;;  %4783 = vmatpush.bf16.msra.mxu1 %v12309_v1 }
 0x32a   : >> { %v2596_v49 = vadd.f32 %v2595_v11, %v2366_v10  ;;  %5253 = vmatpush.bf16.msra.mxu3 %v12341_v38 }
 0x32b   : >> { %v15357_v19 = vadd.f32 %v3212_v5, %v2915_v8 }
 0x32e   : >> { %5254 = vmatpush.bf16.msra.mxu3 %v12340_v63 }
 0x330   : >> { %v2888_v21 = vpop.f32.mrf.mxu2  ;;  %v2369_v59 = vpop.f32.mrf.mxu0 }
 0x331   : >> { %v3214_v45 = vpop.f32.mrf.mxu3  ;;  %v2916_v56 = vadd.f32 %v2888_v21, %v2596_v49  ;;  %v2598_v37 = vpop.f32.mrf.mxu1  ;;  %v3895_v21 = vshrl.u32 %v13869_v16, 16 }
 0x332   : >> { %v2599_v23 = vadd.f32 %v2598_v37, %v2369_v59  ;;  %5255 = vmatpush.bf16.msra.mxu3 %v12339_v50 }
 0x333   : >> { %v15371_v40 = vadd.f32 %v3214_v45, %v2916_v56  ;;  %3370 = vmatmul.bf16.gmra.mxu0 %v15173_v60  ;;  %v3566_v60 = vshll.u32 %v15376_v57, 16  ;;  %v3898_v45 = vshll.u32 %v13869_v16, 16  ;;  %v3897_v31 = vrot.slane %v3895_v21, 3 }
 0x334   : >> { %3682 = vmatmul.bf16.gmra.mxu1 %v3561_v43  ;;  %v3578_v21 = vshrl.u32 %v15407_v30, 16 }
 0x335   : >> { %4008 = vmatmul.bf16.gmra.mxu2 %v3884_v28  ;;  %v3568_v3 = vrot.slane %v3566_v60, 1  ;;  %v3574_v28 = vshll.u32 %v15407_v30, 16  ;;  %v3900_v36 = vrot.slane %v3898_v45, 4  ;;  %v12336_v60 = vld [vmem:[%s16932_s7 + $0x2c8] sm:$0xff]  ;;  %v13871_v30 = vld [vmem:[%s14971_s28 + $0x74] sm:$0xf0]  }
 0x336   : >> { %4172 = vmatmul.bf16.gmra.mxu3 %v15218_v2 }
 0x337   : >> { %v3569_v13 = vsel %vm2699_vm1, %v3564_v61, %v3568_v3 }
 0x338   : >> { %v2891_v34 = vpop.f32.mrf.mxu2  ;;  %v2371_v51 = vpop.f32.mrf.mxu0 }
 0x339   : >> { %v3217_v42 = vpop.f32.mrf.mxu3  ;;  %v2917_v17 = vadd.f32 %v2891_v34, %v2599_v23  ;;  %v2600_v53 = vpop.f32.mrf.mxu1  ;;  %v3570_v23 = vshrl.u32 %v15376_v57, 16 }
 0x33a   : >> { %v2601_v55 = vadd.f32 %v2600_v53, %v2371_v51  ;;  %v3576_v51 = vrot.slane %v3574_v28, 1  ;;  %v3901_v53 = vor.u32 %v3900_v36, %v3897_v31 }
 0x33b   : >> { %v15385_v0 = vadd.f32 %v3217_v42, %v2917_v17  ;;  %v15423_v42 = vld [vmem:[%s14971_s28 + $0x60] sm:$0xff]   ;;  %v3572_v17 = vor.u32 %v3570_v23, %v3568_v3 }
 0x33c   : >> { %v12852_v57 = vunpack.c.h.b16 %v15423_v42  ;;  %v3580_v23 = vor.u32 %v3578_v21, %v3576_v51 }
 0x33d   : >> { %v3577_v63 = vsel %vm2699_vm1, %v3572_v17, %v3576_v51  ;;  %v12291_v17 = vld [vmem:[%s14971_s28 + $0x18] sm:$0xff] }
 0x340   : >> { %v2893_v4 = vpop.f32.mrf.mxu2  ;;  %v2374_v10 = vpop.f32.mrf.mxu0 }
 0x341   : >> { %v3219_v5 = vpop.f32.mrf.mxu3  ;;  %v2918_v8 = vadd.f32 %v2893_v4, %v2601_v55  ;;  %v2603_v11 = vpop.f32.mrf.mxu1  ;;  %v3490_v4 = vunpack.c.l.b16 %v3431_v18 }
 0x342   : >> { %v2604_v49 = vadd.f32 %v2603_v11, %v2374_v10  ;;  %v12335_v10 = vld [vmem:[%s16932_s7 + $0x2c0] sm:$0xff] }
 0x343   : >> { %v15399_v29 = vadd.f32 %v3219_v5, %v2918_v8  ;;  %3375 = vmatmul.bf16.gmra.mxu0 %v15218_v2  ;;  %v12338_v2 = vld [vmem:[%s16932_s7 + $0x2d8] sm:$0xff]  ;;  %v3902_v5 = vsel %vm2392_vm0, %v3892_v48, %v3901_v53  ;;  %v3813_v8 = vpack.c.b16 %v12852_v57, %v12852_v57  ;;  %v3501_v15 = vpack.c.b16 %v3490_v4, %v3490_v4  ;;  %v15465_v4 = vld [vmem:[%s14971_s28 + $0x20] sm:$0xff] }
 0x344   : >> { %3687 = vmatmul.bf16.gmra.mxu1 %v3569_v13  ;;  %5256 = vmatpush.bf16.msra.mxu3 %v12338_v2  ;;  %v12350_v48 = vld [vmem:[%s16932_s7 + $0x338] sm:$0xff] }
 0x345   : >> { %4013 = vmatmul.bf16.gmra.mxu2 %v3893_v14  ;;  %v3907_v14 = vshll.u32 %v3813_v8, 16  ;;  %5578 = vmatpush.bf16.msrb.mxu0 %v12350_v48  ;;  %v3582_v45 = vshll.u32 %v3501_v15, 16  ;;  %v12358_v2 = vld [vmem:[%s16932_s7 + $0x378] sm:$0xff]  ;;  %v4305_v48 = vshrl.u32 %v12291_v17, 16 }
 0x346   : >> { %4177 = vmatmul.bf16.gmra.mxu3 %v15201_v26  ;;  %5742 = vmatpush.bf16.msrb.mxu1 %v12358_v2 }
 0x347   : >> { %v3584_v28 = vrot.slane %v3582_v45, 1 }
 0x348   : >> { %v2896_v56 = vpop.f32.mrf.mxu2  ;;  %v2376_v43 = vpop.f32.mrf.mxu0  ;;  %5257 = vmatpush.bf16.msra.mxu3 %v12337_v41 }
 0x349   : >> { %v3222_v59 = vpop.f32.mrf.mxu3  ;;  %v2919_v37 = vadd.f32 %v2896_v56, %v2604_v49  ;;  %v2605_v54 = vpop.f32.mrf.mxu1  ;;  %v3904_v49 = vshrl.u32 %v3813_v8, 16 }
 0x34a   : >> { %v2606_v20 = vadd.f32 %v2605_v54, %v2376_v43 }
 0x34b   : >> { %v15420_v34 = vadd.f32 %v3222_v59, %v2919_v37  ;;  %v3906_v59 = vrot.slane %v3904_v49, 3  ;;  %v3909_v37 = vrot.slane %v3907_v14, 4 }
 0x34c   : >> { %5258 = vmatpush.bf16.msra.mxu3 %v12336_v60 }
 0x34d   : >> { %v3910_v31 = vor.u32 %v3909_v37, %v3906_v59 }
 0x34f   : >> { %v3911_v51 = vsel %vm2392_vm0, %v3901_v53, %v3910_v31 }
 0x350   : >> { %v2898_v55 = vpop.f32.mrf.mxu2  ;;  %v3341_v38 = vpop.f32.mrf.mxu0  ;;  %5259 = vmatpush.bf16.msra.mxu3 %v12335_v10 }
 0x351   : >> { %v3224_v22 = vpop.f32.mrf.mxu3  ;;  %v2920_v58 = vadd.f32 %v2898_v55, %v2606_v20  ;;  %v3653_v61 = vpop.f32.mrf.mxu1  ;;  %v3391_v3 = vadd.f32 %v3341_v38, %v15238_v52  ;;  %v12376_v52 = vld [vmem:[%s16932_s7 + $0x3b8] sm:$0xff]  ;;  %v13500_v20 = vld [vmem:[%s14971_s28 + $0x74] sm:$0x8]  ;;  %v3585_v55 = vsel %vm2699_vm1, %v3580_v23, %v3584_v28 }
 0x352   : >> { %6054 = vmatpush.bf16.msrb.mxu2 %v12376_v52  ;;  %v13501_v18 = vor.u32 %v13871_v30, %v13500_v20  ;;  %v12325_v38 = vld [vmem:[%s14971_s28 + $0x78] sm:$0xff]  ;;  %v12349_v23 = vld [vmem:[%s16932_s7 + $0x330] sm:$0xff] }
 0x353   : >> { %v15436_v11 = vadd.f32 %v3224_v22, %v2920_v58  ;;  %v3703_v13 = vadd.f32 %v3653_v61, %v3391_v3  ;;  %3380 = vmatmul.bf16.gmra.mxu0 %v15201_v26  ;;  %v13873_v22 = vld [vmem:[%s14971_s28 + $0x7c] sm:$0xff]   ;;  %v4307_v3 = vshll.u32 %v12291_v17, 16  ;;  %v5113_v53 = vshll.u32 %v12325_v38, 16  ;;  %v12357_v28 = vld [vmem:[%s16932_s7 + $0x370] sm:$0xff] }
 0x354   : >> { %3692 = vmatmul.bf16.gmra.mxu1 %v3577_v63  ;;  %v4624_v8 = vshll.u32 %v13501_v18, 16  ;;  %v4629_v10 = vshrl.u32 %v13873_v22, 16  ;;  %v5111_v2 = vshrl.u32 %v12325_v38, 16  ;;  %5579 = vmatpush.bf16.msrb.mxu0 %v12349_v23  ;;  %v13302_v38 = vld [vmem:[%s14971_s28 + $0x78] sm:$0xff]  }
 0x355   : >> { %4018 = vmatmul.bf16.gmra.mxu2 %v3902_v5  ;;  %v4621_v5 = vshrl.u32 %v13501_v18, 16  ;;  %v4309_v49 = vrot.slane %v4307_v3, 1  ;;  %5743 = vmatpush.bf16.msrb.mxu1 %v12357_v28 }
 0x356   : >> { %4182 = vmatmul.bf16.gmra.mxu3 %v15207_v39 }
 0x357   : >> { %v4623_v14 = vrot.slane %v4621_v5, 3  ;;  %v4310_v20 = vor.u32 %v4309_v49, %v4305_v48 }
 0x358   : >> { %v3979_v16 = vpop.f32.mrf.mxu2  ;;  %v3343_v24 = vpop.f32.mrf.mxu0 }
 0x359   : >> { %v4143_v26 = vpop.f32.mrf.mxu3  ;;  %v4029_v50 = vadd.f32 %v3979_v16, %v3703_v13  ;;  %v3655_v1 = vpop.f32.mrf.mxu1  ;;  %v3392_v56 = vadd.f32 %v3343_v24, %v15248_v46  ;;  %v4632_v13 = vshll.u32 %v13873_v22, 16  ;;  %v4626_v24 = vrot.slane %v4624_v8, 4  ;;  %v15494_v8 = vld [vmem:[%s14971_s28 + $0x28] sm:$0xff] }
 0x35b   : >> { %v15451_v43 = vadd.f32 %v4143_v26, %v4029_v50  ;;  %v3704_v54 = vadd.f32 %v3655_v1, %v3392_v56  ;;  %v4631_v1 = vrot.slane %v4629_v10, 3  ;;  %v4634_v21 = vrot.slane %v4632_v13, 4 }
 0x35c   : >> { %v5115_v56 = vrot.slane %v5113_v53, 1  ;;  %v15497_v53 = vld [vmem:[%s14971_s28 + $0x88] sm:$0xff] }
 0x35d   : >> { %v4635_v31 = vor.u32 %v4634_v21, %v4631_v1  ;;  %v5126_v1 = vshll.u32 %v15497_v53, 16 }
 0x360   : >> { %v3981_v36 = vpop.f32.mrf.mxu2  ;;  %v3346_v46 = vpop.f32.mrf.mxu0 }
 0x361   : >> { %v4145_v41 = vpop.f32.mrf.mxu3  ;;  %v4030_v57 = vadd.f32 %v3981_v36, %v3704_v54  ;;  %v3658_v60 = vpop.f32.mrf.mxu1  ;;  %v3393_v58 = vadd.f32 %v3346_v46, %v15255_v47  ;;  %v15469_v47 = vld [vmem:[%s14971_s28 + $0x80] sm:$0xff]  ;;  %v5116_v36 = vor.u32 %v5115_v56, %v5111_v2 }
 0x362   : >> { %v5118_v59 = vshll.u32 %v15469_v47, 16 }
 0x363   : >> { %v15461_v61 = vadd.f32 %v4145_v41, %v4030_v57  ;;  %v3705_v63 = vadd.f32 %v3658_v60, %v3393_v58  ;;  %3385 = vmatmul.bf16.gmra.mxu0 %v15207_v39  ;;  %v4312_v39 = vshll.u32 %v15465_v4, 16  ;;  %v13875_v58 = vld [vmem:[%s14971_s28 + $0x84] sm:$0xff]  }
 0x364   : >> { %3697 = vmatmul.bf16.gmra.mxu1 %v3585_v55  ;;  %v5120_v41 = vrot.slane %v5118_v59, 1  ;;  %v4638_v10 = vshrl.u32 %v13875_v58, 16  ;;  %v4641_v13 = vshll.u32 %v13875_v58, 16 }
 0x365   : >> { %4023 = vmatmul.bf16.gmra.mxu2 %v3911_v51  ;;  %v4314_v30 = vrot.slane %v4312_v39, 1 }
 0x366   : >> { %4187 = vmatmul.bf16.gmra.mxu3 %v15423_v42  ;;  %v12375_v42 = vld [vmem:[%s16932_s7 + $0x3b0] sm:$0xff] }
 0x367   : >> { %6055 = vmatpush.bf16.msrb.mxu2 %v12375_v42  ;;  %v4315_v55 = vsel %vm2699_vm1, %v4310_v20, %v4314_v30 }
 0x368   : >> { %v3984_v15 = vpop.f32.mrf.mxu2  ;;  %v3348_v26 = vpop.f32.mrf.mxu0 }
 0x369   : >> { %v4148_v52 = vpop.f32.mrf.mxu3  ;;  %v4031_v16 = vadd.f32 %v3984_v15, %v3705_v63  ;;  %v3660_v50 = vpop.f32.mrf.mxu1  ;;  %v3394_v45 = vadd.f32 %v3348_v26, %v15266_v7  ;;  %v4627_v7 = vor.u32 %v4626_v24, %v4623_v14  ;;  %v5121_v63 = vsel %vm2699_vm1, %v5116_v36, %v5120_v41 }
 0x36a   : >> { %v4320_v14 = vshll.u32 %v15494_v8, 16  ;;  %v4643_v26 = vrot.slane %v4641_v13, 4  ;;  %v5122_v24 = vshrl.u32 %v15469_v47, 16  ;;  %v5128_v47 = vrot.slane %v5126_v1, 1 }
 0x36b   : >> { %v15477_v37 = vadd.f32 %v4148_v52, %v4031_v16  ;;  %v3706_v54 = vadd.f32 %v3660_v50, %v3394_v45  ;;  %v4636_v22 = vsel %vm2392_vm0, %v4627_v7, %v4635_v31  ;;  %v4640_v16 = vrot.slane %v4638_v10, 3  ;;  %v12348_v45 = vld [vmem:[%s16932_s7 + $0x328] sm:$0xff] }
 0x36c   : >> { %v4322_v56 = vrot.slane %v4320_v14, 1  ;;  %v5124_v59 = vor.u32 %v5122_v24, %v5120_v41  ;;  %5580 = vmatpush.bf16.msrb.mxu0 %v12348_v45 }
 0x370   : >> { %v3986_v17 = vpop.f32.mrf.mxu2  ;;  %v3351_v46 = vpop.f32.mrf.mxu0 }
 0x371   : >> { %v4150_v18 = vpop.f32.mrf.mxu3  ;;  %v4032_v57 = vadd.f32 %v3986_v17, %v3706_v54  ;;  %v3663_v60 = vpop.f32.mrf.mxu1  ;;  %v3395_v51 = vadd.f32 %v3351_v46, %v15271_v33  ;;  %v4316_v33 = vshrl.u32 %v15465_v4, 16  ;;  %v12374_v4 = vld [vmem:[%s16932_s7 + $0x3a8] sm:$0xff]  ;;  %v5129_v46 = vsel %vm2699_vm1, %v5124_v59, %v5128_v47 }
 0x372   : >> { %6056 = vmatpush.bf16.msrb.mxu2 %v12374_v4 }
 0x373   : >> { %v15491_v3 = vadd.f32 %v4150_v18, %v4032_v57  ;;  %v3707_v5 = vadd.f32 %v3663_v60, %v3395_v51  ;;  %4454 = vmatmul.bf16.vlgmr.msra.gmra.mxu0 %v4315_v55  ;;  %v4318_v2 = vor.u32 %v4316_v33, %v4314_v30  ;;  %v13877_v18 = vld [vmem:[%s14971_s28 + $0x8c] sm:$0xff]   ;;  %v13303_v57 = vld [vmem:[%s14971_s28 + $0x80] sm:$0xff]  }
 0x374   : >> { %4784 = vmatmul.bf16.vlgmr.msra.gmra.mxu1 %v4636_v22  ;;  %v12356_v30 = vld [vmem:[%s16932_s7 + $0x368] sm:$0xff]  ;;  %v4647_v22 = vshrl.u32 %v13877_v18, 16  ;;  %v4650_v58 = vshll.u32 %v13877_v18, 16  ;;  %v15527_v51 = vld [vmem:[%s14971_s28 + $0x90] sm:$0xff] }
 0x375   : >> { %4948 = vmatmul.bf16.vlgmr.msra.gmra.mxu2 %v13302_v38  ;;  %v4323_v36 = vsel %vm2699_vm1, %v4318_v2, %v4322_v56  ;;  %5744 = vmatpush.bf16.msrb.mxu1 %v12356_v30  ;;  %v15557_v30 = vld [vmem:[%s14971_s28 + $0x98] sm:$0xff] }
 0x376   : >> { %5260 = vmatmul.bf16.vlgmr.msra.gmra.mxu3 %v5121_v63  ;;  %v4652_v33 = vrot.slane %v4650_v58, 4 }
 0x378   : >> { %v3989_v15 = vpop.f32.mrf.mxu2  ;;  %v3353_v49 = vpop.f32.mrf.mxu0 }
 0x379   : >> { %v4153_v52 = vpop.f32.mrf.mxu3  ;;  %v4033_v48 = vadd.f32 %v3989_v15, %v3707_v5  ;;  %v3665_v39 = vpop.f32.mrf.mxu1  ;;  %v3396_v50 = vadd.f32 %v3353_v49, %v15285_v32  ;;  %v4644_v32 = vor.u32 %v4643_v26, %v4640_v16  ;;  %v5130_v49 = vshrl.u32 %v15497_v53, 16 }
 0x37b   : >> { %v15504_v21 = vadd.f32 %v4153_v52, %v4033_v48  ;;  %v3708_v42 = vadd.f32 %v3665_v39, %v3396_v50  ;;  %v4645_v17 = vsel %vm2392_vm0, %v4635_v31, %v4644_v32  ;;  %v15524_v31 = vld [vmem:[%s14971_s28 + $0x30] sm:$0xff]  ;;  %v4649_v52 = vrot.slane %v4647_v22, 3 }
 0x37c   : >> { %v4328_v15 = vshll.u32 %v15524_v31, 16  ;;  %v5134_v39 = vshll.u32 %v15527_v51, 16  ;;  %v5132_v24 = vor.u32 %v5130_v49, %v5128_v47  ;;  %v13304_v47 = vld [vmem:[%s14971_s28 + $0x88] sm:$0xff]  }
 0x37d   : >> { %v4653_v50 = vor.u32 %v4652_v33, %v4649_v52 }
 0x37e   : >> { %v5136_v1 = vrot.slane %v5134_v39, 1 }
 0x37f   : >> { %v4654_v53 = vsel %vm2392_vm0, %v4644_v32, %v4653_v50  ;;  %v12347_v32 = vld [vmem:[%s16932_s7 + $0x320] sm:$0xff] }
 0x380   : >> { %v3991_v54 = vpop.f32.mrf.mxu2  ;;  %v3356_v20 = vpop.f32.mrf.mxu0  ;;  %5581 = vmatpush.bf16.msrb.mxu0 %v12347_v32 }
 0x381   : >> { %v4155_v23 = vpop.f32.mrf.mxu3  ;;  %v4034_v28 = vadd.f32 %v3991_v54, %v3708_v42  ;;  %v3668_v7 = vpop.f32.mrf.mxu1  ;;  %v3397_v41 = vadd.f32 %v3356_v20, %v15290_v25  ;;  %v4324_v25 = vshrl.u32 %v15494_v8, 16  ;;  %v4330_v8 = vrot.slane %v4328_v15, 1  ;;  %v13879_v54 = vld [vmem:[%s14971_s28 + $0x94] sm:$0xff]  }
 0x382   : >> { %v4659_v18 = vshll.u32 %v13879_v54, 16 }
 0x383   : >> { %v15521_v60 = vadd.f32 %v4155_v23, %v4034_v28  ;;  %v3709_v55 = vadd.f32 %v3668_v7, %v3397_v41  ;;  %4459 = vmatmul.bf16.gmra.mxu0 %v4323_v36  ;;  %v4326_v26 = vor.u32 %v4324_v25, %v4322_v56  ;;  %v12373_v23 = vld [vmem:[%s16932_s7 + $0x3a0] sm:$0xff]  ;;  %v5137_v28 = vsel %vm2699_vm1, %v5132_v24, %v5136_v1  ;;  %v15551_v36 = vld [vmem:[%s14971_s28 + $0x38] sm:$0xff] }
 0x384   : >> { %4789 = vmatmul.bf16.gmra.mxu1 %v4645_v17  ;;  %6057 = vmatpush.bf16.msrb.mxu2 %v12373_v23  ;;  %v4656_v17 = vshrl.u32 %v13879_v54, 16  ;;  %v4661_v25 = vrot.slane %v4659_v18, 4 }
 0x385   : >> { %4953 = vmatmul.bf16.gmra.mxu2 %v13303_v57 }
 0x386   : >> { %5265 = vmatmul.bf16.gmra.mxu3 %v5129_v46  ;;  %v4332_v46 = vshrl.u32 %v15524_v31, 16 }
 0x388   : >> { %v3994_v38 = vpop.f32.mrf.mxu2  ;;  %v3358_v10 = vpop.f32.mrf.mxu0  ;;  %v4334_v33 = vor.u32 %v4332_v46, %v4330_v8  ;;  %v12354_v46 = vld [vmem:[%s16932_s7 + $0x358] sm:$0xff] }
 0x389   : >> { %v4158_v63 = vpop.f32.mrf.mxu3  ;;  %v4035_v5 = vadd.f32 %v3994_v38, %v3709_v55  ;;  %v3670_v13 = vpop.f32.mrf.mxu1  ;;  %v3398_v48 = vadd.f32 %v3358_v10, %v15298_v12  ;;  %v4331_v12 = vsel %vm2699_vm1, %v4326_v26, %v4330_v8  ;;  %v4336_v38 = vshll.u32 %v15551_v36, 16 }
 0x38a   : >> { %v5138_v10 = vshrl.u32 %v15527_v51, 16 }
 0x38b   : >> { %v15534_v14 = vadd.f32 %v4158_v63, %v4035_v5  ;;  %v3710_v16 = vadd.f32 %v3670_v13, %v3398_v48  ;;  %v4658_v63 = vrot.slane %v4656_v17, 3  ;;  %v5142_v13 = vshll.u32 %v15557_v30, 16 }
 0x38c   : >> { %v4338_v31 = vrot.slane %v4336_v38, 1  ;;  %v5140_v49 = vor.u32 %v5138_v10, %v5136_v1 }
 0x38d   : >> { %v4662_v48 = vor.u32 %v4661_v25, %v4658_v63  ;;  %v5144_v39 = vrot.slane %v5142_v13, 1 }
 0x38e   : >> { %v4339_v51 = vsel %vm2699_vm1, %v4334_v33, %v4338_v31 }
 0x38f   : >> { %v5145_v8 = vsel %vm2699_vm1, %v5140_v49, %v5144_v39 }
 0x390   : >> { %v3996_v42 = vpop.f32.mrf.mxu2  ;;  %v3361_v2 = vpop.f32.mrf.mxu0 }
 0x391   : >> { %v4160_v4 = vpop.f32.mrf.mxu3  ;;  %v4036_v45 = vadd.f32 %v3996_v42, %v3710_v16  ;;  %v3673_v59 = vpop.f32.mrf.mxu1  ;;  %v3399_v56 = vadd.f32 %v3361_v2, %v15309_v27  ;;  %v12355_v27 = vld [vmem:[%s16932_s7 + $0x360] sm:$0xff] }
 0x392   : >> { %5745 = vmatpush.bf16.msrb.mxu1 %v12355_v27 }
 0x393   : >> { %v15545_v20 = vadd.f32 %v4160_v4, %v4036_v45  ;;  %v3711_v7 = vadd.f32 %v3673_v59, %v3399_v56  ;;  %4464 = vmatmul.bf16.gmra.mxu0 %v4331_v12  ;;  %v4663_v4 = vsel %vm2392_vm0, %v4653_v50, %v4662_v48  ;;  %v13881_v45 = vld [vmem:[%s14971_s28 + $0x9c] sm:$0xff]   ;;  %v13305_v59 = vld [vmem:[%s14971_s28 + $0x90] sm:$0xff]  }
 0x394   : >> { %4794 = vmatmul.bf16.gmra.mxu1 %v4654_v53  ;;  %v15575_v53 = vld [vmem:[%s14971_s28 + $0x40] sm:$0xff]  ;;  %v4665_v54 = vshrl.u32 %v13881_v45, 16  ;;  %v4668_v23 = vshll.u32 %v13881_v45, 16  ;;  %v12372_v50 = vld [vmem:[%s16932_s7 + $0x398] sm:$0xff] }
 0x395   : >> { %4958 = vmatmul.bf16.gmra.mxu2 %v13304_v47  ;;  %v15584_v56 = vld [vmem:[%s14971_s28 + $0xa0] sm:$0xff]  ;;  %v4344_v27 = vshll.u32 %v15575_v53, 16 }
 0x396   : >> { %5270 = vmatmul.bf16.gmra.mxu3 %v5137_v28  ;;  %6058 = vmatpush.bf16.msrb.mxu2 %v12372_v50 }
 0x397   : >> { %5746 = vmatpush.bf16.msrb.mxu1 %v12354_v46  ;;  %v4346_v25 = vrot.slane %v4344_v27, 1  ;;  %v12345_v27 = vld [vmem:[%s16932_s7 + $0x310] sm:$0xff] }
 0x398   : >> { %v3999_v41 = vpop.f32.mrf.mxu2  ;;  %v3363_v22 = vpop.f32.mrf.mxu0 }
 0x399   : >> { %v4163_v57 = vpop.f32.mrf.mxu3  ;;  %v4037_v55 = vadd.f32 %v3999_v41, %v3711_v7  ;;  %v3675_v58 = vpop.f32.mrf.mxu1  ;;  %v3400_v5 = vadd.f32 %v3363_v22, %v15314_v44  ;;  %v4340_v7 = vshrl.u32 %v15551_v36, 16  ;;  %v4667_v41 = vrot.slane %v4665_v54, 3 }
 0x39a   : >> { %v5146_v22 = vshrl.u32 %v15557_v30, 16 }
 0x39b   : >> { %v15564_v15 = vadd.f32 %v4163_v57, %v4037_v55  ;;  %v3712_v52 = vadd.f32 %v3675_v58, %v3400_v5  ;;  %v4670_v57 = vrot.slane %v4668_v23, 4  ;;  %v5150_v58 = vshll.u32 %v15584_v56, 16 }
 0x39c   : >> { %v4342_v63 = vor.u32 %v4340_v7, %v4338_v31  ;;  %v5148_v10 = vor.u32 %v5146_v22, %v5144_v39 }
 0x39d   : >> { %v4671_v5 = vor.u32 %v4670_v57, %v4667_v41  ;;  %v5152_v13 = vrot.slane %v5150_v58, 1  ;;  %v12353_v41 = vld [vmem:[%s16932_s7 + $0x350] sm:$0xff] }
 0x39e   : >> { %v4347_v30 = vsel %vm2699_vm1, %v4342_v63, %v4346_v25  ;;  %5747 = vmatpush.bf16.msrb.mxu1 %v12353_v41 }
 0x39f   : >> { %v5153_v31 = vsel %vm2699_vm1, %v5148_v10, %v5152_v13 }
 0x3a0   : >> { %v4001_v16 = vpop.f32.mrf.mxu2  ;;  %v3366_v42 = vpop.f32.mrf.mxu0 }
 0x3a1   : >> { %v4165_v26 = vpop.f32.mrf.mxu3  ;;  %v4038_v24 = vadd.f32 %v4001_v16, %v3712_v52  ;;  %v3678_v44 = vpop.f32.mrf.mxu1  ;;  %v3401_v2 = vadd.f32 %v3366_v42, %v15328_v9  ;;  %v12346_v9 = vld [vmem:[%s16932_s7 + $0x318] sm:$0xff] }
 0x3a2   : >> { %5582 = vmatpush.bf16.msrb.mxu0 %v12346_v9 }
 0x3a3   : >> { %v15572_v12 = vadd.f32 %v4165_v26, %v4038_v24  ;;  %v3713_v1 = vadd.f32 %v3678_v44, %v3401_v2  ;;  %4469 = vmatmul.bf16.gmra.mxu0 %v4339_v51  ;;  %v4672_v26 = vsel %vm2392_vm0, %v4662_v48, %v4671_v5  ;;  %v13883_v24 = vld [vmem:[%s14971_s28 + $0xa4] sm:$0xff]   ;;  %v13306_v44 = vld [vmem:[%s14971_s28 + $0x98] sm:$0xff]  }
 0x3a4   : >> { %4799 = vmatmul.bf16.gmra.mxu1 %v4663_v4  ;;  %v15605_v4 = vld [vmem:[%s14971_s28 + $0x48] sm:$0xff]  ;;  %v4674_v45 = vshrl.u32 %v13883_v24, 16  ;;  %v4677_v2 = vshll.u32 %v13883_v24, 16 }
 0x3a5   : >> { %4963 = vmatmul.bf16.gmra.mxu2 %v13305_v59  ;;  %v15608_v59 = vld [vmem:[%s14971_s28 + $0xa8] sm:$0xff]  ;;  %v4352_v50 = vshll.u32 %v15605_v4, 16 }
 0x3a6   : >> { %5275 = vmatmul.bf16.gmra.mxu3 %v5145_v8  ;;  %v4676_v9 = vrot.slane %v4674_v45, 3  ;;  %5583 = vmatpush.bf16.msrb.mxu0 %v12345_v27 }
 0x3a8   : >> { %v4004_v47 = vpop.f32.mrf.mxu2  ;;  %v3368_v17 = vpop.f32.mrf.mxu0 }
 0x3a9   : >> { %v4168_v28 = vpop.f32.mrf.mxu3  ;;  %v4039_v32 = vadd.f32 %v4004_v47, %v3713_v1  ;;  %v3680_v18 = vpop.f32.mrf.mxu1  ;;  %v3402_v55 = vadd.f32 %v3368_v17, %v15333_v6  ;;  %v4679_v47 = vrot.slane %v4677_v2, 4  ;;  %v5158_v17 = vshll.u32 %v15608_v59, 16 }
 0x3ab   : >> { %v15594_v38 = vadd.f32 %v4168_v28, %v4039_v32  ;;  %v3714_v36 = vadd.f32 %v3680_v18, %v3402_v55  ;;  %v12371_v28 = vld [vmem:[%s16932_s7 + $0x390] sm:$0xff]  ;;  %v5154_v32 = vshrl.u32 %v15584_v56, 16  ;;  %v4680_v46 = vor.u32 %v4679_v47, %v4676_v9  ;;  %v12344_v47 = vld [vmem:[%s16932_s7 + $0x308] sm:$0xff] }
 0x3ac   : >> { %6059 = vmatpush.bf16.msrb.mxu2 %v12371_v28  ;;  %v5160_v55 = vrot.slane %v5158_v17, 1  ;;  %5584 = vmatpush.bf16.msrb.mxu0 %v12344_v47 }
 0x3ad   : >> { %v5156_v56 = vor.u32 %v5154_v32, %v5152_v13 }
 0x3af   : >> { %v5161_v13 = vsel %vm2699_vm1, %v5156_v56, %v5160_v55 }
 0x3b0   : >> { %v4006_v52 = vpop.f32.mrf.mxu2  ;;  %v3371_v6 = vpop.f32.mrf.mxu0 }
 0x3b1   : >> { %v4170_v33 = vpop.f32.mrf.mxu3  ;;  %v4040_v49 = vadd.f32 %v4006_v52, %v3714_v36  ;;  %v3683_v16 = vpop.f32.mrf.mxu1  ;;  %v3403_v42 = vadd.f32 %v3371_v6, %v15341_v35  ;;  %v4348_v35 = vshrl.u32 %v15575_v53, 16  ;;  %v13307_v6 = vld [vmem:[%s14971_s28 + $0xa0] sm:$0xff]  }
 0x3b3   : >> { %v15602_v51 = vadd.f32 %v4170_v33, %v4040_v49  ;;  %v3715_v39 = vadd.f32 %v3683_v16, %v3403_v42  ;;  %4474 = vmatmul.bf16.gmra.mxu0 %v4347_v30  ;;  %v4350_v57 = vor.u32 %v4348_v35, %v4346_v25  ;;  %v4681_v33 = vsel %vm2392_vm0, %v4671_v5, %v4680_v46  ;;  %v13885_v49 = vld [vmem:[%s14971_s28 + $0xac] sm:$0xff]  }
 0x3b4   : >> { %4804 = vmatmul.bf16.gmra.mxu1 %v4672_v26  ;;  %v15635_v26 = vld [vmem:[%s14971_s28 + $0x50] sm:$0xff]  ;;  %v4683_v24 = vshrl.u32 %v13885_v49, 16  ;;  %v4686_v42 = vshll.u32 %v13885_v49, 16 }
 0x3b5   : >> { %4968 = vmatmul.bf16.gmra.mxu2 %v13306_v44  ;;  %v15638_v44 = vld [vmem:[%s14971_s28 + $0xb0] sm:$0xff] }
 0x3b6   : >> { %5280 = vmatmul.bf16.gmra.mxu3 %v5153_v31  ;;  %v4688_v35 = vrot.slane %v4686_v42, 4 }
 0x3b8   : >> { %v4009_v48 = vpop.f32.mrf.mxu2  ;;  %v3373_v54 = vpop.f32.mrf.mxu0 }
 0x3b9   : >> { %v4173_v8 = vpop.f32.mrf.mxu3  ;;  %v4041_v1 = vadd.f32 %v4009_v48, %v3715_v39  ;;  %v3685_v23 = vpop.f32.mrf.mxu1  ;;  %v3404_v7 = vadd.f32 %v3373_v54, %v15352_v62  ;;  %v4354_v62 = vrot.slane %v4352_v50, 1  ;;  %v4360_v48 = vshll.u32 %v15635_v26, 16 }
 0x3ba   : >> { %v5162_v54 = vshrl.u32 %v15608_v59, 16 }
 0x3bb   : >> { %v15618_v18 = vadd.f32 %v4173_v8, %v4041_v1  ;;  %v3716_v53 = vadd.f32 %v3685_v23, %v3404_v7  ;;  %v4355_v52 = vsel %vm2699_vm1, %v4350_v57, %v4354_v62  ;;  %v4685_v8 = vrot.slane %v4683_v24, 3 }
 0x3bc   : >> { %v5166_v23 = vshll.u32 %v15638_v44, 16  ;;  %v4362_v7 = vrot.slane %v4360_v48, 1  ;;  %v5164_v32 = vor.u32 %v5162_v54, %v5160_v55 }
 0x3be   : >> { %v5168_v59 = vrot.slane %v5166_v23, 1 }
 0x3c0   : >> { %v4011_v22 = vpop.f32.mrf.mxu2  ;;  %v3376_v63 = vpop.f32.mrf.mxu0 }
 0x3c1   : >> { %v4175_v58 = vpop.f32.mrf.mxu3  ;;  %v4042_v36 = vadd.f32 %v4011_v22, %v3716_v53  ;;  %v3688_v10 = vpop.f32.mrf.mxu1  ;;  %v3405_v25 = vadd.f32 %v3376_v63, %v15357_v19  ;;  %v4356_v19 = vshrl.u32 %v15605_v4, 16  ;;  %v12370_v4 = vld [vmem:[%s16932_s7 + $0x388] sm:$0xff]  ;;  %v5169_v63 = vsel %vm2699_vm1, %v5164_v32, %v5168_v59 }
 0x3c2   : >> { %6060 = vmatpush.bf16.msrb.mxu2 %v12370_v4 }
 0x3c3   : >> { %v15632_v16 = vadd.f32 %v4175_v58, %v4042_v36  ;;  %v3717_v30 = vadd.f32 %v3688_v10, %v3405_v25  ;;  %4479 = vmatmul.bf16.gmra.mxu0 %v4355_v52  ;;  %v4358_v28 = vor.u32 %v4356_v19, %v4354_v62  ;;  %v13887_v58 = vld [vmem:[%s14971_s28 + $0xb4] sm:$0xff]   ;;  %v12352_v62 = vld [vmem:[%s16932_s7 + $0x348] sm:$0xff] }
 0x3c4   : >> { %4809 = vmatmul.bf16.gmra.mxu1 %v4681_v33  ;;  %v13308_v36 = vld [vmem:[%s14971_s28 + $0xa8] sm:$0xff]   ;;  %v4692_v33 = vshrl.u32 %v13887_v58, 16  ;;  %v4695_v49 = vshll.u32 %v13887_v58, 16  ;;  %v15668_v25 = vld [vmem:[%s14971_s28 + $0xb8] sm:$0xff] }
 0x3c5   : >> { %4973 = vmatmul.bf16.gmra.mxu2 %v13307_v6  ;;  %v4363_v56 = vsel %vm2699_vm1, %v4358_v28, %v4362_v7  ;;  %5748 = vmatpush.bf16.msrb.mxu1 %v12352_v62  ;;  %v5174_v48 = vshll.u32 %v15668_v25, 16 }
 0x3c6   : >> { %5285 = vmatmul.bf16.gmra.mxu3 %v5161_v13  ;;  %v4694_v19 = vrot.slane %v4692_v33, 3  ;;  %v12380_v33 = vld [vmem:[%s16932_s7 + $0x3d8] sm:$0xff] }
 0x3c8   : >> { %v4014_v5 = vpop.f32.mrf.mxu2  ;;  %v3378_v45 = vpop.f32.mrf.mxu0 }
 0x3c9   : >> { %v4178_v31 = vpop.f32.mrf.mxu3  ;;  %v4043_v39 = vadd.f32 %v4014_v5, %v3717_v30  ;;  %v3690_v2 = vpop.f32.mrf.mxu1  ;;  %v3406_v1 = vadd.f32 %v3378_v45, %v15371_v40  ;;  %v4689_v40 = vor.u32 %v4688_v35, %v4685_v8  ;;  %v4364_v30 = vshrl.u32 %v15635_v26, 16  ;;  %v12383_v8 = vld [vmem:[%s16932_s7 + $0x3f0] sm:$0xff] }
 0x3cb   : >> { %v15645_v50 = vadd.f32 %v4178_v31, %v4043_v39  ;;  %v3718_v9 = vadd.f32 %v3690_v2, %v3406_v1  ;;  %v4690_v22 = vsel %vm2392_vm0, %v4680_v46, %v4689_v40  ;;  %v15665_v46 = vld [vmem:[%s14971_s28 + $0x58] sm:$0xff]  ;;  %v4697_v39 = vrot.slane %v4695_v49, 4 }
 0x3cc   : >> { %v4368_v31 = vshll.u32 %v15665_v46, 16  ;;  %v5170_v2 = vshrl.u32 %v15638_v44, 16  ;;  %v4366_v1 = vor.u32 %v4364_v30, %v4362_v7  ;;  %v12382_v44 = vld [vmem:[%s16932_s7 + $0x3e8] sm:$0xff] }
 0x3cd   : >> { %v15683_v23 = vor.u32 %v4697_v39, %v4694_v19  ;;  %v5178_v39 = vshrl.u32 %v15668_v25, 16 }
 0x3ce   : >> { %v4370_v54 = vrot.slane %v4368_v31, 1 }
 0x3cf   : >> { %v4699_v7 = vsel %vm2392_vm0, %v4689_v40, %v15683_v23  ;;  %v15704_v40 = vld [vmem:[%s14971_s28 + $0x60] sm:$0xff] }
 0x3d0   : >> { %v4016_v17 = vpop.f32.mrf.mxu2  ;;  %v3381_v41 = vpop.f32.mrf.mxu0 }
 0x3d1   : >> { %v4180_v53 = vpop.f32.mrf.mxu3  ;;  %v4044_v27 = vadd.f32 %v4016_v17, %v3718_v9  ;;  %v3693_v57 = vpop.f32.mrf.mxu1  ;;  %v3407_v55 = vadd.f32 %v3381_v41, %v15385_v0  ;;  %v12384_v0 = vld [vmem:[%s16932_s7 + $0x3f8] sm:$0xff]  ;;  %v5172_v9 = vor.u32 %v5170_v2, %v5168_v59  ;;  %v12369_v59 = vld [vmem:[%s16932_s7 + $0x380] sm:$0xff] }
 0x3d2   : >> { %6380 = vmatpush.bf16.msrb.mxu3 %v12384_v0  ;;  %6061 = vmatpush.bf16.msrb.mxu2 %v12369_v59  ;;  %v15724_v2 = vld [vmem:[%s14971_s28 + $0xc0] sm:$0xff]  }
 0x3d3   : >> { %v15662_v10 = vadd.f32 %v4180_v53, %v4044_v27  ;;  %v3719_v52 = vadd.f32 %v3693_v57, %v3407_v55  ;;  %4484 = vmatmul.bf16.gmra.mxu0 %v4363_v56  ;;  %v4371_v53 = vsel %vm2699_vm1, %v4366_v1, %v4370_v54  ;;  %v13888_v27 = vld [vmem:[%s14971_s28 + $0xbc] sm:$0xff]   ;;  %v13309_v57 = vld [vmem:[%s14971_s28 + $0xb0] sm:$0xff]  }
 0x3d4   : >> { %4814 = vmatmul.bf16.gmra.mxu1 %v4690_v22  ;;  %v12381_v22 = vld [vmem:[%s16932_s7 + $0x3e0] sm:$0xff]  ;;  %v4701_v55 = vshrl.u32 %v13888_v27, 16 }
 0x3d5   : >> { %4978 = vmatmul.bf16.gmra.mxu2 %v13308_v36  ;;  %v4704_v36 = vshll.u32 %v13888_v27, 16 }
 0x3d6   : >> { %5290 = vmatmul.bf16.gmra.mxu3 %v5169_v63  ;;  %v12351_v63 = vld [vmem:[%s16932_s7 + $0x340] sm:$0xff] }
 0x3d7   : >> { %6381 = vmatpush.bf16.msrb.mxu3 %v12383_v8  ;;  %5749 = vmatpush.bf16.msrb.mxu1 %v12351_v63  ;;  %v4706_v31 = vrot.slane %v4704_v36, 4 }
 0x3d8   : >> { %v4019_v6 = vpop.f32.mrf.mxu2  ;;  %v3383_v42 = vpop.f32.mrf.mxu0 }
 0x3d9   : >> { %v4183_v13 = vpop.f32.mrf.mxu3  ;;  %v4045_v24 = vadd.f32 %v4019_v6, %v3719_v52  ;;  %v3695_v5 = vpop.f32.mrf.mxu1  ;;  %v3408_v45 = vadd.f32 %v3383_v42, %v15399_v29  ;;  %v5176_v29 = vrot.slane %v5174_v48, 1  ;;  %v15713_v52 = vld [vmem:[%s14971_s28 + $0xc0] sm:$0xff]  ;;  %v4372_v6 = vshrl.u32 %v15665_v46, 16  ;;  %v12379_v46 = vld [vmem:[%s16932_s7 + $0x3d0] sm:$0xff] }
 0x3db   : >> { %v15681_v35 = vadd.f32 %v4183_v13, %v4045_v24  ;;  %v3720_v26 = vadd.f32 %v3695_v5, %v3408_v45  ;;  %6382 = vmatpush.bf16.msrb.mxu3 %v12382_v44  ;;  %v5177_v56 = vsel %vm2699_vm1, %v5172_v9, %v5176_v29  ;;  %v4376_v13 = vshll.u32 %v15704_v40, 16 }
 0x3dc   : >> { %v4703_v5 = vrot.slane %v4701_v55, 3  ;;  %v5182_v45 = vshll.u32 %v15713_v52, 16  ;;  %v5180_v25 = vor.u32 %v5178_v39, %v5176_v29 }
 0x3dd   : >> { %v4378_v1 = vrot.slane %v4376_v13, 1 }
 0x3de   : >> { %v15731_v9 = vor.u32 %v4706_v31, %v4703_v5  ;;  %v5184_v44 = vrot.slane %v5182_v45, 1  ;;  %v12410_v45 = vld [vmem:[%s16932_s7 + $0x478] sm:$0xff] }
 0x3df   : >> { %6383 = vmatpush.bf16.msrb.mxu3 %v12381_v22  ;;  %6856 = vmatpush.bf16.msra.mxu1 %v12410_v45 }
 0x3e0   : >> { %v4021_v4 = vpop.f32.mrf.mxu2  ;;  %v3386_v32 = vpop.f32.mrf.mxu0  ;;  %v4708_v29 = vsel %vm2392_vm0, %v15683_v23, %v15731_v9  ;;  %v5185_v22 = vsel %vm2699_vm1, %v5180_v25, %v5184_v44  ;;  %v13549_v25 = vld [vmem:[%s14971_s28 + $0x7c] sm:$0x8] }
 0x3e1   : >> { %v4185_v47 = vpop.f32.mrf.mxu3  ;;  %v4046_v28 = vadd.f32 %v4021_v4, %v3720_v26  ;;  %v3698_v17 = vpop.f32.mrf.mxu1  ;;  %v3409_v41 = vadd.f32 %v3386_v32, %v15420_v34  ;;  %v12343_v34 = vld [vmem:[%s16932_s7 + $0x300] sm:$0xff]  ;;  %v4374_v26 = vor.u32 %v4372_v6, %v4370_v54  ;;  %v4233_v4 = vld [vmem:[%s14971_s28 + $0x68] sm:$0x1] }
 0x3e2   : >> { %5585 = vmatpush.bf16.msrb.mxu0 %v12343_v34  ;;  %v4292_v59 = vunpack.c.l.b16 %v4233_v4  ;;  %v12377_v34 = vld [vmem:[%s16932_s7 + $0x3c0] sm:$0xff] }
 0x3e3   : >> { %v15701_v58 = vadd.f32 %v4185_v47, %v4046_v28  ;;  %v3721_v62 = vadd.f32 %v3698_v17, %v3409_v41  ;;  %4489 = vmatmul.bf16.gmra.mxu0 %v4371_v53  ;;  %6384 = vmatpush.bf16.msrb.mxu3 %v12380_v33  ;;  %v12378_v47 = vld [vmem:[%s16932_s7 + $0x3c8] sm:$0xff]  ;;  %v4379_v53 = vsel %vm2699_vm1, %v4374_v26, %v4378_v1  ;;  %v13890_v4 = vld [vmem:[%s14971_s28 + $0x7c] sm:$0xf0]  }
 0x3e4   : >> { %4819 = vmatmul.bf16.gmra.mxu1 %v4699_v7  ;;  %v10882_v28 = vld [vmem:[%s14971_s28 + $0xc8] sm:$0x1]  ;;  %v4303_v23 = vpack.c.b16 %v4292_v59, %v4292_v59 }
 0x3e5   : >> { %4983 = vmatmul.bf16.gmra.mxu2 %v13309_v57 }
 0x3e6   : >> { %5295 = vmatmul.bf16.gmra.mxu3 %v5177_v56  ;;  %v13310_v56 = vld [vmem:[%s14971_s28 + $0xb8] sm:$0xff]   ;;  %v4384_v31 = vshll.u32 %v4303_v23, 16 }
 0x3e7   : >> { %6385 = vmatpush.bf16.msrb.mxu3 %v12379_v46 }
 0x3e8   : >> { %v4024_v49 = vpop.f32.mrf.mxu2  ;;  %v3388_v24 = vpop.f32.mrf.mxu0 }
 0x3e9   : >> { %v4188_v0 = vpop.f32.mrf.mxu3  ;;  %v4047_v30 = vadd.f32 %v4024_v49, %v3721_v62  ;;  %v3700_v42 = vpop.f32.mrf.mxu1  ;;  %v3410_v19 = vadd.f32 %v3388_v24, %v15436_v11  ;;  %v12892_v11 = vunpack.c.h.b16 %v15724_v2  ;;  %v5098_v62 = vunpack.c.l.b16 %v10882_v28  ;;  %v12392_v49 = vld [vmem:[%s16932_s7 + $0x438] sm:$0xff] }
 0x3ea   : >> { %6544 = vmatpush.bf16.msra.mxu0 %v12392_v49  ;;  %v4386_v28 = vrot.slane %v4384_v31, 1 }
 0x3eb   : >> { %v15729_v48 = vadd.f32 %v4188_v0, %v4047_v30  ;;  %v3722_v8 = vadd.f32 %v3700_v42, %v3410_v19  ;;  %v4619_v41 = vpack.c.b16 %v12892_v11, %v12892_v11  ;;  %6386 = vmatpush.bf16.msrb.mxu3 %v12378_v47  ;;  %v5109_v0 = vpack.c.b16 %v5098_v62, %v5098_v62 }
 0x3ec   : >> { %v4380_v30 = vshrl.u32 %v15704_v40, 16 }
 0x3ed   : >> { %v4710_v63 = vshrl.u32 %v4619_v41, 16  ;;  %v4713_v33 = vshll.u32 %v4619_v41, 16  ;;  %v5190_v26 = vshll.u32 %v5109_v0, 16 }
 0x3ee   : >> { %v4382_v47 = vor.u32 %v4380_v30, %v4378_v1 }
 0x3ef   : >> { %6387 = vmatpush.bf16.msrb.mxu3 %v12377_v34  ;;  %v4712_v19 = vrot.slane %v4710_v63, 3  ;;  %v4715_v39 = vrot.slane %v4713_v33, 4 }
 0x3f0   : >> { %v4026_v32 = vpop.f32.mrf.mxu2  ;;  %v4455_v7 = vpop.f32.mrf.mxu0 }
 0x3f1   : >> { %v4190_v17 = vpop.f32.mrf.mxu3  ;;  %v4048_v54 = vadd.f32 %v4026_v32, %v3722_v8  ;;  %v4785_v27 = vpop.f32.mrf.mxu1  ;;  %v4505_v57 = vadd.f32 %v4455_v7, %v15451_v43  ;;  %v12418_v43 = vld [vmem:[%s16932_s7 + $0x4b8] sm:$0xff]  ;;  %v5186_v8 = vshrl.u32 %v15713_v52, 16  ;;  %v4716_v32 = vor.u32 %v4715_v39, %v4712_v19  ;;  %v13909_v7 = vld [vmem:[%s14971_s28 + $0x84] sm:$0xf0]  }
 0x3f2   : >> { %7186 = vmatpush.bf16.msra.mxu2 %v12418_v43 }
 0x3f3   : >> { %v15749_v55 = vadd.f32 %v4190_v17, %v4048_v54  ;;  %v4835_v36 = vadd.f32 %v4785_v27, %v4505_v57  ;;  %4494 = vmatmul.bf16.gmra.mxu0 %v4379_v53  ;;  %v5188_v17 = vor.u32 %v5186_v8, %v5184_v44  ;;  %v5192_v53 = vrot.slane %v5190_v26, 1  ;;  %v13598_v54 = vld [vmem:[%s14971_s28 + $0x84] sm:$0x8] }
 0x3f4   : >> { %4824 = vmatmul.bf16.gmra.mxu1 %v4708_v29  ;;  %v13892_v29 = vld [vmem:[%s14971_s28 + $0x84] sm:$0xff]   ;;  %v4717_v1 = vsel %vm2392_vm0, %v15731_v9, %v4716_v32  ;;  %v13599_v62 = vor.u32 %v13909_v7, %v13598_v54 }
 0x3f5   : >> { %4988 = vmatmul.bf16.gmra.mxu2 %v13310_v56  ;;  %v4387_v56 = vsel %vm2699_vm1, %v4382_v47, %v4386_v28  ;;  %v5193_v34 = vsel %vm2699_vm1, %v5188_v17, %v5192_v53  ;;  %v5431_v49 = vshrl.u32 %v13892_v29, 16  ;;  %v5434_v0 = vshll.u32 %v13892_v29, 16  ;;  %v15781_v9 = vld [vmem:[%s14971_s28 + $0x88] sm:$0xff]  ;;  %v12417_v47 = vld [vmem:[%s16932_s7 + $0x4b0] sm:$0xff] }
 0x3f6   : >> { %5300 = vmatmul.bf16.gmra.mxu3 %v5185_v22  ;;  %v12359_v22 = vld [vmem:[%s14971_s28 + $0x80] sm:$0xff]  ;;  %7187 = vmatpush.bf16.msra.mxu2 %v12417_v47 }
 0x3f7   : >> { %v5433_v39 = vrot.slane %v5431_v49, 3  ;;  %v5436_v45 = vrot.slane %v5434_v0, 4  ;;  %v13913_v0 = vld [vmem:[%s14971_s28 + $0x94] sm:$0xff]  }
 0x3f8   : >> { %v4949_v6 = vpop.f32.mrf.mxu2  ;;  %v4457_v42 = vpop.f32.mrf.mxu0 }
 0x3f9   : >> { %v5261_v13 = vpop.f32.mrf.mxu3  ;;  %v4999_v24 = vadd.f32 %v4949_v6, %v4835_v36  ;;  %v4787_v5 = vpop.f32.mrf.mxu1  ;;  %v4506_v46 = vadd.f32 %v4457_v42, %v15461_v61  ;;  %v13550_v61 = vor.u32 %v13890_v4, %v13549_v25  ;;  %v13911_v36 = vld [vmem:[%s14971_s28 + $0x8c] sm:$0xff]   ;;  %v5915_v6 = vshll.u32 %v12359_v22, 16 }
 0x3fa   : >> { %v6233_v30 = vshrl.u32 %v13911_v36, 16  ;;  %v5437_v29 = vor.u32 %v5436_v45, %v5433_v39 }
 0x3fb   : >> { %v15763_v11 = vadd.f32 %v5261_v13, %v4999_v24  ;;  %v4836_v40 = vadd.f32 %v4787_v5, %v4506_v46  ;;  %v5423_v63 = vshrl.u32 %v13550_v61, 16  ;;  %v5426_v43 = vshll.u32 %v13550_v61, 16  ;;  %v12391_v61 = vld [vmem:[%s16932_s7 + $0x430] sm:$0xff] }
 0x3fc   : >> { %v6225_v13 = vshrl.u32 %v13599_v62, 16  ;;  %v6236_v24 = vshll.u32 %v13911_v36, 16  ;;  %v5913_v46 = vshrl.u32 %v12359_v22, 16  ;;  %v5917_v25 = vrot.slane %v5915_v6, 1  ;;  %6545 = vmatpush.bf16.msra.mxu0 %v12391_v61  ;;  %v13312_v36 = vld [vmem:[%s14971_s28 + $0x80] sm:$0xff]  }
 0x3fd   : >> { %v5425_v42 = vrot.slane %v5423_v63, 3  ;;  %v5428_v19 = vrot.slane %v5426_v43, 4  ;;  %v6235_v17 = vrot.slane %v6233_v30, 3  ;;  %v13894_v63 = vld [vmem:[%s14971_s28 + $0x8c] sm:$0xff]  }
 0x3fe   : >> { %v6227_v4 = vrot.slane %v6225_v13, 3  ;;  %v6238_v53 = vrot.slane %v6236_v24, 4  ;;  %v5443_v30 = vshll.u32 %v13894_v63, 16  ;;  %v15806_v24 = vld [vmem:[%s14971_s28 + $0x90] sm:$0xff] }
 0x400   : >> { %v4951_v27 = vpop.f32.mrf.mxu2  ;;  %v4460_v41 = vpop.f32.mrf.mxu0 }
 0x401   : >> { %v5263_v52 = vpop.f32.mrf.mxu3  ;;  %v5000_v59 = vadd.f32 %v4951_v27, %v4836_v40  ;;  %v4790_v57 = vpop.f32.mrf.mxu1  ;;  %v4507_v44 = vadd.f32 %v4460_v41, %v15477_v37  ;;  %v6228_v37 = vshll.u32 %v13599_v62, 16  ;;  %v12409_v27 = vld [vmem:[%s16932_s7 + $0x470] sm:$0xff] }
 0x402   : >> { %6857 = vmatpush.bf16.msra.mxu1 %v12409_v27 }
 0x403   : >> { %v15777_v23 = vadd.f32 %v5263_v52, %v5000_v59  ;;  %v4837_v33 = vadd.f32 %v4790_v57, %v4507_v44  ;;  %4499 = vmatmul.bf16.gmra.mxu0 %v4387_v56  ;;  %v6230_v32 = vrot.slane %v6228_v37, 4  ;;  %v5429_v52 = vor.u32 %v5428_v19, %v5425_v42 }
 0x404   : >> { %4829 = vmatmul.bf16.gmra.mxu1 %v4717_v1  ;;  %v6239_v57 = vor.u32 %v6238_v53, %v6235_v17  ;;  %v5440_v37 = vshrl.u32 %v13894_v63, 16  ;;  %v6242_v42 = vshrl.u32 %v13913_v0, 16  ;;  %v12390_v17 = vld [vmem:[%s16932_s7 + $0x428] sm:$0xff] }
 0x405   : >> { %4993 = vmatmul.bf16.gmra.mxu2 %v15724_v2  ;;  %v5920_v2 = vshll.u32 %v15781_v9, 16  ;;  %v6231_v41 = vor.u32 %v6230_v32, %v6227_v4  ;;  %v12416_v32 = vld [vmem:[%s16932_s7 + $0x4a8] sm:$0xff]  ;;  %6546 = vmatpush.bf16.msra.mxu0 %v12390_v17 }
 0x406   : >> { %5305 = vmatmul.bf16.gmra.mxu3 %v5193_v34  ;;  %v5438_v34 = vsel %vm2392_vm0, %v5429_v52, %v5437_v29  ;;  %7188 = vmatpush.bf16.msra.mxu2 %v12416_v32 }
 0x407   : >> { %v5922_v59 = vrot.slane %v5920_v2, 1  ;;  %v6240_v49 = vsel %vm2392_vm0, %v6231_v41, %v6239_v57  ;;  %v6244_v2 = vrot.slane %v6242_v42, 3 }
 0x408   : >> { %v4954_v5 = vpop.f32.mrf.mxu2  ;;  %v4462_v26 = vpop.f32.mrf.mxu0 }
 0x409   : >> { %v5266_v31 = vpop.f32.mrf.mxu3  ;;  %v5001_v8 = vadd.f32 %v4954_v5, %v4837_v33  ;;  %v4792_v40 = vpop.f32.mrf.mxu1  ;;  %v4508_v28 = vadd.f32 %v4462_v26, %v15491_v3  ;;  %v5918_v3 = vor.u32 %v5917_v25, %v5913_v46  ;;  %v6245_v5 = vshll.u32 %v13913_v0, 16 }
 0x40a   : >> { %v5442_v46 = vrot.slane %v5440_v37, 3  ;;  %v5924_v26 = vshrl.u32 %v15781_v9, 16  ;;  %v5928_v25 = vshll.u32 %v15806_v24, 16 }
 0x40b   : >> { %v15788_v54 = vadd.f32 %v5266_v31, %v5001_v8  ;;  %v4838_v7 = vadd.f32 %v4792_v40, %v4508_v28  ;;  %v5923_v43 = vsel %vm2699_vm1, %v5918_v3, %v5922_v59  ;;  %v5445_v8 = vrot.slane %v5443_v30, 4 }
 0x40c   : >> { %v6247_v4 = vrot.slane %v6245_v5, 4  ;;  %v5926_v53 = vor.u32 %v5924_v26, %v5922_v59 }
 0x40d   : >> { %v5446_v9 = vor.u32 %v5445_v8, %v5442_v46 }
 0x410   : >> { %v4956_v56 = vpop.f32.mrf.mxu2  ;;  %v4465_v62 = vpop.f32.mrf.mxu0 }
 0x411   : >> { %v5268_v1 = vpop.f32.mrf.mxu3  ;;  %v5002_v22 = vadd.f32 %v4956_v56, %v4838_v7  ;;  %v4795_v44 = vpop.f32.mrf.mxu1  ;;  %v4509_v33 = vadd.f32 %v4465_v62, %v15504_v21  ;;  %v6248_v7 = vor.u32 %v6247_v4, %v6244_v2  ;;  %v5447_v56 = vsel %vm2392_vm0, %v5437_v29, %v5446_v9  ;;  %v12408_v62 = vld [vmem:[%s16932_s7 + $0x468] sm:$0xff] }
 0x412   : >> { %6858 = vmatpush.bf16.msra.mxu1 %v12408_v62 }
 0x413   : >> { %v15803_v6 = vadd.f32 %v5268_v1, %v5002_v22  ;;  %v4839_v13 = vadd.f32 %v4795_v44, %v4509_v33  ;;  %5586 = vmatmul.bf16.vlgmr.msrb.gmra.mxu0 %v5438_v34  ;;  %v13313_v1 = vld [vmem:[%s14971_s28 + $0x88] sm:$0xff]   ;;  %v13896_v22 = vld [vmem:[%s14971_s28 + $0x94] sm:$0xff]   ;;  %v6249_v34 = vsel %vm2392_vm0, %v6239_v57, %v6248_v7 }
 0x414   : >> { %5750 = vmatmul.bf16.vlgmr.msrb.gmra.mxu1 %v13312_v36  ;;  %v13915_v36 = vld [vmem:[%s14971_s28 + $0x9c] sm:$0xff]   ;;  %v5449_v29 = vshrl.u32 %v13896_v22, 16 }
 0x415   : >> { %6062 = vmatmul.bf16.vlgmr.msrb.gmra.mxu2 %v5923_v43  ;;  %v5452_v43 = vshll.u32 %v13896_v22, 16  ;;  %v6251_v0 = vshrl.u32 %v13915_v36, 16 }
 0x416   : >> { %6388 = vmatmul.bf16.vlgmr.msrb.gmra.mxu3 %v6240_v49  ;;  %v15832_v49 = vld [vmem:[%s14971_s28 + $0x98] sm:$0xff]  ;;  %v5451_v5 = vrot.slane %v5449_v29, 3 }
 0x418   : >> { %v4959_v31 = vpop.f32.mrf.mxu2  ;;  %v4467_v39 = vpop.f32.mrf.mxu0 }
 0x419   : >> { %v5271_v21 = vpop.f32.mrf.mxu3  ;;  %v5003_v19 = vadd.f32 %v4959_v31, %v4839_v13  ;;  %v4797_v45 = vpop.f32.mrf.mxu1  ;;  %v4510_v40 = vadd.f32 %v4467_v39, %v15521_v60  ;;  %v5930_v60 = vrot.slane %v5928_v25, 1  ;;  %v6254_v13 = vshll.u32 %v13915_v36, 16 }
 0x41a   : >> { %v5454_v31 = vrot.slane %v5452_v43, 4  ;;  %v5936_v39 = vshll.u32 %v15832_v49, 16 }
 0x41b   : >> { %v15811_v47 = vadd.f32 %v5271_v21, %v5003_v19  ;;  %v4840_v28 = vadd.f32 %v4797_v45, %v4510_v40  ;;  %v5931_v44 = vsel %vm2699_vm1, %v5926_v53, %v5930_v60  ;;  %v5932_v21 = vshrl.u32 %v15806_v24, 16 }
 0x41c   : >> { %v6253_v45 = vrot.slane %v6251_v0, 3  ;;  %v6256_v46 = vrot.slane %v6254_v13, 4  ;;  %v5455_v40 = vor.u32 %v5454_v31, %v5451_v5  ;;  %v5938_v2 = vrot.slane %v5936_v39, 1 }
 0x41d   : >> { %v5934_v25 = vor.u32 %v5932_v21, %v5930_v60 }
 0x41e   : >> { %v6257_v4 = vor.u32 %v6256_v46, %v6253_v45 }
 0x41f   : >> { %v5939_v60 = vsel %vm2699_vm1, %v5934_v25, %v5938_v2 }
 0x420   : >> { %v4961_v61 = vpop.f32.mrf.mxu2  ;;  %v4470_v3 = vpop.f32.mrf.mxu0 }
 0x421   : >> { %v5273_v27 = vpop.f32.mrf.mxu3  ;;  %v5004_v52 = vadd.f32 %v4961_v61, %v4840_v28  ;;  %v4800_v41 = vpop.f32.mrf.mxu1  ;;  %v4511_v59 = vadd.f32 %v4470_v3, %v15534_v14  ;;  %v13314_v61 = vld [vmem:[%s14971_s28 + $0x90] sm:$0xff]  }
 0x423   : >> { %v15829_v63 = vadd.f32 %v5273_v27, %v5004_v52  ;;  %v4841_v33 = vadd.f32 %v4800_v41, %v4511_v59  ;;  %5591 = vmatmul.bf16.gmra.mxu0 %v5447_v56  ;;  %v13898_v27 = vld [vmem:[%s14971_s28 + $0x9c] sm:$0xff]   ;;  %v6258_v41 = vsel %vm2392_vm0, %v6248_v7, %v6257_v4  ;;  %v13917_v56 = vld [vmem:[%s14971_s28 + $0xa4] sm:$0xff]  }
 0x424   : >> { %5755 = vmatmul.bf16.gmra.mxu1 %v13313_v1  ;;  %v12415_v52 = vld [vmem:[%s16932_s7 + $0x4a0] sm:$0xff]  ;;  %v5458_v62 = vshrl.u32 %v13898_v27, 16  ;;  %v5461_v59 = vshll.u32 %v13898_v27, 16  ;;  %v13919_v27 = vld [vmem:[%s14971_s28 + $0xac] sm:$0xff]  }
 0x425   : >> { %6067 = vmatmul.bf16.gmra.mxu2 %v5931_v44  ;;  %v15858_v7 = vld [vmem:[%s14971_s28 + $0xa0] sm:$0xff]  ;;  %v6260_v44 = vshrl.u32 %v13917_v56, 16 }
 0x426   : >> { %6393 = vmatmul.bf16.gmra.mxu3 %v6249_v34  ;;  %7189 = vmatpush.bf16.msra.mxu2 %v12415_v52  ;;  %v6263_v34 = vshll.u32 %v13917_v56, 16  ;;  %v5460_v13 = vrot.slane %v5458_v62, 3  ;;  %v6272_v56 = vshll.u32 %v13919_v27, 16 }
 0x428   : >> { %v4964_v14 = vpop.f32.mrf.mxu2  ;;  %v4472_v42 = vpop.f32.mrf.mxu0  ;;  %v6265_v5 = vrot.slane %v6263_v34, 4 }
 0x429   : >> { %v5276_v37 = vpop.f32.mrf.mxu3  ;;  %v5005_v30 = vadd.f32 %v4964_v14, %v4841_v33  ;;  %v4802_v57 = vpop.f32.mrf.mxu1  ;;  %v4512_v19 = vadd.f32 %v4472_v42, %v15545_v20  ;;  %v5456_v20 = vsel %vm2392_vm0, %v5446_v9, %v5455_v40  ;;  %v12389_v9 = vld [vmem:[%s16932_s7 + $0x420] sm:$0xff]  ;;  %v5463_v14 = vrot.slane %v5461_v59, 4 }
 0x42a   : >> { %6547 = vmatpush.bf16.msra.mxu0 %v12389_v9  ;;  %v5944_v42 = vshll.u32 %v15858_v7, 16 }
 0x42b   : >> { %v15837_v8 = vadd.f32 %v5276_v37, %v5005_v30  ;;  %v4842_v26 = vadd.f32 %v4802_v57, %v4512_v19  ;;  %v5940_v37 = vshrl.u32 %v15832_v49, 16  ;;  %v6262_v57 = vrot.slane %v6260_v44, 3 }
 0x42c   : >> { %v5464_v19 = vor.u32 %v5463_v14, %v5460_v13  ;;  %v5946_v45 = vrot.slane %v5944_v42, 1  ;;  %v6274_v13 = vrot.slane %v6272_v56, 4 }
 0x42d   : >> { %v5942_v39 = vor.u32 %v5940_v37, %v5938_v2  ;;  %v6266_v46 = vor.u32 %v6265_v5, %v6262_v57 }
 0x430   : >> { %v4966_v28 = vpop.f32.mrf.mxu2  ;;  %v4475_v24 = vpop.f32.mrf.mxu0 }
 0x431   : >> { %v5278_v32 = vpop.f32.mrf.mxu3  ;;  %v5006_v17 = vadd.f32 %v4966_v28, %v4842_v26  ;;  %v4805_v53 = vpop.f32.mrf.mxu1  ;;  %v4513_v3 = vadd.f32 %v4475_v24, %v15564_v15  ;;  %v12407_v15 = vld [vmem:[%s16932_s7 + $0x460] sm:$0xff] }
 0x432   : >> { %6859 = vmatpush.bf16.msra.mxu1 %v12407_v15  ;;  %v13900_v24 = vld [vmem:[%s14971_s28 + $0xa4] sm:$0xff]  }
 0x433   : >> { %v15849_v1 = vadd.f32 %v5278_v32, %v5006_v17  ;;  %v4843_v22 = vadd.f32 %v4805_v53, %v4513_v3  ;;  %5596 = vmatmul.bf16.gmra.mxu0 %v5456_v20  ;;  %v13315_v17 = vld [vmem:[%s14971_s28 + $0x98] sm:$0xff]   ;;  %v5947_v20 = vsel %vm2699_vm1, %v5942_v39, %v5946_v45  ;;  %v5467_v3 = vshrl.u32 %v13900_v24, 16 }
 0x434   : >> { %5760 = vmatmul.bf16.gmra.mxu1 %v13314_v61  ;;  %v6267_v61 = vsel %vm2392_vm0, %v6257_v4, %v6266_v46  ;;  %v6269_v4 = vshrl.u32 %v13919_v27, 16  ;;  %v15901_v27 = vld [vmem:[%s14971_s28 + $0xb0] sm:$0xff] }
 0x435   : >> { %6072 = vmatmul.bf16.gmra.mxu2 %v5939_v60  ;;  %v5470_v60 = vshll.u32 %v13900_v24, 16  ;;  %v5469_v44 = vrot.slane %v5467_v3, 3  ;;  %v13921_v24 = vld [vmem:[%s14971_s28 + $0xb4] sm:$0xff]  }
 0x436   : >> { %6398 = vmatmul.bf16.gmra.mxu3 %v6258_v41  ;;  %v15881_v41 = vld [vmem:[%s14971_s28 + $0xa8] sm:$0xff] }
 0x437   : >> { %v5472_v34 = vrot.slane %v5470_v60, 4  ;;  %v5956_v56 = vshrl.u32 %v15881_v41, 16 }
 0x438   : >> { %v4969_v36 = vpop.f32.mrf.mxu2  ;;  %v4477_v43 = vpop.f32.mrf.mxu0 }
 0x439   : >> { %v5281_v33 = vpop.f32.mrf.mxu3  ;;  %v5007_v29 = vadd.f32 %v4969_v36, %v4843_v22  ;;  %v4807_v0 = vpop.f32.mrf.mxu1  ;;  %v4514_v30 = vadd.f32 %v4477_v43, %v15572_v12  ;;  %v5465_v12 = vsel %vm2392_vm0, %v5455_v40, %v5464_v19  ;;  %v12414_v40 = vld [vmem:[%s16932_s7 + $0x498] sm:$0xff]  ;;  %v5948_v36 = vshrl.u32 %v15858_v7, 16 }
 0x43a   : >> { %7190 = vmatpush.bf16.msra.mxu2 %v12414_v40  ;;  %v5952_v43 = vshll.u32 %v15881_v41, 16  ;;  %v12387_v41 = vld [vmem:[%s16932_s7 + $0x410] sm:$0xff] }
 0x43b   : >> { %v15863_v31 = vadd.f32 %v5281_v33, %v5007_v29  ;;  %v4844_v21 = vadd.f32 %v4807_v0, %v4514_v30  ;;  %v12406_v33 = vld [vmem:[%s16932_s7 + $0x458] sm:$0xff]  ;;  %v6271_v0 = vrot.slane %v6269_v4, 3  ;;  %v5473_v30 = vor.u32 %v5472_v34, %v5469_v44 }
 0x43c   : >> { %6860 = vmatpush.bf16.msra.mxu1 %v12406_v33  ;;  %v5950_v42 = vor.u32 %v5948_v36, %v5946_v45  ;;  %v5954_v7 = vrot.slane %v5952_v43, 1  ;;  %v12405_v36 = vld [vmem:[%s16932_s7 + $0x450] sm:$0xff] }
 0x43d   : >> { %v6275_v57 = vor.u32 %v6274_v13, %v6271_v0 }
 0x440   : >> { %v4971_v26 = vpop.f32.mrf.mxu2  ;;  %v4480_v49 = vpop.f32.mrf.mxu0  ;;  %6861 = vmatpush.bf16.msra.mxu1 %v12405_v36 }
 0x441   : >> { %v5283_v25 = vpop.f32.mrf.mxu3  ;;  %v5008_v28 = vadd.f32 %v4971_v26, %v4844_v21  ;;  %v4810_v32 = vpop.f32.mrf.mxu1  ;;  %v4515_v53 = vadd.f32 %v4480_v49, %v15594_v38  ;;  %v12388_v38 = vld [vmem:[%s16932_s7 + $0x418] sm:$0xff]  ;;  %v13902_v49 = vld [vmem:[%s14971_s28 + $0xac] sm:$0xff]  }
 0x442   : >> { %6548 = vmatpush.bf16.msra.mxu0 %v12388_v38 }
 0x443   : >> { %v15872_v2 = vadd.f32 %v5283_v25, %v5008_v28  ;;  %v4845_v52 = vadd.f32 %v4810_v32, %v4515_v53  ;;  %5601 = vmatmul.bf16.gmra.mxu0 %v5465_v12  ;;  %v5474_v25 = vsel %vm2392_vm0, %v5464_v19, %v5473_v30  ;;  %v13316_v28 = vld [vmem:[%s14971_s28 + $0xa0] sm:$0xff]   ;;  %v5955_v12 = vsel %vm2699_vm1, %v5950_v42, %v5954_v7 }
 0x444   : >> { %5765 = vmatmul.bf16.gmra.mxu1 %v13315_v17  ;;  %v6276_v17 = vsel %vm2392_vm0, %v6266_v46, %v6275_v57  ;;  %v6278_v19 = vshrl.u32 %v13921_v24, 16 }
 0x445   : >> { %6077 = vmatmul.bf16.gmra.mxu2 %v5947_v20  ;;  %v5476_v20 = vshrl.u32 %v13902_v49, 16 }
 0x446   : >> { %6403 = vmatmul.bf16.gmra.mxu3 %v6267_v61  ;;  %v5479_v61 = vshll.u32 %v13902_v49, 16  ;;  %6549 = vmatpush.bf16.msra.mxu0 %v12387_v41 }
 0x447   : >> { %v5478_v46 = vrot.slane %v5476_v20, 3 }
 0x448   : >> { %v4974_v22 = vpop.f32.mrf.mxu2  ;;  %v4482_v59 = vpop.f32.mrf.mxu0  ;;  %v5481_v4 = vrot.slane %v5479_v61, 4 }
 0x449   : >> { %v5286_v9 = vpop.f32.mrf.mxu3  ;;  %v5009_v62 = vadd.f32 %v4974_v22, %v4845_v52  ;;  %v4812_v15 = vpop.f32.mrf.mxu1  ;;  %v4516_v29 = vadd.f32 %v4482_v59, %v15602_v51  ;;  %v6281_v52 = vshll.u32 %v13921_v24, 16  ;;  %v12413_v22 = vld [vmem:[%s16932_s7 + $0x490] sm:$0xff]  ;;  %v6280_v59 = vrot.slane %v6278_v19, 3  ;;  %v15927_v24 = vld [vmem:[%s14971_s28 + $0xb8] sm:$0xff] }
 0x44a   : >> { %7191 = vmatpush.bf16.msra.mxu2 %v12413_v22  ;;  %v5482_v33 = vor.u32 %v5481_v4, %v5478_v46  ;;  %v12412_v22 = vld [vmem:[%s16932_s7 + $0x488] sm:$0xff] }
 0x44b   : >> { %v15889_v14 = vadd.f32 %v5286_v9, %v5009_v62  ;;  %v4846_v37 = vadd.f32 %v4812_v15, %v4516_v29  ;;  %v5960_v62 = vshll.u32 %v15901_v27, 16  ;;  %v6283_v15 = vrot.slane %v6281_v52, 4 }
 0x44d   : >> { %v5962_v29 = vrot.slane %v5960_v62, 1  ;;  %v6284_v43 = vor.u32 %v6283_v15, %v6280_v59 }
 0x44e   : >> { %7192 = vmatpush.bf16.msra.mxu2 %v12412_v22 }
 0x450   : >> { %v4976_v5 = vpop.f32.mrf.mxu2  ;;  %v4485_v26 = vpop.f32.mrf.mxu0 }
 0x451   : >> { %v5288_v21 = vpop.f32.mrf.mxu3  ;;  %v5010_v39 = vadd.f32 %v4976_v5, %v4846_v37  ;;  %v4815_v51 = vpop.f32.mrf.mxu1  ;;  %v4517_v32 = vadd.f32 %v4485_v26, %v15618_v18  ;;  %v13904_v26 = vld [vmem:[%s14971_s28 + $0xb4] sm:$0xff]  }
 0x453   : >> { %v15898_v45 = vadd.f32 %v5288_v21, %v5010_v39  ;;  %v4847_v53 = vadd.f32 %v4815_v51, %v4517_v32  ;;  %5606 = vmatmul.bf16.gmra.mxu0 %v5474_v25  ;;  %v5483_v21 = vsel %vm2392_vm0, %v5473_v30, %v5482_v33  ;;  %v13317_v39 = vld [vmem:[%s14971_s28 + $0xa8] sm:$0xff]  }
 0x454   : >> { %5770 = vmatmul.bf16.gmra.mxu1 %v13316_v28  ;;  %v13923_v28 = vld [vmem:[%s14971_s28 + $0xbc] sm:$0xff]  }
 0x455   : >> { %6082 = vmatmul.bf16.gmra.mxu2 %v5955_v12  ;;  %v5485_v12 = vshrl.u32 %v13904_v26, 16  ;;  %v6287_v30 = vshrl.u32 %v13923_v28, 16 }
 0x456   : >> { %6408 = vmatmul.bf16.gmra.mxu3 %v6276_v17  ;;  %v5488_v17 = vshll.u32 %v13904_v26, 16 }
 0x458   : >> { %v4979_v3 = vpop.f32.mrf.mxu2  ;;  %v4487_v40 = vpop.f32.mrf.mxu0 }
 0x459   : >> { %v5291_v18 = vpop.f32.mrf.mxu3  ;;  %v5011_v60 = vadd.f32 %v4979_v3, %v4847_v53  ;;  %v4817_v38 = vpop.f32.mrf.mxu1  ;;  %v4518_v9 = vadd.f32 %v4487_v40, %v15632_v16  ;;  %v5958_v16 = vor.u32 %v5956_v56, %v5954_v7  ;;  %v6285_v7 = vsel %vm2392_vm0, %v6275_v57, %v6284_v43 }
 0x45a   : >> { %v6290_v53 = vshll.u32 %v13923_v28, 16  ;;  %v5487_v57 = vrot.slane %v5485_v12, 3  ;;  %v5490_v3 = vrot.slane %v5488_v17, 4  ;;  %v5968_v40 = vshll.u32 %v15927_v24, 16 }
 0x45b   : >> { %v15909_v44 = vadd.f32 %v5291_v18, %v5011_v60  ;;  %v4848_v34 = vadd.f32 %v4817_v38, %v4518_v9  ;;  %v5963_v25 = vsel %vm2699_vm1, %v5958_v16, %v5962_v29  ;;  %v5964_v18 = vshrl.u32 %v15901_v27, 16  ;;  %v12386_v9 = vld [vmem:[%s16932_s7 + $0x408] sm:$0xff] }
 0x45c   : >> { %v6289_v38 = vrot.slane %v6287_v30, 3  ;;  %v6292_v46 = vrot.slane %v6290_v53, 4  ;;  %v5491_v27 = vor.u32 %v5490_v3, %v5487_v57  ;;  %6550 = vmatpush.bf16.msra.mxu0 %v12386_v9 }
 0x45d   : >> { %v5966_v62 = vor.u32 %v5964_v18, %v5962_v29  ;;  %v12404_v29 = vld [vmem:[%s16932_s7 + $0x448] sm:$0xff]  ;;  %v12425_v18 = vld [vmem:[%s16932_s7 + $0x4f0] sm:$0xff] }
 0x45e   : >> { %v15940_v59 = vor.u32 %v6292_v46, %v6289_v38  ;;  %6862 = vmatpush.bf16.msra.mxu1 %v12404_v29 }
 0x460   : >> { %v4981_v0 = vpop.f32.mrf.mxu2  ;;  %v4490_v42 = vpop.f32.mrf.mxu0 }
 0x461   : >> { %v5293_v13 = vpop.f32.mrf.mxu3  ;;  %v5012_v37 = vadd.f32 %v4981_v0, %v4848_v34  ;;  %v4820_v5 = vpop.f32.mrf.mxu1  ;;  %v4519_v51 = vadd.f32 %v4490_v42, %v15645_v50  ;;  %v5492_v0 = vsel %vm2392_vm0, %v5482_v33, %v5491_v27 }
 0x463   : >> { %v15924_v49 = vadd.f32 %v5293_v13, %v5012_v37  ;;  %v4849_v32 = vadd.f32 %v4820_v5, %v4519_v51  ;;  %5611 = vmatmul.bf16.gmra.mxu0 %v5483_v21  ;;  %v15944_v13 = vld [vmem:[%s14971_s28 + $0xb0] sm:$0xff]   ;;  %v13906_v37 = vld [vmem:[%s14971_s28 + $0xbc] sm:$0xff]   ;;  %v6294_v21 = vsel %vm2392_vm0, %v6284_v43, %v15940_v59 }
 0x464   : >> { %5775 = vmatmul.bf16.gmra.mxu1 %v13317_v39  ;;  %v13925_v39 = vld [vmem:[%s14971_s28 + $0xc4] sm:$0xff]   ;;  %v5494_v51 = vshrl.u32 %v13906_v37, 16  ;;  %v12426_v43 = vld [vmem:[%s16932_s7 + $0x4f8] sm:$0xff] }
 0x465   : >> { %6087 = vmatmul.bf16.gmra.mxu2 %v5963_v25  ;;  %v5497_v25 = vshll.u32 %v13906_v37, 16  ;;  %v6299_v28 = vshll.u32 %v13925_v39, 16  ;;  %7350 = vmatpush.bf16.msra.mxu3 %v12426_v43 }
 0x466   : >> { %6413 = vmatmul.bf16.gmra.mxu3 %v6285_v7  ;;  %v15959_v7 = vld [vmem:[%s14971_s28 + $0xc0] sm:$0xff] }
 0x467   : >> { %v6301_v3 = vrot.slane %v6299_v28, 4  ;;  %v12422_v28 = vld [vmem:[%s16932_s7 + $0x4d8] sm:$0xff] }
 0x468   : >> { %v4984_v20 = vpop.f32.mrf.mxu2  ;;  %v4492_v19 = vpop.f32.mrf.mxu0 }
 0x469   : >> { %v5296_v50 = vpop.f32.mrf.mxu3  ;;  %v5013_v61 = vadd.f32 %v4984_v20, %v4849_v32  ;;  %v4822_v52 = vpop.f32.mrf.mxu1  ;;  %v4520_v60 = vadd.f32 %v4492_v19, %v15662_v10  ;;  %v5970_v10 = vrot.slane %v5968_v40, 1  ;;  %v5496_v20 = vrot.slane %v5494_v51, 3  ;;  %7351 = vmatpush.bf16.msra.mxu3 %v12425_v18  ;;  %v12403_v51 = vld [vmem:[%s16932_s7 + $0x440] sm:$0xff]  ;;  %v12421_v18 = vld [vmem:[%s16932_s7 + $0x4d0] sm:$0xff] }
 0x46a   : >> { %6863 = vmatpush.bf16.msra.mxu1 %v12403_v51 }
 0x46b   : >> { %v15932_v4 = vadd.f32 %v5296_v50, %v5013_v61  ;;  %v4850_v56 = vadd.f32 %v4822_v52, %v4520_v60  ;;  %v5971_v5 = vsel %vm2699_vm1, %v5966_v62, %v5970_v10  ;;  %v5499_v50 = vrot.slane %v5497_v25, 4  ;;  %v13907_v62 = vld [vmem:[%s14971_s28 + $0xc4] sm:$0xff]  }
 0x46c   : >> { %v5972_v61 = vshrl.u32 %v15927_v24, 16  ;;  %v5976_v52 = vshll.u32 %v15959_v7, 16 }
 0x46d   : >> { %v15972_v38 = vor.u32 %v5499_v50, %v5496_v20  ;;  %v5980_v50 = vshrl.u32 %v15959_v7, 16 }
 0x46e   : >> { %v5974_v46 = vor.u32 %v5972_v61, %v5970_v10  ;;  %v5978_v24 = vrot.slane %v5976_v52, 1  ;;  %v12411_v10 = vld [vmem:[%s16932_s7 + $0x480] sm:$0xff] }
 0x46f   : >> { %7193 = vmatpush.bf16.msra.mxu2 %v12411_v10 }
 0x470   : >> { %v4986_v15 = vpop.f32.mrf.mxu2  ;;  %v4495_v36 = vpop.f32.mrf.mxu0  ;;  %v5979_v37 = vsel %vm2699_vm1, %v5974_v46, %v5978_v24  ;;  %v16024_v46 = vld [vmem:[%s14971_s28 + $0xd0] sm:$0xff]  }
 0x471   : >> { %v5298_v34 = vpop.f32.mrf.mxu3  ;;  %v5014_v41 = vadd.f32 %v4986_v15, %v4850_v56  ;;  %v4825_v16 = vpop.f32.mrf.mxu1  ;;  %v4521_v42 = vadd.f32 %v4495_v36, %v15681_v35  ;;  %v6296_v35 = vshrl.u32 %v13925_v39, 16  ;;  %v5501_v36 = vsel %vm2392_vm0, %v5491_v27, %v15972_v38  ;;  %v12423_v27 = vld [vmem:[%s16932_s7 + $0x4e0] sm:$0xff] }
 0x472   : >> { %v5503_v39 = vshrl.u32 %v13907_v62, 16 }
 0x473   : >> { %v15955_v26 = vadd.f32 %v5298_v34, %v5014_v41  ;;  %v4851_v33 = vadd.f32 %v4825_v16, %v4521_v42  ;;  %5616 = vmatmul.bf16.gmra.mxu0 %v5492_v0  ;;  %v6298_v57 = vrot.slane %v6296_v35, 3  ;;  %v15983_v16 = vld [vmem:[%s14971_s28 + $0xb8] sm:$0xff]   ;;  %v13926_v42 = vld [vmem:[%s14971_s28 + $0xcc] sm:$0xff]  }
 0x474   : >> { %5780 = vmatmul.bf16.gmra.mxu1 %v15944_v13  ;;  %v6305_v25 = vshrl.u32 %v13926_v42, 16  ;;  %v6308_v35 = vshll.u32 %v13926_v42, 16  ;;  %v16040_v42 = vld [vmem:[%s14971_s28 + $0xc0] sm:$0xff]  }
 0x475   : >> { %6092 = vmatmul.bf16.gmra.mxu2 %v5971_v5  ;;  %v15974_v56 = vor.u32 %v6301_v3, %v6298_v57  ;;  %v16016_v3 = vld [vmem:[%s14971_s28 + $0xc8] sm:$0xff]  }
 0x476   : >> { %6418 = vmatmul.bf16.gmra.mxu3 %v6294_v21  ;;  %v6307_v52 = vrot.slane %v6305_v25, 3  ;;  %v6310_v57 = vrot.slane %v6308_v35, 4  ;;  %v12419_v25 = vld [vmem:[%s16932_s7 + $0x4c0] sm:$0xff] }
 0x477   : >> { %v6303_v29 = vsel %vm2392_vm0, %v15940_v59, %v15974_v56  ;;  %v5506_v59 = vshll.u32 %v13907_v62, 16 }
 0x478   : >> { %v4989_v32 = vpop.f32.mrf.mxu2  ;;  %v4497_v30 = vpop.f32.mrf.mxu0  ;;  %v16029_v62 = vor.u32 %v6310_v57, %v6307_v52 }
 0x479   : >> { %v5301_v12 = vpop.f32.mrf.mxu3  ;;  %v5015_v17 = vadd.f32 %v4989_v32, %v4851_v33  ;;  %v4827_v53 = vpop.f32.mrf.mxu1  ;;  %v4522_v19 = vadd.f32 %v4497_v30, %v15701_v58  ;;  %v12424_v58 = vld [vmem:[%s16932_s7 + $0x4e8] sm:$0xff]  ;;  %v5508_v20 = vrot.slane %v5506_v59, 4 }
 0x47a   : >> { %7352 = vmatpush.bf16.msra.mxu3 %v12424_v58  ;;  %v16004_v33 = vld [vmem:[%s14971_s28 + $0xc8] sm:$0xff] }
 0x47b   : >> { %v15970_v60 = vadd.f32 %v5301_v12, %v5015_v17  ;;  %v4852_v40 = vadd.f32 %v4827_v53, %v4522_v19  ;;  %v5505_v12 = vrot.slane %v5503_v39, 3  ;;  %v5984_v61 = vshll.u32 %v16004_v33, 16 }
 0x47c   : >> { %v5988_v57 = vshrl.u32 %v16004_v33, 16  ;;  %v13647_v33 = vld [vmem:[%s14971_s28 + $0xe4] sm:$0x8] }
 0x47d   : >> { %v16026_v7 = vor.u32 %v5508_v20, %v5505_v12 }
 0x47e   : >> { %7353 = vmatpush.bf16.msra.mxu3 %v12423_v27 }
 0x480   : >> { %v4991_v22 = vpop.f32.mrf.mxu2  ;;  %v4500_v34 = vpop.f32.mrf.mxu0 }
 0x481   : >> { %v5303_v9 = vpop.f32.mrf.mxu3  ;;  %v5016_v15 = vadd.f32 %v4991_v22, %v4852_v40  ;;  %v4830_v41 = vpop.f32.mrf.mxu1  ;;  %v4523_v0 = vadd.f32 %v4500_v34, %v15729_v48  ;;  %v12385_v48 = vld [vmem:[%s16932_s7 + $0x400] sm:$0xff]  ;;  %v5982_v22 = vor.u32 %v5980_v50, %v5978_v24  ;;  %v12420_v34 = vld [vmem:[%s16932_s7 + $0x4c8] sm:$0xff]  ;;  %v5510_v24 = vsel %vm2392_vm0, %v15972_v38, %v16026_v7 }
 0x482   : >> { %6551 = vmatpush.bf16.msra.mxu0 %v12385_v48  ;;  %7354 = vmatpush.bf16.msra.mxu3 %v12422_v28  ;;  %v6312_v48 = vsel %vm2392_vm0, %v15974_v56, %v16029_v62  ;;  %v12460_v56 = vld [vmem:[%s16932_s7 + $0x5b8] sm:$0xff] }
 0x483   : >> { %v15997_v5 = vadd.f32 %v5303_v9, %v5016_v15  ;;  %v4853_v21 = vadd.f32 %v4830_v41, %v4523_v0  ;;  %5621 = vmatmul.bf16.gmra.mxu0 %v5501_v36  ;;  %v12932_v9 = vunpack.c.h.b16 %v16016_v3  ;;  %v12972_v15 = vunpack.c.h.b16 %v16024_v46  ;;  %v11108_v41 = vld [vmem:[%s14971_s28 + $0xd0] sm:$0x1]  ;;  %8152 = vmatpush.bf16.msrb.mxu2 %v12460_v56 }
 0x484   : >> { %5785 = vmatmul.bf16.gmra.mxu1 %v15983_v16  ;;  %v5900_v59 = vunpack.c.l.b16 %v11108_v41 }
 0x485   : >> { %6097 = vmatmul.bf16.gmra.mxu2 %v5979_v37  ;;  %v6223_v51 = vpack.c.b16 %v12972_v15, %v12972_v15 }
 0x486   : >> { %6423 = vmatmul.bf16.gmra.mxu3 %v6303_v29 }
 0x487   : >> { %7355 = vmatpush.bf16.msra.mxu3 %v12421_v18  ;;  %v6314_v12 = vshrl.u32 %v6223_v51, 16  ;;  %v12452_v18 = vld [vmem:[%s16932_s7 + $0x578] sm:$0xff] }
 0x488   : >> { %v4994_v43 = vpop.f32.mrf.mxu2  ;;  %v4502_v30 = vpop.f32.mrf.mxu0  ;;  %7988 = vmatpush.bf16.msrb.mxu1 %v12452_v18  ;;  %v12459_v18 = vld [vmem:[%s16932_s7 + $0x5b0] sm:$0xff] }
 0x489   : >> { %v5306_v32 = vpop.f32.mrf.mxu3  ;;  %v5017_v17 = vadd.f32 %v4994_v43, %v4853_v21  ;;  %v4832_v53 = vpop.f32.mrf.mxu1  ;;  %v4524_v19 = vadd.f32 %v4502_v30, %v15749_v55  ;;  %v5986_v55 = vrot.slane %v5984_v61, 1  ;;  %v5421_v21 = vpack.c.b16 %v12932_v9, %v12932_v9  ;;  %v12444_v43 = vld [vmem:[%s16932_s7 + $0x538] sm:$0xff]  ;;  %8153 = vmatpush.bf16.msrb.mxu2 %v12459_v18  ;;  %v12458_v18 = vld [vmem:[%s16932_s7 + $0x5a8] sm:$0xff] }
 0x48a   : >> { %7662 = vmatpush.bf16.msrb.mxu0 %v12444_v43  ;;  %v6316_v9 = vrot.slane %v6314_v12, 3  ;;  %v16080_v43 = vld [vmem:[%s14971_s28 + $0x90] sm:$0xff] }
 0x48b   : >> { %v16021_v40 = vadd.f32 %v5306_v32, %v5017_v17  ;;  %v4854_v58 = vadd.f32 %v4832_v53, %v4524_v19  ;;  %v5987_v27 = vsel %vm2699_vm1, %v5982_v22, %v5986_v55  ;;  %7356 = vmatpush.bf16.msra.mxu3 %v12420_v34  ;;  %v5515_v28 = vshll.u32 %v5421_v21, 16 }
 0x48c   : >> { %v5911_v32 = vpack.c.b16 %v5900_v59, %v5900_v59  ;;  %v6317_v17 = vshll.u32 %v6223_v51, 16  ;;  %v12393_v59 = vld [vmem:[%s14971_s28 + $0x88] sm:$0xff] }
 0x48d   : >> { %v5517_v52 = vrot.slane %v5515_v28, 4  ;;  %8154 = vmatpush.bf16.msrb.mxu2 %v12458_v18 }
 0x48e   : >> { %v5992_v22 = vshll.u32 %v5911_v32, 16  ;;  %v6319_v15 = vrot.slane %v6317_v17, 4 }
 0x48f   : >> { %7357 = vmatpush.bf16.msra.mxu3 %v12419_v25 }
 0x490   : >> { %v4996_v36 = vpop.f32.mrf.mxu2  ;;  %v5587_v37 = vpop.f32.mrf.mxu0 }
 0x491   : >> { %v5308_v10 = vpop.f32.mrf.mxu3  ;;  %v5018_v0 = vadd.f32 %v4996_v36, %v4854_v58  ;;  %v5751_v29 = vpop.f32.mrf.mxu1  ;;  %v5637_v39 = vadd.f32 %v5587_v37, %v15763_v11  ;;  %v5512_v11 = vshrl.u32 %v5421_v21, 16  ;;  %v6320_v37 = vor.u32 %v6319_v15, %v6316_v9 }
 0x493   : >> { %v16050_v35 = vadd.f32 %v5308_v10, %v5018_v0  ;;  %v5801_v38 = vadd.f32 %v5751_v29, %v5637_v39  ;;  %5626 = vmatmul.bf16.gmra.mxu0 %v5510_v24  ;;  %v5514_v19 = vrot.slane %v5512_v11, 3  ;;  %v5990_v10 = vor.u32 %v5988_v57, %v5986_v55  ;;  %v13928_v29 = vld [vmem:[%s14971_s28 + $0xe4] sm:$0xf0]   ;;  %v13930_v11 = vld [vmem:[%s14971_s28 + $0xec] sm:$0xff]  }
 0x494   : >> { %5790 = vmatmul.bf16.gmra.mxu1 %v16040_v42  ;;  %v5994_v0 = vrot.slane %v5992_v22, 1  ;;  %v13648_v51 = vor.u32 %v13928_v29, %v13647_v33  ;;  %v7042_v17 = vshll.u32 %v13930_v11, 16 }
 0x495   : >> { %6102 = vmatmul.bf16.gmra.mxu2 %v5987_v27  ;;  %v5518_v36 = vor.u32 %v5517_v52, %v5514_v19  ;;  %v6722_v52 = vshll.u32 %v16080_v43, 16 }
 0x496   : >> { %6428 = vmatmul.bf16.gmra.mxu3 %v6312_v48  ;;  %v5995_v55 = vsel %vm2699_vm1, %v5990_v10, %v5994_v0  ;;  %v7031_v32 = vshrl.u32 %v13648_v51, 16  ;;  %v7034_v12 = vshll.u32 %v13648_v51, 16  ;;  %v7044_v15 = vrot.slane %v7042_v17, 4  ;;  %v12443_v10 = vld [vmem:[%s16932_s7 + $0x530] sm:$0xff] }
 0x497   : >> { %v5519_v48 = vsel %vm2392_vm0, %v16026_v7, %v5518_v36  ;;  %v6717_v7 = vshll.u32 %v12393_v59, 16  ;;  %v12451_v0 = vld [vmem:[%s16932_s7 + $0x570] sm:$0xff]  ;;  %7663 = vmatpush.bf16.msrb.mxu0 %v12443_v10 }
 0x498   : >> { %v6063_v30 = vpop.f32.mrf.mxu2  ;;  %v5589_v50 = vpop.f32.mrf.mxu0  ;;  %v7033_v57 = vrot.slane %v7031_v32, 3  ;;  %v7036_v22 = vrot.slane %v7034_v12, 4  ;;  %7989 = vmatpush.bf16.msrb.mxu1 %v12451_v0 }
 0x499   : >> { %v6389_v53 = vpop.f32.mrf.mxu3  ;;  %v6113_v20 = vadd.f32 %v6063_v30, %v5801_v38  ;;  %v5753_v61 = vpop.f32.mrf.mxu1  ;;  %v5638_v58 = vadd.f32 %v5589_v50, %v15777_v23  ;;  %v6321_v38 = vsel %vm2392_vm0, %v16029_v62, %v6320_v37  ;;  %v6719_v19 = vrot.slane %v6717_v7, 1  ;;  %v12395_v7 = vld [vmem:[%s14971_s28 + $0x98] sm:$0xff] }
 0x49a   : >> { %v7037_v33 = vor.u32 %v7036_v22, %v7033_v57 }
 0x49b   : >> { %v16064_v34 = vadd.f32 %v6389_v53, %v6113_v20  ;;  %v5802_v41 = vadd.f32 %v5753_v61, %v5638_v58  ;;  %v6715_v20 = vshrl.u32 %v12393_v59, 16 }
 0x49d   : >> { %v6720_v37 = vor.u32 %v6719_v19, %v6715_v20 }
 0x4a0   : >> { %v6065_v24 = vpop.f32.mrf.mxu2  ;;  %v5592_v23 = vpop.f32.mrf.mxu0 }
 0x4a1   : >> { %v6391_v27 = vpop.f32.mrf.mxu3  ;;  %v6114_v21 = vadd.f32 %v6065_v24, %v5802_v41  ;;  %v5756_v39 = vpop.f32.mrf.mxu1  ;;  %v5639_v25 = vadd.f32 %v5592_v23, %v15788_v54  ;;  %v7039_v54 = vshrl.u32 %v13930_v11, 16 }
 0x4a3   : >> { %v16076_v28 = vadd.f32 %v6391_v27, %v6114_v21  ;;  %v5803_v56 = vadd.f32 %v5756_v39, %v5639_v25  ;;  %5631 = vmatmul.bf16.gmra.mxu0 %v5519_v48  ;;  %v7041_v9 = vrot.slane %v7039_v54, 3  ;;  %v13322_v48 = vld [vmem:[%s14971_s28 + $0x88] sm:$0xff]  }
 0x4a4   : >> { %5795 = vmatmul.bf16.gmra.mxu1 %v16016_v3 }
 0x4a5   : >> { %6107 = vmatmul.bf16.gmra.mxu2 %v5995_v55  ;;  %v7045_v29 = vor.u32 %v7044_v15, %v7041_v9  ;;  %v13332_v55 = vld [vmem:[%s14971_s28 + $0xe8] sm:$0xff]  }
 0x4a6   : >> { %6433 = vmatmul.bf16.gmra.mxu3 %v6321_v38  ;;  %v13932_v38 = vld [vmem:[%s14971_s28 + $0xf4] sm:$0xff]  }
 0x4a7   : >> { %v7046_v25 = vsel %vm2392_vm0, %v7037_v33, %v7045_v29  ;;  %v7048_v32 = vshrl.u32 %v13932_v38, 16  ;;  %v7051_v12 = vshll.u32 %v13932_v38, 16 }
 0x4a8   : >> { %v6068_v30 = vpop.f32.mrf.mxu2  ;;  %v5594_v50 = vpop.f32.mrf.mxu0 }
 0x4a9   : >> { %v6394_v53 = vpop.f32.mrf.mxu3  ;;  %v6115_v62 = vadd.f32 %v6068_v30, %v5803_v56  ;;  %v5758_v61 = vpop.f32.mrf.mxu1  ;;  %v5640_v58 = vadd.f32 %v5594_v50, %v15803_v6  ;;  %v6724_v6 = vrot.slane %v6722_v52, 1  ;;  %v7053_v19 = vrot.slane %v7051_v12, 4 }
 0x4ab   : >> { %v16087_v41 = vadd.f32 %v6394_v53, %v6115_v62  ;;  %v5804_v36 = vadd.f32 %v5758_v61, %v5640_v58  ;;  %v6725_v59 = vsel %vm2699_vm1, %v6720_v37, %v6724_v6  ;;  %v6730_v62 = vshll.u32 %v12395_v7, 16  ;;  %v12442_v58 = vld [vmem:[%s16932_s7 + $0x528] sm:$0xff]  ;;  %v13323_v37 = vld [vmem:[%s14971_s28 + $0x90] sm:$0xff]  }
 0x4ac   : >> { %v7050_v61 = vrot.slane %v7048_v32, 3  ;;  %7664 = vmatpush.bf16.msrb.mxu0 %v12442_v58  ;;  %v6734_v32 = vshrl.u32 %v12395_v7, 16  ;;  %v13324_v7 = vld [vmem:[%s14971_s28 + $0x98] sm:$0xff]  }
 0x4ae   : >> { %v7054_v9 = vor.u32 %v7053_v19, %v7050_v61 }
 0x4b0   : >> { %v6070_v24 = vpop.f32.mrf.mxu2  ;;  %v5597_v23 = vpop.f32.mrf.mxu0 }
 0x4b1   : >> { %v6396_v27 = vpop.f32.mrf.mxu3  ;;  %v6116_v21 = vadd.f32 %v6070_v24, %v5804_v36  ;;  %v5761_v39 = vpop.f32.mrf.mxu1  ;;  %v5641_v51 = vadd.f32 %v5597_v23, %v15811_v47  ;;  %v6726_v47 = vshrl.u32 %v16080_v43, 16  ;;  %v6732_v43 = vrot.slane %v6730_v62, 1  ;;  %v12450_v24 = vld [vmem:[%s16932_s7 + $0x568] sm:$0xff]  ;;  %v13934_v23 = vld [vmem:[%s14971_s28 + $0xfc] sm:$0xff]  }
 0x4b2   : >> { %7990 = vmatpush.bf16.msrb.mxu1 %v12450_v24 }
 0x4b3   : >> { %v16101_v11 = vadd.f32 %v6396_v27, %v6116_v21  ;;  %v5805_v56 = vadd.f32 %v5761_v39, %v5641_v51  ;;  %6552 = vmatmul.bf16.vlgmr.msra.gmra.mxu0 %v13322_v48  ;;  %v6728_v22 = vor.u32 %v6726_v47, %v6724_v6  ;;  %v7055_v27 = vsel %vm2392_vm0, %v7045_v29, %v7054_v9  ;;  %v16122_v21 = vld [vmem:[%s14971_s28 + $0xf0] sm:$0xff]  }
 0x4b4   : >> { %6864 = vmatmul.bf16.vlgmr.msra.gmra.mxu1 %v6725_v59  ;;  %v12396_v59 = vld [vmem:[%s14971_s28 + $0xa0] sm:$0xff]  ;;  %v7057_v51 = vshrl.u32 %v13934_v23, 16  ;;  %v6736_v47 = vor.u32 %v6734_v32, %v6732_v43 }
 0x4b5   : >> { %7194 = vmatmul.bf16.vlgmr.msra.gmra.mxu2 %v7046_v25  ;;  %v6733_v33 = vsel %vm2699_vm1, %v6728_v22, %v6732_v43  ;;  %v7060_v25 = vshll.u32 %v13934_v23, 16  ;;  %v6738_v12 = vshll.u32 %v12396_v59, 16  ;;  %v16140_v43 = vld [vmem:[%s14971_s28 + $0xf8] sm:$0xff]  }
 0x4b6   : >> { %7358 = vmatmul.bf16.vlgmr.msra.gmra.mxu3 %v13332_v55 }
 0x4b7   : >> { %v6740_v62 = vrot.slane %v6738_v12, 1 }
 0x4b8   : >> { %v6073_v54 = vpop.f32.mrf.mxu2  ;;  %v5599_v53 = vpop.f32.mrf.mxu0 }
 0x4b9   : >> { %v6399_v17 = vpop.f32.mrf.mxu3  ;;  %v6117_v30 = vadd.f32 %v6073_v54, %v5805_v56  ;;  %v5763_v20 = vpop.f32.mrf.mxu1  ;;  %v5642_v50 = vadd.f32 %v5599_v53, %v15829_v63  ;;  %v6741_v22 = vsel %vm2699_vm1, %v6736_v47, %v6740_v62 }
 0x4bb   : >> { %v16106_v52 = vadd.f32 %v6399_v17, %v6117_v30  ;;  %v5806_v57 = vadd.f32 %v5763_v20, %v5642_v50  ;;  %v7059_v17 = vrot.slane %v7057_v51, 3  ;;  %v7062_v30 = vrot.slane %v7060_v25, 4 }
 0x4bc   : >> { %v6742_v25 = vshrl.u32 %v12396_v59, 16  ;;  %v13325_v59 = vld [vmem:[%s14971_s28 + $0xa0] sm:$0xff]  }
 0x4bd   : >> { %v7063_v50 = vor.u32 %v7062_v30, %v7059_v17 }
 0x4be   : >> { %v6744_v12 = vor.u32 %v6742_v25, %v6740_v62 }
 0x4c0   : >> { %v6075_v63 = vpop.f32.mrf.mxu2  ;;  %v5602_v10 = vpop.f32.mrf.mxu0 }
 0x4c1   : >> { %v6401_v15 = vpop.f32.mrf.mxu3  ;;  %v6118_v36 = vadd.f32 %v6075_v63, %v5806_v57  ;;  %v5766_v0 = vpop.f32.mrf.mxu1  ;;  %v5643_v6 = vadd.f32 %v5602_v10, %v15837_v8 }
 0x4c3   : >> { %v16125_v39 = vadd.f32 %v6401_v15, %v6118_v36  ;;  %v5807_v48 = vadd.f32 %v5766_v0, %v5643_v6  ;;  %6557 = vmatmul.bf16.gmra.mxu0 %v13323_v37  ;;  %v7064_v15 = vsel %vm2392_vm0, %v7054_v9, %v7063_v50  ;;  %v13936_v36 = vld [vmem:[%s14971_s28 + $0x104] sm:$0xff]  }
 0x4c4   : >> { %6869 = vmatmul.bf16.gmra.mxu1 %v6733_v33  ;;  %v12441_v37 = vld [vmem:[%s16932_s7 + $0x520] sm:$0xff]  ;;  %v12397_v33 = vld [vmem:[%s14971_s28 + $0xa8] sm:$0xff]  ;;  %v7066_v9 = vshrl.u32 %v13936_v36, 16  ;;  %v7069_v24 = vshll.u32 %v13936_v36, 16 }
 0x4c5   : >> { %7199 = vmatmul.bf16.gmra.mxu2 %v7055_v27  ;;  %7665 = vmatpush.bf16.msrb.mxu0 %v12441_v37 }
 0x4c6   : >> { %7363 = vmatmul.bf16.gmra.mxu3 %v16122_v21 }
 0x4c8   : >> { %v6078_v55 = vpop.f32.mrf.mxu2  ;;  %v5604_v56 = vpop.f32.mrf.mxu0 }
 0x4c9   : >> { %v6404_v38 = vpop.f32.mrf.mxu3  ;;  %v6119_v8 = vadd.f32 %v6078_v55, %v5807_v48  ;;  %v5768_v29 = vpop.f32.mrf.mxu1  ;;  %v5644_v54 = vadd.f32 %v5604_v56, %v15849_v1  ;;  %v12457_v1 = vld [vmem:[%s16932_s7 + $0x5a0] sm:$0xff]  ;;  %v6746_v55 = vshll.u32 %v12397_v33, 16  ;;  %v7071_v56 = vrot.slane %v7069_v24, 4 }
 0x4ca   : >> { %8155 = vmatpush.bf16.msrb.mxu2 %v12457_v1  ;;  %v12398_v1 = vld [vmem:[%s14971_s28 + $0xb0] sm:$0xff]  ;;  %v6750_v24 = vshrl.u32 %v12397_v33, 16 }
 0x4cb   : >> { %v16130_v53 = vadd.f32 %v6404_v38, %v6119_v8  ;;  %v5808_v20 = vadd.f32 %v5768_v29, %v5644_v54  ;;  %v7068_v8 = vrot.slane %v7066_v9, 3  ;;  %v6748_v54 = vrot.slane %v6746_v55, 1 }
 0x4cd   : >> { %v7072_v17 = vor.u32 %v7071_v56, %v7068_v8 }
 0x4d0   : >> { %v6080_v61 = vpop.f32.mrf.mxu2  ;;  %v5607_v18 = vpop.f32.mrf.mxu0 }
 0x4d1   : >> { %v6406_v19 = vpop.f32.mrf.mxu3  ;;  %v6120_v57 = vadd.f32 %v6080_v61, %v5808_v20  ;;  %v5771_v58 = vpop.f32.mrf.mxu1  ;;  %v5645_v63 = vadd.f32 %v5607_v18, %v15863_v31  ;;  %v12449_v31 = vld [vmem:[%s16932_s7 + $0x560] sm:$0xff]  ;;  %v7073_v18 = vsel %vm2392_vm0, %v7063_v50, %v7072_v17 }
 0x4d2   : >> { %7991 = vmatpush.bf16.msrb.mxu1 %v12449_v31 }
 0x4d3   : >> { %v16143_v10 = vadd.f32 %v6406_v19, %v6120_v57  ;;  %v5809_v0 = vadd.f32 %v5771_v58, %v5645_v63  ;;  %6562 = vmatmul.bf16.gmra.mxu0 %v13324_v7  ;;  %v6749_v57 = vsel %vm2699_vm1, %v6744_v12, %v6748_v54  ;;  %v16161_v58 = vld [vmem:[%s14971_s28 + $0x100] sm:$0xff]   ;;  %v13938_v7 = vld [vmem:[%s14971_s28 + $0x10c] sm:$0xff]   ;;  %v12456_v63 = vld [vmem:[%s16932_s7 + $0x598] sm:$0xff] }
 0x4d4   : >> { %6874 = vmatmul.bf16.gmra.mxu1 %v6741_v22  ;;  %v7075_v50 = vshrl.u32 %v13938_v7, 16  ;;  %8156 = vmatpush.bf16.msrb.mxu2 %v12456_v63 }
 0x4d5   : >> { %7204 = vmatmul.bf16.gmra.mxu2 %v7064_v15  ;;  %v7078_v15 = vshll.u32 %v13938_v7, 16 }
 0x4d6   : >> { %7368 = vmatmul.bf16.gmra.mxu3 %v16140_v43 }
 0x4d8   : >> { %v6083_v6 = vpop.f32.mrf.mxu2  ;;  %v5609_v48 = vpop.f32.mrf.mxu0 }
 0x4d9   : >> { %v6409_v27 = vpop.f32.mrf.mxu3  ;;  %v6121_v23 = vadd.f32 %v6083_v6, %v5809_v0  ;;  %v5773_v51 = vpop.f32.mrf.mxu1  ;;  %v5646_v38 = vadd.f32 %v5609_v48, %v15872_v2  ;;  %v6754_v6 = vshll.u32 %v12398_v1, 16  ;;  %v7077_v48 = vrot.slane %v7075_v50, 3 }
 0x4db   : >> { %v16154_v29 = vadd.f32 %v6409_v27, %v6121_v23  ;;  %v5810_v32 = vadd.f32 %v5773_v51, %v5646_v38  ;;  %v12448_v27 = vld [vmem:[%s16932_s7 + $0x558] sm:$0xff]  ;;  %v7080_v51 = vrot.slane %v7078_v15, 4  ;;  %v6752_v38 = vor.u32 %v6750_v24, %v6748_v54 }
 0x4dc   : >> { %7992 = vmatpush.bf16.msrb.mxu1 %v12448_v27  ;;  %v6756_v8 = vrot.slane %v6754_v6, 1  ;;  %v12439_v27 = vld [vmem:[%s16932_s7 + $0x510] sm:$0xff] }
 0x4dd   : >> { %v7081_v56 = vor.u32 %v7080_v51, %v7077_v48 }
 0x4e0   : >> { %v6085_v30 = vpop.f32.mrf.mxu2  ;;  %v5612_v61 = vpop.f32.mrf.mxu0 }
 0x4e1   : >> { %v6411_v20 = vpop.f32.mrf.mxu3  ;;  %v6122_v47 = vadd.f32 %v6085_v30, %v5810_v32  ;;  %v5776_v19 = vpop.f32.mrf.mxu1  ;;  %v5647_v2 = vadd.f32 %v5612_v61, %v15889_v14  ;;  %v12440_v14 = vld [vmem:[%s16932_s7 + $0x518] sm:$0xff] }
 0x4e2   : >> { %7666 = vmatpush.bf16.msrb.mxu0 %v12440_v14 }
 0x4e3   : >> { %v16164_v22 = vadd.f32 %v6411_v20, %v6122_v47  ;;  %v5811_v62 = vadd.f32 %v5776_v19, %v5647_v2  ;;  %6567 = vmatmul.bf16.gmra.mxu0 %v13325_v59  ;;  %v13326_v47 = vld [vmem:[%s14971_s28 + $0xa8] sm:$0xff]   ;;  %v7082_v19 = vsel %vm2392_vm0, %v7072_v17, %v7081_v56  ;;  %v6758_v17 = vshrl.u32 %v12398_v1, 16  ;;  %v12447_v1 = vld [vmem:[%s16932_s7 + $0x550] sm:$0xff] }
 0x4e4   : >> { %6879 = vmatmul.bf16.gmra.mxu1 %v6749_v57  ;;  %v16185_v59 = vld [vmem:[%s14971_s28 + $0x108] sm:$0xff]   ;;  %v13940_v57 = vld [vmem:[%s14971_s28 + $0x114] sm:$0xff]  }
 0x4e5   : >> { %7209 = vmatmul.bf16.gmra.mxu2 %v7073_v18  ;;  %v12399_v18 = vld [vmem:[%s14971_s28 + $0xb8] sm:$0xff]  ;;  %v7084_v7 = vshrl.u32 %v13940_v57, 16  ;;  %7993 = vmatpush.bf16.msrb.mxu1 %v12447_v1 }
 0x4e6   : >> { %7373 = vmatmul.bf16.gmra.mxu3 %v16161_v58  ;;  %7667 = vmatpush.bf16.msrb.mxu0 %v12439_v27 }
 0x4e8   : >> { %v6088_v36 = vpop.f32.mrf.mxu2  ;;  %v5614_v31 = vpop.f32.mrf.mxu0 }
 0x4e9   : >> { %v6414_v0 = vpop.f32.mrf.mxu3  ;;  %v6123_v37 = vadd.f32 %v6088_v36, %v5811_v62  ;;  %v5778_v9 = vpop.f32.mrf.mxu1  ;;  %v5648_v23 = vadd.f32 %v5614_v31, %v15898_v45  ;;  %v6757_v45 = vsel %vm2699_vm1, %v6752_v38, %v6756_v8  ;;  %v7087_v62 = vshll.u32 %v13940_v57, 16 }
 0x4ea   : >> { %v6762_v36 = vshll.u32 %v12399_v18, 16  ;;  %v7086_v31 = vrot.slane %v7084_v7, 3 }
 0x4eb   : >> { %v16178_v25 = vadd.f32 %v6414_v0, %v6123_v37  ;;  %v5812_v55 = vadd.f32 %v5778_v9, %v5648_v23  ;;  %v12455_v0 = vld [vmem:[%s16932_s7 + $0x590] sm:$0xff]  ;;  %v7089_v9 = vrot.slane %v7087_v62, 4  ;;  %v6760_v23 = vor.u32 %v6758_v17, %v6756_v8 }
 0x4ec   : >> { %8157 = vmatpush.bf16.msrb.mxu2 %v12455_v0  ;;  %v6764_v48 = vrot.slane %v6762_v36, 1  ;;  %v12454_v0 = vld [vmem:[%s16932_s7 + $0x588] sm:$0xff] }
 0x4ed   : >> { %v7090_v51 = vor.u32 %v7089_v9, %v7086_v31 }
 0x4f0   : >> { %v6090_v33 = vpop.f32.mrf.mxu2  ;;  %v5617_v30 = vpop.f32.mrf.mxu0  ;;  %8158 = vmatpush.bf16.msrb.mxu2 %v12454_v0 }
 0x4f1   : >> { %v6416_v32 = vpop.f32.mrf.mxu3  ;;  %v6124_v12 = vadd.f32 %v6090_v33, %v5812_v55  ;;  %v5781_v20 = vpop.f32.mrf.mxu1  ;;  %v5649_v61 = vadd.f32 %v5617_v30, %v15909_v44 }
 0x4f3   : >> { %v16188_v2 = vadd.f32 %v6416_v32, %v6124_v12  ;;  %v5813_v54 = vadd.f32 %v5781_v20, %v5649_v61  ;;  %6572 = vmatmul.bf16.gmra.mxu0 %v13326_v47  ;;  %v6765_v12 = vsel %vm2699_vm1, %v6760_v23, %v6764_v48  ;;  %v7091_v20 = vsel %vm2392_vm0, %v7081_v56, %v7090_v51  ;;  %v13337_v47 = vld [vmem:[%s14971_s28 + $0x110] sm:$0xff]  }
 0x4f4   : >> { %6884 = vmatmul.bf16.gmra.mxu1 %v6757_v45  ;;  %v13942_v45 = vld [vmem:[%s14971_s28 + $0x11c] sm:$0xff]  }
 0x4f5   : >> { %7214 = vmatmul.bf16.gmra.mxu2 %v7082_v19  ;;  %v12400_v19 = vld [vmem:[%s14971_s28 + $0xc0] sm:$0xff]  ;;  %v7093_v57 = vshrl.u32 %v13942_v45, 16 }
 0x4f6   : >> { %7378 = vmatmul.bf16.gmra.mxu3 %v16185_v59  ;;  %v6770_v56 = vshll.u32 %v12400_v19, 16 }
 0x4f8   : >> { %v6093_v63 = vpop.f32.mrf.mxu2  ;;  %v5619_v44 = vpop.f32.mrf.mxu0 }
 0x4f9   : >> { %v6419_v14 = vpop.f32.mrf.mxu3  ;;  %v6125_v50 = vadd.f32 %v6093_v63, %v5813_v54  ;;  %v5783_v15 = vpop.f32.mrf.mxu1  ;;  %v5650_v37 = vadd.f32 %v5619_v44, %v15924_v49  ;;  %v7096_v54 = vshll.u32 %v13942_v45, 16 }
 0x4fb   : >> { %v16196_v24 = vadd.f32 %v6419_v14, %v6125_v50  ;;  %v5814_v6 = vadd.f32 %v5783_v15, %v5650_v37  ;;  %v6766_v50 = vshrl.u32 %v12399_v18, 16  ;;  %v7095_v15 = vrot.slane %v7093_v57, 3  ;;  %v12438_v37 = vld [vmem:[%s16932_s7 + $0x508] sm:$0xff] }
 0x4fc   : >> { %v7098_v17 = vrot.slane %v7096_v54, 4  ;;  %v6772_v18 = vrot.slane %v6770_v56, 1  ;;  %7668 = vmatpush.bf16.msrb.mxu0 %v12438_v37 }
 0x4fd   : >> { %v6768_v31 = vor.u32 %v6766_v50, %v6764_v48  ;;  %v12477_v50 = vld [vmem:[%s16932_s7 + $0x5f0] sm:$0xff] }
 0x4fe   : >> { %v7099_v9 = vor.u32 %v7098_v17, %v7095_v15 }
 0x500   : >> { %v6095_v49 = vpop.f32.mrf.mxu2  ;;  %v5622_v33 = vpop.f32.mrf.mxu0  ;;  %v7100_v48 = vsel %vm2392_vm0, %v7090_v51, %v7099_v9 }
 0x501   : >> { %v6421_v55 = vpop.f32.mrf.mxu3  ;;  %v6126_v38 = vadd.f32 %v6095_v49, %v5814_v6  ;;  %v5786_v32 = vpop.f32.mrf.mxu1  ;;  %v5651_v30 = vadd.f32 %v5622_v33, %v15932_v4  ;;  %v6773_v49 = vsel %vm2699_vm1, %v6768_v31, %v6772_v18  ;;  %v13338_v33 = vld [vmem:[%s14971_s28 + $0x118] sm:$0xff]  }
 0x503   : >> { %v16209_v61 = vadd.f32 %v6421_v55, %v6126_v38  ;;  %v5815_v8 = vadd.f32 %v5786_v32, %v5651_v30  ;;  %6577 = vmatmul.bf16.gmra.mxu0 %v15944_v13  ;;  %v12446_v55 = vld [vmem:[%s16932_s7 + $0x548] sm:$0xff] }
 0x504   : >> { %6889 = vmatmul.bf16.gmra.mxu1 %v6765_v12  ;;  %v13944_v32 = vld [vmem:[%s14971_s28 + $0x124] sm:$0xff]  }
 0x505   : >> { %7219 = vmatmul.bf16.gmra.mxu2 %v7091_v20  ;;  %7994 = vmatpush.bf16.msrb.mxu1 %v12446_v55  ;;  %v16234_v20 = vld [vmem:[%s14971_s28 + $0xc8] sm:$0xff]  ;;  %v7105_v45 = vshll.u32 %v13944_v32, 16  ;;  %v12475_v55 = vld [vmem:[%s16932_s7 + $0x5e0] sm:$0xff] }
 0x506   : >> { %7383 = vmatmul.bf16.gmra.mxu3 %v13337_v47  ;;  %v7102_v47 = vshrl.u32 %v13944_v32, 16 }
 0x508   : >> { %v6098_v7 = vpop.f32.mrf.mxu2  ;;  %v5624_v14 = vpop.f32.mrf.mxu0 }
 0x509   : >> { %v6424_v62 = vpop.f32.mrf.mxu3  ;;  %v6127_v63 = vadd.f32 %v6098_v7, %v5815_v8  ;;  %v5788_v4 = vpop.f32.mrf.mxu1  ;;  %v5652_v44 = vadd.f32 %v5624_v14, %v15955_v26  ;;  %v7104_v14 = vrot.slane %v7102_v47, 3 }
 0x50b   : >> { %v16214_v36 = vadd.f32 %v6424_v62, %v6127_v63  ;;  %v5816_v13 = vadd.f32 %v5788_v4, %v5652_v44  ;;  %v6774_v62 = vshrl.u32 %v12400_v19, 16  ;;  %v7107_v4 = vrot.slane %v7105_v45, 4  ;;  %v12476_v19 = vld [vmem:[%s16932_s7 + $0x5e8] sm:$0xff] }
 0x50d   : >> { %v6776_v15 = vor.u32 %v6774_v62, %v6772_v18 }
 0x510   : >> { %v6100_v26 = vpop.f32.mrf.mxu2  ;;  %v5627_v1 = vpop.f32.mrf.mxu0 }
 0x511   : >> { %v6426_v6 = vpop.f32.mrf.mxu3  ;;  %v6128_v27 = vadd.f32 %v6100_v26, %v5816_v13  ;;  %v5791_v23 = vpop.f32.mrf.mxu1  ;;  %v5653_v38 = vadd.f32 %v5627_v1, %v15970_v60  ;;  %v12478_v60 = vld [vmem:[%s16932_s7 + $0x5f8] sm:$0xff]  ;;  %v7108_v13 = vor.u32 %v7107_v4, %v7104_v14  ;;  %v16284_v4 = vld [vmem:[%s14971_s28 + $0x130] sm:$0xff]  }
 0x512   : >> { %8464 = vmatpush.bf16.msrb.mxu3 %v12478_v60 }
 0x513   : >> { %v16230_v12 = vadd.f32 %v6426_v6, %v6128_v27  ;;  %v5817_v30 = vadd.f32 %v5791_v23, %v5653_v38  ;;  %6582 = vmatmul.bf16.gmra.mxu0 %v15983_v16  ;;  %v6778_v16 = vshll.u32 %v16234_v20, 16  ;;  %v12453_v27 = vld [vmem:[%s16932_s7 + $0x580] sm:$0xff]  ;;  %v7109_v1 = vsel %vm2392_vm0, %v7099_v9, %v7108_v13 }
 0x514   : >> { %6894 = vmatmul.bf16.gmra.mxu1 %v6773_v49  ;;  %v13339_v23 = vld [vmem:[%s14971_s28 + $0x120] sm:$0xff]   ;;  %v13945_v49 = vld [vmem:[%s14971_s28 + $0x12c] sm:$0xff]   ;;  %8159 = vmatpush.bf16.msrb.mxu2 %v12453_v27 }
 0x515   : >> { %7224 = vmatmul.bf16.gmra.mxu2 %v7100_v48  ;;  %v6780_v17 = vrot.slane %v6778_v16, 1  ;;  %v12445_v9 = vld [vmem:[%s16932_s7 + $0x540] sm:$0xff]  ;;  %v7111_v32 = vshrl.u32 %v13945_v49, 16 }
 0x516   : >> { %7388 = vmatmul.bf16.gmra.mxu3 %v13338_v33  ;;  %v12437_v33 = vld [vmem:[%s16932_s7 + $0x500] sm:$0xff]  ;;  %7995 = vmatpush.bf16.msrb.mxu1 %v12445_v9 }
 0x517   : >> { %8465 = vmatpush.bf16.msrb.mxu3 %v12477_v50  ;;  %v6781_v6 = vsel %vm2699_vm1, %v6776_v15, %v6780_v17  ;;  %7669 = vmatpush.bf16.msrb.mxu0 %v12437_v33  ;;  %v7113_v62 = vrot.slane %v7111_v32, 3 }
 0x518   : >> { %v6103_v51 = vpop.f32.mrf.mxu2  ;;  %v5629_v54 = vpop.f32.mrf.mxu0 }
 0x519   : >> { %v6429_v8 = vpop.f32.mrf.mxu3  ;;  %v6129_v57 = vadd.f32 %v6103_v51, %v5817_v30  ;;  %v5793_v7 = vpop.f32.mrf.mxu1  ;;  %v5654_v63 = vadd.f32 %v5629_v54, %v15997_v5  ;;  %v7114_v30 = vshll.u32 %v13945_v49, 16 }
 0x51b   : >> { %v16244_v56 = vadd.f32 %v6429_v8, %v6129_v57  ;;  %v5818_v44 = vadd.f32 %v5793_v7, %v5654_v63  ;;  %8466 = vmatpush.bf16.msrb.mxu3 %v12476_v19  ;;  %v6782_v57 = vshrl.u32 %v16234_v20, 16  ;;  %v7116_v16 = vrot.slane %v7114_v30, 4  ;;  %v12473_v63 = vld [vmem:[%s16932_s7 + $0x5d0] sm:$0xff]  ;;  %v11334_v19 = vld [vmem:[%s14971_s28 + $0xd8] sm:$0x1] }
 0x51d   : >> { %v7117_v20 = vor.u32 %v7116_v16, %v7113_v62 }
 0x51f   : >> { %8467 = vmatpush.bf16.msrb.mxu3 %v12475_v55  ;;  %v12471_v55 = vld [vmem:[%s16932_s7 + $0x5c0] sm:$0xff] }
 0x520   : >> { %v6105_v5 = vpop.f32.mrf.mxu2  ;;  %v5632_v31 = vpop.f32.mrf.mxu0 }
 0x521   : >> { %v6431_v0 = vpop.f32.mrf.mxu3  ;;  %v6130_v37 = vadd.f32 %v6105_v5, %v5818_v44  ;;  %v5796_v26 = vpop.f32.mrf.mxu1  ;;  %v5655_v18 = vadd.f32 %v5632_v31, %v16021_v40  ;;  %v16267_v40 = vld [vmem:[%s14971_s28 + $0xd0] sm:$0xff]  ;;  %v6784_v44 = vor.u32 %v6782_v57, %v6780_v17  ;;  %v13012_v5 = vunpack.c.h.b16 %v16284_v4  ;;  %v12494_v57 = vld [vmem:[%s16932_s7 + $0x678] sm:$0xff] }
 0x522   : >> { %v6786_v54 = vshll.u32 %v16267_v40, 16  ;;  %8954 = vmatpush.bf16.msra.mxu1 %v12494_v57 }
 0x523   : >> { %v16260_v38 = vadd.f32 %v6431_v0, %v6130_v37  ;;  %v5819_v48 = vadd.f32 %v5796_v26, %v5655_v18  ;;  %6587 = vmatmul.bf16.gmra.mxu0 %v16040_v42  ;;  %v12474_v42 = vld [vmem:[%s16932_s7 + $0x5d8] sm:$0xff]  ;;  %v6702_v18 = vunpack.c.l.b16 %v11334_v19  ;;  %v7029_v49 = vpack.c.b16 %v13012_v5, %v13012_v5  ;;  %v13696_v19 = vld [vmem:[%s14971_s28 + $0xec] sm:$0x8] }
 0x524   : >> { %6899 = vmatmul.bf16.gmra.mxu1 %v6781_v6  ;;  %8468 = vmatpush.bf16.msrb.mxu3 %v12474_v42  ;;  %v6788_v15 = vrot.slane %v6786_v54, 1 }
 0x525   : >> { %7229 = vmatmul.bf16.gmra.mxu2 %v7109_v1  ;;  %v7118_v1 = vsel %vm2392_vm0, %v7108_v13, %v7117_v20  ;;  %v6713_v9 = vpack.c.b16 %v6702_v18, %v6702_v18  ;;  %v12486_v13 = vld [vmem:[%s16932_s7 + $0x638] sm:$0xff]  ;;  %v7120_v32 = vshrl.u32 %v7029_v49, 16  ;;  %v7123_v30 = vshll.u32 %v7029_v49, 16 }
 0x526   : >> { %7393 = vmatmul.bf16.gmra.mxu3 %v13339_v23  ;;  %v6789_v27 = vsel %vm2699_vm1, %v6784_v44, %v6788_v15  ;;  %v13340_v23 = vld [vmem:[%s14971_s28 + $0x128] sm:$0xff]   ;;  %8790 = vmatpush.bf16.msra.mxu0 %v12486_v13  ;;  %v13949_v18 = vld [vmem:[%s14971_s28 + $0xf4] sm:$0xff]  }
 0x527   : >> { %v7125_v62 = vrot.slane %v7123_v30, 4  ;;  %v7841_v13 = vshrl.u32 %v13949_v18, 16 }
 0x528   : >> { %v6108_v47 = vpop.f32.mrf.mxu2  ;;  %v5634_v51 = vpop.f32.mrf.mxu0  ;;  %8469 = vmatpush.bf16.msrb.mxu3 %v12473_v63 }
 0x529   : >> { %v6434_v45 = vpop.f32.mrf.mxu3  ;;  %v6131_v60 = vadd.f32 %v6108_v47, %v5819_v48  ;;  %v5798_v8 = vpop.f32.mrf.mxu1  ;;  %v5656_v7 = vadd.f32 %v5634_v51, %v16050_v35  ;;  %v12472_v35 = vld [vmem:[%s16932_s7 + $0x5c8] sm:$0xff]  ;;  %v6790_v51 = vshrl.u32 %v16267_v40, 16  ;;  %v13947_v40 = vld [vmem:[%s14971_s28 + $0xec] sm:$0xf0]  }
 0x52b   : >> { %v16281_v14 = vadd.f32 %v6434_v45, %v6131_v60  ;;  %v5820_v50 = vadd.f32 %v5798_v8, %v5656_v7  ;;  %v6794_v8 = vshll.u32 %v6713_v9, 16  ;;  %v7122_v7 = vrot.slane %v7120_v32, 3 }
 0x52c   : >> { %8470 = vmatpush.bf16.msrb.mxu3 %v12472_v35  ;;  %v7844_v32 = vshll.u32 %v13949_v18, 16 }
 0x52d   : >> { %v6796_v44 = vrot.slane %v6794_v8, 1  ;;  %v7126_v5 = vor.u32 %v7125_v62, %v7122_v7 }
 0x52e   : >> { %v7846_v7 = vrot.slane %v7844_v32, 4 }
 0x530   : >> { %v6110_v0 = vpop.f32.mrf.mxu2  ;;  %v6553_v26 = vpop.f32.mrf.mxu0  ;;  %8471 = vmatpush.bf16.msrb.mxu3 %v12471_v55  ;;  %v16326_v55 = vld [vmem:[%s14971_s28 + $0xf0] sm:$0xff] }
 0x531   : >> { %v6436_v37 = vpop.f32.mrf.mxu3  ;;  %v6132_v31 = vadd.f32 %v6110_v0, %v5820_v50  ;;  %v6865_v6 = vpop.f32.mrf.mxu1  ;;  %v6603_v17 = vadd.f32 %v6553_v26, %v16064_v34  ;;  %v12512_v34 = vld [vmem:[%s16932_s7 + $0x6b8] sm:$0xff]  ;;  %v6792_v50 = vor.u32 %v6790_v51, %v6788_v15  ;;  %v7127_v15 = vsel %vm2392_vm0, %v7117_v20, %v7126_v5  ;;  %v12485_v5 = vld [vmem:[%s16932_s7 + $0x630] sm:$0xff] }
 0x532   : >> { %9266 = vmatpush.bf16.msra.mxu2 %v12512_v34  ;;  %8791 = vmatpush.bf16.msra.mxu0 %v12485_v5 }
 0x533   : >> { %v16298_v48 = vadd.f32 %v6436_v37, %v6132_v31  ;;  %v6915_v33 = vadd.f32 %v6865_v6, %v6603_v17  ;;  %6592 = vmatmul.bf16.gmra.mxu0 %v16016_v3  ;;  %v12427_v37 = vld [vmem:[%s14971_s28 + $0xe8] sm:$0xff]  ;;  %v13697_v31 = vor.u32 %v13947_v40, %v13696_v19 }
 0x534   : >> { %6904 = vmatmul.bf16.gmra.mxu1 %v6789_v27  ;;  %v6797_v27 = vsel %vm2699_vm1, %v6792_v50, %v6796_v44 }
 0x535   : >> { %7234 = vmatmul.bf16.gmra.mxu2 %v7118_v1  ;;  %v12461_v1 = vld [vmem:[%s14971_s28 + $0xf0] sm:$0xff]  ;;  %v7833_v9 = vshrl.u32 %v13697_v31, 16  ;;  %v7836_v34 = vshll.u32 %v13697_v31, 16 }
 0x536   : >> { %7398 = vmatmul.bf16.gmra.mxu3 %v13340_v23  ;;  %v8325_v20 = vshll.u32 %v12461_v1, 16 }
 0x537   : >> { %v7838_v57 = vrot.slane %v7836_v34, 4 }
 0x538   : >> { %v7195_v42 = vpop.f32.mrf.mxu2  ;;  %v6555_v45 = vpop.f32.mrf.mxu0  ;;  %v8327_v50 = vrot.slane %v8325_v20, 1  ;;  %v16355_v20 = vld [vmem:[%s14971_s28 + $0xf8] sm:$0xff] }
 0x539   : >> { %v7359_v3 = vpop.f32.mrf.mxu3  ;;  %v7245_v47 = vadd.f32 %v7195_v42, %v6915_v33  ;;  %v6867_v60 = vpop.f32.mrf.mxu1  ;;  %v6604_v54 = vadd.f32 %v6555_v45, %v16076_v28  ;;  %v7523_v33 = vshll.u32 %v12427_v37, 16  ;;  %v7835_v45 = vrot.slane %v7833_v9, 3 }
 0x53b   : >> { %v16312_v16 = vadd.f32 %v7359_v3, %v7245_v47  ;;  %v6916_v63 = vadd.f32 %v6867_v60, %v6604_v54  ;;  %v7521_v3 = vshrl.u32 %v12427_v37, 16  ;;  %v7525_v47 = vrot.slane %v7523_v33, 1  ;;  %v13951_v33 = vld [vmem:[%s14971_s28 + $0xfc] sm:$0xff]  }
 0x53c   : >> { %v7843_v54 = vrot.slane %v7841_v13, 3 }
 0x53e   : >> { %v7847_v31 = vor.u32 %v7846_v7, %v7843_v54 }
 0x540   : >> { %v7197_v35 = vpop.f32.mrf.mxu2  ;;  %v6558_v28 = vpop.f32.mrf.mxu0 }
 0x541   : >> { %v7361_v0 = vpop.f32.mrf.mxu3  ;;  %v7246_v26 = vadd.f32 %v7197_v35, %v6916_v63  ;;  %v6870_v6 = vpop.f32.mrf.mxu1  ;;  %v6605_v17 = vadd.f32 %v6558_v28, %v16087_v41  ;;  %v16330_v41 = vld [vmem:[%s14971_s28 + $0xf8] sm:$0xff]  ;;  %v8323_v63 = vshrl.u32 %v12461_v1, 16  ;;  %v12493_v35 = vld [vmem:[%s16932_s7 + $0x670] sm:$0xff] }
 0x542   : >> { %v8330_v44 = vshll.u32 %v16330_v41, 16  ;;  %8955 = vmatpush.bf16.msra.mxu1 %v12493_v35  ;;  %v8334_v7 = vshrl.u32 %v16330_v41, 16 }
 0x543   : >> { %v16322_v23 = vadd.f32 %v7361_v0, %v7246_v26  ;;  %v6917_v49 = vadd.f32 %v6870_v6, %v6605_v17  ;;  %6597 = vmatmul.bf16.gmra.mxu0 %v16024_v46  ;;  %v7528_v46 = vshll.u32 %v16326_v55, 16  ;;  %v7526_v0 = vor.u32 %v7525_v47, %v7521_v3  ;;  %v16358_v3 = vld [vmem:[%s14971_s28 + $0x100] sm:$0xff] }
 0x544   : >> { %6909 = vmatmul.bf16.gmra.mxu1 %v6797_v27  ;;  %v8328_v26 = vor.u32 %v8327_v50, %v8323_v63  ;;  %v8332_v28 = vrot.slane %v8330_v44, 1  ;;  %v12484_v50 = vld [vmem:[%s16932_s7 + $0x628] sm:$0xff] }
 0x545   : >> { %7239 = vmatmul.bf16.gmra.mxu2 %v7127_v15  ;;  %v7530_v37 = vrot.slane %v7528_v46, 1  ;;  %8792 = vmatpush.bf16.msra.mxu0 %v12484_v50 }
 0x546   : >> { %7403 = vmatmul.bf16.gmra.mxu3 %v16284_v4  ;;  %v12511_v4 = vld [vmem:[%s16932_s7 + $0x6b0] sm:$0xff]  ;;  %v8333_v34 = vsel %vm2699_vm1, %v8328_v26, %v8332_v28 }
 0x547   : >> { %9267 = vmatpush.bf16.msra.mxu2 %v12511_v4  ;;  %v7531_v1 = vsel %vm2699_vm1, %v7526_v0, %v7530_v37  ;;  %v8338_v4 = vshll.u32 %v16358_v3, 16 }
 0x548   : >> { %v7200_v30 = vpop.f32.mrf.mxu2  ;;  %v6560_v51 = vpop.f32.mrf.mxu0 }
 0x549   : >> { %v7364_v42 = vpop.f32.mrf.mxu3  ;;  %v7247_v60 = vadd.f32 %v7200_v30, %v6917_v49  ;;  %v6872_v8 = vpop.f32.mrf.mxu1  ;;  %v6606_v62 = vadd.f32 %v6560_v51, %v16101_v11  ;;  %v7839_v11 = vor.u32 %v7838_v57, %v7835_v45  ;;  %v7850_v30 = vshrl.u32 %v13951_v33, 16 }
 0x54a   : >> { %v8340_v35 = vrot.slane %v8338_v4, 1 }
 0x54b   : >> { %v16338_v19 = vadd.f32 %v7364_v42, %v7247_v60  ;;  %v6918_v40 = vadd.f32 %v6872_v8, %v6606_v62  ;;  %v7848_v49 = vsel %vm2392_vm0, %v7839_v11, %v7847_v31  ;;  %v7853_v42 = vshll.u32 %v13951_v33, 16  ;;  %v16385_v33 = vld [vmem:[%s14971_s28 + $0x100] sm:$0xff] }
 0x54c   : >> { %v7536_v8 = vshll.u32 %v16355_v20, 16  ;;  %v7852_v57 = vrot.slane %v7850_v30, 3 }
 0x54d   : >> { %v7855_v54 = vrot.slane %v7853_v42, 4 }
 0x54f   : >> { %v7856_v5 = vor.u32 %v7855_v54, %v7852_v57 }
 0x550   : >> { %v7202_v6 = vpop.f32.mrf.mxu2  ;;  %v6563_v17 = vpop.f32.mrf.mxu0 }
 0x551   : >> { %v7366_v27 = vpop.f32.mrf.mxu3  ;;  %v7248_v18 = vadd.f32 %v7202_v6, %v6918_v40  ;;  %v6875_v15 = vpop.f32.mrf.mxu1  ;;  %v6607_v9 = vadd.f32 %v6563_v17, %v16106_v52  ;;  %v7532_v52 = vshrl.u32 %v16326_v55, 16  ;;  %v12510_v55 = vld [vmem:[%s16932_s7 + $0x6a8] sm:$0xff]  ;;  %v7538_v40 = vrot.slane %v7536_v8, 1 }
 0x552   : >> { %9268 = vmatpush.bf16.msra.mxu2 %v12510_v55  ;;  %v13953_v17 = vld [vmem:[%s14971_s28 + $0x104] sm:$0xff]  }
 0x553   : >> { %v16351_v13 = vadd.f32 %v7366_v27, %v7248_v18  ;;  %v6919_v32 = vadd.f32 %v6875_v15, %v6607_v9  ;;  %7670 = vmatmul.bf16.vlgmr.msrb.gmra.mxu0 %v7531_v1  ;;  %v7534_v44 = vor.u32 %v7532_v52, %v7530_v37  ;;  %v7857_v18 = vsel %vm2392_vm0, %v7847_v31, %v7856_v5  ;;  %v12492_v37 = vld [vmem:[%s16932_s7 + $0x668] sm:$0xff] }
 0x554   : >> { %7996 = vmatmul.bf16.vlgmr.msrb.gmra.mxu1 %v7848_v49  ;;  %v7859_v31 = vshrl.u32 %v13953_v17, 16  ;;  %v7862_v9 = vshll.u32 %v13953_v17, 16  ;;  %v7544_v52 = vshll.u32 %v16385_v33, 16 }
 0x555   : >> { %8160 = vmatmul.bf16.vlgmr.msrb.gmra.mxu2 %v16122_v21  ;;  %v7539_v27 = vsel %vm2699_vm1, %v7534_v44, %v7538_v40  ;;  %8956 = vmatpush.bf16.msra.mxu1 %v12492_v37  ;;  %v16418_v37 = vld [vmem:[%s14971_s28 + $0x110] sm:$0xff] }
 0x556   : >> { %8472 = vmatmul.bf16.vlgmr.msrb.gmra.mxu3 %v8333_v34  ;;  %v16388_v34 = vld [vmem:[%s14971_s28 + $0x108] sm:$0xff] }
 0x557   : >> { %v8346_v8 = vshll.u32 %v16388_v34, 16 }
 0x558   : >> { %v7205_v47 = vpop.f32.mrf.mxu2  ;;  %v6565_v60 = vpop.f32.mrf.mxu0 }
 0x559   : >> { %v7369_v46 = vpop.f32.mrf.mxu3  ;;  %v7249_v45 = vadd.f32 %v7205_v47, %v6919_v32  ;;  %v6877_v51 = vpop.f32.mrf.mxu1  ;;  %v6608_v21 = vadd.f32 %v6565_v60, %v16125_v39  ;;  %v8336_v39 = vor.u32 %v8334_v7, %v8332_v28  ;;  %v7864_v60 = vrot.slane %v7862_v9, 4 }
 0x55a   : >> { %v7546_v7 = vrot.slane %v7544_v52, 1 }
 0x55b   : >> { %v16365_v62 = vadd.f32 %v7369_v46, %v7249_v45  ;;  %v6920_v63 = vadd.f32 %v6877_v51, %v6608_v21  ;;  %v8341_v15 = vsel %vm2699_vm1, %v8336_v39, %v8340_v35  ;;  %v7861_v45 = vrot.slane %v7859_v31, 3 }
 0x55c   : >> { %v8342_v51 = vshrl.u32 %v16358_v3, 16 }
 0x55e   : >> { %v8344_v4 = vor.u32 %v8342_v51, %v8340_v35 }
 0x560   : >> { %v7207_v41 = vpop.f32.mrf.mxu2  ;;  %v6568_v26 = vpop.f32.mrf.mxu0 }
 0x561   : >> { %v7371_v0 = vpop.f32.mrf.mxu3  ;;  %v7250_v11 = vadd.f32 %v7207_v41, %v6920_v63  ;;  %v6880_v6 = vpop.f32.mrf.mxu1  ;;  %v6609_v28 = vadd.f32 %v6568_v26, %v16130_v53  ;;  %v7540_v53 = vshrl.u32 %v16355_v20, 16  ;;  %v7865_v20 = vor.u32 %v7864_v60, %v7861_v45 }
 0x562   : >> { %v8348_v63 = vrot.slane %v8346_v8, 1 }
 0x563   : >> { %v16381_v1 = vadd.f32 %v7371_v0, %v7250_v11  ;;  %v6921_v49 = vadd.f32 %v6880_v6, %v6609_v28  ;;  %7675 = vmatmul.bf16.gmra.mxu0 %v7539_v27  ;;  %v7542_v21 = vor.u32 %v7540_v53, %v7538_v40  ;;  %v7866_v3 = vsel %vm2392_vm0, %v7856_v5, %v7865_v20  ;;  %v13955_v0 = vld [vmem:[%s14971_s28 + $0x10c] sm:$0xff]   ;;  %v12509_v40 = vld [vmem:[%s16932_s7 + $0x6a0] sm:$0xff] }
 0x564   : >> { %8001 = vmatmul.bf16.gmra.mxu1 %v7857_v18  ;;  %v8349_v35 = vsel %vm2699_vm1, %v8344_v4, %v8348_v63  ;;  %9269 = vmatpush.bf16.msra.mxu2 %v12509_v40  ;;  %v12483_v5 = vld [vmem:[%s16932_s7 + $0x620] sm:$0xff]  ;;  %v16412_v27 = vld [vmem:[%s14971_s28 + $0x108] sm:$0xff]  ;;  %v7868_v18 = vshrl.u32 %v13955_v0, 16  ;;  %v7871_v17 = vshll.u32 %v13955_v0, 16  ;;  %v16445_v40 = vld [vmem:[%s14971_s28 + $0x118] sm:$0xff] }
 0x565   : >> { %8165 = vmatmul.bf16.gmra.mxu2 %v16140_v43  ;;  %8793 = vmatpush.bf16.msra.mxu0 %v12483_v5 }
 0x566   : >> { %8477 = vmatmul.bf16.gmra.mxu3 %v8341_v15  ;;  %v7873_v53 = vrot.slane %v7871_v17, 4 }
 0x568   : >> { %v7210_v32 = vpop.f32.mrf.mxu2  ;;  %v6570_v47 = vpop.f32.mrf.mxu0 }
 0x569   : >> { %v7374_v30 = vpop.f32.mrf.mxu3  ;;  %v7251_v42 = vadd.f32 %v7210_v32, %v6921_v49  ;;  %v6882_v46 = vpop.f32.mrf.mxu1  ;;  %v6610_v43 = vadd.f32 %v6570_v47, %v16143_v10  ;;  %v7547_v10 = vsel %vm2699_vm1, %v7542_v21, %v7546_v7  ;;  %v7548_v49 = vshrl.u32 %v16385_v33, 16 }
 0x56a   : >> { %v7552_v32 = vshll.u32 %v16412_v27, 16  ;;  %v8350_v47 = vshrl.u32 %v16388_v34, 16 }
 0x56b   : >> { %v16395_v57 = vadd.f32 %v7374_v30, %v7251_v42  ;;  %v6922_v54 = vadd.f32 %v6882_v46, %v6610_v43  ;;  %v7870_v30 = vrot.slane %v7868_v18, 3  ;;  %v8354_v46 = vshll.u32 %v16418_v37, 16 }
 0x56c   : >> { %v7550_v60 = vor.u32 %v7548_v49, %v7546_v7  ;;  %v7554_v43 = vrot.slane %v7552_v32, 1  ;;  %v8352_v51 = vor.u32 %v8350_v47, %v8348_v63 }
 0x56d   : >> { %v7874_v33 = vor.u32 %v7873_v53, %v7870_v30  ;;  %v8356_v8 = vrot.slane %v8354_v46, 1 }
 0x56f   : >> { %v7875_v34 = vsel %vm2392_vm0, %v7865_v20, %v7874_v33  ;;  %v8357_v7 = vsel %vm2699_vm1, %v8352_v51, %v8356_v8  ;;  %v12508_v20 = vld [vmem:[%s16932_s7 + $0x698] sm:$0xff] }
 0x570   : >> { %v7212_v55 = vpop.f32.mrf.mxu2  ;;  %v6573_v39 = vpop.f32.mrf.mxu0  ;;  %9270 = vmatpush.bf16.msra.mxu2 %v12508_v20 }
 0x571   : >> { %v7376_v50 = vpop.f32.mrf.mxu3  ;;  %v7252_v44 = vadd.f32 %v7212_v55, %v6922_v54  ;;  %v6885_v41 = vpop.f32.mrf.mxu1  ;;  %v6611_v11 = vadd.f32 %v6573_v39, %v16154_v29  ;;  %v12491_v29 = vld [vmem:[%s16932_s7 + $0x660] sm:$0xff] }
 0x572   : >> { %8957 = vmatpush.bf16.msra.mxu1 %v12491_v29 }
 0x573   : >> { %v16405_v26 = vadd.f32 %v7376_v50, %v7252_v44  ;;  %v6923_v6 = vadd.f32 %v6885_v41, %v6611_v11  ;;  %7680 = vmatmul.bf16.gmra.mxu0 %v7547_v10  ;;  %v13957_v44 = vld [vmem:[%s14971_s28 + $0x114] sm:$0xff]  }
 0x574   : >> { %8006 = vmatmul.bf16.gmra.mxu1 %v7866_v3  ;;  %v16436_v10 = vld [vmem:[%s14971_s28 + $0x110] sm:$0xff]  ;;  %v7877_v3 = vshrl.u32 %v13957_v44, 16  ;;  %v7880_v0 = vshll.u32 %v13957_v44, 16 }
 0x575   : >> { %8170 = vmatmul.bf16.gmra.mxu2 %v16161_v58  ;;  %v7560_v17 = vshll.u32 %v16436_v10, 16 }
 0x576   : >> { %8482 = vmatmul.bf16.gmra.mxu3 %v8349_v35  ;;  %v7879_v29 = vrot.slane %v7877_v3, 3 }
 0x577   : >> { %v7562_v30 = vrot.slane %v7560_v17, 1  ;;  %v12481_v17 = vld [vmem:[%s16932_s7 + $0x610] sm:$0xff] }
 0x578   : >> { %v7215_v28 = vpop.f32.mrf.mxu2  ;;  %v6575_v9 = vpop.f32.mrf.mxu0 }
 0x579   : >> { %v7379_v15 = vpop.f32.mrf.mxu3  ;;  %v7253_v31 = vadd.f32 %v7215_v28, %v6923_v6  ;;  %v6887_v58 = vpop.f32.mrf.mxu1  ;;  %v6612_v42 = vadd.f32 %v6575_v9, %v16164_v22  ;;  %v7555_v22 = vsel %vm2699_vm1, %v7550_v60, %v7554_v43  ;;  %v7882_v28 = vrot.slane %v7880_v0, 4 }
 0x57a   : >> { %v8362_v9 = vshll.u32 %v16445_v40, 16 }
 0x57b   : >> { %v16425_v52 = vadd.f32 %v7379_v15, %v7253_v31  ;;  %v6924_v45 = vadd.f32 %v6887_v58, %v6612_v42  ;;  %v12490_v15 = vld [vmem:[%s16932_s7 + $0x658] sm:$0xff]  ;;  %v8358_v31 = vshrl.u32 %v16418_v37, 16  ;;  %v7883_v53 = vor.u32 %v7882_v28, %v7879_v29  ;;  %v12489_v29 = vld [vmem:[%s16932_s7 + $0x650] sm:$0xff] }
 0x57c   : >> { %8958 = vmatpush.bf16.msra.mxu1 %v12490_v15  ;;  %v8364_v47 = vrot.slane %v8362_v9, 1 }
 0x57d   : >> { %v8360_v42 = vor.u32 %v8358_v31, %v8356_v8 }
 0x580   : >> { %v7217_v54 = vpop.f32.mrf.mxu2  ;;  %v6578_v55 = vpop.f32.mrf.mxu0  ;;  %8959 = vmatpush.bf16.msra.mxu1 %v12489_v29 }
 0x581   : >> { %v7381_v21 = vpop.f32.mrf.mxu3  ;;  %v7254_v4 = vadd.f32 %v7217_v54, %v6924_v45  ;;  %v6890_v50 = vpop.f32.mrf.mxu1  ;;  %v6613_v39 = vadd.f32 %v6578_v55, %v16178_v25  ;;  %v12482_v25 = vld [vmem:[%s16932_s7 + $0x618] sm:$0xff]  ;;  %v7884_v54 = vsel %vm2392_vm0, %v7874_v33, %v7883_v53  ;;  %v16462_v55 = vld [vmem:[%s14971_s28 + $0x110] sm:$0xff]   ;;  %v16472_v33 = vld [vmem:[%s14971_s28 + $0x120] sm:$0xff] }
 0x582   : >> { %8794 = vmatpush.bf16.msra.mxu0 %v12482_v25 }
 0x583   : >> { %v16432_v41 = vadd.f32 %v7381_v21, %v7254_v4  ;;  %v6925_v63 = vadd.f32 %v6890_v50, %v6613_v39  ;;  %7685 = vmatmul.bf16.gmra.mxu0 %v7555_v22  ;;  %v13959_v21 = vld [vmem:[%s14971_s28 + $0x11c] sm:$0xff]  }
 0x584   : >> { %8011 = vmatmul.bf16.gmra.mxu1 %v7875_v34  ;;  %v16469_v22 = vld [vmem:[%s14971_s28 + $0x118] sm:$0xff]  ;;  %v7886_v34 = vshrl.u32 %v13959_v21, 16  ;;  %v7889_v44 = vshll.u32 %v13959_v21, 16 }
 0x585   : >> { %8175 = vmatmul.bf16.gmra.mxu2 %v16185_v59  ;;  %v7556_v59 = vshrl.u32 %v16412_v27, 16  ;;  %v7568_v20 = vshll.u32 %v16469_v22, 16 }
 0x586   : >> { %8487 = vmatmul.bf16.gmra.mxu3 %v8357_v7  ;;  %v7564_v7 = vshrl.u32 %v16436_v10, 16  ;;  %v7888_v25 = vrot.slane %v7886_v34, 3  ;;  %8795 = vmatpush.bf16.msra.mxu0 %v12481_v17 }
 0x587   : >> { %v7558_v32 = vor.u32 %v7556_v59, %v7554_v43  ;;  %v8365_v43 = vsel %vm2699_vm1, %v8360_v42, %v8364_v47 }
 0x588   : >> { %v7220_v11 = vpop.f32.mrf.mxu2  ;;  %v6580_v5 = vpop.f32.mrf.mxu0  ;;  %v7566_v28 = vor.u32 %v7564_v7, %v7562_v30 }
 0x589   : >> { %v7384_v35 = vpop.f32.mrf.mxu3  ;;  %v7255_v6 = vadd.f32 %v7220_v11, %v6925_v63  ;;  %v6892_v18 = vpop.f32.mrf.mxu1  ;;  %v6614_v49 = vadd.f32 %v6580_v5, %v16188_v2  ;;  %v7563_v37 = vsel %vm2699_vm1, %v7558_v32, %v7562_v30  ;;  %v7891_v11 = vrot.slane %v7889_v44, 4 }
 0x58a   : >> { %v8370_v5 = vshll.u32 %v16472_v33, 16 }
 0x58b   : >> { %v16455_v58 = vadd.f32 %v7384_v35, %v7255_v6  ;;  %v6926_v27 = vadd.f32 %v6892_v18, %v6614_v49  ;;  %v12507_v35 = vld [vmem:[%s16932_s7 + $0x690] sm:$0xff]  ;;  %v8366_v6 = vshrl.u32 %v16445_v40, 16  ;;  %v7892_v15 = vor.u32 %v7891_v11, %v7888_v25 }
 0x58c   : >> { %9271 = vmatpush.bf16.msra.mxu2 %v12507_v35  ;;  %v8372_v49 = vrot.slane %v8370_v5, 1  ;;  %v12480_v35 = vld [vmem:[%s16932_s7 + $0x608] sm:$0xff] }
 0x58d   : >> { %v8368_v40 = vor.u32 %v8366_v6, %v8364_v47  ;;  %8796 = vmatpush.bf16.msra.mxu0 %v12480_v35 }
 0x58f   : >> { %v8373_v47 = vsel %vm2699_vm1, %v8368_v40, %v8372_v49 }
 0x590   : >> { %v7222_v46 = vpop.f32.mrf.mxu2  ;;  %v6583_v2 = vpop.f32.mrf.mxu0 }
 0x591   : >> { %v7386_v45 = vpop.f32.mrf.mxu3  ;;  %v7256_v60 = vadd.f32 %v7222_v46, %v6926_v27  ;;  %v6895_v51 = vpop.f32.mrf.mxu1  ;;  %v6615_v4 = vadd.f32 %v6583_v2, %v16196_v24  ;;  %v16495_v2 = vld [vmem:[%s14971_s28 + $0x118] sm:$0xff]  }
 0x593   : >> { %v16465_v8 = vadd.f32 %v7386_v45, %v7256_v60  ;;  %v6927_v50 = vadd.f32 %v6895_v51, %v6615_v4  ;;  %7690 = vmatmul.bf16.gmra.mxu0 %v7563_v37  ;;  %v7893_v45 = vsel %vm2392_vm0, %v7883_v53, %v7892_v15  ;;  %v13961_v60 = vld [vmem:[%s14971_s28 + $0x124] sm:$0xff]  }
 0x594   : >> { %8016 = vmatmul.bf16.gmra.mxu1 %v7884_v54  ;;  %v16502_v54 = vld [vmem:[%s14971_s28 + $0x120] sm:$0xff]  ;;  %v7895_v21 = vshrl.u32 %v13961_v60, 16  ;;  %v7898_v4 = vshll.u32 %v13961_v60, 16  ;;  %v16505_v53 = vld [vmem:[%s14971_s28 + $0x128] sm:$0xff] }
 0x595   : >> { %8180 = vmatmul.bf16.gmra.mxu2 %v16462_v55 }
 0x596   : >> { %8492 = vmatmul.bf16.gmra.mxu3 %v8365_v43  ;;  %v7897_v7 = vrot.slane %v7895_v21, 3  ;;  %v7580_v21 = vshrl.u32 %v16502_v54, 16 }
 0x598   : >> { %v7225_v39 = vpop.f32.mrf.mxu2  ;;  %v6585_v3 = vpop.f32.mrf.mxu0 }
 0x599   : >> { %v7389_v24 = vpop.f32.mrf.mxu3  ;;  %v7257_v63 = vadd.f32 %v7225_v39, %v6927_v50  ;;  %v6897_v0 = vpop.f32.mrf.mxu1  ;;  %v6616_v59 = vadd.f32 %v6585_v3, %v16209_v61  ;;  %v7570_v61 = vrot.slane %v7568_v20, 1  ;;  %v7572_v50 = vshrl.u32 %v16469_v22, 16  ;;  %v12506_v22 = vld [vmem:[%s16932_s7 + $0x688] sm:$0xff] }
 0x59a   : >> { %v8378_v20 = vshll.u32 %v16505_v53, 16  ;;  %9272 = vmatpush.bf16.msra.mxu2 %v12506_v22 }
 0x59b   : >> { %v16482_v18 = vadd.f32 %v7389_v24, %v7257_v63  ;;  %v6928_v10 = vadd.f32 %v6897_v0, %v6616_v59  ;;  %v7571_v46 = vsel %vm2699_vm1, %v7566_v28, %v7570_v61  ;;  %v7576_v24 = vshll.u32 %v16502_v54, 16 }
 0x59c   : >> { %v7900_v63 = vrot.slane %v7898_v4, 4  ;;  %v8374_v0 = vshrl.u32 %v16472_v33, 16  ;;  %v7574_v59 = vor.u32 %v7572_v50, %v7570_v61  ;;  %v8380_v33 = vrot.slane %v8378_v20, 1  ;;  %v12488_v61 = vld [vmem:[%s16932_s7 + $0x648] sm:$0xff] }
 0x59d   : >> { %v7578_v6 = vrot.slane %v7576_v24, 1  ;;  %8960 = vmatpush.bf16.msra.mxu1 %v12488_v61  ;;  %v8382_v24 = vshrl.u32 %v16505_v53, 16 }
 0x59e   : >> { %v8376_v5 = vor.u32 %v8374_v0, %v8372_v49 }
 0x59f   : >> { %v7582_v0 = vor.u32 %v7580_v21, %v7578_v6 }
 0x5a0   : >> { %v7227_v31 = vpop.f32.mrf.mxu2  ;;  %v6588_v32 = vpop.f32.mrf.mxu0 }
 0x5a1   : >> { %v7391_v9 = vpop.f32.mrf.mxu3  ;;  %v7258_v27 = vadd.f32 %v7227_v31, %v6928_v10  ;;  %v6900_v42 = vpop.f32.mrf.mxu1  ;;  %v6617_v30 = vadd.f32 %v6588_v32, %v16214_v36  ;;  %v7579_v31 = vsel %vm2699_vm1, %v7574_v59, %v7578_v6  ;;  %v16528_v32 = vld [vmem:[%s14971_s28 + $0x120] sm:$0xff]  }
 0x5a2   : >> { %v12505_v6 = vld [vmem:[%s16932_s7 + $0x680] sm:$0xff] }
 0x5a3   : >> { %v16498_v51 = vadd.f32 %v7391_v9, %v7258_v27  ;;  %v6929_v37 = vadd.f32 %v6900_v42, %v6617_v30  ;;  %7695 = vmatmul.bf16.gmra.mxu0 %v7571_v46  ;;  %v13963_v27 = vld [vmem:[%s14971_s28 + $0x12c] sm:$0xff]   ;;  %v8381_v42 = vsel %vm2699_vm1, %v8376_v5, %v8380_v33  ;;  %9273 = vmatpush.bf16.msra.mxu2 %v12505_v6 }
 0x5a4   : >> { %8021 = vmatmul.bf16.gmra.mxu1 %v7893_v45  ;;  %v7904_v60 = vshrl.u32 %v13963_v27, 16  ;;  %v7907_v30 = vshll.u32 %v13963_v27, 16 }
 0x5a5   : >> { %8185 = vmatmul.bf16.gmra.mxu2 %v16495_v2 }
 0x5a6   : >> { %8497 = vmatmul.bf16.gmra.mxu3 %v8373_v47  ;;  %v16538_v47 = vld [vmem:[%s14971_s28 + $0x130] sm:$0xff] }
 0x5a8   : >> { %v7230_v43 = vpop.f32.mrf.mxu2  ;;  %v6590_v44 = vpop.f32.mrf.mxu0 }
 0x5a9   : >> { %v7394_v36 = vpop.f32.mrf.mxu3  ;;  %v7259_v34 = vadd.f32 %v7230_v43, %v6929_v37  ;;  %v6902_v39 = vpop.f32.mrf.mxu1  ;;  %v6618_v3 = vadd.f32 %v6590_v44, %v16230_v12  ;;  %v7901_v12 = vor.u32 %v7900_v63, %v7897_v7  ;;  %v7909_v44 = vrot.slane %v7907_v30, 4 }
 0x5aa   : >> { %v8386_v7 = vshll.u32 %v16538_v47, 16 }
 0x5ab   : >> { %v16512_v25 = vadd.f32 %v7394_v36, %v7259_v34  ;;  %v6930_v11 = vadd.f32 %v6902_v39, %v6618_v3  ;;  %v7902_v9 = vsel %vm2392_vm0, %v7892_v15, %v7901_v12  ;;  %v16535_v15 = vld [vmem:[%s14971_s28 + $0x128] sm:$0xff]  ;;  %v7906_v34 = vrot.slane %v7904_v60, 3 }
 0x5ac   : >> { %v7584_v50 = vshll.u32 %v16535_v15, 16  ;;  %v8388_v22 = vrot.slane %v8386_v7, 1  ;;  %v7588_v60 = vshrl.u32 %v16535_v15, 16 }
 0x5ad   : >> { %v7910_v20 = vor.u32 %v7909_v44, %v7906_v34  ;;  %v16581_v44 = vld [vmem:[%s14971_s28 + $0x138] sm:$0xff]  }
 0x5ae   : >> { %v7586_v54 = vrot.slane %v7584_v50, 1  ;;  %v8390_v50 = vshrl.u32 %v16538_v47, 16  ;;  %v11560_v47 = vld [vmem:[%s14971_s28 + $0x138] sm:$0x1] }
 0x5b0   : >> { %v7232_v10 = vpop.f32.mrf.mxu2  ;;  %v6593_v28 = vpop.f32.mrf.mxu0 }
 0x5b1   : >> { %v7396_v17 = vpop.f32.mrf.mxu3  ;;  %v7260_v29 = vadd.f32 %v7232_v10, %v6930_v11  ;;  %v6905_v40 = vpop.f32.mrf.mxu1  ;;  %v6619_v49 = vadd.f32 %v6593_v28, %v16244_v56  ;;  %v8384_v11 = vor.u32 %v8382_v24, %v8380_v33  ;;  %v7587_v10 = vsel %vm2699_vm1, %v7582_v0, %v7586_v54  ;;  %v16559_v28 = vld [vmem:[%s14971_s28 + $0x128] sm:$0xff]  }
 0x5b2   : >> { %v7590_v24 = vor.u32 %v7588_v60, %v7586_v54 }
 0x5b3   : >> { %v16531_v46 = vadd.f32 %v7396_v17, %v7260_v29  ;;  %v6931_v45 = vadd.f32 %v6905_v40, %v6619_v49  ;;  %7700 = vmatmul.bf16.gmra.mxu0 %v7579_v31  ;;  %v7911_v17 = vsel %vm2392_vm0, %v7901_v12, %v7910_v20  ;;  %v13964_v29 = vld [vmem:[%s14971_s28 + $0x134] sm:$0xff]   ;;  %v8389_v40 = vsel %vm2699_vm1, %v8384_v11, %v8388_v22  ;;  %v12479_v12 = vld [vmem:[%s16932_s7 + $0x600] sm:$0xff] }
 0x5b4   : >> { %8026 = vmatmul.bf16.gmra.mxu1 %v7902_v9  ;;  %v16563_v9 = vld [vmem:[%s14971_s28 + $0x130] sm:$0xff]  ;;  %v7913_v27 = vshrl.u32 %v13964_v29, 16  ;;  %v7916_v61 = vshll.u32 %v13964_v29, 16  ;;  %v16573_v49 = vld [vmem:[%s14971_s28 + $0x138] sm:$0xff]  ;;  %8797 = vmatpush.bf16.msra.mxu0 %v12479_v12  ;;  %v13052_v11 = vunpack.c.h.b16 %v16581_v44 }
 0x5b5   : >> { %8190 = vmatmul.bf16.gmra.mxu2 %v16528_v32  ;;  %v7592_v30 = vshll.u32 %v16563_v9, 16  ;;  %v8394_v34 = vshll.u32 %v16573_v49, 16  ;;  %v16597_v12 = vld [vmem:[%s14971_s28 + $0x130] sm:$0xff]  }
 0x5b6   : >> { %8502 = vmatmul.bf16.gmra.mxu3 %v8381_v42 }
 0x5b7   : >> { %v7594_v7 = vrot.slane %v7592_v30, 1  ;;  %v7596_v30 = vshrl.u32 %v16563_v9, 16 }
 0x5b8   : >> { %v7235_v56 = vpop.f32.mrf.mxu2  ;;  %v6595_v43 = vpop.f32.mrf.mxu0 }
 0x5b9   : >> { %v7399_v37 = vpop.f32.mrf.mxu3  ;;  %v7261_v4 = vadd.f32 %v7235_v56, %v6931_v45  ;;  %v6907_v36 = vpop.f32.mrf.mxu1  ;;  %v6620_v39 = vadd.f32 %v6595_v43, %v16260_v38  ;;  %v7918_v43 = vrot.slane %v7916_v61, 4  ;;  %v7598_v9 = vor.u32 %v7596_v30, %v7594_v7 }
 0x5bb   : >> { %v16545_v63 = vadd.f32 %v7399_v37, %v7261_v4  ;;  %v6932_v3 = vadd.f32 %v6907_v36, %v6620_v39  ;;  %v7915_v4 = vrot.slane %v7913_v27, 3 }
 0x5bd   : >> { %v7919_v0 = vor.u32 %v7918_v43, %v7915_v4 }
 0x5bf   : >> { %v7920_v6 = vsel %vm2392_vm0, %v7910_v20, %v7919_v0 }
 0x5c0   : >> { %v7237_v35 = vpop.f32.mrf.mxu2  ;;  %v6598_v38 = vpop.f32.mrf.mxu0 }
 0x5c1   : >> { %v16547_v59 = vpop.f32.mrf.mxu3  ;;  %v16549_v5 = vadd.f32 %v7237_v35, %v6932_v3  ;;  %v6910_v53 = vpop.f32.mrf.mxu1  ;;  %v6621_v33 = vadd.f32 %v6598_v38, %v16281_v14  ;;  %v12487_v14 = vld [vmem:[%s16932_s7 + $0x640] sm:$0xff]  ;;  %v12520_v3 = vld [vmem:[%s16935_s10 + $0x38] sm:$0xff]  ;;  %v8396_v35 = vrot.slane %v8394_v34, 1 }
 0x5c2   : >> { %8961 = vmatpush.bf16.msra.mxu1 %v12487_v14  ;;  %9487 = vmatpush.bf16.msra.mxu3 %v12520_v3  ;;  %v11786_v38 = vld [vmem:[%s14971_s28 + $0x140] sm:$0x1] }
 0x5c3   : >> { %v6933_v31 = vadd.f32 %v6910_v53, %v6621_v33  ;;  %7705 = vmatmul.bf16.gmra.mxu0 %v7587_v10  ;;  %v7595_v10 = vsel %vm2699_vm1, %v7590_v24, %v7594_v7  ;;  %v7508_v33 = vunpack.c.l.b16 %v11560_v47  ;;  %v8310_v27 = vunpack.c.l.b16 %v11786_v38  ;;  %v12519_v24 = vld [vmem:[%s16935_s10 + $0x30] sm:$0xff]  ;;  %v13966_v47 = vld [vmem:[%s14971_s28 + $0xf4] sm:$0xf0]   ;;  %v13968_v7 = vld [vmem:[%s14971_s28 + $0xfc] sm:$0xff]  }
 0x5c4   : >> { %8031 = vmatmul.bf16.gmra.mxu1 %v7911_v17 }
 0x5c5   : >> { %8195 = vmatmul.bf16.gmra.mxu2 %v16559_v28  ;;  %v7519_v14 = vpack.c.b16 %v7508_v33, %v7508_v33  ;;  %v8321_v60 = vpack.c.b16 %v8310_v27, %v8310_v27 }
 0x5c6   : >> { %8507 = vmatmul.bf16.gmra.mxu3 %v8389_v40  ;;  %v7831_v40 = vpack.c.b16 %v13052_v11, %v13052_v11 }
 0x5c7   : >> { %v8402_v34 = vshll.u32 %v8321_v60, 16  ;;  %9488 = vmatpush.bf16.msra.mxu3 %v12519_v24 }
 0x5c8   : >> { %v7240_v42 = vpop.f32.mrf.mxu2  ;;  %v6600_v37 = vpop.f32.mrf.mxu0 }
 0x5c9   : >> { %v7404_v45 = vpop.f32.mrf.mxu3  ;;  %v7263_v56 = vadd.f32 %v7240_v42, %v6933_v31  ;;  %v6912_v21 = vpop.f32.mrf.mxu1  ;;  %v6622_v36 = vadd.f32 %v6600_v37, %v16298_v48  ;;  %v8392_v48 = vor.u32 %v8390_v50, %v8388_v22  ;;  %v7922_v42 = vshrl.u32 %v7831_v40, 16 }
 0x5ca   : >> { %v8398_v50 = vshrl.u32 %v16573_v49, 16 }
 0x5cb   : >> { %v16583_v39 = vadd.f32 %v7404_v45, %v7263_v56  ;;  %v6934_v15 = vadd.f32 %v6912_v21, %v6622_v36  ;;  %v8397_v22 = vsel %vm2699_vm1, %v8392_v48, %v8396_v35  ;;  %v7925_v45 = vshll.u32 %v7831_v40, 16  ;;  %v13745_v48 = vld [vmem:[%s14971_s28 + $0xf4] sm:$0x8] }
 0x5cc   : >> { %v7600_v21 = vshll.u32 %v7519_v14, 16  ;;  %v7924_v4 = vrot.slane %v7922_v42, 3  ;;  %v8400_v38 = vor.u32 %v8398_v50, %v8396_v35  ;;  %v8643_v14 = vshrl.u32 %v13968_v7, 16 }
 0x5cd   : >> { %v7927_v43 = vrot.slane %v7925_v45, 4  ;;  %v8646_v42 = vshll.u32 %v13968_v7, 16  ;;  %v12496_v45 = vld [vmem:[%s14971_s28 + $0x100] sm:$0xff] }
 0x5ce   : >> { %v7602_v3 = vrot.slane %v7600_v21, 1  ;;  %v8645_v21 = vrot.slane %v8643_v14, 3 }
 0x5cf   : >> { %v7928_v11 = vor.u32 %v7927_v43, %v7924_v4  ;;  %v8648_v4 = vrot.slane %v8646_v42, 4 }
 0x5d0   : >> { %v7242_v53 = vpop.f32.mrf.mxu2  ;;  %v7671_v54 = vpop.f32.mrf.mxu0 }
 0x5d1   : >> { %v16592_v17 = vadd.f32 %v7242_v53, %v6934_v15  ;;  %v7997_v29 = vpop.f32.mrf.mxu1  ;;  %v7721_v31 = vadd.f32 %v7671_v54, %v16312_v16  ;;  %v8404_v53 = vrot.slane %v8402_v34, 1  ;;  %v7929_v33 = vsel %vm2392_vm0, %v7919_v0, %v7928_v11 }
 0x5d2   : >> { %v9132_v34 = vshll.u32 %v12496_v45, 16 }
 0x5d3   : >> { %v8047_v61 = vadd.f32 %v7997_v29, %v7721_v31  ;;  %7710 = vmatmul.bf16.gmra.mxu0 %v7595_v10  ;;  %v8405_v31 = vsel %vm2699_vm1, %v8400_v38, %v8404_v53 }
 0x5d4   : >> { %8036 = vmatmul.bf16.gmra.mxu1 %v7920_v6  ;;  %v7603_v6 = vsel %vm2699_vm1, %v7598_v9, %v7602_v3  ;;  %v8649_v9 = vor.u32 %v8648_v4, %v8645_v21  ;;  %v9134_v11 = vrot.slane %v9132_v34, 1  ;;  %v13353_v34 = vld [vmem:[%s14971_s28 + $0x100] sm:$0xff]  }
 0x5d5   : >> { %8200 = vmatmul.bf16.gmra.mxu2 %v16597_v12 }
 0x5d6   : >> { %8512 = vmatmul.bf16.gmra.mxu3 %v8397_v22  ;;  %v12495_v22 = vld [vmem:[%s14971_s28 + $0xf8] sm:$0xff] }
 0x5d7   : >> { %v9127_v60 = vshll.u32 %v12495_v22, 16 }
 0x5d8   : >> { %v8161_v20 = vpop.f32.mrf.mxu2  ;;  %v7673_v56 = vpop.f32.mrf.mxu0 }
 0x5d9   : >> { %v16602_v16 = vadd.f32 %v8161_v20, %v8047_v61  ;;  %v7999_v37 = vpop.f32.mrf.mxu1  ;;  %v7722_v36 = vadd.f32 %v7673_v56, %v16322_v23  ;;  %v13746_v23 = vor.u32 %v13966_v47, %v13745_v48  ;;  %v9129_v50 = vrot.slane %v9127_v60, 1 }
 0x5da   : >> { %v9136_v60 = vshrl.u32 %v12496_v45, 16 }
 0x5db   : >> { %v8048_v15 = vadd.f32 %v7999_v37, %v7722_v36  ;;  %v8635_v27 = vshrl.u32 %v13746_v23, 16  ;;  %v8638_v61 = vshll.u32 %v13746_v23, 16  ;;  %v9125_v36 = vshrl.u32 %v12495_v22, 16  ;;  %v13352_v23 = vld [vmem:[%s14971_s28 + $0xf8] sm:$0xff]  }
 0x5dd   : >> { %v8637_v0 = vrot.slane %v8635_v27, 3  ;;  %v8640_v37 = vrot.slane %v8638_v61, 4  ;;  %v9130_v3 = vor.u32 %v9129_v50, %v9125_v36 }
 0x5df   : >> { %v8641_v24 = vor.u32 %v8640_v37, %v8637_v0 }
 0x5e0   : >> { %v8163_v10 = vpop.f32.mrf.mxu2  ;;  %v7676_v49 = vpop.f32.mrf.mxu0 }
 0x5e1   : >> { %v16611_v54 = vadd.f32 %v8163_v10, %v8048_v15  ;;  %v8002_v29 = vpop.f32.mrf.mxu1  ;;  %v7723_v40 = vadd.f32 %v7676_v49, %v16338_v19  ;;  %v8650_v10 = vsel %vm2392_vm0, %v8641_v24, %v8649_v9  ;;  %v13970_v49 = vld [vmem:[%s14971_s28 + $0x104] sm:$0xff]  }
 0x5e2   : >> { %v8652_v7 = vshrl.u32 %v13970_v49, 16 }
 0x5e3   : >> { %v8049_v35 = vadd.f32 %v8002_v29, %v7723_v40  ;;  %7715 = vmatmul.bf16.gmra.mxu0 %v7603_v6  ;;  %v9135_v29 = vsel %vm2699_vm1, %v9130_v3, %v9134_v11  ;;  %v8655_v40 = vshll.u32 %v13970_v49, 16 }
 0x5e4   : >> { %8041 = vmatmul.bf16.gmra.mxu1 %v7929_v33  ;;  %v12518_v33 = vld [vmem:[%s16935_s10 + $0x28] sm:$0xff]  ;;  %v8654_v61 = vrot.slane %v8652_v7, 3 }
 0x5e5   : >> { %8205 = vmatmul.bf16.gmra.mxu2 %v16581_v44  ;;  %9489 = vmatpush.bf16.msra.mxu3 %v12518_v33  ;;  %v8657_v14 = vrot.slane %v8655_v40, 4 }
 0x5e6   : >> { %8517 = vmatmul.bf16.gmra.mxu3 %v8405_v31  ;;  %v12497_v31 = vld [vmem:[%s14971_s28 + $0x108] sm:$0xff] }
 0x5e8   : >> { %v8166_v20 = vpop.f32.mrf.mxu2  ;;  %v7678_v19 = vpop.f32.mrf.mxu0 }
 0x5e9   : >> { %v16621_v30 = vadd.f32 %v8166_v20, %v8049_v35  ;;  %v8004_v56 = vpop.f32.mrf.mxu1  ;;  %v7724_v43 = vadd.f32 %v7678_v19, %v16351_v13  ;;  %v9140_v20 = vshll.u32 %v12497_v31, 16  ;;  %v8658_v19 = vor.u32 %v8657_v14, %v8654_v61 }
 0x5eb   : >> { %v8050_v15 = vadd.f32 %v8004_v56, %v7724_v43  ;;  %v9138_v56 = vor.u32 %v9136_v60, %v9134_v11  ;;  %v9142_v37 = vrot.slane %v9140_v20, 1  ;;  %v8659_v50 = vsel %vm2392_vm0, %v8649_v9, %v8658_v19  ;;  %v13354_v60 = vld [vmem:[%s14971_s28 + $0x108] sm:$0xff]   ;;  %v13974_v20 = vld [vmem:[%s14971_s28 + $0x114] sm:$0xff]  }
 0x5f0   : >> { %v8168_v48 = vpop.f32.mrf.mxu2  ;;  %v7681_v38 = vpop.f32.mrf.mxu0 }
 0x5f1   : >> { %v16624_v47 = vadd.f32 %v8168_v48, %v8050_v15  ;;  %v8007_v53 = vpop.f32.mrf.mxu1  ;;  %v7725_v13 = vadd.f32 %v7681_v38, %v16365_v62  ;;  %v13972_v15 = vld [vmem:[%s14971_s28 + $0x10c] sm:$0xff]   ;;  %v12517_v48 = vld [vmem:[%s16935_s10 + $0x20] sm:$0xff] }
 0x5f2   : >> { %v8661_v3 = vshrl.u32 %v13972_v15, 16  ;;  %v8664_v11 = vshll.u32 %v13972_v15, 16  ;;  %v12498_v38 = vld [vmem:[%s14971_s28 + $0x110] sm:$0xff]  ;;  %9490 = vmatpush.bf16.msra.mxu3 %v12517_v48 }
 0x5f3   : >> { %v8051_v6 = vadd.f32 %v8007_v53, %v7725_v13  ;;  %8798 = vmatmul.bf16.vlgmr.msra.gmra.mxu0 %v8650_v10 }
 0x5f4   : >> { %8962 = vmatmul.bf16.vlgmr.msra.gmra.mxu1 %v13352_v23  ;;  %v8663_v23 = vrot.slane %v8661_v3, 3  ;;  %v8666_v49 = vrot.slane %v8664_v11, 4  ;;  %v12516_v3 = vld [vmem:[%s16935_s10 + $0x18] sm:$0xff] }
 0x5f5   : >> { %9274 = vmatmul.bf16.vlgmr.msra.gmra.mxu2 %v9135_v29  ;;  %v9144_v29 = vshrl.u32 %v12497_v31, 16 }
 0x5f6   : >> { %v8667_v7 = vor.u32 %v8666_v49, %v8663_v23  ;;  %9491 = vmatpush.bf16.msra.mxu3 %v12516_v3  ;;  %v12501_v3 = vld [vmem:[%s14971_s28 + $0x128] sm:$0xff] }
 0x5f7   : >> { %v9146_v40 = vor.u32 %v9144_v29, %v9142_v37 }
 0x5f8   : >> { %v8171_v22 = vpop.f32.mrf.mxu2  ;;  %v7683_v27 = vpop.f32.mrf.mxu0 }
 0x5f9   : >> { %v16635_v35 = vadd.f32 %v8171_v22, %v8051_v6  ;;  %v8009_v62 = vpop.f32.mrf.mxu1  ;;  %v7726_v42 = vadd.f32 %v7683_v27, %v16381_v1  ;;  %v9143_v1 = vsel %vm2699_vm1, %v9138_v56, %v9142_v37  ;;  %v9148_v6 = vshll.u32 %v12498_v38, 16 }
 0x5fa   : >> { %v8670_v56 = vshrl.u32 %v13974_v20, 16  ;;  %v8673_v37 = vshll.u32 %v13974_v20, 16 }
 0x5fb   : >> { %v8052_v0 = vadd.f32 %v8009_v62, %v7726_v42  ;;  %v9150_v22 = vrot.slane %v9148_v6, 1  ;;  %v8668_v42 = vsel %vm2392_vm0, %v8658_v19, %v8667_v7 }
 0x5fc   : >> { %v8672_v15 = vrot.slane %v8670_v56, 3  ;;  %v8675_v19 = vrot.slane %v8673_v37, 4 }
 0x5fe   : >> { %v8676_v11 = vor.u32 %v8675_v19, %v8672_v15 }
 0x600   : >> { %v8173_v21 = vpop.f32.mrf.mxu2  ;;  %v7686_v43 = vpop.f32.mrf.mxu0 }
 0x601   : >> { %v16638_v4 = vadd.f32 %v8173_v21, %v8052_v0  ;;  %v8012_v36 = vpop.f32.mrf.mxu1  ;;  %v7727_v24 = vadd.f32 %v7686_v43, %v16395_v57  ;;  %v12499_v21 = vld [vmem:[%s14971_s28 + $0x118] sm:$0xff] }
 0x602   : >> { %v9160_v20 = vshrl.u32 %v12499_v21, 16 }
 0x603   : >> { %v8053_v45 = vadd.f32 %v8012_v36, %v7727_v24  ;;  %8803 = vmatmul.bf16.gmra.mxu0 %v8659_v50 }
 0x604   : >> { %8967 = vmatmul.bf16.gmra.mxu1 %v13353_v34 }
 0x605   : >> { %9279 = vmatmul.bf16.gmra.mxu2 %v9143_v1  ;;  %v9156_v1 = vshll.u32 %v12499_v21, 16 }
 0x608   : >> { %v8176_v53 = vpop.f32.mrf.mxu2  ;;  %v7688_v10 = vpop.f32.mrf.mxu0 }
 0x609   : >> { %v16649_v9 = vadd.f32 %v8176_v53, %v8053_v45  ;;  %v8014_v57 = vpop.f32.mrf.mxu1  ;;  %v7728_v13 = vadd.f32 %v7688_v10, %v16405_v26  ;;  %v9151_v26 = vsel %vm2699_vm1, %v9146_v40, %v9150_v22  ;;  %v9158_v53 = vrot.slane %v9156_v1, 1 }
 0x60b   : >> { %v8054_v33 = vadd.f32 %v8014_v57, %v7728_v13  ;;  %v8677_v13 = vsel %vm2392_vm0, %v8667_v7, %v8676_v11  ;;  %v9162_v56 = vor.u32 %v9160_v20, %v9158_v53  ;;  %v12514_v20 = vld [vmem:[%s16935_s10 + $0x8] sm:$0xff] }
 0x610   : >> { %v8178_v27 = vpop.f32.mrf.mxu2  ;;  %v7691_v61 = vpop.f32.mrf.mxu0 }
 0x611   : >> { %v16652_v62 = vadd.f32 %v8178_v27, %v8054_v33  ;;  %v8017_v14 = vpop.f32.mrf.mxu1  ;;  %v7729_v0 = vadd.f32 %v7691_v61, %v16425_v52  ;;  %v9152_v52 = vshrl.u32 %v12498_v38, 16 }
 0x613   : >> { %v8055_v31 = vadd.f32 %v8017_v14, %v7729_v0  ;;  %8808 = vmatmul.bf16.gmra.mxu0 %v8668_v42  ;;  %v9154_v48 = vor.u32 %v9152_v52, %v9150_v22  ;;  %v12500_v22 = vld [vmem:[%s14971_s28 + $0x120] sm:$0xff] }
 0x614   : >> { %8972 = vmatmul.bf16.gmra.mxu1 %v13354_v60  ;;  %v9164_v0 = vshll.u32 %v12500_v22, 16 }
 0x615   : >> { %9284 = vmatmul.bf16.gmra.mxu2 %v9151_v26  ;;  %v9159_v29 = vsel %vm2699_vm1, %v9154_v48, %v9158_v53 }
 0x616   : >> { %v9166_v37 = vrot.slane %v9164_v0, 1 }
 0x618   : >> { %v8181_v43 = vpop.f32.mrf.mxu2  ;;  %v7693_v50 = vpop.f32.mrf.mxu0 }
 0x619   : >> { %v16660_v36 = vadd.f32 %v8181_v43, %v8055_v31  ;;  %v8019_v34 = vpop.f32.mrf.mxu1  ;;  %v7730_v24 = vadd.f32 %v7693_v50, %v16432_v41  ;;  %v13976_v41 = vld [vmem:[%s14971_s28 + $0x11c] sm:$0xff]  }
 0x61a   : >> { %v8679_v33 = vshrl.u32 %v13976_v41, 16  ;;  %v8682_v40 = vshll.u32 %v13976_v41, 16  ;;  %v9172_v41 = vshll.u32 %v12501_v3, 16 }
 0x61b   : >> { %v8056_v45 = vadd.f32 %v8019_v34, %v7730_v24  ;;  %v9167_v24 = vsel %vm2699_vm1, %v9162_v56, %v9166_v37 }
 0x61c   : >> { %v8681_v60 = vrot.slane %v8679_v33, 3  ;;  %v8684_v7 = vrot.slane %v8682_v40, 4  ;;  %v9174_v33 = vrot.slane %v9172_v41, 1 }
 0x61e   : >> { %v8685_v31 = vor.u32 %v8684_v7, %v8681_v60  ;;  %v13980_v7 = vld [vmem:[%s14971_s28 + $0x12c] sm:$0xff]  }
 0x61f   : >> { %v8697_v0 = vshrl.u32 %v13980_v7, 16 }
 0x620   : >> { %v8183_v10 = vpop.f32.mrf.mxu2  ;;  %v7696_v23 = vpop.f32.mrf.mxu0  ;;  %v8686_v19 = vsel %vm2392_vm0, %v8676_v11, %v8685_v31 }
 0x621   : >> { %v16666_v57 = vadd.f32 %v8183_v10, %v8056_v45  ;;  %v8022_v49 = vpop.f32.mrf.mxu1  ;;  %v7731_v38 = vadd.f32 %v7696_v23, %v16455_v58 }
 0x623   : >> { %v8057_v6 = vadd.f32 %v8022_v49, %v7731_v38  ;;  %8813 = vmatmul.bf16.gmra.mxu0 %v8677_v13  ;;  %v9168_v13 = vshrl.u32 %v12500_v22, 16 }
 0x624   : >> { %8977 = vmatmul.bf16.gmra.mxu1 %v16462_v55  ;;  %v12515_v55 = vld [vmem:[%s16935_s10 + $0x10] sm:$0xff] }
 0x625   : >> { %9289 = vmatmul.bf16.gmra.mxu2 %v9159_v29  ;;  %9492 = vmatpush.bf16.msra.mxu3 %v12515_v55  ;;  %v12502_v55 = vld [vmem:[%s14971_s28 + $0x130] sm:$0xff] }
 0x628   : >> { %v8186_v27 = vpop.f32.mrf.mxu2  ;;  %v7698_v14 = vpop.f32.mrf.mxu0 }
 0x629   : >> { %v16674_v61 = vadd.f32 %v8186_v27, %v8057_v6  ;;  %v8024_v42 = vpop.f32.mrf.mxu1  ;;  %v7732_v58 = vadd.f32 %v7698_v14, %v16465_v8  ;;  %v13978_v8 = vld [vmem:[%s14971_s28 + $0x124] sm:$0xff]   ;;  %v16691_v6 = vpop.f32.mrf.mxu3  ;;  %9493 = vmatpush.bf16.msra.mxu3 %v12514_v20 }
 0x62a   : >> { %v8688_v1 = vshrl.u32 %v13978_v8, 16  ;;  %v8691_v45 = vshll.u32 %v13978_v8, 16  ;;  %v9180_v8 = vshll.u32 %v12502_v55, 16 }
 0x62b   : >> { %v8058_v26 = vadd.f32 %v8024_v42, %v7732_v58 }
 0x62c   : >> { %v8690_v11 = vrot.slane %v8688_v1, 3  ;;  %v8693_v49 = vrot.slane %v8691_v45, 4  ;;  %v9182_v1 = vrot.slane %v9180_v8, 1 }
 0x62e   : >> { %v8694_v29 = vor.u32 %v8693_v49, %v8690_v11  ;;  %v13982_v49 = vld [vmem:[%s14971_s28 + $0x134] sm:$0xff]  }
 0x62f   : >> { %v8706_v41 = vshrl.u32 %v13982_v49, 16 }
 0x630   : >> { %v8188_v43 = vpop.f32.mrf.mxu2  ;;  %v7701_v34 = vpop.f32.mrf.mxu0  ;;  %v8695_v60 = vsel %vm2392_vm0, %v8685_v31, %v8694_v29 }
 0x631   : >> { %v16680_v50 = vadd.f32 %v8188_v43, %v8058_v26  ;;  %v8027_v15 = vpop.f32.mrf.mxu1  ;;  %v7733_v21 = vadd.f32 %v7701_v34, %v16482_v18  ;;  %v8700_v26 = vshll.u32 %v13980_v7, 16  ;;  %v16704_v56 = vpop.f32.mrf.mxu3  ;;  %v8699_v34 = vrot.slane %v8697_v0, 3 }
 0x633   : >> { %v8059_v52 = vadd.f32 %v8027_v15, %v7733_v21  ;;  %8818 = vmatmul.bf16.gmra.mxu0 %v8686_v19  ;;  %v8702_v15 = vrot.slane %v8700_v26, 4  ;;  %v9176_v19 = vshrl.u32 %v12501_v3, 16 }
 0x634   : >> { %8982 = vmatmul.bf16.gmra.mxu1 %v16495_v2  ;;  %v9170_v2 = vor.u32 %v9168_v13, %v9166_v37 }
 0x635   : >> { %9294 = vmatmul.bf16.gmra.mxu2 %v9167_v24  ;;  %v8703_v24 = vor.u32 %v8702_v15, %v8699_v34  ;;  %v13983_v15 = vld [vmem:[%s14971_s28 + $0x13c] sm:$0xff]  }
 0x636   : >> { %v8715_v8 = vshrl.u32 %v13983_v15, 16 }
 0x637   : >> { %v8704_v11 = vsel %vm2392_vm0, %v8694_v29, %v8703_v24  ;;  %v7426_v29 = vadd.f32 %v16547_v59, %v16549_v5 }
 0x638   : >> { %v8191_v48 = vpop.f32.mrf.mxu2  ;;  %v7703_v10 = vpop.f32.mrf.mxu0 }
 0x639   : >> { %v16688_v53 = vadd.f32 %v8191_v48, %v8059_v52  ;;  %v8029_v23 = vpop.f32.mrf.mxu1  ;;  %v7734_v18 = vadd.f32 %v7703_v10, %v16498_v51  ;;  %v9175_v51 = vsel %vm2699_vm1, %v9170_v2, %v9174_v33  ;;  %v9178_v52 = vor.u32 %v9176_v19, %v9174_v33  ;;  %v12513_v2 = vld [vmem:[%s16935_s10] sm:$0xff]  ;;  %v12503_v33 = vld [vmem:[%s14971_s28 + $0x138] sm:$0xff] }
 0x63a   : >> { %9494 = vmatpush.bf16.msra.mxu3 %v12513_v2 }
 0x63b   : >> { %v8060_v38 = vadd.f32 %v8029_v23, %v7734_v18  ;;  %v16713_v18 = vpop.f32.mrf.mxu3 }
 0x640   : >> { %v8193_v40 = vpop.f32.mrf.mxu2  ;;  %v7706_v14 = vpop.f32.mrf.mxu0 }
 0x641   : >> { %v16693_v27 = vadd.f32 %v8193_v40, %v8060_v38  ;;  %v8032_v42 = vpop.f32.mrf.mxu1  ;;  %v7735_v58 = vadd.f32 %v7706_v14, %v16512_v25  ;;  %v8709_v38 = vshll.u32 %v13982_v49, 16 }
 0x643   : >> { %v8061_v22 = vadd.f32 %v8032_v42, %v7735_v58  ;;  %8823 = vmatmul.bf16.gmra.mxu0 %v8695_v60  ;;  %v8708_v60 = vrot.slane %v8706_v41, 3  ;;  %v9184_v58 = vshrl.u32 %v12502_v55, 16 }
 0x644   : >> { %8987 = vmatmul.bf16.gmra.mxu1 %v16528_v32 }
 0x645   : >> { %9299 = vmatmul.bf16.gmra.mxu2 %v9175_v51  ;;  %v9188_v51 = vshll.u32 %v12503_v33, 16  ;;  %v9186_v26 = vor.u32 %v9184_v58, %v9182_v1 }
 0x648   : >> { %v8196_v31 = vpop.f32.mrf.mxu2  ;;  %v7708_v25 = vpop.f32.mrf.mxu0 }
 0x649   : >> { %v16706_v37 = vadd.f32 %v8196_v31, %v8061_v22  ;;  %v8034_v43 = vpop.f32.mrf.mxu1  ;;  %v7736_v32 = vadd.f32 %v7708_v25, %v16531_v46  ;;  %v9183_v46 = vsel %vm2699_vm1, %v9178_v52, %v9182_v1  ;;  %v16726_v22 = vpop.f32.mrf.mxu3  ;;  %v9190_v31 = vrot.slane %v9188_v51, 1  ;;  %v12504_v1 = vld [vmem:[%s14971_s28 + $0x140] sm:$0xff] }
 0x64b   : >> { %v8062_v21 = vadd.f32 %v8034_v43, %v7736_v32  ;;  %v9191_v55 = vsel %vm2699_vm1, %v9186_v26, %v9190_v31 }
 0x650   : >> { %v8198_v45 = vpop.f32.mrf.mxu2  ;;  %v7711_v10 = vpop.f32.mrf.mxu0 }
 0x651   : >> { %v16709_v48 = vadd.f32 %v8198_v45, %v8062_v21  ;;  %v8037_v23 = vpop.f32.mrf.mxu1  ;;  %v7737_v13 = vadd.f32 %v7711_v10, %v16545_v63  ;;  %v8718_v21 = vshll.u32 %v13983_v15, 16  ;;  %v16735_v52 = vpop.f32.mrf.mxu3  ;;  %v7428_v45 = vadd.f32 %v16691_v6, %v16592_v17 }
 0x653   : >> { %v8063_v3 = vadd.f32 %v8037_v23, %v7737_v13  ;;  %8828 = vmatmul.bf16.gmra.mxu0 %v8704_v11  ;;  %v8717_v11 = vrot.slane %v8715_v8, 3  ;;  %v8720_v49 = vrot.slane %v8718_v21, 4  ;;  %v9200_v21 = vshrl.u32 %v12504_v1, 16 }
 0x654   : >> { %8992 = vmatmul.bf16.gmra.mxu1 %v16559_v28  ;;  %v8711_v28 = vrot.slane %v8709_v38, 4 }
 0x655   : >> { %9304 = vmatmul.bf16.gmra.mxu2 %v9183_v46  ;;  %v9196_v46 = vshll.u32 %v12504_v1, 16  ;;  %v8721_v38 = vor.u32 %v8720_v49, %v8717_v11 }
 0x656   : >> { %v8712_v0 = vor.u32 %v8711_v28, %v8708_v60 }
 0x658   : >> { %v8201_v40 = vpop.f32.mrf.mxu2  ;;  %v7713_v14 = vpop.f32.mrf.mxu0  ;;  %v8713_v34 = vsel %vm2392_vm0, %v8703_v24, %v8712_v0 }
 0x659   : >> { %v16724_v63 = vadd.f32 %v8201_v40, %v8063_v3  ;;  %v8039_v42 = vpop.f32.mrf.mxu1  ;;  %v7738_v7 = vadd.f32 %v7713_v14, %v7426_v29  ;;  %v13361_v3 = vld [vmem:[%s14971_s28 + $0x140] sm:$0xff]   ;;  %v9198_v40 = vrot.slane %v9196_v46, 1  ;;  %v12012_v14 = vld [vmem:[%s14971_s28 + $0x148] sm:$0x1] }
 0x65a   : >> { %v13092_v2 = vunpack.c.h.b16 %v13361_v3  ;;  %v9112_v51 = vunpack.c.l.b16 %v12012_v14 }
 0x65b   : >> { %v8064_v20 = vadd.f32 %v8039_v42, %v7738_v7  ;;  %v16744_v42 = vpop.f32.mrf.mxu3  ;;  %v8722_v7 = vsel %vm2392_vm0, %v8712_v0, %v8721_v38 }
 0x65c   : >> { %v8633_v58 = vpack.c.b16 %v13092_v2, %v13092_v2  ;;  %v8525_v2 = vadd.f32 %v16726_v22, %v16621_v30 }
 0x660   : >> { %v8203_v25 = vpop.f32.mrf.mxu2  ;;  %v7716_v5 = vpop.f32.mrf.mxu0 }
 0x661   : >> { %v16728_v59 = vadd.f32 %v8203_v25, %v8064_v20  ;;  %v8042_v43 = vpop.f32.mrf.mxu1  ;;  %v7739_v32 = vadd.f32 %v7716_v5, %v16583_v39  ;;  %v8523_v20 = vadd.f32 %v16704_v56, %v16602_v16  ;;  %v8727_v25 = vshll.u32 %v8633_v58, 16 }
 0x662   : >> { %v9123_v5 = vpack.c.b16 %v9112_v51, %v9112_v51 }
 0x663   : >> { %v8065_v19 = vadd.f32 %v8042_v43, %v7739_v32  ;;  %8833 = vmatmul.bf16.gmra.mxu0 %v8713_v34  ;;  %v8524_v34 = vadd.f32 %v16713_v18, %v16611_v54  ;;  %v8485_v8 = vpop.f32.mrf.mxu3  ;;  %v16764_v18 = vld [vmem:[%s16934_s9] ss:$0 sm:$0xff] }
 0x664   : >> { %8997 = vmatmul.bf16.gmra.mxu1 %v16597_v12  ;;  %v9192_v12 = vshrl.u32 %v12503_v33, 16  ;;  %v9204_v16 = vshll.u32 %v9123_v5, 16 }
 0x665   : >> { %9309 = vmatmul.bf16.gmra.mxu2 %v9191_v55 }
 0x666   : >> { %v9194_v29 = vor.u32 %v9192_v12, %v9190_v31  ;;  %v8724_v31 = vshrl.u32 %v8633_v58, 16 }
 0x668   : >> { %v8206_v24 = vpop.f32.mrf.mxu2  ;;  %v7718_v39 = vpop.f32.mrf.mxu0  ;;  %v9199_v33 = vsel %vm2699_vm1, %v9194_v29, %v9198_v40  ;;  %v8726_v55 = vrot.slane %v8724_v31, 3 }
 0x669   : >> { %v16740_v10 = vadd.f32 %v8206_v24, %v8065_v19  ;;  %v8044_v23 = vpop.f32.mrf.mxu1  ;;  %v7740_v13 = vadd.f32 %v7718_v39, %v7428_v45  ;;  %v8729_v19 = vrot.slane %v8727_v25, 4  ;;  %v9202_v39 = vor.u32 %v9200_v21, %v9198_v40 }
 0x66b   : >> { %v8066_v41 = vadd.f32 %v8044_v23, %v7740_v13  ;;  %v8730_v24 = vor.u32 %v8729_v19, %v8726_v55  ;;  %v9206_v23 = vrot.slane %v9204_v16, 1  ;;  %v8488_v14 = vpop.f32.mrf.mxu3 }
 0x66d   : >> { %v8731_v46 = vsel %vm2392_vm0, %v8721_v38, %v8730_v24  ;;  %v8526_v38 = vadd.f32 %v16735_v52, %v16624_v47 }
 0x670   : >> { %v8208_v17 = vpop.f32.mrf.mxu2  ;;  %v8799_v60 = vpop.f32.mrf.mxu0 }
 0x671   : >> { %v16746_v6 = vadd.f32 %v8208_v17, %v8066_v41  ;;  %v8963_v28 = vpop.f32.mrf.mxu1  ;;  %v8849_v26 = vadd.f32 %v8799_v60, %v8523_v20  ;;  %v9207_v41 = vsel %vm2699_vm1, %v9202_v39, %v9206_v23 }
 0x673   : >> { %8838 = vmatmul.bf16.gmra.mxu0 %v8722_v7  ;;  %v9013_v0 = vadd.f32 %v8963_v28, %v8849_v26  ;;  %v8490_v31 = vpop.f32.mrf.mxu3 }
 0x674   : >> { %9002 = vmatmul.bf16.gmra.mxu1 %v16581_v44  ;;  %v16758_v44 = vld [vmem:[%s16933_s8] ss:$0 sm:$0xff] }
 0x675   : >> { %9314 = vmatmul.bf16.gmra.mxu2 %v9199_v33 }
 0x678   : >> { %v9275_v43 = vpop.f32.mrf.mxu2  ;;  %v8801_v15 = vpop.f32.mrf.mxu0 }
 0x679   : >> { %v8965_v32 = vpop.f32.mrf.mxu1  ;;  %v9325_v56 = vadd.f32 %v9275_v43, %v9013_v0  ;;  %v8850_v45 = vadd.f32 %v8801_v15, %v8524_v34  ;;  %v8527_v15 = vadd.f32 %v16744_v42, %v16635_v35 }
 0x67b   : >> { %v9349_v54 = vmul.f32 %v16758_v44, %v9325_v56  ;;  %v9014_v11 = vadd.f32 %v8965_v32, %v8850_v45  ;;  %v8493_v16 = vpop.f32.mrf.mxu3  ;;  %v8528_v45 = vadd.f32 %v8485_v8, %v16638_v4 }
 0x67d   : >> { %v9373_v29 = vadd.f32 %v16764_v18, %v9349_v54 }
 0x67f   : >> { %v9393_v28 = vmax.f32 %v9373_v29, 0.0 }
 0x680   : >> { %v9277_v1 = vpop.f32.mrf.mxu2  ;;  %v8804_v13 = vpop.f32.mrf.mxu0 }
 0x681   : >> { %v9326_v49 = vadd.f32 %v9277_v1, %v9014_v11  ;;  %v8968_v12 = vpop.f32.mrf.mxu1  ;;  %v8851_v60 = vadd.f32 %v8804_v13, %v8525_v2  ;;  %v8529_v2 = vadd.f32 %v8488_v14, %v16649_v9 }
 0x683   : >> { %v9350_v40 = vmul.f32 %v16758_v44, %v9326_v49  ;;  %8843 = vmatmul.bf16.gmra.mxu0 %v8731_v46  ;;  %v9015_v51 = vadd.f32 %v8968_v12, %v8851_v60 }
 0x684   : >> { %9007 = vmatmul.bf16.gmra.mxu1 %v13361_v3 }
 0x685   : >> { %v9374_v17 = vadd.f32 %v16764_v18, %v9350_v40  ;;  %9319 = vmatmul.bf16.gmra.mxu2 %v9207_v41  ;;  %v8495_v41 = vpop.f32.mrf.mxu3 }
 0x687   : >> { %v9394_v7 = vmax.f32 %v9374_v17, 0.0 }
 0x688   : >> { %v9280_v58 = vpop.f32.mrf.mxu2  ;;  %v8806_v30 = vpop.f32.mrf.mxu0 }
 0x689   : >> { %v9413_v33 = vpack.c.bf16 %v9394_v7, %v9393_v28  ;;  %v8970_v22 = vpop.f32.mrf.mxu1  ;;  %v9327_v20 = vadd.f32 %v9280_v58, %v9015_v51  ;;  %v8852_v26 = vadd.f32 %v8806_v30, %v8526_v38  ;;  %v8530_v7 = vadd.f32 %v8490_v31, %v16652_v62 }
 0x68b   : >> { %9495 = vmatmul.bf16.vlgmr.msra.gmra.mxu3 %v9413_v33  ;;  %v9351_v3 = vmul.f32 %v16758_v44, %v9327_v20  ;;  %v9016_v25 = vadd.f32 %v8970_v22, %v8852_v26 }
 0x68d   : >> { %v9375_v47 = vadd.f32 %v16764_v18, %v9351_v3  ;;  %v8498_v9 = vpop.f32.mrf.mxu3 }
 0x68f   : >> { %v9395_v19 = vmax.f32 %v9375_v47, 0.0 }
 0x690   : >> { %v9282_v5 = vpop.f32.mrf.mxu2  ;;  %v8809_v34 = vpop.f32.mrf.mxu0 }
 0x691   : >> { %v9328_v43 = vadd.f32 %v9282_v5, %v9016_v25  ;;  %v8973_v0 = vpop.f32.mrf.mxu1  ;;  %v8853_v55 = vadd.f32 %v8809_v34, %v8527_v15 }
 0x693   : >> { %v9352_v52 = vmul.f32 %v16758_v44, %v9328_v43  ;;  %v9017_v24 = vadd.f32 %v8973_v0, %v8853_v55  ;;  %v8531_v43 = vadd.f32 %v8493_v16, %v16660_v36  ;;  %v8532_v55 = vadd.f32 %v8495_v41, %v16666_v57 }
 0x695   : >> { %v9376_v32 = vadd.f32 %v16764_v18, %v9352_v52  ;;  %v8500_v15 = vpop.f32.mrf.mxu3 }
 0x697   : >> { %v9396_v21 = vmax.f32 %v9376_v32, 0.0 }
 0x698   : >> { %v9285_v56 = vpop.f32.mrf.mxu2  ;;  %v8811_v39 = vpop.f32.mrf.mxu0 }
 0x699   : >> { %v8975_v23 = vpop.f32.mrf.mxu1  ;;  %v9414_v54 = vpack.c.bf16 %v9396_v21, %v9395_v19  ;;  %v9329_v11 = vadd.f32 %v9285_v56, %v9017_v24  ;;  %v8854_v1 = vadd.f32 %v8811_v39, %v8528_v45 }
 0x69b   : >> { %9500 = vmatmul.bf16.gmra.mxu3 %v9414_v54  ;;  %v9353_v35 = vmul.f32 %v16758_v44, %v9329_v11  ;;  %v9018_v42 = vadd.f32 %v8975_v23, %v8854_v1 }
 0x69d   : >> { %v9377_v29 = vadd.f32 %v16764_v18, %v9353_v35  ;;  %v8503_v23 = vpop.f32.mrf.mxu3 }
 0x69f   : >> { %v9397_v17 = vmax.f32 %v9377_v29, 0.0  ;;  %v8534_v29 = vadd.f32 %v8500_v15, %v16680_v50 }
 0x6a0   : >> { %v9287_v49 = vpop.f32.mrf.mxu2  ;;  %v8814_v12 = vpop.f32.mrf.mxu0 }
 0x6a1   : >> { %v9330_v13 = vadd.f32 %v9287_v49, %v9018_v42  ;;  %v8978_v46 = vpop.f32.mrf.mxu1  ;;  %v8855_v40 = vadd.f32 %v8814_v12, %v8529_v2  ;;  %v8533_v42 = vadd.f32 %v8498_v9, %v16674_v61 }
 0x6a3   : >> { %v9354_v4 = vmul.f32 %v16758_v44, %v9330_v13  ;;  %v9019_v58 = vadd.f32 %v8978_v46, %v8855_v40 }
 0x6a5   : >> { %v9378_v8 = vadd.f32 %v16764_v18, %v9354_v4 }
 0x6a7   : >> { %v9398_v60 = vmax.f32 %v9378_v8, 0.0 }
 0x6a8   : >> { %v9290_v28 = vpop.f32.mrf.mxu2  ;;  %v8816_v38 = vpop.f32.mrf.mxu0 }
 0x6a9   : >> { %v8980_v33 = vpop.f32.mrf.mxu1  ;;  %v9415_v51 = vpack.c.bf16 %v9398_v60, %v9397_v17  ;;  %v9331_v30 = vadd.f32 %v9290_v28, %v9019_v58  ;;  %v8856_v22 = vadd.f32 %v8816_v38, %v8530_v7  ;;  %v8505_v60 = vpop.f32.mrf.mxu3 }
 0x6ab   : >> { %9505 = vmatmul.bf16.gmra.mxu3 %v9415_v51  ;;  %v9355_v14 = vmul.f32 %v16758_v44, %v9331_v30  ;;  %v9020_v20 = vadd.f32 %v8980_v33, %v8856_v22  ;;  %v8535_v22 = vadd.f32 %v8503_v23, %v16688_v53 }
 0x6ad   : >> { %v9379_v34 = vadd.f32 %v16764_v18, %v9355_v14 }
 0x6af   : >> { %v9399_v47 = vmax.f32 %v9379_v34, 0.0 }
 0x6b0   : >> { %v9292_v26 = vpop.f32.mrf.mxu2  ;;  %v8819_v25 = vpop.f32.mrf.mxu0 }
 0x6b1   : >> { %v9332_v3 = vadd.f32 %v9292_v26, %v9020_v20  ;;  %v8983_v5 = vpop.f32.mrf.mxu1  ;;  %v8857_v0 = vadd.f32 %v8819_v25, %v8531_v43  ;;  %v8508_v14 = vpop.f32.mrf.mxu3  ;;  %v8536_v43 = vadd.f32 %v8505_v60, %v16693_v27 }
 0x6b3   : >> { %v9356_v62 = vmul.f32 %v16758_v44, %v9332_v3  ;;  %v9021_v19 = vadd.f32 %v8983_v5, %v8857_v0 }
 0x6b5   : >> { %v9380_v31 = vadd.f32 %v16764_v18, %v9356_v62 }
 0x6b7   : >> { %v9400_v52 = vmax.f32 %v9380_v31, 0.0 }
 0x6b8   : >> { %v9295_v32 = vpop.f32.mrf.mxu2  ;;  %v8821_v21 = vpop.f32.mrf.mxu0 }
 0x6b9   : >> { %v8985_v56 = vpop.f32.mrf.mxu1  ;;  %v9416_v45 = vpack.c.bf16 %v9400_v52, %v9399_v47  ;;  %v9333_v24 = vadd.f32 %v9295_v32, %v9021_v19  ;;  %v8858_v39 = vadd.f32 %v8821_v21, %v8532_v55  ;;  %v8510_v53 = vpop.f32.mrf.mxu3 }
 0x6bb   : >> { %9510 = vmatmul.bf16.gmra.mxu3 %v9416_v45  ;;  %v9357_v36 = vmul.f32 %v16758_v44, %v9333_v24  ;;  %v9022_v16 = vadd.f32 %v8985_v56, %v8858_v39  ;;  %v8537_v45 = vadd.f32 %v8508_v14, %v16706_v37 }
 0x6bd   : >> { %v9381_v49 = vadd.f32 %v16764_v18, %v9357_v36 }
 0x6bf   : >> { %v9401_v46 = vmax.f32 %v9381_v49, 0.0 }
 0x6c0   : >> { %v9297_v54 = vpop.f32.mrf.mxu2  ;;  %v8824_v1 = vpop.f32.mrf.mxu0 }
 0x6c1   : >> { %v9334_v11 = vadd.f32 %v9297_v54, %v9022_v16  ;;  %v8988_v35 = vpop.f32.mrf.mxu1  ;;  %v8859_v12 = vadd.f32 %v8824_v1, %v8533_v42  ;;  %v8513_v54 = vpop.f32.mrf.mxu3  ;;  %v8538_v1 = vadd.f32 %v8510_v53, %v16709_v48 }
 0x6c3   : >> { %v9358_v57 = vmul.f32 %v16758_v44, %v9334_v11  ;;  %v9023_v4 = vadd.f32 %v8988_v35, %v8859_v12 }
 0x6c5   : >> { %v9382_v13 = vadd.f32 %v16764_v18, %v9358_v57 }
 0x6c7   : >> { %v9402_v41 = vmax.f32 %v9382_v13, 0.0 }
 0x6c8   : >> { %v9300_v2 = vpop.f32.mrf.mxu2  ;;  %v8826_v8 = vpop.f32.mrf.mxu0 }
 0x6c9   : >> { %v8990_v40 = vpop.f32.mrf.mxu1  ;;  %v9417_v17 = vpack.c.bf16 %v9402_v41, %v9401_v46  ;;  %v9335_v28 = vadd.f32 %v9300_v2, %v9023_v4  ;;  %v8860_v7 = vadd.f32 %v8826_v8, %v8534_v29  ;;  %v8515_v8 = vpop.f32.mrf.mxu3 }
 0x6cb   : >> { %9515 = vmatmul.bf16.gmra.mxu3 %v9417_v17  ;;  %v9359_v61 = vmul.f32 %v16758_v44, %v9335_v28  ;;  %v9024_v58 = vadd.f32 %v8990_v40, %v8860_v7  ;;  %v8539_v40 = vadd.f32 %v8513_v54, %v16724_v63  ;;  %v13362_v54 = vld [vmem:[%s16833_s25 + $0x10] sm:$0xff]  }
 0x6cd   : >> { %v9383_v9 = vadd.f32 %v16764_v18, %v9359_v61 }
 0x6cf   : >> { %v9403_v3 = vmax.f32 %v9383_v9, 0.0 }
 0x6d0   : >> { %v9302_v38 = vpop.f32.mrf.mxu2  ;;  %v8829_v51 = vpop.f32.mrf.mxu0 }
 0x6d1   : >> { %v9336_v33 = vadd.f32 %v9302_v38, %v9024_v58  ;;  %v8993_v30 = vpop.f32.mrf.mxu1  ;;  %v8861_v26 = vadd.f32 %v8829_v51, %v8535_v22  ;;  %v8540_v38 = vadd.f32 %v8515_v8, %v16728_v59  ;;  %v8518_v63 = vpop.f32.mrf.mxu3 }
 0x6d3   : >> { %v9360_v50 = vmul.f32 %v16758_v44, %v9336_v33  ;;  %v9025_v34 = vadd.f32 %v8993_v30, %v8861_v26 }
 0x6d5   : >> { %v9384_v20 = vadd.f32 %v16764_v18, %v9360_v50 }
 0x6d7   : >> { %v9404_v25 = vmax.f32 %v9384_v20, 0.0 }
 0x6d8   : >> { %v9305_v5 = vpop.f32.mrf.mxu2  ;;  %v8831_v62 = vpop.f32.mrf.mxu0 }
 0x6d9   : >> { %v8995_v31 = vpop.f32.mrf.mxu1  ;;  %v9418_v0 = vpack.c.bf16 %v9404_v25, %v9403_v3  ;;  %v9337_v15 = vadd.f32 %v9305_v5, %v9025_v34  ;;  %v8862_v47 = vadd.f32 %v8831_v62, %v8536_v43  ;;  %v8541_v5 = vadd.f32 %v8518_v63, %v16740_v10 }
 0x6db   : >> { %9520 = vmatmul.bf16.gmra.mxu3 %v9418_v0  ;;  %v9361_v52 = vmul.f32 %v16758_v44, %v9337_v15  ;;  %v9026_v32 = vadd.f32 %v8995_v31, %v8862_v47  ;;  %v8520_v0 = vpop.f32.mrf.mxu3 }
 0x6dd   : >> { %v9385_v24 = vadd.f32 %v16764_v18, %v9361_v52  ;;  %v8542_v52 = vadd.f32 %v8520_v0, %v16746_v6 }
 0x6df   : >> { %v9405_v16 = vmax.f32 %v9385_v24, 0.0 }
 0x6e0   : >> { %v9307_v55 = vpop.f32.mrf.mxu2  ;;  %v8834_v21 = vpop.f32.mrf.mxu0 }
 0x6e1   : >> { %v9338_v19 = vadd.f32 %v9307_v55, %v9026_v32  ;;  %v8998_v56 = vpop.f32.mrf.mxu1  ;;  %v8863_v36 = vadd.f32 %v8834_v21, %v8537_v45 }
 0x6e3   : >> { %v9362_v27 = vmul.f32 %v16758_v44, %v9338_v19  ;;  %v9027_v35 = vadd.f32 %v8998_v56, %v8863_v36  ;;  %v16827_v56 = vld [vmem:[%s16951_s15] ss:$0 sm:$0xff] }
 0x6e5   : >> { %v9386_v39 = vadd.f32 %v16764_v18, %v9362_v27 }
 0x6e7   : >> { %v9406_v23 = vmax.f32 %v9386_v39, 0.0 }
 0x6e8   : >> { %v9310_v11 = vpop.f32.mrf.mxu2  ;;  %v8836_v42 = vpop.f32.mrf.mxu0 }
 0x6e9   : >> { %v9000_v49 = vpop.f32.mrf.mxu1  ;;  %v9419_v57 = vpack.c.bf16 %v9406_v23, %v9405_v16  ;;  %v9339_v13 = vadd.f32 %v9310_v11, %v9027_v35  ;;  %v8864_v12 = vadd.f32 %v8836_v42, %v8538_v1  ;;  %v16839_v16 = vld [vmem:[%s16952_s16] ss:$0 sm:$0xff]  ;;  %v13095_v35 = vunpack.c.l.bf16 %v13362_v54 }
 0x6eb   : >> { %9525 = vmatmul.bf16.gmra.mxu3 %v9419_v57  ;;  %v9363_v37 = vmul.f32 %v16758_v44, %v9339_v13  ;;  %v9028_v46 = vadd.f32 %v9000_v49, %v8864_v12 }
 0x6ed   : >> { %v9387_v17 = vadd.f32 %v16764_v18, %v9363_v37  ;;  %v13096_v37 = vunpack.c.h.bf16 %v13362_v54  ;;  %v13366_v54 = vld [vmem:[%s16833_s25 + $0x30] sm:$0xff]  }
 0x6ef   : >> { %v9407_v7 = vmax.f32 %v9387_v17, 0.0 }
 0x6f0   : >> { %v9312_v41 = vpop.f32.mrf.mxu2  ;;  %v8839_v29 = vpop.f32.mrf.mxu0 }
 0x6f1   : >> { %v9340_v2 = vadd.f32 %v9312_v41, %v9028_v46  ;;  %v9003_v4 = vpop.f32.mrf.mxu1  ;;  %v8865_v28 = vadd.f32 %v8839_v29, %v8539_v40 }
 0x6f3   : >> { %v9364_v48 = vmul.f32 %v16758_v44, %v9340_v2  ;;  %v9029_v33 = vadd.f32 %v9003_v4, %v8865_v28 }
 0x6f5   : >> { %v9388_v60 = vadd.f32 %v16764_v18, %v9364_v48  ;;  %v13363_v48 = vld [vmem:[%s16833_s25 + $0x18] sm:$0xff]  }
 0x6f7   : >> { %v9408_v61 = vmax.f32 %v9388_v60, 0.0  ;;  %v13099_v60 = vunpack.c.l.bf16 %v13363_v48 }
 0x6f8   : >> { %v9315_v58 = vpop.f32.mrf.mxu2  ;;  %v8841_v51 = vpop.f32.mrf.mxu0 }
 0x6f9   : >> { %v9420_v30 = vpack.c.bf16 %v9408_v61, %v9407_v7  ;;  %v9005_v22 = vpop.f32.mrf.mxu1  ;;  %v9341_v9 = vadd.f32 %v9315_v58, %v9029_v33  ;;  %v8866_v50 = vadd.f32 %v8841_v51, %v8540_v38  ;;  %v13100_v61 = vunpack.c.h.bf16 %v13363_v48 }
 0x6fb   : >> { %9530 = vmatmul.bf16.gmra.mxu3 %v9420_v30  ;;  %v9365_v14 = vmul.f32 %v16758_v44, %v9341_v9  ;;  %v9030_v20 = vadd.f32 %v9005_v22, %v8866_v50 }
 0x6fd   : >> { %v9389_v43 = vadd.f32 %v16764_v18, %v9365_v14  ;;  %v13364_v14 = vld [vmem:[%s16833_s25 + $0x20] sm:$0xff]  }
 0x6ff   : >> { %v9409_v15 = vmax.f32 %v9389_v43, 0.0 }
 0x700   : >> { %v9317_v26 = vpop.f32.mrf.mxu2  ;;  %v8844_v25 = vpop.f32.mrf.mxu0 }
 0x701   : >> { %v9342_v3 = vadd.f32 %v9317_v26, %v9030_v20  ;;  %v9008_v34 = vpop.f32.mrf.mxu1  ;;  %v8867_v31 = vadd.f32 %v8844_v25, %v8541_v5  ;;  %v13103_v20 = vunpack.c.l.bf16 %v13364_v14  ;;  %v13104_v25 = vunpack.c.h.bf16 %v13364_v14 }
 0x703   : >> { %v9366_v59 = vmul.f32 %v16758_v44, %v9342_v3  ;;  %v9031_v32 = vadd.f32 %v9008_v34, %v8867_v31 }
 0x705   : >> { %v9390_v62 = vadd.f32 %v16764_v18, %v9366_v59 }
 0x707   : >> { %v9410_v47 = vmax.f32 %v9390_v62, 0.0 }
 0x708   : >> { %v9320_v53 = vpop.f32.mrf.mxu2  ;;  %v8846_v55 = vpop.f32.mrf.mxu0 }
 0x709   : >> { %v9421_v19 = vpack.c.bf16 %v9410_v47, %v9409_v15  ;;  %v9343_v10 = vadd.f32 %v9320_v53, %v9031_v32  ;;  %v8868_v21 = vadd.f32 %v8846_v55, %v8542_v52  ;;  %v9010_v45 = vpop.f32.mrf.mxu1  ;;  %v13365_v53 = vld [vmem:[%s16833_s25 + $0x28] sm:$0xff]  }
 0x70a   : >> { %v13107_v52 = vunpack.c.l.bf16 %v13365_v53 }
 0x70b   : >> { %9535 = vmatmul.bf16.gmra.mxu3 %v9421_v19  ;;  %v9367_v27 = vmul.f32 %v16758_v44, %v9343_v10  ;;  %v9032_v39 = vadd.f32 %v9010_v45, %v8868_v21  ;;  %v13108_v19 = vunpack.c.h.bf16 %v13365_v53 }
 0x70d   : >> { %v9391_v11 = vadd.f32 %v16764_v18, %v9367_v27 }
 0x70e   : >> { %v9496_v24 = vpop.f32.mrf.mxu3 }
 0x70f   : >> { %v9592_v36 = vmul.f32 %v16827_v56, %v9496_v24  ;;  %v9411_v13 = vmax.f32 %v9391_v11, 0.0  ;;  %v13111_v11 = vunpack.c.l.bf16 %v13366_v54 }
 0x710   : >> { %v9322_v6 = vpop.f32.mrf.mxu2 }
 0x711   : >> { %v9344_v23 = vadd.f32 %v9322_v6, %v9032_v39  ;;  %v9616_v42 = vadd.f32 %v16839_v16, %v9592_v36 }
 0x713   : >> { %v9368_v1 = vmul.f32 %v16758_v44, %v9344_v23  ;;  %v9636_v41 = vadd.f32 %v13095_v35, %v9616_v42  ;;  %v13112_v42 = vunpack.c.h.bf16 %v13366_v54 }
 0x715   : >> { %v9392_v49 = vadd.f32 %v16764_v18, %v9368_v1  ;;  %v9656_v44 = vmax.f32 %v9636_v41, 0.0 }
 0x716   : >> { %v9498_v57 = vpop.f32.mrf.mxu3 }
 0x717   : >> { %v9412_v12 = vmax.f32 %v9392_v49, 0.0  ;;  %v9593_v46 = vmul.f32 %v16827_v56, %v9498_v57 }
 0x719   : >> { %v9617_v2 = vadd.f32 %v16839_v16, %v9593_v46  ;;  %v9422_v29 = vpack.c.bf16 %v9412_v12, %v9411_v13 }
 0x71b   : >> { %v9637_v4 = vadd.f32 %v13096_v37, %v9617_v2  ;;  %9540 = vmatmul.bf16.gmra.mxu3 %v9422_v29 }
 0x71d   : >> { %v9657_v8 = vmax.f32 %v9637_v4, 0.0  ;;  %v13367_v4 = vld [vmem:[%s16833_s25 + $0x38] sm:$0xff]  }
 0x71e   : >> { %v9501_v18 = vpop.f32.mrf.mxu3 }
 0x71f   : >> { %v13136_v40 = vpack.c.bf16 %v9657_v8, %v9656_v44  ;;  %v9594_v17 = vmul.f32 %v16827_v56, %v9501_v18  ;;  %v13115_v44 = vunpack.c.l.bf16 %v13367_v4 }
 0x721   : >> { %13137 = vst [vmem:[%s16850_s24] sm:$0xff] %v13136_v40   ;;  %v9618_v28 = vadd.f32 %v16839_v16, %v9594_v17  ;;  %v13116_v40 = vunpack.c.h.bf16 %v13367_v4 }
 0x723   : >> { %v9638_v38 = vadd.f32 %v13099_v60, %v9618_v28 }
 0x725   : >> { %v9658_v30 = vmax.f32 %v9638_v38, 0.0 }
 0x726   : >> { %v9503_v7 = vpop.f32.mrf.mxu3 }
 0x727   : >> { %v9595_v58 = vmul.f32 %v16827_v56, %v9503_v7 }
 0x729   : >> { %v9619_v33 = vadd.f32 %v16839_v16, %v9595_v58 }
 0x72b   : >> { %v9639_v51 = vadd.f32 %v13100_v61, %v9619_v33 }
 0x72d   : >> { %v9659_v22 = vmax.f32 %v9639_v51, 0.0  ;;  %v13368_v51 = vld [vmem:[%s16833_s25 + $0x40] sm:$0xff]  }
 0x72e   : >> { %v9506_v9 = vpop.f32.mrf.mxu3 }
 0x72f   : >> { %v13141_v50 = vpack.c.bf16 %v9659_v22, %v9658_v30  ;;  %v9596_v63 = vmul.f32 %v16827_v56, %v9506_v9  ;;  %v13119_v30 = vunpack.c.l.bf16 %v13368_v51 }
 0x731   : >> { %13372 = vst [vmem:[%s16850_s24 + $0x8] sm:$0xff] %v13141_v50   ;;  %v9620_v26 = vadd.f32 %v16839_v16, %v9596_v63  ;;  %v13120_v50 = vunpack.c.h.bf16 %v13368_v51 }
 0x733   : >> { %v9640_v43 = vadd.f32 %v13103_v20, %v9620_v26 }
 0x735   : >> { %v9660_v62 = vmax.f32 %v9640_v43, 0.0 }
 0x736   : >> { %v9508_v3 = vpop.f32.mrf.mxu3 }
 0x737   : >> { %v9597_v5 = vmul.f32 %v16827_v56, %v9508_v3 }
 0x739   : >> { %v9621_v59 = vadd.f32 %v16839_v16, %v9597_v5 }
 0x73b   : >> { %v9641_v34 = vadd.f32 %v13104_v25, %v9621_v59 }
 0x73d   : >> { %v9661_v31 = vmax.f32 %v9641_v34, 0.0  ;;  %v13369_v34 = vld [vmem:[%s16833_s25 + $0x48] sm:$0xff]  }
 0x73e   : >> { %v9511_v0 = vpop.f32.mrf.mxu3 }
 0x73f   : >> { %v13146_v15 = vpack.c.bf16 %v9661_v31, %v9660_v62  ;;  %v9598_v47 = vmul.f32 %v16827_v56, %v9511_v0  ;;  %v13123_v62 = vunpack.c.l.bf16 %v13369_v34 }
 0x741   : >> { %13373 = vst [vmem:[%s16850_s24 + $0x10] sm:$0xff] %v13146_v15   ;;  %v9622_v32 = vadd.f32 %v16839_v16, %v9598_v47  ;;  %v13124_v15 = vunpack.c.h.bf16 %v13369_v34 }
 0x743   : >> { %v9642_v21 = vadd.f32 %v13107_v52, %v9622_v32 }
 0x745   : >> { %v9662_v27 = vmax.f32 %v9642_v21, 0.0 }
 0x746   : >> { %v9513_v55 = vpop.f32.mrf.mxu3 }
 0x747   : >> { %v9599_v10 = vmul.f32 %v16827_v56, %v9513_v55 }
 0x749   : >> { %v9623_v45 = vadd.f32 %v16839_v16, %v9599_v10 }
 0x74b   : >> { %v9643_v24 = vadd.f32 %v13108_v19, %v9623_v45 }
 0x74d   : >> { %v9663_v39 = vmax.f32 %v9643_v24, 0.0  ;;  %v13370_v24 = vld [vmem:[%s16833_s25 + $0x50] sm:$0xff]  }
 0x74e   : >> { %v9516_v6 = vpop.f32.mrf.mxu3 }
 0x74f   : >> { %v13151_v36 = vpack.c.bf16 %v9663_v39, %v9662_v27  ;;  %v9600_v23 = vmul.f32 %v16827_v56, %v9516_v6  ;;  %v13127_v27 = vunpack.c.l.bf16 %v13370_v24 }
 0x751   : >> { %13374 = vst [vmem:[%s16850_s24 + $0x18] sm:$0xff] %v13151_v36   ;;  %v9624_v1 = vadd.f32 %v16839_v16, %v9600_v23  ;;  %v13128_v36 = vunpack.c.h.bf16 %v13370_v24 }
 0x753   : >> { %v9644_v57 = vadd.f32 %v13111_v11, %v9624_v1 }
 0x755   : >> { %v9664_v37 = vmax.f32 %v9644_v57, 0.0 }
 0x756   : >> { %v9518_v35 = vpop.f32.mrf.mxu3 }
 0x757   : >> { %v9601_v49 = vmul.f32 %v16827_v56, %v9518_v35 }
 0x759   : >> { %v9625_v13 = vadd.f32 %v16839_v16, %v9601_v49 }
 0x75b   : >> { %v9645_v12 = vadd.f32 %v13112_v42, %v9625_v13 }
 0x75d   : >> { %v9665_v46 = vmax.f32 %v9645_v12, 0.0  ;;  %v13371_v12 = vld [vmem:[%s16833_s25 + $0x58] sm:$0xff]  }
 0x75e   : >> { %v9521_v41 = vpop.f32.mrf.mxu3 }
 0x75f   : >> { %v13156_v2 = vpack.c.bf16 %v9665_v46, %v9664_v37  ;;  %v9602_v29 = vmul.f32 %v16827_v56, %v9521_v41  ;;  %v13131_v37 = vunpack.c.l.bf16 %v13371_v12 }
 0x761   : >> { %13375 = vst [vmem:[%s16850_s24 + $0x20] sm:$0xff] %v13156_v2   ;;  %v9626_v8 = vadd.f32 %v16839_v16, %v9602_v29  ;;  %v13132_v2 = vunpack.c.h.bf16 %v13371_v12 }
 0x763   : >> { %v9646_v48 = vadd.f32 %v13115_v44, %v9626_v8 }
 0x765   : >> { %v9666_v7 = vmax.f32 %v9646_v48, 0.0 }
 0x766   : >> { %v9523_v18 = vpop.f32.mrf.mxu3 }
 0x767   : >> { %v9603_v17 = vmul.f32 %v16827_v56, %v9523_v18 }
 0x769   : >> { %v9627_v60 = vadd.f32 %v16839_v16, %v9603_v17 }
 0x76b   : >> { %v9647_v28 = vadd.f32 %v13116_v40, %v9627_v60 }
 0x76d   : >> { %v9667_v61 = vmax.f32 %v9647_v28, 0.0 }
 0x76e   : >> { %v9526_v58 = vpop.f32.mrf.mxu3 }
 0x76f   : >> { %v13161_v38 = vpack.c.bf16 %v9667_v61, %v9666_v7  ;;  %v9604_v33 = vmul.f32 %v16827_v56, %v9526_v58 }
 0x771   : >> { %13376 = vst [vmem:[%s16850_s24 + $0x28] sm:$0xff] %v13161_v38   ;;  %v9628_v22 = vadd.f32 %v16839_v16, %v9604_v33 }
 0x773   : >> { %v9648_v14 = vadd.f32 %v13119_v30, %v9628_v22 }
 0x775   : >> { %v9668_v3 = vmax.f32 %v9648_v14, 0.0 }
 0x776   : >> { %v9528_v9 = vpop.f32.mrf.mxu3 }
 0x777   : >> { %v9605_v63 = vmul.f32 %v16827_v56, %v9528_v9 }
 0x779   : >> { %v9629_v20 = vadd.f32 %v16839_v16, %v9605_v63 }
 0x77b   : >> { %v9649_v26 = vadd.f32 %v13120_v50, %v9629_v20 }
 0x77d   : >> { %v9669_v25 = vmax.f32 %v9649_v26, 0.0 }
 0x77e   : >> { %v9531_v5 = vpop.f32.mrf.mxu3 }
 0x77f   : >> { %v13166_v43 = vpack.c.bf16 %v9669_v25, %v9668_v3  ;;  %v9606_v59 = vmul.f32 %v16827_v56, %v9531_v5 }
 0x781   : >> { %13377 = vst [vmem:[%s16850_s24 + $0x30] sm:$0xff] %v13166_v43   ;;  %v9630_v31 = vadd.f32 %v16839_v16, %v9606_v59 }
 0x783   : >> { %v9650_v53 = vadd.f32 %v13123_v62, %v9630_v31 }
 0x785   : >> { %v9670_v55 = vmax.f32 %v9650_v53, 0.0 }
 0x786   : >> { %v9533_v0 = vpop.f32.mrf.mxu3 }
 0x787   : >> { %v9607_v47 = vmul.f32 %v16827_v56, %v9533_v0 }
 0x789   : >> { %v9631_v52 = vadd.f32 %v16839_v16, %v9607_v47 }
 0x78b   : >> { %v9651_v32 = vadd.f32 %v13124_v15, %v9631_v52 }
 0x78d   : >> { %v9671_v19 = vmax.f32 %v9651_v32, 0.0 }
 0x78e   : >> { %v9536_v10 = vpop.f32.mrf.mxu3 }
 0x78f   : >> { %v13171_v21 = vpack.c.bf16 %v9671_v19, %v9670_v55  ;;  %v9608_v45 = vmul.f32 %v16827_v56, %v9536_v10 }
 0x791   : >> { %13378 = vst [vmem:[%s16850_s24 + $0x38] sm:$0xff] %v13171_v21   ;;  %v9632_v39 = vadd.f32 %v16839_v16, %v9608_v45 }
 0x793   : >> { %v9652_v54 = vadd.f32 %v13127_v27, %v9632_v39 }
 0x795   : >> { %v9672_v35 = vmax.f32 %v9652_v54, 0.0 }
 0x796   : >> { %v9538_v6 = vpop.f32.mrf.mxu3 }
 0x797   : >> { %v9609_v23 = vmul.f32 %v16827_v56, %v9538_v6 }
 0x799   : >> { %v9633_v11 = vadd.f32 %v16839_v16, %v9609_v23 }
 0x79b   : >> { %v9653_v1 = vadd.f32 %v13128_v36, %v9633_v11 }
 0x79d   : >> { %v9673_v42 = vmax.f32 %v9653_v1, 0.0 }
 0x79e   : >> { %v9541_v49 = vpop.f32.mrf.mxu3 }
 0x79f   : >> { %v13176_v57 = vpack.c.bf16 %v9673_v42, %v9672_v35  ;;  %v9610_v13 = vmul.f32 %v16827_v56, %v9541_v49 }
 0x7a1   : >> { %13379 = vst [vmem:[%s16850_s24 + $0x40] sm:$0xff] %v13176_v57   ;;  %v9634_v46 = vadd.f32 %v16839_v16, %v9610_v13 }
 0x7a3   : >> { %v9654_v4 = vadd.f32 %v13131_v37, %v9634_v46 }
 0x7a5   : >> { %v9674_v18 = vmax.f32 %v9654_v4, 0.0 }
 0x7a6   : >> { %v9543_v41 = vpop.f32.mrf.mxu3 }
 0x7a7   : >> { %v9611_v29 = vmul.f32 %v16827_v56, %v9543_v41 }
 0x7a9   : >> { %v9635_v44 = vadd.f32 %v16839_v16, %v9611_v29 }
 0x7ab   : >> { %v9655_v8 = vadd.f32 %v13132_v2, %v9635_v44 }
 0x7ad   : >> { %v9675_v40 = vmax.f32 %v9655_v8, 0.0  ;;  %2153 = sbr.rel (!%p2151_p13) target bundleno = 531 (0x213), region = 167 }
 0x7af   : >> { %v13181_v17 = vpack.c.bf16 %v9675_v40, %v9674_v18 }
 0x7b1   : >> { %13380 = vst [vmem:[%s16850_s24 + $0x48] sm:$0xff] %v13181_v17  }
 0x7b2 PF: > { %s16953_s11 = sld [smem:[#allocation5_spill]] }
 0x7b3   : > { %s16954_s25 = sld [smem:[#allocation3_spill]] }
 0x7b4   : > { %s16955_s26 = sld [smem:[#allocation4_spill]] }
 0x7b5   : > { %s16956_s27 = sld [smem:[#allocation6_spill]] }
 0x7b6   : > { %s16957_s28 = sld [smem:[#allocation7_spill]] }
 0x7b8   : > { %s23_s29 = sadd.s32 1, %s16953_s11  }
 0x7b9   : > { %p20_p0 = scmp.ge.s32.totalorder %s23_s29, 6  }
 0x7bb   :  { %22 = sbr.rel (!%p20_p0) target bundleno = 4 (0x4), region = 178 }

</bundles_post_ra>
